<compile_context>
chip_gen: v7x
topology: tpu7x:2x2x1
jax: 0.10.0
libtpu: 0.0.40
codegen_flags: <defaults>
</compile_context>

<pallas_src>
import math

import jax
import jax.numpy as jnp
from jax.experimental import pallas as pl
from jax.experimental.pallas import tpu as pltpu

SPADE_HIDDEN = 32
LEAKY_SLOPE = 0.01   # nn.LeakyReLU() default negative_slope
SPADE_EPS = 1e-5


# --------------------------------------------------------------------------
# Fully fused DecoderBlock kernel (both AdaptiveConvBlocks, per image)
# --------------------------------------------------------------------------
def _make_decoder_kernel(H, W, cout):
    HW = H * W

    def _patches_3x3(x, m_left, m_right):
        """x: (C, H*W) bf16 -> (9*C, H*W) bf16 zero-padded 3x3 neighborhoods (tap-major).

        Shifts are static contiguous lane slices of a row-padded buffer; only the
        left/right column wrap needs masking (boolean selects, no arithmetic)."""
        C = x.shape[0]
        zpad = jnp.zeros((C, W + 1), x.dtype)
        xr = jnp.concatenate([zpad, x, zpad], axis=1)      # (C, HW + 2W + 2)
        pieces = []
        for dh in (-1, 0, 1):
            for dw in (-1, 0, 1):
                off = (W + 1) + dh * W + dw                # static, >= 0
                piece = xr[:, off:off + HW]
                if dw == -1:
                    piece = jnp.where(m_left, piece, 0.0)
                elif dw == 1:
                    piece = jnp.where(m_right, piece, 0.0)
                pieces.append(piece)
        return jnp.concatenate(pieces, axis=0)             # (9*C, HW) bf16

    def _adaptive_block(x_bf16, mask_patches, wms_ref, bms_ref, wgb_ref, bgb_ref,
                        m_left, m_right):
        """One AdaptiveConvBlock: conv3x3 -> SPADE -> LeakyReLU.  Returns f32 (Cout, HW).

        Main conv and SPADE shared conv are merged in one block-diagonal matmul:
          [h; actv_pre] = [[W_main, 0], [0, W_shared]] @ [x_patches; mask_patches]."""
        xp = _patches_3x3(x_bf16, m_left, m_right)                  # (9*Cin, HW)
        rhs = jnp.concatenate([xp, mask_patches], axis=0)           # (9*Cin+9*Cmask, HW)
        hm = jnp.dot(wms_ref[...], rhs,
                     preferred_element_type=jnp.float32) + bms_ref[...]
        h = hm[:cout]                                               # (Cout, HW) f32
        actv = jnp.maximum(hm[cout:], 0.0).astype(jnp.bfloat16)     # (32, HW)

        # gamma/beta convs merged along Cout (single matmul, K = 9*32).
        gb = jnp.dot(wgb_ref[...], _patches_3x3(actv, m_left, m_right),
                     preferred_element_type=jnp.float32) + bgb_ref[...]
        gamma = gb[:cout]
        beta = gb[cout:]

        # SPADE: param-free per-sample/per-channel norm over spatial, then modulate.
        mean = jnp.mean(h, axis=1, keepdims=True)                   # lane reduction
        var = jnp.mean(jnp.square(h - mean), axis=1, keepdims=True)
        hn = (h - mean) * jax.lax.rsqrt(var + SPADE_EPS)
        out = hn * (1.0 + gamma) + beta
        # LeakyReLU (slope 0.01, nn.LeakyReLU default)
        return jnp.where(out > 0, out, LEAKY_SLOPE * out)

    def kernel(x_ref, mask_ref, res_ref,
               wms1_ref, bms1_ref, wgb1_ref, bgb1_ref,
               wms2_ref, bms2_ref, wgb2_ref, bgb2_ref,
               o_ref):
        # Column-wrap masks for the 3x3 taps (computed once, reused by every conv).
        col = jax.lax.broadcasted_iota(jnp.int32, (1, HW), 1) % W
        m_left = col >= 1          # reading column j-1 is valid
        m_right = col < W - 1      # reading column j+1 is valid

        # Mask patches built ONCE per image, shared by both adaptive blocks.
        mask_patches = _patches_3x3(mask_ref[0], m_left, m_right)   # (9*Cmask, HW) bf16

        # Block 1 (+ fused residual add), block 2 — h1 never leaves VMEM.
        h1 = _adaptive_block(x_ref[0], mask_patches,
                             wms1_ref, bms1_ref, wgb1_ref, bgb1_ref, m_left, m_right)
        h1 = h1 + res_ref[0].astype(jnp.float32)                    # x = x + adding_feat
        h2 = _adaptive_block(h1.astype(jnp.bfloat16), mask_patches,
                             wms2_ref, bms2_ref, wgb2_ref, bgb2_ref, m_left, m_right)
        o_ref[0] = h2.astype(o_ref.dtype)

    return kernel


def _vmem_limit_bytes(cin1, cmask, cout, hw):
    """Scoped-VMEM limit sized from the actual buffers (clamped to [32, 64] MiB;
    v7x physical VMEM is 64 MiB)."""
    bf, f4 = 2, 4
    nh = SPADE_HIDDEN
    # double-buffered pipeline blocks (per-image inputs / output / weights)
    io = 2 * hw * (cin1 * bf + cmask * bf + cout * f4 + cout * f4)
    wts = 2 * ((cout + nh) * 9 * (cin1 + cmask) * bf + 2 * cout * 9 * nh * bf
               + (3 * cout + nh) * f4)
    # worst-case simultaneously-live in-kernel temporaries
    live = hw * (2 * 9 * (cin1 + cmask) * bf     # x patches + concat rhs
                 + 9 * cmask * bf                # shared mask patches
                 + 9 * nh * bf                   # actv patches
                 + (cout + nh) * f4              # merged conv result
                 + 2 * cout * f4                 # gamma/beta
                 + 3 * cout * f4)                # h / h1 / out temps
    est = io + wts + 2 * live                    # 2x headroom for compiler temps
    return int(min(max(est, 32 << 20), 64 << 20))


def _block_diag(a, b):
    """[[a, 0], [0, b]]"""
    za = jnp.zeros((a.shape[0], b.shape[1]), a.dtype)
    zb = jnp.zeros((b.shape[0], a.shape[1]), b.dtype)
    return jnp.concatenate(
        [jnp.concatenate([a, za], axis=1), jnp.concatenate([zb, b], axis=1)], axis=0)


def _interp_matrix(n_in, n_out):
    """Bilinear interpolation matrix (align_corners=True), shape (n_out, n_in)."""
    if n_out == 1:
        src = jnp.zeros((1,), jnp.float32)
    else:
        src = jnp.arange(n_out, dtype=jnp.float32) * ((n_in - 1) / (n_out - 1))
    src = jnp.clip(src, 0.0, float(n_in - 1))
    grid = jnp.arange(n_in, dtype=jnp.float32)
    return jnp.maximum(0.0, 1.0 - jnp.abs(src[:, None] - grid[None, :]))


def decoder_block_forward(params, x, y, mask_feature, adding_feat):
    """DecoderBlock.forward.  All tensors NCHW, exactly as the PyTorch reference."""
    N, _, H, W = x.shape
    Ho, Wo = 2 * H, 2 * W
    HW = Ho * Wo
    cout = params["block1"]["w_main"].shape[0]
    cmask = mask_feature.shape[1]

    # x = torch.concat([x, y], dim=1)
    cat = jnp.concatenate([x, y], axis=1)
    cin1 = cat.shape[1]

    # nn.UpsamplingBilinear2d(scale_factor=2) — separable (H then W) interpolation,
    # two tiny f32 einsums; the dense Kronecker matrix is never built.
    mh = _interp_matrix(H, Ho)   # (Ho, H)
    mw = _interp_matrix(W, Wo)   # (Wo, W)
    up = jnp.einsum('nchw,Hh->ncHw', cat, mh, precision=jax.lax.Precision.HIGHEST)
    up = jnp.einsum('ncHw,Ww->ncHW', up, mw, precision=jax.lax.Precision.HIGHEST)
    x_flat = up.reshape(N, cin1, HW).astype(jnp.bfloat16)          # MXU operand -> bf16

    # SPADE mask path: resize once (shared by both blocks); patches built in-kernel.
    mask_r = jax.image.resize(mask_feature, (N, cmask, Ho, Wo), method="bilinear")
    mask_flat = mask_r.reshape(N, cmask, HW).astype(jnp.bfloat16)  # MXU operand -> bf16

    res_flat = adding_feat.reshape(N, cout, HW)                    # residual stays f32

    # Pre-fused / pre-cast weights: main+shared convs merged block-diagonally,
    # gamma/beta convs merged along Cout.  (cout should be a multiple of 8 so the
    # row splits inside the kernel stay sublane-aligned.)
    def prep(p):
        wms = _block_diag(p["w_main"], p["w_shared"]).astype(jnp.bfloat16)
        bms = jnp.concatenate([p["b_main"], p["b_shared"]], axis=0)
        return wms, bms, p["w_gb"].astype(jnp.bfloat16), p["b_gb"]

    wms1, bms1, wgb1, bgb1 = prep(params["block1"])
    wms2, bms2, wgb2, bgb2 = prep(params["block2"])
    weights = [wms1, bms1, wgb1, bgb1, wms2, bms2, wgb2, bgb2]

    def img_spec(c):
        return pl.BlockSpec((1, c, HW), lambda n: (n, 0, 0))

    in_specs = ([img_spec(cin1), img_spec(cmask), img_spec(cout)]
                + [pl.BlockSpec(w.shape, lambda n: (0, 0)) for w in weights])

    kernel = _make_decoder_kernel(Ho, Wo, cout)
    out = pl.pallas_call(
        kernel,
        out_shape=jax.ShapeDtypeStruct((N, cout, HW), x.dtype),
        grid=(N,),
        in_specs=in_specs,
        out_specs=pl.BlockSpec((1, cout, HW), lambda n: (n, 0, 0)),
        compiler_params=pltpu.CompilerParams(
            dimension_semantics=("parallel",),             # batch axis -> both v7x TCs
            vmem_limit_bytes=_vmem_limit_bytes(cin1, cmask, cout, HW)),
    )(x_flat, mask_flat, res_flat, *weights)
    return out.reshape(N, cout, Ho, Wo)


# --------------------------------------------------------------------------
# Parameter setup (PyTorch Conv2d-style uniform init, fused weight layout)
# --------------------------------------------------------------------------
def _conv_params(key, cin, cout):
    """Conv2d(cin, cout, 3, padding=1) in fused layout:
    w: (cout, 9*cin), column k*cin + c == PyTorch weight[cout, c, k//3, k%3];
    b: (cout, 1)."""
    kw, kb = jax.random.split(key)
    bound = 1.0 / math.sqrt(cin * 9)
    w = jax.random.uniform(kw, (cout, 9 * cin), jnp.float32, -bound, bound)
    b = jax.random.uniform(kb, (cout, 1), jnp.float32, -bound, bound)
    return w, b


def init_adaptive_block_params(key, cin, cout, cmask):
    k1, k2, k3 = jax.random.split(key, 3)
    w_main, b_main = _conv_params(k1, cin, cout)
    w_shared, b_shared = _conv_params(k2, cmask, SPADE_HIDDEN)
    # mlp_gamma and mlp_beta merged along Cout: gamma rows first, beta rows second.
    # (When loading a real checkpoint: w_gb = concat([W_gamma, W_beta], axis=0).)
    w_gb, b_gb = _conv_params(k3, SPADE_HIDDEN, 2 * cout)
    return {"w_main": w_main, "b_main": b_main,
            "w_shared": w_shared, "b_shared": b_shared,
            "w_gb": w_gb, "b_gb": b_gb}


def init_decoder_block_params(key, in_channels, out_channels, adding_channels,
                              mask_channels=None):
    if not mask_channels:
        mask_channels = in_channels // 2
    k1, k2 = jax.random.split(key)
    return {
        "block1": init_adaptive_block_params(
            k1, in_channels + adding_channels, out_channels, mask_channels),
        "block2": init_adaptive_block_params(
            k2, out_channels, out_channels, mask_channels),
    }


if __name__ == "__main__":
    key = jax.random.PRNGKey(0)
    kp, kx, ky, km, ka = jax.random.split(key, 5)

    N = 2
    in_channels = 4        # channels of x
    adding_channels = 4    # channels of y (concat partner)
    out_channels = 8
    mask_channels = in_channels // 2
    H = W = 16

    x = jax.random.normal(kx, (N, in_channels, H, W), jnp.float32)
    y = jax.random.normal(ky, (N, adding_channels, H, W), jnp.float32)
    mask_feature = jax.random.normal(km, (N, mask_channels, H, W), jnp.float32)
    adding_feat = jax.random.normal(ka, (N, out_channels, 2 * H, 2 * W), jnp.float32)

    params = init_decoder_block_params(kp, in_channels, out_channels, adding_channels)

    out = jax.jit(decoder_block_forward)(params, x, y, mask_feature, adding_feat)
    jax.block_until_ready(out)
    assert out.shape == (N, out_channels, 2 * H, 2 * W)
    assert bool(jnp.all(jnp.isfinite(out)))
    print("KERNEL_OK")
</pallas_src>

<mosaic_0001>
module attributes {stable_mosaic.version = 11 : i64} {
  func.func @kernel(%arg0: i32, %arg1: memref<1x8x1024xbf16, #tpu.memory_space<vmem>>, %arg2: memref<1x2x1024xbf16, #tpu.memory_space<vmem>>, %arg3: memref<1x8x1024xf32, #tpu.memory_space<vmem>>, %arg4: memref<40x90xbf16, #tpu.memory_space<vmem>>, %arg5: memref<40x1xf32, #tpu.memory_space<vmem>>, %arg6: memref<16x288xbf16, #tpu.memory_space<vmem>>, %arg7: memref<16x1xf32, #tpu.memory_space<vmem>>, %arg8: memref<40x90xbf16, #tpu.memory_space<vmem>>, %arg9: memref<40x1xf32, #tpu.memory_space<vmem>>, %arg10: memref<16x288xbf16, #tpu.memory_space<vmem>>, %arg11: memref<16x1xf32, #tpu.memory_space<vmem>>, %arg12: memref<1x8x1024xf32, #tpu.memory_space<vmem>>) attributes {dimension_semantics = [#tpu.dimension_semantics<parallel>], iteration_bounds = array<i64: 2>, scalar_prefetch = 0 : i64, scratch_operands = 0 : i64, tpu.core_type = #tpu.core_type<tc>, window_params = [{transform_indices = @transform_0, window_bounds = array<i64: 1, 8, 1024>}, {transform_indices = @transform_1, window_bounds = array<i64: 1, 2, 1024>}, {transform_indices = @transform_2, window_bounds = array<i64: 1, 8, 1024>}, {pipeline_mode = #tpu.pipeline_mode<synchronous>, transform_indices = @transform_3, window_bounds = array<i64: 40, 90>}, {pipeline_mode = #tpu.pipeline_mode<synchronous>, transform_indices = @transform_4, window_bounds = array<i64: 40, 1>}, {pipeline_mode = #tpu.pipeline_mode<synchronous>, transform_indices = @transform_5, window_bounds = array<i64: 16, 288>}, {pipeline_mode = #tpu.pipeline_mode<synchronous>, transform_indices = @transform_6, window_bounds = array<i64: 16, 1>}, {pipeline_mode = #tpu.pipeline_mode<synchronous>, transform_indices = @transform_7, window_bounds = array<i64: 40, 90>}, {pipeline_mode = #tpu.pipeline_mode<synchronous>, transform_indices = @transform_8, window_bounds = array<i64: 40, 1>}, {pipeline_mode = #tpu.pipeline_mode<synchronous>, transform_indices = @transform_9, window_bounds = array<i64: 16, 288>}, {pipeline_mode = #tpu.pipeline_mode<synchronous>, transform_indices = @transform_10, window_bounds = array<i64: 16, 1>}, {transform_indices = @transform_11, window_bounds = array<i64: 1, 8, 1024>}]} {
    %0 = tpu.iota {dimensions = array<i32: 1>} : vector<1x1024xi32>
    %c32_i32 = arith.constant 32 : i32
    %c0_i32 = arith.constant 0 : i32
    %1 = arith.cmpi eq, %c32_i32, %c0_i32 : i32
    %c1_i32 = arith.constant 1 : i32
    %2 = arith.select %1, %c1_i32, %c32_i32 : i32
    %3 = vector.broadcast %2 : i32 to vector<1x1024xi32>
    %4 = arith.remsi %0, %3 : vector<1x1024xi32>
    %c0_i32_0 = arith.constant 0 : i32
    %5 = vector.broadcast %c0_i32_0 : i32 to vector<1x1024xi32>
    %6 = arith.cmpi ne, %4, %5 : vector<1x1024xi32>
    %c0_i32_1 = arith.constant 0 : i32
    %7 = vector.broadcast %c0_i32_1 : i32 to vector<1x1024xi32>
    %8 = arith.cmpi slt, %4, %7 : vector<1x1024xi32>
    %c0_i32_2 = arith.constant 0 : i32
    %9 = arith.cmpi slt, %2, %c0_i32_2 : i32
    %10 = vector.broadcast %9 : i1 to vector<1x1024xi1>
    %11 = vector.broadcast %10 : vector<1x1024xi1> to vector<1x1024xi1>
    %12 = arith.xori %8, %11 : vector<1x1024xi1>
    %13 = arith.andi %12, %6 : vector<1x1024xi1>
    %14 = vector.broadcast %2 : i32 to vector<1x1024xi32>
    %15 = arith.addi %4, %14 : vector<1x1024xi32>
    %16 = arith.select %13, %15, %4 : vector<1x1024xi1>, vector<1x1024xi32>
    %c1_i32_3 = arith.constant 1 : i32
    %17 = vector.broadcast %c1_i32_3 : i32 to vector<1x1024xi32>
    %18 = arith.cmpi sge, %16, %17 : vector<1x1024xi32>
    %c31_i32 = arith.constant 31 : i32
    %19 = vector.broadcast %c31_i32 : i32 to vector<1x1024xi32>
    %20 = arith.cmpi slt, %16, %19 : vector<1x1024xi32>
    %c0 = arith.constant 0 : index
    %c0_4 = arith.constant 0 : index
    %c0_5 = arith.constant 0 : index
    %21 = vector.load %arg2[%c0, %c0_4, %c0_5] : memref<1x2x1024xbf16, #tpu.memory_space<vmem>>, vector<1x2x1024xbf16>
    %22 = vector.shape_cast %21 : vector<1x2x1024xbf16> to vector<2x1024xbf16>
    %cst = arith.constant 0.000000e+00 : bf16
    %23 = vector.broadcast %cst : bf16 to vector<2x33xbf16>
    %24 = tpu.concatenate %23, %22, %23 in 1 : vector<2x33xbf16>, vector<2x1024xbf16>, vector<2x33xbf16> -> vector<2x1090xbf16>
    %25 = vector.extract_strided_slice %24 {offsets = [0, 0], sizes = [2, 1024], strides = [1, 1]} : vector<2x1090xbf16> to vector<2x1024xbf16>
    %cst_6 = arith.constant 0.000000e+00 : f32
    %26 = arith.truncf %cst_6 : f32 to bf16
    %27 = vector.shape_cast %18 : vector<1x1024xi1> to vector<1x1024xi1>
    %28 = vector.broadcast %27 : vector<1x1024xi1> to vector<2x1024xi1>
    %29 = vector.broadcast %26 : bf16 to vector<2x1024xbf16>
    %30 = arith.select %28, %25, %29 : vector<2x1024xi1>, vector<2x1024xbf16>
    %31 = vector.extract_strided_slice %24 {offsets = [0, 1], sizes = [2, 1024], strides = [1, 1]} : vector<2x1090xbf16> to vector<2x1024xbf16>
    %32 = vector.extract_strided_slice %24 {offsets = [0, 2], sizes = [2, 1024], strides = [1, 1]} : vector<2x1090xbf16> to vector<2x1024xbf16>
    %cst_7 = arith.constant 0.000000e+00 : f32
    %33 = arith.truncf %cst_7 : f32 to bf16
    %34 = vector.shape_cast %20 : vector<1x1024xi1> to vector<1x1024xi1>
    %35 = vector.broadcast %34 : vector<1x1024xi1> to vector<2x1024xi1>
    %36 = vector.broadcast %33 : bf16 to vector<2x1024xbf16>
    %37 = arith.select %35, %32, %36 : vector<2x1024xi1>, vector<2x1024xbf16>
    %38 = vector.extract_strided_slice %24 {offsets = [0, 32], sizes = [2, 1024], strides = [1, 1]} : vector<2x1090xbf16> to vector<2x1024xbf16>
    %cst_8 = arith.constant 0.000000e+00 : f32
    %39 = arith.truncf %cst_8 : f32 to bf16
    %40 = vector.shape_cast %18 : vector<1x1024xi1> to vector<1x1024xi1>
    %41 = vector.broadcast %40 : vector<1x1024xi1> to vector<2x1024xi1>
    %42 = vector.broadcast %39 : bf16 to vector<2x1024xbf16>
    %43 = arith.select %41, %38, %42 : vector<2x1024xi1>, vector<2x1024xbf16>
    %44 = vector.extract_strided_slice %24 {offsets = [0, 33], sizes = [2, 1024], strides = [1, 1]} : vector<2x1090xbf16> to vector<2x1024xbf16>
    %45 = vector.extract_strided_slice %24 {offsets = [0, 34], sizes = [2, 1024], strides = [1, 1]} : vector<2x1090xbf16> to vector<2x1024xbf16>
    %cst_9 = arith.constant 0.000000e+00 : f32
    %46 = arith.truncf %cst_9 : f32 to bf16
    %47 = vector.shape_cast %20 : vector<1x1024xi1> to vector<1x1024xi1>
    %48 = vector.broadcast %47 : vector<1x1024xi1> to vector<2x1024xi1>
    %49 = vector.broadcast %46 : bf16 to vector<2x1024xbf16>
    %50 = arith.select %48, %45, %49 : vector<2x1024xi1>, vector<2x1024xbf16>
    %51 = vector.extract_strided_slice %24 {offsets = [0, 64], sizes = [2, 1024], strides = [1, 1]} : vector<2x1090xbf16> to vector<2x1024xbf16>
    %cst_10 = arith.constant 0.000000e+00 : f32
    %52 = arith.truncf %cst_10 : f32 to bf16
    %53 = vector.shape_cast %18 : vector<1x1024xi1> to vector<1x1024xi1>
    %54 = vector.broadcast %53 : vector<1x1024xi1> to vector<2x1024xi1>
    %55 = vector.broadcast %52 : bf16 to vector<2x1024xbf16>
    %56 = arith.select %54, %51, %55 : vector<2x1024xi1>, vector<2x1024xbf16>
    %57 = vector.extract_strided_slice %24 {offsets = [0, 65], sizes = [2, 1024], strides = [1, 1]} : vector<2x1090xbf16> to vector<2x1024xbf16>
    %58 = vector.extract_strided_slice %24 {offsets = [0, 66], sizes = [2, 1024], strides = [1, 1]} : vector<2x1090xbf16> to vector<2x1024xbf16>
    %cst_11 = arith.constant 0.000000e+00 : f32
    %59 = arith.truncf %cst_11 : f32 to bf16
    %60 = vector.shape_cast %20 : vector<1x1024xi1> to vector<1x1024xi1>
    %61 = vector.broadcast %60 : vector<1x1024xi1> to vector<2x1024xi1>
    %62 = vector.broadcast %59 : bf16 to vector<2x1024xbf16>
    %63 = arith.select %61, %58, %62 : vector<2x1024xi1>, vector<2x1024xbf16>
    %64 = tpu.concatenate %30, %31, %37, %43, %44, %50, %56, %57, %63 in 0 : vector<2x1024xbf16>, vector<2x1024xbf16>, vector<2x1024xbf16>, vector<2x1024xbf16>, vector<2x1024xbf16>, vector<2x1024xbf16>, vector<2x1024xbf16>, vector<2x1024xbf16>, vector<2x1024xbf16> -> vector<18x1024xbf16>
    %c0_12 = arith.constant 0 : index
    %c0_13 = arith.constant 0 : index
    %c0_14 = arith.constant 0 : index
    %65 = vector.load %arg1[%c0_12, %c0_13, %c0_14] : memref<1x8x1024xbf16, #tpu.memory_space<vmem>>, vector<1x8x1024xbf16>
    %66 = vector.shape_cast %65 : vector<1x8x1024xbf16> to vector<8x1024xbf16>
    %cst_15 = arith.constant 0.000000e+00 : bf16
    %67 = vector.broadcast %cst_15 : bf16 to vector<8x33xbf16>
    %68 = tpu.concatenate %67, %66, %67 in 1 : vector<8x33xbf16>, vector<8x1024xbf16>, vector<8x33xbf16> -> vector<8x1090xbf16>
    %69 = vector.extract_strided_slice %68 {offsets = [0, 0], sizes = [8, 1024], strides = [1, 1]} : vector<8x1090xbf16> to vector<8x1024xbf16>
    %cst_16 = arith.constant 0.000000e+00 : f32
    %70 = arith.truncf %cst_16 : f32 to bf16
    %71 = vector.shape_cast %18 : vector<1x1024xi1> to vector<1x1024xi1>
    %72 = vector.broadcast %71 : vector<1x1024xi1> to vector<8x1024xi1>
    %73 = vector.broadcast %70 : bf16 to vector<8x1024xbf16>
    %74 = arith.select %72, %69, %73 : vector<8x1024xi1>, vector<8x1024xbf16>
    %75 = vector.extract_strided_slice %68 {offsets = [0, 1], sizes = [8, 1024], strides = [1, 1]} : vector<8x1090xbf16> to vector<8x1024xbf16>
    %76 = vector.extract_strided_slice %68 {offsets = [0, 2], sizes = [8, 1024], strides = [1, 1]} : vector<8x1090xbf16> to vector<8x1024xbf16>
    %cst_17 = arith.constant 0.000000e+00 : f32
    %77 = arith.truncf %cst_17 : f32 to bf16
    %78 = vector.shape_cast %20 : vector<1x1024xi1> to vector<1x1024xi1>
    %79 = vector.broadcast %78 : vector<1x1024xi1> to vector<8x1024xi1>
    %80 = vector.broadcast %77 : bf16 to vector<8x1024xbf16>
    %81 = arith.select %79, %76, %80 : vector<8x1024xi1>, vector<8x1024xbf16>
    %82 = vector.extract_strided_slice %68 {offsets = [0, 32], sizes = [8, 1024], strides = [1, 1]} : vector<8x1090xbf16> to vector<8x1024xbf16>
    %cst_18 = arith.constant 0.000000e+00 : f32
    %83 = arith.truncf %cst_18 : f32 to bf16
    %84 = vector.shape_cast %18 : vector<1x1024xi1> to vector<1x1024xi1>
    %85 = vector.broadcast %84 : vector<1x1024xi1> to vector<8x1024xi1>
    %86 = vector.broadcast %83 : bf16 to vector<8x1024xbf16>
    %87 = arith.select %85, %82, %86 : vector<8x1024xi1>, vector<8x1024xbf16>
    %88 = vector.extract_strided_slice %68 {offsets = [0, 33], sizes = [8, 1024], strides = [1, 1]} : vector<8x1090xbf16> to vector<8x1024xbf16>
    %89 = vector.extract_strided_slice %68 {offsets = [0, 34], sizes = [8, 1024], strides = [1, 1]} : vector<8x1090xbf16> to vector<8x1024xbf16>
    %cst_19 = arith.constant 0.000000e+00 : f32
    %90 = arith.truncf %cst_19 : f32 to bf16
    %91 = vector.shape_cast %20 : vector<1x1024xi1> to vector<1x1024xi1>
    %92 = vector.broadcast %91 : vector<1x1024xi1> to vector<8x1024xi1>
    %93 = vector.broadcast %90 : bf16 to vector<8x1024xbf16>
    %94 = arith.select %92, %89, %93 : vector<8x1024xi1>, vector<8x1024xbf16>
    %95 = vector.extract_strided_slice %68 {offsets = [0, 64], sizes = [8, 1024], strides = [1, 1]} : vector<8x1090xbf16> to vector<8x1024xbf16>
    %cst_20 = arith.constant 0.000000e+00 : f32
    %96 = arith.truncf %cst_20 : f32 to bf16
    %97 = vector.shape_cast %18 : vector<1x1024xi1> to vector<1x1024xi1>
    %98 = vector.broadcast %97 : vector<1x1024xi1> to vector<8x1024xi1>
    %99 = vector.broadcast %96 : bf16 to vector<8x1024xbf16>
    %100 = arith.select %98, %95, %99 : vector<8x1024xi1>, vector<8x1024xbf16>
    %101 = vector.extract_strided_slice %68 {offsets = [0, 65], sizes = [8, 1024], strides = [1, 1]} : vector<8x1090xbf16> to vector<8x1024xbf16>
    %102 = vector.extract_strided_slice %68 {offsets = [0, 66], sizes = [8, 1024], strides = [1, 1]} : vector<8x1090xbf16> to vector<8x1024xbf16>
    %cst_21 = arith.constant 0.000000e+00 : f32
    %103 = arith.truncf %cst_21 : f32 to bf16
    %104 = vector.shape_cast %20 : vector<1x1024xi1> to vector<1x1024xi1>
    %105 = vector.broadcast %104 : vector<1x1024xi1> to vector<8x1024xi1>
    %106 = vector.broadcast %103 : bf16 to vector<8x1024xbf16>
    %107 = arith.select %105, %102, %106 : vector<8x1024xi1>, vector<8x1024xbf16>
    %108 = tpu.concatenate %74, %75, %81, %87, %88, %94, %100, %101, %107 in 0 : vector<8x1024xbf16>, vector<8x1024xbf16>, vector<8x1024xbf16>, vector<8x1024xbf16>, vector<8x1024xbf16>, vector<8x1024xbf16>, vector<8x1024xbf16>, vector<8x1024xbf16>, vector<8x1024xbf16> -> vector<72x1024xbf16>
    %109 = tpu.concatenate %108, %64 in 0 : vector<72x1024xbf16>, vector<18x1024xbf16> -> vector<90x1024xbf16>
    %c0_22 = arith.constant 0 : index
    %c0_23 = arith.constant 0 : index
    %110 = vector.load %arg4[%c0_22, %c0_23] : memref<40x90xbf16, #tpu.memory_space<vmem>>, vector<40x90xbf16>
    %cst_24 = arith.constant dense<0.000000e+00> : vector<40x1024xf32>
    %111 = tpu.matmul %110, %109, %cst_24 {dimension_numbers = #tpu.dot_dimension_numbers<[1], [0], [0], [1], [0, 0, 1, 1], [], []>} : vector<40x90xbf16>, vector<90x1024xbf16>, vector<40x1024xf32> -> vector<40x1024xf32>
    %c0_25 = arith.constant 0 : index
    %c0_26 = arith.constant 0 : index
    %112 = vector.load %arg5[%c0_25, %c0_26] : memref<40x1xf32, #tpu.memory_space<vmem>>, vector<40x1xf32>
    %113 = vector.broadcast %112 : vector<40x1xf32> to vector<40x1024xf32>
    %114 = arith.addf %111, %113 : vector<40x1024xf32>
    %115 = vector.extract_strided_slice %114 {offsets = [0, 0], sizes = [8, 1024], strides = [1, 1]} : vector<40x1024xf32> to vector<8x1024xf32>
    %116 = vector.extract_strided_slice %114 {offsets = [8, 0], sizes = [32, 1024], strides = [1, 1]} : vector<40x1024xf32> to vector<32x1024xf32>
    %cst_27 = arith.constant 0.000000e+00 : f32
    %117 = vector.broadcast %cst_27 : f32 to vector<32x1024xf32>
    %118 = arith.maximumf %116, %117 : vector<32x1024xf32>
    %119 = arith.truncf %118 : vector<32x1024xf32> to vector<32x1024xbf16>
    %c0_28 = arith.constant 0 : index
    %c0_29 = arith.constant 0 : index
    %120 = vector.load %arg6[%c0_28, %c0_29] : memref<16x288xbf16, #tpu.memory_space<vmem>>, vector<16x288xbf16>
    %cst_30 = arith.constant 0.000000e+00 : bf16
    %121 = vector.broadcast %cst_30 : bf16 to vector<32x33xbf16>
    %122 = tpu.concatenate %121, %119, %121 in 1 : vector<32x33xbf16>, vector<32x1024xbf16>, vector<32x33xbf16> -> vector<32x1090xbf16>
    %123 = vector.extract_strided_slice %122 {offsets = [0, 0], sizes = [32, 1024], strides = [1, 1]} : vector<32x1090xbf16> to vector<32x1024xbf16>
    %cst_31 = arith.constant 0.000000e+00 : f32
    %124 = arith.truncf %cst_31 : f32 to bf16
    %125 = vector.shape_cast %18 : vector<1x1024xi1> to vector<1x1024xi1>
    %126 = vector.broadcast %125 : vector<1x1024xi1> to vector<32x1024xi1>
    %127 = vector.broadcast %124 : bf16 to vector<32x1024xbf16>
    %128 = arith.select %126, %123, %127 : vector<32x1024xi1>, vector<32x1024xbf16>
    %129 = vector.extract_strided_slice %122 {offsets = [0, 1], sizes = [32, 1024], strides = [1, 1]} : vector<32x1090xbf16> to vector<32x1024xbf16>
    %130 = vector.extract_strided_slice %122 {offsets = [0, 2], sizes = [32, 1024], strides = [1, 1]} : vector<32x1090xbf16> to vector<32x1024xbf16>
    %cst_32 = arith.constant 0.000000e+00 : f32
    %131 = arith.truncf %cst_32 : f32 to bf16
    %132 = vector.shape_cast %20 : vector<1x1024xi1> to vector<1x1024xi1>
    %133 = vector.broadcast %132 : vector<1x1024xi1> to vector<32x1024xi1>
    %134 = vector.broadcast %131 : bf16 to vector<32x1024xbf16>
    %135 = arith.select %133, %130, %134 : vector<32x1024xi1>, vector<32x1024xbf16>
    %136 = vector.extract_strided_slice %122 {offsets = [0, 32], sizes = [32, 1024], strides = [1, 1]} : vector<32x1090xbf16> to vector<32x1024xbf16>
    %cst_33 = arith.constant 0.000000e+00 : f32
    %137 = arith.truncf %cst_33 : f32 to bf16
    %138 = vector.shape_cast %18 : vector<1x1024xi1> to vector<1x1024xi1>
    %139 = vector.broadcast %138 : vector<1x1024xi1> to vector<32x1024xi1>
    %140 = vector.broadcast %137 : bf16 to vector<32x1024xbf16>
    %141 = arith.select %139, %136, %140 : vector<32x1024xi1>, vector<32x1024xbf16>
    %142 = vector.extract_strided_slice %122 {offsets = [0, 33], sizes = [32, 1024], strides = [1, 1]} : vector<32x1090xbf16> to vector<32x1024xbf16>
    %143 = vector.extract_strided_slice %122 {offsets = [0, 34], sizes = [32, 1024], strides = [1, 1]} : vector<32x1090xbf16> to vector<32x1024xbf16>
    %cst_34 = arith.constant 0.000000e+00 : f32
    %144 = arith.truncf %cst_34 : f32 to bf16
    %145 = vector.shape_cast %20 : vector<1x1024xi1> to vector<1x1024xi1>
    %146 = vector.broadcast %145 : vector<1x1024xi1> to vector<32x1024xi1>
    %147 = vector.broadcast %144 : bf16 to vector<32x1024xbf16>
    %148 = arith.select %146, %143, %147 : vector<32x1024xi1>, vector<32x1024xbf16>
    %149 = vector.extract_strided_slice %122 {offsets = [0, 64], sizes = [32, 1024], strides = [1, 1]} : vector<32x1090xbf16> to vector<32x1024xbf16>
    %cst_35 = arith.constant 0.000000e+00 : f32
    %150 = arith.truncf %cst_35 : f32 to bf16
    %151 = vector.shape_cast %18 : vector<1x1024xi1> to vector<1x1024xi1>
    %152 = vector.broadcast %151 : vector<1x1024xi1> to vector<32x1024xi1>
    %153 = vector.broadcast %150 : bf16 to vector<32x1024xbf16>
    %154 = arith.select %152, %149, %153 : vector<32x1024xi1>, vector<32x1024xbf16>
    %155 = vector.extract_strided_slice %122 {offsets = [0, 65], sizes = [32, 1024], strides = [1, 1]} : vector<32x1090xbf16> to vector<32x1024xbf16>
    %156 = vector.extract_strided_slice %122 {offsets = [0, 66], sizes = [32, 1024], strides = [1, 1]} : vector<32x1090xbf16> to vector<32x1024xbf16>
    %cst_36 = arith.constant 0.000000e+00 : f32
    %157 = arith.truncf %cst_36 : f32 to bf16
    %158 = vector.shape_cast %20 : vector<1x1024xi1> to vector<1x1024xi1>
    %159 = vector.broadcast %158 : vector<1x1024xi1> to vector<32x1024xi1>
    %160 = vector.broadcast %157 : bf16 to vector<32x1024xbf16>
    %161 = arith.select %159, %156, %160 : vector<32x1024xi1>, vector<32x1024xbf16>
    %162 = tpu.concatenate %128, %129, %135, %141, %142, %148, %154, %155, %161 in 0 : vector<32x1024xbf16>, vector<32x1024xbf16>, vector<32x1024xbf16>, vector<32x1024xbf16>, vector<32x1024xbf16>, vector<32x1024xbf16>, vector<32x1024xbf16>, vector<32x1024xbf16>, vector<32x1024xbf16> -> vector<288x1024xbf16>
    %cst_37 = arith.constant dense<0.000000e+00> : vector<16x1024xf32>
    %163 = tpu.matmul %120, %162, %cst_37 {dimension_numbers = #tpu.dot_dimension_numbers<[1], [0], [0], [1], [0, 0, 1, 1], [], []>} : vector<16x288xbf16>, vector<288x1024xbf16>, vector<16x1024xf32> -> vector<16x1024xf32>
    %c0_38 = arith.constant 0 : index
    %c0_39 = arith.constant 0 : index
    %164 = vector.load %arg7[%c0_38, %c0_39] : memref<16x1xf32, #tpu.memory_space<vmem>>, vector<16x1xf32>
    %165 = vector.broadcast %164 : vector<16x1xf32> to vector<16x1024xf32>
    %166 = arith.addf %163, %165 : vector<16x1024xf32>
    %167 = vector.extract_strided_slice %166 {offsets = [0, 0], sizes = [8, 1024], strides = [1, 1]} : vector<16x1024xf32> to vector<8x1024xf32>
    %168 = vector.extract_strided_slice %166 {offsets = [8, 0], sizes = [8, 1024], strides = [1, 1]} : vector<16x1024xf32> to vector<8x1024xf32>
    %cst_40 = arith.constant dense<0.000000e+00> : vector<8xf32>
    %169 = vector.multi_reduction <add>, %115, %cst_40 [1] : vector<8x1024xf32> to vector<8xf32>
    %170 = vector.shape_cast %169 : vector<8xf32> to vector<8x1xf32>
    %cst_41 = arith.constant 1.024000e+03 : f32
    %171 = vector.broadcast %cst_41 : f32 to vector<8x1xf32>
    %172 = arith.divf %170, %171 : vector<8x1xf32>
    %173 = vector.broadcast %172 : vector<8x1xf32> to vector<8x1024xf32>
    %174 = arith.subf %115, %173 : vector<8x1024xf32>
    %175 = arith.mulf %174, %174 : vector<8x1024xf32>
    %cst_42 = arith.constant dense<0.000000e+00> : vector<8xf32>
    %176 = vector.multi_reduction <add>, %175, %cst_42 [1] : vector<8x1024xf32> to vector<8xf32>
    %177 = vector.shape_cast %176 : vector<8xf32> to vector<8x1xf32>
    %cst_43 = arith.constant 1.024000e+03 : f32
    %178 = vector.broadcast %cst_43 : f32 to vector<8x1xf32>
    %179 = arith.divf %177, %178 : vector<8x1xf32>
    %180 = vector.broadcast %172 : vector<8x1xf32> to vector<8x1024xf32>
    %181 = arith.subf %115, %180 : vector<8x1024xf32>
    %cst_44 = arith.constant 9.99999974E-6 : f32
    %182 = vector.broadcast %cst_44 : f32 to vector<8x1xf32>
    %183 = arith.addf %179, %182 : vector<8x1xf32>
    %184 = math.rsqrt %183 : vector<8x1xf32>
    %185 = vector.broadcast %184 : vector<8x1xf32> to vector<8x1024xf32>
    %186 = arith.mulf %181, %185 : vector<8x1024xf32>
    %cst_45 = arith.constant 1.000000e+00 : f32
    %187 = vector.broadcast %cst_45 : f32 to vector<8x1024xf32>
    %188 = arith.addf %187, %167 : vector<8x1024xf32>
    %189 = arith.mulf %186, %188 : vector<8x1024xf32>
    %190 = arith.addf %189, %168 : vector<8x1024xf32>
    %cst_46 = arith.constant 0.000000e+00 : f32
    %191 = vector.broadcast %cst_46 : f32 to vector<8x1024xf32>
    %192 = arith.cmpf ogt, %190, %191 : vector<8x1024xf32>
    %cst_47 = arith.constant 0.00999999977 : f32
    %193 = vector.broadcast %cst_47 : f32 to vector<8x1024xf32>
    %194 = arith.mulf %193, %190 : vector<8x1024xf32>
    %195 = arith.select %192, %190, %194 : vector<8x1024xi1>, vector<8x1024xf32>
    %c0_48 = arith.constant 0 : index
    %c0_49 = arith.constant 0 : index
    %c0_50 = arith.constant 0 : index
    %196 = vector.load %arg3[%c0_48, %c0_49, %c0_50] : memref<1x8x1024xf32, #tpu.memory_space<vmem>>, vector<1x8x1024xf32>
    %197 = vector.shape_cast %196 : vector<1x8x1024xf32> to vector<8x1024xf32>
    %198 = arith.addf %195, %197 : vector<8x1024xf32>
    %199 = arith.truncf %198 : vector<8x1024xf32> to vector<8x1024xbf16>
    %cst_51 = arith.constant 0.000000e+00 : bf16
    %200 = vector.broadcast %cst_51 : bf16 to vector<8x33xbf16>
    %201 = tpu.concatenate %200, %199, %200 in 1 : vector<8x33xbf16>, vector<8x1024xbf16>, vector<8x33xbf16> -> vector<8x1090xbf16>
    %202 = vector.extract_strided_slice %201 {offsets = [0, 0], sizes = [8, 1024], strides = [1, 1]} : vector<8x1090xbf16> to vector<8x1024xbf16>
    %cst_52 = arith.constant 0.000000e+00 : f32
    %203 = arith.truncf %cst_52 : f32 to bf16
    %204 = vector.shape_cast %18 : vector<1x1024xi1> to vector<1x1024xi1>
    %205 = vector.broadcast %204 : vector<1x1024xi1> to vector<8x1024xi1>
    %206 = vector.broadcast %203 : bf16 to vector<8x1024xbf16>
    %207 = arith.select %205, %202, %206 : vector<8x1024xi1>, vector<8x1024xbf16>
    %208 = vector.extract_strided_slice %201 {offsets = [0, 1], sizes = [8, 1024], strides = [1, 1]} : vector<8x1090xbf16> to vector<8x1024xbf16>
    %209 = vector.extract_strided_slice %201 {offsets = [0, 2], sizes = [8, 1024], strides = [1, 1]} : vector<8x1090xbf16> to vector<8x1024xbf16>
    %cst_53 = arith.constant 0.000000e+00 : f32
    %210 = arith.truncf %cst_53 : f32 to bf16
    %211 = vector.shape_cast %20 : vector<1x1024xi1> to vector<1x1024xi1>
    %212 = vector.broadcast %211 : vector<1x1024xi1> to vector<8x1024xi1>
    %213 = vector.broadcast %210 : bf16 to vector<8x1024xbf16>
    %214 = arith.select %212, %209, %213 : vector<8x1024xi1>, vector<8x1024xbf16>
    %215 = vector.extract_strided_slice %201 {offsets = [0, 32], sizes = [8, 1024], strides = [1, 1]} : vector<8x1090xbf16> to vector<8x1024xbf16>
    %cst_54 = arith.constant 0.000000e+00 : f32
    %216 = arith.truncf %cst_54 : f32 to bf16
    %217 = vector.shape_cast %18 : vector<1x1024xi1> to vector<1x1024xi1>
    %218 = vector.broadcast %217 : vector<1x1024xi1> to vector<8x1024xi1>
    %219 = vector.broadcast %216 : bf16 to vector<8x1024xbf16>
    %220 = arith.select %218, %215, %219 : vector<8x1024xi1>, vector<8x1024xbf16>
    %221 = vector.extract_strided_slice %201 {offsets = [0, 33], sizes = [8, 1024], strides = [1, 1]} : vector<8x1090xbf16> to vector<8x1024xbf16>
    %222 = vector.extract_strided_slice %201 {offsets = [0, 34], sizes = [8, 1024], strides = [1, 1]} : vector<8x1090xbf16> to vector<8x1024xbf16>
    %cst_55 = arith.constant 0.000000e+00 : f32
    %223 = arith.truncf %cst_55 : f32 to bf16
    %224 = vector.shape_cast %20 : vector<1x1024xi1> to vector<1x1024xi1>
    %225 = vector.broadcast %224 : vector<1x1024xi1> to vector<8x1024xi1>
    %226 = vector.broadcast %223 : bf16 to vector<8x1024xbf16>
    %227 = arith.select %225, %222, %226 : vector<8x1024xi1>, vector<8x1024xbf16>
    %228 = vector.extract_strided_slice %201 {offsets = [0, 64], sizes = [8, 1024], strides = [1, 1]} : vector<8x1090xbf16> to vector<8x1024xbf16>
    %cst_56 = arith.constant 0.000000e+00 : f32
    %229 = arith.truncf %cst_56 : f32 to bf16
    %230 = vector.shape_cast %18 : vector<1x1024xi1> to vector<1x1024xi1>
    %231 = vector.broadcast %230 : vector<1x1024xi1> to vector<8x1024xi1>
    %232 = vector.broadcast %229 : bf16 to vector<8x1024xbf16>
    %233 = arith.select %231, %228, %232 : vector<8x1024xi1>, vector<8x1024xbf16>
    %234 = vector.extract_strided_slice %201 {offsets = [0, 65], sizes = [8, 1024], strides = [1, 1]} : vector<8x1090xbf16> to vector<8x1024xbf16>
    %235 = vector.extract_strided_slice %201 {offsets = [0, 66], sizes = [8, 1024], strides = [1, 1]} : vector<8x1090xbf16> to vector<8x1024xbf16>
    %cst_57 = arith.constant 0.000000e+00 : f32
    %236 = arith.truncf %cst_57 : f32 to bf16
    %237 = vector.shape_cast %20 : vector<1x1024xi1> to vector<1x1024xi1>
    %238 = vector.broadcast %237 : vector<1x1024xi1> to vector<8x1024xi1>
    %239 = vector.broadcast %236 : bf16 to vector<8x1024xbf16>
    %240 = arith.select %238, %235, %239 : vector<8x1024xi1>, vector<8x1024xbf16>
    %241 = tpu.concatenate %207, %208, %214, %220, %221, %227, %233, %234, %240 in 0 : vector<8x1024xbf16>, vector<8x1024xbf16>, vector<8x1024xbf16>, vector<8x1024xbf16>, vector<8x1024xbf16>, vector<8x1024xbf16>, vector<8x1024xbf16>, vector<8x1024xbf16>, vector<8x1024xbf16> -> vector<72x1024xbf16>
    %242 = tpu.concatenate %241, %64 in 0 : vector<72x1024xbf16>, vector<18x1024xbf16> -> vector<90x1024xbf16>
    %c0_58 = arith.constant 0 : index
    %c0_59 = arith.constant 0 : index
    %243 = vector.load %arg8[%c0_58, %c0_59] : memref<40x90xbf16, #tpu.memory_space<vmem>>, vector<40x90xbf16>
    %cst_60 = arith.constant dense<0.000000e+00> : vector<40x1024xf32>
    %244 = tpu.matmul %243, %242, %cst_60 {dimension_numbers = #tpu.dot_dimension_numbers<[1], [0], [0], [1], [0, 0, 1, 1], [], []>} : vector<40x90xbf16>, vector<90x1024xbf16>, vector<40x1024xf32> -> vector<40x1024xf32>
    %c0_61 = arith.constant 0 : index
    %c0_62 = arith.constant 0 : index
    %245 = vector.load %arg9[%c0_61, %c0_62] : memref<40x1xf32, #tpu.memory_space<vmem>>, vector<40x1xf32>
    %246 = vector.broadcast %245 : vector<40x1xf32> to vector<40x1024xf32>
    %247 = arith.addf %244, %246 : vector<40x1024xf32>
    %248 = vector.extract_strided_slice %247 {offsets = [0, 0], sizes = [8, 1024], strides = [1, 1]} : vector<40x1024xf32> to vector<8x1024xf32>
    %249 = vector.extract_strided_slice %247 {offsets = [8, 0], sizes = [32, 1024], strides = [1, 1]} : vector<40x1024xf32> to vector<32x1024xf32>
    %cst_63 = arith.constant 0.000000e+00 : f32
    %250 = vector.broadcast %cst_63 : f32 to vector<32x1024xf32>
    %251 = arith.maximumf %249, %250 : vector<32x1024xf32>
    %252 = arith.truncf %251 : vector<32x1024xf32> to vector<32x1024xbf16>
    %c0_64 = arith.constant 0 : index
    %c0_65 = arith.constant 0 : index
    %253 = vector.load %arg10[%c0_64, %c0_65] : memref<16x288xbf16, #tpu.memory_space<vmem>>, vector<16x288xbf16>
    %cst_66 = arith.constant 0.000000e+00 : bf16
    %254 = vector.broadcast %cst_66 : bf16 to vector<32x33xbf16>
    %255 = tpu.concatenate %254, %252, %254 in 1 : vector<32x33xbf16>, vector<32x1024xbf16>, vector<32x33xbf16> -> vector<32x1090xbf16>
    %256 = vector.extract_strided_slice %255 {offsets = [0, 0], sizes = [32, 1024], strides = [1, 1]} : vector<32x1090xbf16> to vector<32x1024xbf16>
    %cst_67 = arith.constant 0.000000e+00 : f32
    %257 = arith.truncf %cst_67 : f32 to bf16
    %258 = vector.shape_cast %18 : vector<1x1024xi1> to vector<1x1024xi1>
    %259 = vector.broadcast %258 : vector<1x1024xi1> to vector<32x1024xi1>
    %260 = vector.broadcast %257 : bf16 to vector<32x1024xbf16>
    %261 = arith.select %259, %256, %260 : vector<32x1024xi1>, vector<32x1024xbf16>
    %262 = vector.extract_strided_slice %255 {offsets = [0, 1], sizes = [32, 1024], strides = [1, 1]} : vector<32x1090xbf16> to vector<32x1024xbf16>
    %263 = vector.extract_strided_slice %255 {offsets = [0, 2], sizes = [32, 1024], strides = [1, 1]} : vector<32x1090xbf16> to vector<32x1024xbf16>
    %cst_68 = arith.constant 0.000000e+00 : f32
    %264 = arith.truncf %cst_68 : f32 to bf16
    %265 = vector.shape_cast %20 : vector<1x1024xi1> to vector<1x1024xi1>
    %266 = vector.broadcast %265 : vector<1x1024xi1> to vector<32x1024xi1>
    %267 = vector.broadcast %264 : bf16 to vector<32x1024xbf16>
    %268 = arith.select %266, %263, %267 : vector<32x1024xi1>, vector<32x1024xbf16>
    %269 = vector.extract_strided_slice %255 {offsets = [0, 32], sizes = [32, 1024], strides = [1, 1]} : vector<32x1090xbf16> to vector<32x1024xbf16>
    %cst_69 = arith.constant 0.000000e+00 : f32
    %270 = arith.truncf %cst_69 : f32 to bf16
    %271 = vector.shape_cast %18 : vector<1x1024xi1> to vector<1x1024xi1>
    %272 = vector.broadcast %271 : vector<1x1024xi1> to vector<32x1024xi1>
    %273 = vector.broadcast %270 : bf16 to vector<32x1024xbf16>
    %274 = arith.select %272, %269, %273 : vector<32x1024xi1>, vector<32x1024xbf16>
    %275 = vector.extract_strided_slice %255 {offsets = [0, 33], sizes = [32, 1024], strides = [1, 1]} : vector<32x1090xbf16> to vector<32x1024xbf16>
    %276 = vector.extract_strided_slice %255 {offsets = [0, 34], sizes = [32, 1024], strides = [1, 1]} : vector<32x1090xbf16> to vector<32x1024xbf16>
    %cst_70 = arith.constant 0.000000e+00 : f32
    %277 = arith.truncf %cst_70 : f32 to bf16
    %278 = vector.shape_cast %20 : vector<1x1024xi1> to vector<1x1024xi1>
    %279 = vector.broadcast %278 : vector<1x1024xi1> to vector<32x1024xi1>
    %280 = vector.broadcast %277 : bf16 to vector<32x1024xbf16>
    %281 = arith.select %279, %276, %280 : vector<32x1024xi1>, vector<32x1024xbf16>
    %282 = vector.extract_strided_slice %255 {offsets = [0, 64], sizes = [32, 1024], strides = [1, 1]} : vector<32x1090xbf16> to vector<32x1024xbf16>
    %cst_71 = arith.constant 0.000000e+00 : f32
    %283 = arith.truncf %cst_71 : f32 to bf16
    %284 = vector.shape_cast %18 : vector<1x1024xi1> to vector<1x1024xi1>
    %285 = vector.broadcast %284 : vector<1x1024xi1> to vector<32x1024xi1>
    %286 = vector.broadcast %283 : bf16 to vector<32x1024xbf16>
    %287 = arith.select %285, %282, %286 : vector<32x1024xi1>, vector<32x1024xbf16>
    %288 = vector.extract_strided_slice %255 {offsets = [0, 65], sizes = [32, 1024], strides = [1, 1]} : vector<32x1090xbf16> to vector<32x1024xbf16>
    %289 = vector.extract_strided_slice %255 {offsets = [0, 66], sizes = [32, 1024], strides = [1, 1]} : vector<32x1090xbf16> to vector<32x1024xbf16>
    %cst_72 = arith.constant 0.000000e+00 : f32
    %290 = arith.truncf %cst_72 : f32 to bf16
    %291 = vector.shape_cast %20 : vector<1x1024xi1> to vector<1x1024xi1>
    %292 = vector.broadcast %291 : vector<1x1024xi1> to vector<32x1024xi1>
    %293 = vector.broadcast %290 : bf16 to vector<32x1024xbf16>
    %294 = arith.select %292, %289, %293 : vector<32x1024xi1>, vector<32x1024xbf16>
    %295 = tpu.concatenate %261, %262, %268, %274, %275, %281, %287, %288, %294 in 0 : vector<32x1024xbf16>, vector<32x1024xbf16>, vector<32x1024xbf16>, vector<32x1024xbf16>, vector<32x1024xbf16>, vector<32x1024xbf16>, vector<32x1024xbf16>, vector<32x1024xbf16>, vector<32x1024xbf16> -> vector<288x1024xbf16>
    %cst_73 = arith.constant dense<0.000000e+00> : vector<16x1024xf32>
    %296 = tpu.matmul %253, %295, %cst_73 {dimension_numbers = #tpu.dot_dimension_numbers<[1], [0], [0], [1], [0, 0, 1, 1], [], []>} : vector<16x288xbf16>, vector<288x1024xbf16>, vector<16x1024xf32> -> vector<16x1024xf32>
    %c0_74 = arith.constant 0 : index
    %c0_75 = arith.constant 0 : index
    %297 = vector.load %arg11[%c0_74, %c0_75] : memref<16x1xf32, #tpu.memory_space<vmem>>, vector<16x1xf32>
    %298 = vector.broadcast %297 : vector<16x1xf32> to vector<16x1024xf32>
    %299 = arith.addf %296, %298 : vector<16x1024xf32>
    %300 = vector.extract_strided_slice %299 {offsets = [0, 0], sizes = [8, 1024], strides = [1, 1]} : vector<16x1024xf32> to vector<8x1024xf32>
    %301 = vector.extract_strided_slice %299 {offsets = [8, 0], sizes = [8, 1024], strides = [1, 1]} : vector<16x1024xf32> to vector<8x1024xf32>
    %cst_76 = arith.constant dense<0.000000e+00> : vector<8xf32>
    %302 = vector.multi_reduction <add>, %248, %cst_76 [1] : vector<8x1024xf32> to vector<8xf32>
    %303 = vector.shape_cast %302 : vector<8xf32> to vector<8x1xf32>
    %cst_77 = arith.constant 1.024000e+03 : f32
    %304 = vector.broadcast %cst_77 : f32 to vector<8x1xf32>
    %305 = arith.divf %303, %304 : vector<8x1xf32>
    %306 = vector.broadcast %305 : vector<8x1xf32> to vector<8x1024xf32>
    %307 = arith.subf %248, %306 : vector<8x1024xf32>
    %308 = arith.mulf %307, %307 : vector<8x1024xf32>
    %cst_78 = arith.constant dense<0.000000e+00> : vector<8xf32>
    %309 = vector.multi_reduction <add>, %308, %cst_78 [1] : vector<8x1024xf32> to vector<8xf32>
    %310 = vector.shape_cast %309 : vector<8xf32> to vector<8x1xf32>
    %cst_79 = arith.constant 1.024000e+03 : f32
    %311 = vector.broadcast %cst_79 : f32 to vector<8x1xf32>
    %312 = arith.divf %310, %311 : vector<8x1xf32>
    %313 = vector.broadcast %305 : vector<8x1xf32> to vector<8x1024xf32>
    %314 = arith.subf %248, %313 : vector<8x1024xf32>
    %cst_80 = arith.constant 9.99999974E-6 : f32
    %315 = vector.broadcast %cst_80 : f32 to vector<8x1xf32>
    %316 = arith.addf %312, %315 : vector<8x1xf32>
    %317 = math.rsqrt %316 : vector<8x1xf32>
    %318 = vector.broadcast %317 : vector<8x1xf32> to vector<8x1024xf32>
    %319 = arith.mulf %314, %318 : vector<8x1024xf32>
    %cst_81 = arith.constant 1.000000e+00 : f32
    %320 = vector.broadcast %cst_81 : f32 to vector<8x1024xf32>
    %321 = arith.addf %320, %300 : vector<8x1024xf32>
    %322 = arith.mulf %319, %321 : vector<8x1024xf32>
    %323 = arith.addf %322, %301 : vector<8x1024xf32>
    %cst_82 = arith.constant 0.000000e+00 : f32
    %324 = vector.broadcast %cst_82 : f32 to vector<8x1024xf32>
    %325 = arith.cmpf ogt, %323, %324 : vector<8x1024xf32>
    %cst_83 = arith.constant 0.00999999977 : f32
    %326 = vector.broadcast %cst_83 : f32 to vector<8x1024xf32>
    %327 = arith.mulf %326, %323 : vector<8x1024xf32>
    %328 = arith.select %325, %323, %327 : vector<8x1024xi1>, vector<8x1024xf32>
    %c0_84 = arith.constant 0 : index
    %c0_85 = arith.constant 0 : index
    %c0_86 = arith.constant 0 : index
    %329 = vector.load %arg12[%c0_84, %c0_85, %c0_86] : memref<1x8x1024xf32, #tpu.memory_space<vmem>>, vector<1x8x1024xf32>
    %330 = vector.shape_cast %329 : vector<1x8x1024xf32> to vector<8x1024xf32>
    %331 = vector.shape_cast %328 : vector<8x1024xf32> to vector<1x8x1024xf32>
    tpu.vector_store %arg12[%c0_84, %c0_85, %c0_86], %331 {strides = array<i32>} : memref<1x8x1024xf32, #tpu.memory_space<vmem>>, vector<1x8x1024xf32>,
    return
  }
  func.func @transform_0(%arg0: i32) -> (i32, i32, i32) {
    %c0_i32 = arith.constant 0 : i32
    %c0_i32_0 = arith.constant 0 : i32
    %c0_i32_1 = arith.constant 0 : i32
    return %arg0, %c0_i32, %c0_i32_0 : i32, i32, i32
  }
  func.func @transform_1(%arg0: i32) -> (i32, i32, i32) {
    %c0_i32 = arith.constant 0 : i32
    %c0_i32_0 = arith.constant 0 : i32
    %c0_i32_1 = arith.constant 0 : i32
    return %arg0, %c0_i32, %c0_i32_0 : i32, i32, i32
  }
  func.func @transform_2(%arg0: i32) -> (i32, i32, i32) {
    %c0_i32 = arith.constant 0 : i32
    %c0_i32_0 = arith.constant 0 : i32
    %c0_i32_1 = arith.constant 0 : i32
    return %arg0, %c0_i32, %c0_i32_0 : i32, i32, i32
  }
  func.func @transform_3(%arg0: i32) -> (i32, i32) {
    %c0_i32 = arith.constant 0 : i32
    %c0_i32_0 = arith.constant 0 : i32
    %c0_i32_1 = arith.constant 0 : i32
    return %c0_i32, %c0_i32_0 : i32, i32
  }
  func.func @transform_4(%arg0: i32) -> (i32, i32) {
    %c0_i32 = arith.constant 0 : i32
    %c0_i32_0 = arith.constant 0 : i32
    %c0_i32_1 = arith.constant 0 : i32
    return %c0_i32, %c0_i32_0 : i32, i32
  }
  func.func @transform_5(%arg0: i32) -> (i32, i32) {
    %c0_i32 = arith.constant 0 : i32
    %c0_i32_0 = arith.constant 0 : i32
    %c0_i32_1 = arith.constant 0 : i32
    return %c0_i32, %c0_i32_0 : i32, i32
  }
  func.func @transform_6(%arg0: i32) -> (i32, i32) {
    %c0_i32 = arith.constant 0 : i32
    %c0_i32_0 = arith.constant 0 : i32
    %c0_i32_1 = arith.constant 0 : i32
    return %c0_i32, %c0_i32_0 : i32, i32
  }
  func.func @transform_7(%arg0: i32) -> (i32, i32) {
    %c0_i32 = arith.constant 0 : i32
    %c0_i32_0 = arith.constant 0 : i32
    %c0_i32_1 = arith.constant 0 : i32
    return %c0_i32, %c0_i32_0 : i32, i32
  }
  func.func @transform_8(%arg0: i32) -> (i32, i32) {
    %c0_i32 = arith.constant 0 : i32
    %c0_i32_0 = arith.constant 0 : i32
    %c0_i32_1 = arith.constant 0 : i32
    return %c0_i32, %c0_i32_0 : i32, i32
  }
  func.func @transform_9(%arg0: i32) -> (i32, i32) {
    %c0_i32 = arith.constant 0 : i32
    %c0_i32_0 = arith.constant 0 : i32
    %c0_i32_1 = arith.constant 0 : i32
    return %c0_i32, %c0_i32_0 : i32, i32
  }
  func.func @transform_10(%arg0: i32) -> (i32, i32) {
    %c0_i32 = arith.constant 0 : i32
    %c0_i32_0 = arith.constant 0 : i32
    %c0_i32_1 = arith.constant 0 : i32
    return %c0_i32, %c0_i32_0 : i32, i32
  }
  func.func @transform_11(%arg0: i32) -> (i32, i32, i32) {
    %c0_i32 = arith.constant 0 : i32
    %c0_i32_0 = arith.constant 0 : i32
    %c0_i32_1 = arith.constant 0 : i32
    return %arg0, %c0_i32, %c0_i32_0 : i32, i32, i32
  }
}

</mosaic_0001>

<bundles_post_ra>
// kernel: decoder_block_forward.1
= control target key start
LH: loop header
LB: loop body
LE: loop exit
PB: predicated region body
PF: predicated region fallthrough
CT: control target
= control target key end

     0   :  { %s6284_s17 = smov 0   ;;  %s11232_s0 = inlined_call_operand.vmem [shape: bf16[2,8,1024], index: 0, kind: input, shape index: {}]   ;;  %s11233_s1 = inlined_call_operand.vmem [shape: bf16[2,2,1024], index: 1, kind: input, shape index: {}]   ;;  %s11234_s2 = inlined_call_operand.vmem [shape: f32[2,8,1024], index: 2, kind: input, shape index: {}]   ;;  %s11235_s3 = inlined_call_operand.vmem [shape: bf16[40,90], index: 3, kind: input, shape index: {}]   ;;  %s11236_s4 = inlined_call_operand.vmem [shape: f32[40,1], index: 4, kind: input, shape index: {}]   ;;  %s11237_s5 = inlined_call_operand.vmem [shape: bf16[16,288], index: 5, kind: input, shape index: {}]   ;;  %s11238_s6 = inlined_call_operand.vmem [shape: f32[16,1], index: 6, kind: input, shape index: {}]   ;;  %s11239_s7 = inlined_call_operand.vmem [shape: bf16[40,90], index: 7, kind: input, shape index: {}]   ;;  %s11240_s8 = inlined_call_operand.vmem [shape: f32[40,1], index: 8, kind: input, shape index: {}]   ;;  %s11241_s9 = inlined_call_operand.vmem [shape: bf16[16,288], index: 9, kind: input, shape index: {}]   ;;  %s11242_s10 = inlined_call_operand.vmem [shape: f32[16,1], index: 10, kind: input, shape index: {}]   ;;  %s11243_s11 = inlined_call_operand.vmem [shape: f32[2,8,1024], index: 11, kind: output, shape index: {}]  }
   0x1 LB: > { %s5991_s18 = sadd.s32 4294967295, %s6207_s17   ;;  %p5995_p0 = scmp.ge.s32.totalorder %s6207_s17, 1  ;;  %s6207_s17 = sphi %s6284_s17, %s21_s17  }
   0x2   : > { %p356_p1 = scmp.lt.s32.totalorder %s6207_s17, 3 }
   0x4   : > { %p357_p2 = pnand %p5995_p0, %p356_p1 }
   0x6   : > { %360 = sbr.rel (%p357_p2) target bundleno = 3068 (0xbfc), region = 64 }
   0xd   : > { %p405_p3 = scmp.lt.s32.totalorder %s5991_s18, 1  ;;  %v427_v0 = vlaneseq  ;;  %v11246_v1 = vmov 0   ;;  %s6210_s23 = smov 33   ;;  %v6211_v22 = vmov 1966171168  }
   0xe   : > { %2130 = vmatprep.mubr.bf16.mxu0 %v11246_v1  ;;  %2191 = vmatprep.mubr.bf16.mxu1 %v11246_v1  ;;  %v552_v23 = vunpack.c.l.s4 %v6211_v22  ;;  %s6212_s25 = smov 32   ;;  %s6213_s29 = smov 2  }
   0xf   : > { %s12289_s18 = smov (!%p405_p3, %s5991_s18), 1  ;;  %v6296_v2 = vand.u32 127, %v427_v0  ;;  %6172 = vset.pattern.permute.xlu1 %v11246_v1  ;;  %6171 = vset.pattern.permute.xlu0 %v11246_v1  ;;  %v555_v3 = vshrl.u32 %v427_v0, 7  ;;  %s6214_s30 = smov 34  }
  0x10   : > { %s6081_s19 = sshll.u32 %s12289_s18, 5  ;;  %s5998_s24 = sshll.u32 %s12289_s18, 3  ;;  %v553_v31 = vunpack.c.0.s8 %v552_v23 }
  0x11   : > { %v429_v4 = vadd.s32 128, %v6296_v2  ;;  %v440_v5 = vand.u32 31, %v6296_v2  ;;  %v430_v6 = vadd.s32 256, %v6296_v2  ;;  %s6307_s22 = scalar_lea.vmem %s11232_s0, %s6081_s19  ;;  %v431_v7 = vadd.s32 384, %v6296_v2  ;;  %s413_s28 = scalar_lea.vmem %s11233_s1, %s5998_s24 }
  0x12   : > { %v6311_v8 = vld [vmem:[%s6307_s22 + $0x8] sm:$0xff]  ;;  %v1428_v9 = vld [vmem:[%s6307_s22] sm:$0xff]  ;;  %v6320_v15 = vsub.s32 0, %v555_v3  ;;  %v6338_v21 = vsub.s32 4, %v555_v3  ;;  %v434_v33 = vadd.s32 768, %v6296_v2  ;;  %v435_v34 = vadd.s32 896, %v6296_v2 }
  0x13   : > { %v447_v10 = vand.u32 31, %v429_v4  ;;  %vm6314_vm0 = vcmp.ge.s32.totalorder %v440_v5, 1  ;;  %v454_v12 = vand.u32 31, %v430_v6  ;;  %v6005_v13 = vcombine.low %v6311_v8, %v6311_v8  ;;  %v6393_v39 = vld [vmem:[%s413_s28] sm:$0xff]  ;;  %s6215_s12 = smov 64   ;;  %s6216_s13 = smov 66  }
  0x14   : > { %v6003_v14 = vcombine.low %v1428_v9, %v1428_v9  ;;  %vm6322_vm1 = vcmp.lt.s32.totalorder %v440_v5, 31  ;;  %v461_v17 = vand.u32 31, %v431_v7  ;;  %v6004_v20 = vcombine.high %v1428_v9, %v1428_v9  ;;  %v1430_v58 = vld [vmem:[%s6307_s22 + $0x10] sm:$0xff]  ;;  %v1431_v61 = vld [vmem:[%s6307_s22 + $0x18] sm:$0xff]  ;;  %s6217_s14 = smov 95   ;;  %s6218_s15 = smov 127  }
  0x15   : > { %vm533_vm2 = vcmp.ge.s32.totalorder %v447_v10, 1  ;;  %vm6326_vm3 = vcmp.ge.s32.totalorder %v454_v12, 1  ;;  %vm6330_vm4 = vcmp.lt.s32.totalorder %v447_v10, 31  ;;  %1456 = vrot.lane.b32.xlu1 %v6005_v13, %s6210_s23  ;;  %vm6350_vm9 = vcmp.lt.s32.totalorder %v454_v12, 31  ;;  %s6219_s16 = smov 126   ;;  %s6220_s19 = smov 96  }
  0x16   : > { %1452 = vrot.lane.b32.xlu0 %v6003_v14, %s6210_s23  ;;  %vm654_vm5 = vmpackc.low %vm533_vm2, %vm6314_vm0  ;;  %vm535_vm6 = vcmp.ge.s32.totalorder %v461_v17, 1  ;;  %vm6358_vm10 = vcmp.lt.s32.totalorder %v461_v17, 31  ;;  %v6388_v37 = vsub.s32 %v553_v31, %v555_v3  ;;  %v482_v40 = vand.u32 31, %v434_v33  ;;  %s6221_s20 = smov 94   ;;  %s6222_s21 = smov 63  }
  0x17   : > { %v658_v24 = vsel %vm654_vm5, 65537, %v11246_v1  ;;  %vm726_vm7 = vmpackc.low %vm6330_vm4, %vm6322_vm1  ;;  %v489_v41 = vand.u32 31, %v435_v34  ;;  %v432_v53 = vadd.s32 512, %v6296_v2  ;;  %v433_v54 = vadd.s32 640, %v6296_v2  ;;  %s6223_s24 = smov 62   ;;  %s6082_s26 = sshll.u32 %s12289_s18, 6 }
  0x18   : > { %v6346_v25 = vrot.slane %v658_v24, %v6320_v15  ;;  %vm655_vm8 = vmpackc.low %vm535_vm6, %vm6326_vm3  ;;  %v6370_v30 = vrot.slane %v658_v24, %v6338_v21  ;;  %v730_v32 = vsel %vm726_vm7, 65537, %v11246_v1  ;;  %vm538_vm12 = vcmp.ge.s32.totalorder %v482_v40, 1  ;;  %s423_s28 = scalar_lea.vmem %s11243_s11, %s6082_s26 }
  0x19   : > { %v6356_v27 = vsel %vm655_vm8, 65537, %v11246_v1  ;;  %vm727_vm11 = vmpackc.low %vm6358_vm10, %vm6350_vm9  ;;  %v741_v35 = vrot.slane %v730_v32, %v6338_v21  ;;  %v737_v36 = vrot.slane %v730_v32, %v6320_v15  ;;  %vm539_vm13 = vcmp.ge.s32.totalorder %v489_v41, 1 }
  0x1a   : > { %11523 = vst [vmem:[#allocation2_spill] sm:$0xff] %v6346_v25  ;;  %808 = vrot.lane.b32.xlu1 %v6346_v25, %s6212_s25  ;;  %1454 = vrot.lane.b32.xlu0 %v6004_v20, %s6210_s23  ;;  %v6367_v29 = vrot.slane %v6356_v27, %v6320_v15  ;;  %11529 = vst [vmem:[#allocation4_spill] sm:$0xff] %v6370_v30  ;;  %v6391_v38 = vsel %vm727_vm11, 65537, %v11246_v1  ;;  %vm6395_vm14 = vcmp.lt.s32.totalorder %v482_v40, 31  ;;  %vm547_vm15 = vcmp.lt.s32.totalorder %v489_v41, 31 }
  0x1b   : > { %v745_v43 = vrot.slane %v6391_v38, %v6320_v15  ;;  %v557_v44 = vrot.slane %v6393_v39, %v6388_v37  ;;  %vm657_vm0 = vmpackc.low %vm539_vm13, %vm538_vm12  ;;  %v468_v55 = vand.u32 31, %v432_v53  ;;  %v475_v56 = vand.u32 31, %v433_v54 }
  0x1c   : > { %11528 = vst [vmem:[#allocation3_spill] sm:$0xff] %v6367_v29  ;;  %v661_v45 = vsel %vm657_vm0, 65537, %v11246_v1  ;;  %vm729_vm1 = vmpackc.low %vm547_vm15, %vm6395_vm14  ;;  %v6006_v57 = vcombine.high %v6311_v8, %v6311_v8  ;;  %v6008_v59 = vcombine.high %v1430_v58, %v1430_v58  ;;  %v6007_v60 = vcombine.low %v1430_v58, %v1430_v58 }
  0x1d   : > { %v6407_v46 = vrot.slane %v661_v45, %v6338_v21  ;;  %v565_v47 = vcombine.high %v557_v44, %v557_v44  ;;  %v733_v48 = vsel %vm729_vm1, 65537, %v11246_v1  ;;  %v573_v51 = vrot.slane %v557_v44, %v6388_v37 }
  0x1e   : > { %812 = vrot.lane.b32.xlu1 %v6367_v29, %s6212_s25  ;;  %810 = vrot.lane.b32.xlu0 %v6370_v30, %s6212_s25  ;;  %v6415_v49 = vrot.slane %v733_v48, %v6338_v21  ;;  %vm536_vm2 = vcmp.ge.s32.totalorder %v468_v55, 1  ;;  %vm537_vm3 = vcmp.ge.s32.totalorder %v475_v56, 1  ;;  %v6444_v62 = vrot.slane %v6356_v27, %v6338_v21 }
  0x1f   : > { %11532 = vst [vmem:[#allocation5_spill] sm:$0xff] %v6407_v46  ;;  %v587_v50 = vrot.slane %v565_v47, %v6388_v37  ;;  %v595_v52 = vcombine.high %v573_v51, %v573_v51  ;;  %vm656_vm4 = vmpackc.low %vm537_vm3, %vm536_vm2  ;;  %v6009_v63 = vcombine.low %v1431_v61, %v1431_v61  ;;  %vm544_vm5 = vcmp.lt.s32.totalorder %v468_v55, 31 }
  0x20   : > { %11533 = vst [vmem:[#allocation6_spill] sm:$0xff] %v6444_v62  ;;  %v660_v0 = vsel %vm656_vm4, 65537, %v11246_v1  ;;  %vm545_vm6 = vcmp.lt.s32.totalorder %v475_v56, 31  ;;  %v749_v4 = vrot.slane %v6391_v38, %v6338_v21  ;;  %v6463_v5 = vrot.slane %v661_v45, %v6320_v15 }
  0x21   : > { %v6451_v2 = vrot.slane %v660_v0, %v6338_v21  ;;  %v6454_v3 = vrot.slane %v660_v0, %v6320_v15  ;;  %vm728_vm7 = vmpackc.low %vm545_vm6, %vm544_vm5  ;;  %v761_v9 = vrot.slane %v733_v48, %v6320_v15  ;;  %v550_v10 = vcombine.high %v6393_v39, %v6393_v39 }
  0x22   : > { %768 = vrot.lane.b32.xlu1 %v741_v35, %s6213_s29  ;;  %766 = vrot.lane.b32.xlu0 %v737_v36, %s6213_s29  ;;  %11536 = vst [vmem:[#allocation9_spill] sm:$0xff] %v6463_v5  ;;  %v732_v6 = vsel %vm728_vm7, 65537, %v11246_v1  ;;  %v597_v11 = vcombine.high %v587_v50, %v587_v50  ;;  %vm11306_vm8 = vcmask 269312   ;;  %vm11291_vm9 = vcmask 15360  }
  0x23   : > { %11534 = vst [vmem:[#allocation7_spill] sm:$0xff] %v6451_v2  ;;  %11535 = vst [vmem:[#allocation8_spill] sm:$0xff] %v6454_v3  ;;  %v757_v7 = vrot.slane %v732_v6, %v6338_v21  ;;  %v753_v8 = vrot.slane %v732_v6, %v6320_v15  ;;  %v564_v12 = vrot.slane %v550_v10, %v6388_v37  ;;  %vm11292_vm13 = vcmask 261120  }
  0x24   : > { %vm11317_vm1 = vcmask 277504   ;;  %vm908_vm5 = vcmask 523264  }
  0x25   : > { %v580_v13 = vrot.slane %v564_v12, %v6388_v37  ;;  %v566_v14 = vcombine.high %v564_v12, %v564_v12 }
  0x26   : > { %850 = vrot.lane.b32.xlu1 %v737_v36, %s6214_s30  ;;  %770 = vrot.lane.b32.xlu0 %v745_v43, %s6213_s29 }
  0x27   : > { %v6485_v15 = vrot.slane %v566_v14, %v6388_v37  ;;  %v596_v16 = vcombine.high %v580_v13, %v580_v13 }
  0x2a   : > { %854 = vrot.lane.b32.xlu1 %v745_v43, %s6214_s30  ;;  %852 = vrot.lane.b32.xlu0 %v741_v35, %s6214_s30 }
  0x2e   : > { %601 = vrot.lane.b32.xlu1 %v587_v50, %s6210_s23  ;;  %599 = vrot.lane.b32.xlu0 %v573_v51, %s6210_s23 }
  0x32   : > { %892 = vrot.lane.b32.xlu1 %v6346_v25, %s6215_s12  ;;  %603 = vrot.lane.b32.xlu0 %v595_v52, %s6210_s23 }
  0x36   : > { %896 = vrot.lane.b32.xlu1 %v6367_v29, %s6215_s12  ;;  %894 = vrot.lane.b32.xlu0 %v6370_v30, %s6215_s12 }
  0x3a   : > { %936 = vrot.lane.b32.xlu1 %v741_v35, %s6216_s13  ;;  %934 = vrot.lane.b32.xlu0 %v737_v36, %s6216_s13 }
  0x3e   : > { %1458 = vrot.lane.b32.xlu1 %v6006_v57, %s6210_s23  ;;  %938 = vrot.lane.b32.xlu0 %v745_v43, %s6216_s13 }
  0x42   : > { %1462 = vrot.lane.b32.xlu1 %v6008_v59, %s6210_s23  ;;  %1460 = vrot.lane.b32.xlu0 %v6007_v60, %s6210_s23 }
  0x46   : > { %814 = vrot.lane.b32.xlu1 %v6444_v62, %s6212_s25  ;;  %1464 = vrot.lane.b32.xlu0 %v6009_v63, %s6210_s23 }
  0x4a   : > { %818 = vrot.lane.b32.xlu1 %v6451_v2, %s6212_s25  ;;  %816 = vrot.lane.b32.xlu0 %v6454_v3, %s6212_s25 }
  0x4e   : > { %772 = vrot.lane.b32.xlu1 %v749_v4, %s6213_s29  ;;  %820 = vrot.lane.b32.xlu0 %v6463_v5, %s6212_s25 }
  0x52   : > { %776 = vrot.lane.b32.xlu1 %v757_v7, %s6213_s29  ;;  %774 = vrot.lane.b32.xlu0 %v753_v8, %s6213_s29 }
  0x56   : > { %856 = vrot.lane.b32.xlu1 %v749_v4, %s6214_s30  ;;  %778 = vrot.lane.b32.xlu0 %v761_v9, %s6213_s29 }
  0x5a   : > { %605 = vrot.lane.b32.xlu1 %v597_v11, %s6210_s23  ;;  %858 = vrot.lane.b32.xlu0 %v753_v8, %s6214_s30 }
  0x5e   : > { %860 = vrot.lane.b32.xlu1 %v757_v7, %s6214_s30  ;;  %607 = vrot.lane.b32.xlu0 %v580_v13, %s6210_s23 }
  0x62   : > { %609 = vrot.lane.b32.xlu1 %v6485_v15, %s6210_s23  ;;  %862 = vrot.lane.b32.xlu0 %v761_v9, %s6214_s30 }
  0x66   : > { %898 = vrot.lane.b32.xlu1 %v6444_v62, %s6215_s12  ;;  %611 = vrot.lane.b32.xlu0 %v596_v16, %s6210_s23 }
  0x6a   : > { %902 = vrot.lane.b32.xlu1 %v6451_v2, %s6215_s12  ;;  %900 = vrot.lane.b32.xlu0 %v6454_v3, %s6215_s12 }
  0x6e   : > { %940 = vrot.lane.b32.xlu1 %v749_v4, %s6216_s13  ;;  %904 = vrot.lane.b32.xlu0 %v6463_v5, %s6215_s12 }
  0x72   : > { %944 = vrot.lane.b32.xlu1 %v757_v7, %s6216_s13  ;;  %942 = vrot.lane.b32.xlu0 %v753_v8, %s6216_s13 }
  0x76   : > { %946 = vrot.lane.b32.xlu0 %v761_v9, %s6216_s13 }
  0x87   : > { %v6503_v17 = vpop.permute.xlu1 %1456 }
  0x88   : > { %v1453_v18 = vpop.permute.xlu0 %1452 }
  0x89   : > { %v6523_v28 = vsel %vm11306_vm8, 0, %v1453_v18 }
  0x8a   : > { %v1543_v33 = vrot.slane %v6523_v28, 4 }
  0x8c   : > { %v6505_v19 = vpop.permute.xlu1 %808  ;;  %v1455_v20 = vpop.permute.xlu0 %1454 }
  0x8d   : > { %11537 = vst [vmem:[#allocation10_spill] sm:$0xff] %v6505_v19  ;;  %v6508_v21 = vsel %vm11306_vm8, %v1453_v18, %v1455_v20  ;;  %v6512_v22 = vsel %vm11306_vm8, %v1455_v20, %v6503_v17  ;;  %vm11288_vm11 = vcmp.ne.s16.totalorder %v6505_v19, 0 }
  0x8e   : > { %1661 = vrot.lane.b32.xlu0 %v6512_v22, %s6217_s14  ;;  %1659 = vrot.lane.b32.xlu1 %v6508_v21, %s6217_s14  ;;  %v1545_v26 = vrot.slane %v6512_v22, 4  ;;  %v1544_v27 = vrot.slane %v6508_v21, 4  ;;  %v1505_v52 = vsel %vm11288_vm11, %v6523_v28, 0 }
  0x8f   : > { %v1622_v57 = vrot.slane %v1505_v52, 4 }
  0x90   : > { %v6518_v23 = vpop.permute.xlu1 %812  ;;  %v811_v24 = vpop.permute.xlu0 %810 }
  0x91   : > { %v6587_v55 = vsel %vm11292_vm13, %v6505_v19, %v811_v24  ;;  %v6591_v56 = vsel %vm11292_vm13, %v811_v24, %v6518_v23 }
  0x92   : > { %1556 = vrot.lane.b32.xlu0 %v1545_v26, %s6218_s15  ;;  %1554 = vrot.lane.b32.xlu1 %v1544_v27, %s6218_s15  ;;  %11544 = vst [vmem:[#allocation17_spill] sm:$0xff] %v6587_v55  ;;  %11545 = vst [vmem:[#allocation18_spill] sm:$0xff] %v6591_v56  ;;  %vm11251_vm15 = vcmp.ne.s16.totalorder %v6587_v55, 0  ;;  %vm11276_vm0 = vcmp.ne.s16.totalorder %v6591_v56, 0 }
  0x93   : > { %v1506_v6 = vsel %vm11251_vm15, %v6508_v21, 0  ;;  %v1507_v7 = vsel %vm11276_vm0, %v6512_v22, 0 }
  0x94   : > { %v769_v31 = vpop.permute.xlu1 %768  ;;  %v6531_v32 = vpop.permute.xlu0 %766  ;;  %v1623_v12 = vrot.slane %v1506_v6, 4  ;;  %v1624_v13 = vrot.slane %v1507_v7, 4 }
  0x95   : > { %11538 = vst [vmem:[#allocation11_spill] sm:$0xff] %v6531_v32  ;;  %vm11283_vm12 = vcmp.ne.s16.totalorder %v6531_v32, 0  ;;  %v6565_v47 = vsel %vm11291_vm9, %v6531_v32, %v769_v31 }
  0x96   : > { %1552 = vrot.lane.b32.xlu1 %v1543_v33, %s6218_s15  ;;  %11542 = vst [vmem:[#allocation15_spill] sm:$0xff] %v6565_v47  ;;  %v1496_v51 = vsel %vm11283_vm12, %v6523_v28, 0  ;;  %vm11252_vm14 = vcmp.ne.s16.totalorder %v6565_v47, 0 }
  0x97   : > { %v1497_v59 = vsel %vm11252_vm14, %v6508_v21, 0 }
  0x98   : > { %v6537_v34 = vpop.permute.xlu1 %850  ;;  %v6539_v35 = vpop.permute.xlu0 %770 }
  0x99   : > { %11539 = vst [vmem:[#allocation12_spill] sm:$0xff] %v6537_v34  ;;  %v6543_v36 = vsel %vm11291_vm9, %v769_v31, %v6539_v35  ;;  %vm11282_vm4 = vcmp.ne.s16.totalorder %v6537_v34, 0 }
  0x9a   : > { %11540 = vst [vmem:[#allocation13_spill] sm:$0xff] %v6543_v36  ;;  %vm11280_vm10 = vcmp.ne.s16.totalorder %v6543_v36, 0 }
  0x9b   : > { %v1498_v37 = vsel %vm11280_vm10, %v6512_v22, 0 }
  0x9c   : > { %v6549_v38 = vpop.permute.xlu1 %854  ;;  %1591 = vrot.lane.b32.xlu1 %v1498_v37, %s6219_s16  ;;  %v853_v39 = vpop.permute.xlu0 %852 }
  0x9d   : > { %v6625_v10 = vsel %vm11317_vm1, %v6537_v34, %v853_v39  ;;  %v6629_v11 = vsel %vm11317_vm1, %v853_v39, %v6549_v38 }
  0x9e   : > { %11547 = vst [vmem:[#allocation20_spill] sm:$0xff] %v6625_v10  ;;  %11548 = vst [vmem:[#allocation21_spill] sm:$0xff] %v6629_v11  ;;  %vm11244_vm2 = vcmp.ne.s16.totalorder %v6625_v10, 0  ;;  %vm11270_vm3 = vcmp.ne.s16.totalorder %v6629_v11, 0 }
  0x9f   : > { %v1515_v37 = vsel %vm11244_vm2, %v6508_v21, 0  ;;  %v1516_v39 = vsel %vm11270_vm3, %v6512_v22, 0 }
  0xa0   : > { %v602_v40 = vpop.permute.xlu1 %601  ;;  %v600_v41 = vpop.permute.xlu0 %599 }
  0xa1   : > { %v6553_v42 = vsel %vm11306_vm8, 0, %v600_v41  ;;  %v6594_v58 = vsel %vm11306_vm8, %v600_v41, %v602_v40 }
  0xa2   : > { %v978_v43 = vrot.slane %v6553_v42, 7  ;;  %v799_v60 = vsel %vm11283_vm12, %v6553_v42, 0  ;;  %v979_v0 = vrot.slane %v6594_v58, 7  ;;  %v800_v14 = vsel %vm11252_vm14, %v6594_v58, 0 }
  0xa3   : > { %v1023_v4 = vrot.slane %v799_v60, 6  ;;  %v1024_v24 = vrot.slane %v800_v14, 6  ;;  %v842_v52 = vsel %vm11251_vm15, %v6594_v58, 0 }
  0xa4   : > { %v6558_v44 = vpop.permute.xlu1 %892  ;;  %987 = vrot.lane.b32.xlu0 %v978_v43, %s6218_s15  ;;  %v6561_v45 = vpop.permute.xlu0 %603  ;;  %v1693_v43 = vrot.slane %v1515_v37, 4  ;;  %v1069_v60 = vrot.slane %v842_v52, 5  ;;  %v1104_v37 = vrot.slane %v6553_v42, 4 }
  0xa5   : > { %11541 = vst [vmem:[#allocation14_spill] sm:$0xff] %v6558_v44  ;;  %v6569_v48 = vsel %vm11306_vm8, %v602_v40, %v6561_v45 }
  0xa6   : > { %11543 = vst [vmem:[#allocation16_spill] sm:$0xff] %v6569_v48  ;;  %v980_v50 = vrot.slane %v6569_v48, 7  ;;  %v801_v16 = vsel %vm11280_vm10, %v6569_v48, 0  ;;  %vm1360_vm10 = vcmask 1043456  }
  0xa7   : > { %v1025_v31 = vrot.slane %v801_v16, 6  ;;  %v1105_v16 = vrot.slane %v6594_v58, 4 }
  0xa8   : > { %v6579_v53 = vpop.permute.xlu1 %896  ;;  %1587 = vrot.lane.b32.xlu0 %v1496_v51, %s6219_s16  ;;  %991 = vrot.lane.b32.xlu1 %v980_v50, %s6218_s15  ;;  %v6583_v54 = vpop.permute.xlu0 %894  ;;  %v1694_v50 = vrot.slane %v1516_v39, 4  ;;  %v843_v51 = vsel %vm11276_vm0, %v6569_v48, 0  ;;  %v1106_v39 = vrot.slane %v6569_v48, 4  ;;  %vm11353_vm0 = vcmp.ne.s16.totalorder %v6370_v30, 0 }
  0xa9   : > { %v1489_v36 = vsel %vm11353_vm0, %v6508_v21, 0 }
  0xac   : > { %v6604_v61 = vpop.permute.xlu1 %936  ;;  %1589 = vrot.lane.b32.xlu0 %v1497_v59, %s6219_s16  ;;  %1631 = vrot.lane.b32.xlu1 %v1622_v57, %s6220_s19  ;;  %v6608_v63 = vpop.permute.xlu0 %934  ;;  %v1070_v59 = vrot.slane %v843_v51, 5 }
  0xad   : > { %11546 = vst [vmem:[#allocation19_spill] sm:$0xff] %v6608_v63  ;;  %vm11271_vm15 = vcmp.ne.s16.totalorder %v6608_v63, 0 }
  0xb0   : > { %v6617_v8 = vpop.permute.xlu1 %1458  ;;  %989 = vrot.lane.b32.xlu0 %v979_v0, %s6218_s15  ;;  %1032 = vrot.lane.b32.xlu1 %v1023_v4, %s6219_s16  ;;  %v6621_v9 = vpop.permute.xlu0 %938  ;;  %v1514_v0 = vsel %vm11282_vm4, %v6523_v28, 0 }
  0xb1   : > { %v1692_v7 = vrot.slane %v1514_v0, 4 }
  0xb4   : > { %v6639_v18 = vpop.permute.xlu1 %1462  ;;  %1633 = vrot.lane.b32.xlu0 %v1623_v12, %s6220_s19  ;;  %1635 = vrot.lane.b32.xlu1 %v1624_v13, %s6220_s19  ;;  %v6643_v20 = vpop.permute.xlu0 %1460  ;;  %v841_v12 = vsel %vm11288_vm11, %v6553_v42, 0  ;;  %vm11356_vm11 = vcmp.ne.s16.totalorder %v6346_v25, 0 }
  0xb5   : > { %v702_v30 = vsel %vm11356_vm11, %v6553_v42, 0 }
  0xb8   : > { %1034 = vrot.lane.b32.xlu1 %v1024_v24, %s6219_s16  ;;  %1036 = vrot.lane.b32.xlu0 %v1025_v31, %s6219_s16  ;;  %v6653_v40 = vpop.permute.xlu0 %1464  ;;  %v6655_v41 = vpop.permute.xlu1 %814  ;;  %v1068_v24 = vrot.slane %v841_v12, 5  ;;  %v6693_v31 = vsel %vm908_vm5, %v6558_v44, %v6583_v54 }
  0xb9   : > { %11549 = vst [vmem:[#allocation22_spill] sm:$0xff] %v6653_v40  ;;  %11551 = vst [vmem:[#allocation24_spill] sm:$0xff] %v6693_v31  ;;  %vm11245_vm6 = vcmp.ne.s16.totalorder %v6693_v31, 0 }
  0xba   : > { %v926_v12 = vsel %vm11245_vm6, %v6594_v58, 0 }
  0xbc   : > { %1703 = vrot.lane.b32.xlu1 %v1693_v43, %s6221_s20  ;;  %1705 = vrot.lane.b32.xlu0 %v1694_v50, %s6221_s20  ;;  %v6666_v57 = vpop.permute.xlu0 %816  ;;  %v6671_v4 = vpop.permute.xlu1 %818  ;;  %v885_v43 = vsel %vm11270_vm3, %v6569_v48, 0  ;;  %v884_v50 = vsel %vm11244_vm2, %v6594_v58, 0  ;;  %vm11279_vm2 = vcmp.ne.s16.totalorder %v6558_v44, 0 }
  0xbd   : > { %v1150_v0 = vrot.slane %v884_v50, 3  ;;  %v1524_v50 = vsel %vm11245_vm6, %v6508_v21, 0  ;;  %vm11363_vm6 = vcmask 539648   ;;  %v6905_v11 = vsel %vm11292_vm13, %v6666_v57, %v6671_v4 }
  0xbe   : > { %11563 = vst [vmem:[#allocation36_spill] sm:$0xff] %v6905_v11 }
  0xc0   : > { %1081 = vrot.lane.b32.xlu1 %v1070_v59, %s6220_s19  ;;  %1079 = vrot.lane.b32.xlu0 %v1069_v60, %s6220_s19  ;;  %v6675_v6 = vpop.permute.xlu0 %820  ;;  %v6683_v13 = vpop.permute.xlu1 %772  ;;  %v6713_v59 = vsel %vm908_vm5, %v6583_v54, %v6579_v53  ;;  %v1151_v60 = vrot.slane %v885_v43, 3 }
  0xc1   : > { %11550 = vst [vmem:[#allocation23_spill] sm:$0xff] %v6675_v6  ;;  %11553 = vst [vmem:[#allocation26_spill] sm:$0xff] %v6713_v59  ;;  %vm11248_vm7 = vcmp.ne.s16.totalorder %v6713_v59, 0  ;;  %v967_v59 = vsel %vm11271_vm15, %v6553_v42, 0 }
  0xc4   : > { %1701 = vrot.lane.b32.xlu1 %v1692_v7, %s6221_s20  ;;  %1657 = vrot.lane.b32.xlu0 %v6523_v28, %s6217_s14  ;;  %v6685_v14 = vpop.permute.xlu0 %774  ;;  %v6704_v51 = vpop.permute.xlu1 %776  ;;  %v883_v7 = vsel %vm11282_vm4, %v6553_v42, 0  ;;  %vm11324_vm4 = vcmp.ne.s16.totalorder %v6905_v11, 0 }
  0xc8   : > { %1115 = vrot.lane.b32.xlu1 %v1105_v16, %s6217_s14  ;;  %1077 = vrot.lane.b32.xlu0 %v1068_v24, %s6220_s19  ;;  %v6706_v52 = vpop.permute.xlu0 %778  ;;  %v6724_v16 = vpop.permute.xlu1 %856  ;;  %v1149_v24 = vrot.slane %v883_v7, 3  ;;  %v1525_v7 = vsel %vm11248_vm7, %v6512_v22, 0 }
  0xc9   : > { %11552 = vst [vmem:[#allocation25_spill] sm:$0xff] %v6706_v52  ;;  %v6933_v44 = vsel %vm11291_vm9, %v6704_v51, %v6706_v52 }
  0xca   : > { %11566 = vst [vmem:[#allocation39_spill] sm:$0xff] %v6933_v44 }
  0xcc   : > { %1113 = vrot.lane.b32.xlu1 %v1104_v37, %s6217_s14  ;;  %1117 = vrot.lane.b32.xlu0 %v1106_v39, %s6217_s14  ;;  %v6726_v54 = vpop.permute.xlu0 %858  ;;  %v1195_v37 = vrot.slane %v926_v12, 2  ;;  %v927_v39 = vsel %vm11248_vm7, %v6569_v48, 0  ;;  %v925_v12 = vsel %vm11279_vm2, %v6553_v42, 0 }
  0xcd   : > { %v1196_v43 = vrot.slane %v927_v39, 2  ;;  %v1194_v39 = vrot.slane %v925_v12, 2  ;;  %v6785_v12 = vsel %vm11363_vm6, %v6604_v61, %v6621_v9 }
  0xce   : > { %11557 = vst [vmem:[#allocation30_spill] sm:$0xff] %v6785_v12  ;;  %vm11265_vm14 = vcmp.ne.s16.totalorder %v6785_v12, 0 }
  0xd0   : > { %1162 = vrot.lane.b32.xlu1 %v1151_v60, %s6221_s20  ;;  %1160 = vrot.lane.b32.xlu0 %v1150_v0, %s6221_s20  ;;  %v6737_v60 = vpop.permute.xlu1 %605  ;;  %v6739_v0 = vpop.permute.xlu0 %607 }
  0xd1   : > { %v6960_v32 = vsel %vm11306_vm8, %v6561_v45, %v6737_v60  ;;  %v6976_v45 = vsel %vm11306_vm8, %v6737_v60, %v6739_v0  ;;  %v6993_v60 = vsel %vm11317_vm1, %v6549_v38, %v6724_v16  ;;  %v7014_v38 = vsel %vm11317_vm1, %v6724_v16, %v6726_v54 }
  0xd2   : > { %11567 = vst [vmem:[#allocation40_spill] sm:$0xff] %v6993_v60  ;;  %11569 = vst [vmem:[#allocation42_spill] sm:$0xff] %v7014_v38  ;;  %v1107_v52 = vrot.slane %v6960_v32, 4 }
  0xd4   : > { %1158 = vrot.lane.b32.xlu0 %v1149_v24, %s6221_s20  ;;  %1205 = vrot.lane.b32.xlu1 %v1195_v37, %s6215_s12  ;;  %v6753_v24 = vpop.permute.xlu1 %860  ;;  %v6755_v37 = vpop.permute.xlu0 %862 }
  0xd5   : > { %11554 = vst [vmem:[#allocation27_spill] sm:$0xff] %v6755_v37 }
  0xd8   : > { %1207 = vrot.lane.b32.xlu0 %v1196_v43, %s6215_s12  ;;  %1738 = vrot.lane.b32.xlu1 %v1524_v50, %s6215_s12  ;;  %v1230_v43 = vrot.slane %v6594_v58, 1  ;;  %v1231_v50 = vrot.slane %v6569_v48, 1  ;;  %v6765_v1 = vpop.permute.xlu0 %611 }
  0xd9   : > { %11555 = vst [vmem:[#allocation28_spill] sm:$0xff] %v6765_v1 }
  0xdc   : > { %1740 = vrot.lane.b32.xlu0 %v1525_v7, %s6215_s12  ;;  %1764 = vrot.lane.b32.xlu1 %v1544_v27, %s6222_s21  ;;  %v6763_v7 = vpop.permute.xlu1 %609  ;;  %v6772_v27 = vsel %vm11363_vm6, %v6608_v63, %v6604_v61  ;;  %v1534_v61 = vsel %vm11265_vm14, %v6512_v22, 0  ;;  %v6910_v63 = vsel %vm11291_vm9, %v6685_v14, %v6704_v51 }
  0xdd   : > { %11556 = vst [vmem:[#allocation29_spill] sm:$0xff] %v6772_v27  ;;  %vm11264_vm7 = vcmp.ne.s16.totalorder %v6772_v27, 0  ;;  %v6837_v27 = vsel %vm11306_vm8, %v6643_v20, %v6639_v18  ;;  %11564 = vst [vmem:[#allocation37_spill] sm:$0xff] %v6910_v63  ;;  %vm11305_vm12 = vcmp.ne.s16.totalorder %v6910_v63, 0 }
  0xde   : > { %v1533_v31 = vsel %vm11264_vm7, %v6508_v21, 0  ;;  %v1510_v51 = vsel %vm11324_vm4, %v6837_v27, 0 }
  0xe0   : > { %1766 = vrot.lane.b32.xlu0 %v1545_v26, %s6222_s21  ;;  %1203 = vrot.lane.b32.xlu1 %v1194_v39, %s6215_s12  ;;  %v1523_v26 = vsel %vm11279_vm2, %v6523_v28, 0  ;;  %v6787_v39 = vpop.permute.xlu1 %898  ;;  %vm1005_vm2 = vcmask 1039360  }
  0xe4   : > { %1240 = vrot.lane.b32.xlu0 %v1230_v43, %s6222_s21  ;;  %1242 = vrot.lane.b32.xlu1 %v1231_v50, %s6222_s21  ;;  %v6789_v43 = vpop.permute.xlu0 %900  ;;  %v1229_v50 = vrot.slane %v6553_v42, 1 }
  0xe8   : > { %1736 = vrot.lane.b32.xlu0 %v1523_v26, %s6215_s12  ;;  %1762 = vrot.lane.b32.xlu1 %v1543_v33, %s6222_s21  ;;  %v1532_v33 = vsel %vm11271_vm15, %v6523_v28, 0  ;;  %v6805_v26 = vpop.permute.xlu1 %902  ;;  %v6807_v10 = vpop.permute.xlu0 %904 }
  0xe9   : > { %11558 = vst [vmem:[#allocation31_spill] sm:$0xff] %v6807_v10 }
  0xec   : > { %1238 = vrot.lane.b32.xlu0 %v1229_v50, %s6222_s21  ;;  %1799 = vrot.lane.b32.xlu1 %v1533_v31, %s6223_s24  ;;  %v6814_v31 = vsel %vm11306_vm8, %v6503_v17, %v6617_v8  ;;  %v968_v50 = vsel %vm11264_vm7, %v6594_v58, 0  ;;  %v6832_v17 = vsel %vm11306_vm8, %v6617_v8, %v6643_v20  ;;  %v6849_v8 = vsel %vm11292_vm13, %v6518_v23, %v6655_v41 }
  0xed   : > { %v11263_v55 = vrot.slane %v6814_v31, 4  ;;  %11559 = vst [vmem:[#allocation32_spill] sm:$0xff] %v6849_v8  ;;  %v6854_v20 = vsel %vm11291_vm9, %v6539_v35, %v6683_v13  ;;  %v11269_v12 = vrot.slane %v6832_v17, 4  ;;  %vm11316_vm7 = vcmp.ne.s16.totalorder %v6849_v8, 0 }
  0xee   : > { %11560 = vst [vmem:[#allocation33_spill] sm:$0xff] %v6854_v20  ;;  %v6878_v35 = vsel %vm11292_vm13, %v6655_v41, %v6666_v57 }
  0xef   : > { %11561 = vst [vmem:[#allocation34_spill] sm:$0xff] %v6878_v35  ;;  %vm11315_vm3 = vcmp.ne.s16.totalorder %v6878_v35, 0 }
  0xf0   : > { %1797 = vrot.lane.b32.xlu1 %v1532_v33, %s6223_s24  ;;  %1801 = vrot.lane.b32.xlu0 %v1534_v61, %s6223_s24  ;;  %v6824_v33 = vpop.permute.xlu1 %940  ;;  %v6826_v61 = vpop.permute.xlu0 %942 }
  0xf4   : > { %1276 = vrot.lane.b32.xlu1 %v968_v50, %s6223_s24  ;;  %1274 = vrot.lane.b32.xlu0 %v967_v59, %s6223_s24  ;;  %v969_v59 = vsel %vm11265_vm14, %v6569_v48, 0  ;;  %v11268_v50 = vrot.slane %v6837_v27, 4  ;;  %vm11295_vm14 = vcmp.ne.s16.totalorder %v6854_v20, 0  ;;  %v6865_v23 = vpop.permute.xlu1 %944 }
  0xf8   : > { %1558 = vrot.lane.b32.xlu1 %v11263_v55, %s6218_s15  ;;  %1278 = vrot.lane.b32.xlu0 %v969_v59, %s6223_s24  ;;  %v6861_v55 = vsel %vm11306_vm8, %v6639_v18, %v6653_v40  ;;  %v6867_v59 = vpop.permute.xlu0 %946  ;;  %v6883_v18 = vsel %vm11291_vm9, %v6683_v13, %v6685_v14 }
  0xf9   : > { %11562 = vst [vmem:[#allocation35_spill] sm:$0xff] %v6883_v18  ;;  %v11281_v47 = vrot.slane %v6861_v55, 4  ;;  %vm11296_vm15 = vcmp.ne.s16.totalorder %v6883_v18, 0 }
  0xfc   : > { %1562 = vrot.lane.b32.xlu1 %v11268_v50, %s6218_s15  ;;  %1560 = vrot.lane.b32.xlu0 %v11269_v12, %s6218_s15  ;;  %v1499_v50 = vsel %vm11295_vm14, %v6814_v31, 0  ;;  %v1508_v12 = vsel %vm11316_vm7, %v6814_v31, 0 }
  0xfd   : > { %v1625_v56 = vrot.slane %v1508_v12, 4  ;;  %v6928_v12 = vsel %vm11292_vm13, %v6671_v4, %v6675_v6  ;;  %v1501_v4 = vsel %vm11305_vm12, %v6837_v27, 0  ;;  %vm11314_vm13 = vcmp.ne.s16.totalorder %v6933_v44, 0 }
  0xfe   : > { %11565 = vst [vmem:[#allocation38_spill] sm:$0xff] %v6928_v12  ;;  %vm11335_vm9 = vcmp.ne.s16.totalorder %v6928_v12, 0  ;;  %v845_v44 = vsel %vm11315_vm3, %v6976_v45, 0 }
 0x100   : > { %v6894_v41 = vpop.permute.xlu1 %1659  ;;  %1593 = vrot.lane.b32.xlu1 %v1499_v50, %s6219_s16  ;;  %1564 = vrot.lane.b32.xlu0 %v11281_v47, %s6218_s15  ;;  %v6900_v13 = vpop.permute.xlu0 %1661  ;;  %v1500_v50 = vsel %vm11296_vm15, %v6832_v17, 0  ;;  %v1509_v47 = vsel %vm11315_vm3, %v6832_v17, 0 }
 0x101   : > { %v1626_v34 = vrot.slane %v1509_v47, 4  ;;  %v1488_v47 = vsel %vm11356_vm11, %v6523_v28, 0  ;;  %v981_v28 = vrot.slane %v6960_v32, 7  ;;  %vm11362_vm11 = vcmask 506880  }
 0x104   : > { %v1555_v57 = vpop.permute.xlu1 %1554  ;;  %1637 = vrot.lane.b32.xlu1 %v1625_v56, %s6220_s19  ;;  %1595 = vrot.lane.b32.xlu0 %v1500_v50, %s6219_s16  ;;  %v6923_v14 = vpop.permute.xlu0 %1556 }
 0x105   : > { %v1571_v56 = vsel %vm1005_vm2, %v1555_v57, %v6923_v14 }
 0x106   : > { %v1829_v50 = vsel %vm1360_vm10, %v1489_v36, %v1571_v56 }
 0x107   : > { %2098 = vmatprep.subr.bf16.mxu0 %v1829_v50  ;;  %v1627_v50 = vrot.slane %v1510_v51, 4  ;;  %v6981_v51 = vsel %vm11306_vm8, %v6739_v0, %v6763_v7  ;;  %v6998_v0 = vsel %vm11306_vm8, %v6763_v7, %v6765_v1  ;;  %vm1095_vm8 = vcmask 785408  }
 0x108   : > { %v1553_v21 = vpop.permute.xlu1 %1552  ;;  %1597 = vrot.lane.b32.xlu1 %v1501_v4, %s6219_s16  ;;  %1639 = vrot.lane.b32.xlu0 %v1626_v34, %s6220_s19  ;;  %v1502_v4 = vsel %vm11314_vm13, %v6861_v55, 0  ;;  %v1511_v34 = vsel %vm11335_vm9, %v6861_v55, 0  ;;  %11568 = vst [vmem:[#allocation41_spill] sm:$0xff] %v6998_v0  ;;  %v804_v16 = vsel %vm11305_vm12, %v6981_v51, 0  ;;  %v805_v63 = vsel %vm11314_vm13, %v6998_v0, 0 }
 0x109   : > { %v1570_v36 = vsel %vm1005_vm2, %v1553_v21, %v1555_v57  ;;  %v1628_v57 = vrot.slane %v1511_v34, 4  ;;  %v983_v21 = vrot.slane %v6981_v51, 7  ;;  %v984_v34 = vrot.slane %v6998_v0, 7 }
 0x10a   : > { %v1825_v56 = vsel %vm1360_vm10, %v1488_v47, %v1570_v36  ;;  %v982_v36 = vrot.slane %v6976_v45, 7  ;;  %v802_v47 = vsel %vm11295_vm14, %v6960_v32, 0  ;;  %vm11348_vm14 = vcmp.ne.s16.totalorder %v6993_v60, 0 }
 0x10b   : > { %2099 = vmatpush1.bf16.msra.mxu0 %v1825_v56  ;;  %vm11354_vm12 = vcmask 1031168   ;;  %v1029_v5 = vrot.slane %v805_v63, 6  ;;  %v847_v11 = vsel %vm11335_vm9, %v6998_v0, 0  ;;  %vm1256_vm9 = vcmask 515072  }
 0x10c   : > { %1641 = vrot.lane.b32.xlu1 %v1627_v50, %s6220_s19  ;;  %1599 = vrot.lane.b32.xlu0 %v1502_v4, %s6219_s16  ;;  %v1026_v4 = vrot.slane %v802_v47, 6 }
 0x10e   : > { %v7000_v56 = vpop.permute.xlu1 %1591 }
 0x110   : > { %993 = vrot.lane.b32.xlu1 %v981_v28, %s6218_s15  ;;  %1643 = vrot.lane.b32.xlu0 %v1628_v57, %s6220_s19  ;;  %v803_v28 = vsel %vm11296_vm15, %v6976_v45, 0  ;;  %vm11336_vm15 = vcmp.ne.s16.totalorder %v7014_v38, 0  ;;  %v7180_v38 = vsel %vm908_vm5, %v6789_v43, %v6805_v26 }
 0x111   : > { %11575 = vst [vmem:[#allocation48_spill] sm:$0xff] %v7180_v38 }
 0x114   : > { %997 = vrot.lane.b32.xlu1 %v983_v21, %s6218_s15  ;;  %995 = vrot.lane.b32.xlu0 %v982_v36, %s6218_s15  ;;  %v1027_v21 = vrot.slane %v803_v28, 6  ;;  %v1517_v36 = vsel %vm11348_vm14, %v6814_v31, 0  ;;  %v1518_v28 = vsel %vm11336_vm15, %v6832_v17, 0 }
 0x115   : > { %v1696_v19 = vrot.slane %v1518_v28, 4 }
 0x116   : > { %v7002_v50 = vpop.permute.xlu0 %987 }
 0x118   : > { %1038 = vrot.lane.b32.xlu1 %v1026_v4, %s6219_s16  ;;  %999 = vrot.lane.b32.xlu0 %v984_v34, %s6218_s15  ;;  %v1695_v34 = vrot.slane %v1517_v36, 4  ;;  %v844_v36 = vsel %vm11316_vm7, %v6960_v32, 0  ;;  %vm1131_vm7 = vcmask 777216  }
 0x119   : > { %v1071_v8 = vrot.slane %v844_v36, 5 }
 0x11a   : > { %v7016_v7 = vpop.permute.xlu1 %991  ;;  %v1588_v57 = vpop.permute.xlu0 %1587 }
 0x11c   : > { %1663 = vrot.lane.b32.xlu1 %v6814_v31, %s6217_s14  ;;  %1040 = vrot.lane.b32.xlu0 %v1027_v21, %s6219_s16  ;;  %v1028_v21 = vrot.slane %v804_v16, 6 }
 0x11e   : > { %v1632_v47 = vpop.permute.xlu1 %1631  ;;  %v1590_v4 = vpop.permute.xlu0 %1589 }
 0x11f   : > { %v1605_v1 = vsel %vm11354_vm12, %v1588_v57, %v1590_v4  ;;  %v7070_v57 = vsel %vm11317_vm1, %v6753_v24, %v6755_v37 }
 0x120   : > { %1707 = vrot.lane.b32.xlu1 %v1695_v34, %s6221_s20  ;;  %1665 = vrot.lane.b32.xlu0 %v6832_v17, %s6217_s14  ;;  %v7049_v34 = vsel %vm11317_vm1, %v6726_v54, %v6753_v24  ;;  %11571 = vst [vmem:[#allocation44_spill] sm:$0xff] %v7070_v57  ;;  %vm11334_vm3 = vcmp.ne.s16.totalorder %v7070_v57, 0  ;;  %vm1176_vm1 = vcmask 769024  }
 0x121   : > { %11570 = vst [vmem:[#allocation43_spill] sm:$0xff] %v7049_v34  ;;  %vm11327_vm13 = vcmp.ne.s16.totalorder %v7049_v34, 0 }
 0x122   : > { %v7034_v18 = vpop.permute.xlu1 %1032  ;;  %v7036_v20 = vpop.permute.xlu0 %989 }
 0x123   : > { %v1006_v40 = vsel %vm1005_vm2, %v7002_v50, %v7036_v20 }
 0x124   : > { %1042 = vrot.lane.b32.xlu1 %v1028_v21, %s6219_s16  ;;  %1709 = vrot.lane.b32.xlu0 %v1696_v19, %s6221_s20  ;;  %v1606_v19 = vsel %vm11354_vm12, %v1590_v4, %v7000_v56 }
 0x126   : > { %v7051_v16 = vpop.permute.xlu1 %1635  ;;  %v1634_v28 = vpop.permute.xlu0 %1633 }
 0x127   : > { %v1649_v21 = vsel %vm1095_vm8, %v1632_v47, %v1634_v28  ;;  %v1650_v54 = vsel %vm1095_vm8, %v1634_v28, %v7051_v16  ;;  %v1072_v28 = vrot.slane %v845_v44, 5  ;;  %v1676_v44 = vsel %vm1131_vm7, %v6894_v41, %v6900_v13 }
 0x128   : > { %1083 = vrot.lane.b32.xlu1 %v1071_v8, %s6220_s19  ;;  %1044 = vrot.lane.b32.xlu0 %v1029_v5, %s6219_s16  ;;  %v1861_v63 = vsel %vm1360_vm10, %v1606_v19, %v1650_v54  ;;  %v1857_v36 = vsel %vm1360_vm10, %v1605_v1, %v1649_v21  ;;  %v1519_v5 = vsel %vm11327_vm13, %v6837_v27, 0  ;;  %v846_v21 = vsel %vm11324_vm4, %v6981_v51, 0 }
 0x129   : > { %2100 = vmatprep.subr.bf16.mxu0 %v1861_v63  ;;  %v1697_v8 = vrot.slane %v1519_v5, 4  ;;  %v1520_v54 = vsel %vm11334_vm3, %v6861_v55, 0  ;;  %v1073_v5 = vrot.slane %v846_v21, 5 }
 0x12a   : > { %v7072_v47 = vpop.permute.xlu1 %1034  ;;  %2101 = vmatpush1.bf16.msra.mxu0 %v1857_v36  ;;  %v7074_v4 = vpop.permute.xlu0 %1036  ;;  %v1698_v35 = vrot.slane %v1520_v54, 4 }
 0x12c   : > { %1667 = vrot.lane.b32.xlu1 %v6837_v27, %s6217_s14  ;;  %1085 = vrot.lane.b32.xlu0 %v1072_v28, %s6220_s19 }
 0x12e   : > { %v1704_v1 = vpop.permute.xlu1 %1703  ;;  %v7083_v24 = vpop.permute.xlu0 %1705 }
 0x12f   : > { %v1720_v19 = vsel %vm1176_vm1, %v1704_v1, %v7083_v24 }
 0x130   : > { %1711 = vrot.lane.b32.xlu1 %v1697_v8, %s6221_s20  ;;  %1669 = vrot.lane.b32.xlu0 %v6861_v55, %s6217_s14  ;;  %v1893_v63 = vsel %vm1360_vm10, %v1676_v44, %v1720_v19  ;;  %v1074_v44 = vrot.slane %v847_v11, 5  ;;  %v1108_v11 = vrot.slane %v6976_v45, 4 }
 0x131   : > { %2102 = vmatprep.subr.bf16.mxu0 %v1893_v63 }
 0x132   : > { %v7100_v36 = vpop.permute.xlu1 %1081  ;;  %v7102_v28 = vpop.permute.xlu0 %1079 }
 0x133   : > { %11572 = vst [vmem:[#allocation45_spill] sm:$0xff] %v7100_v36 }
 0x134   : > { %1087 = vrot.lane.b32.xlu1 %v1073_v5, %s6220_s19  ;;  %1713 = vrot.lane.b32.xlu0 %v1698_v35, %s6221_s20  ;;  %v1109_v5 = vrot.slane %v6981_v51, 4 }
 0x136   : > { %v1702_v8 = vpop.permute.xlu1 %1701  ;;  %v1658_v37 = vpop.permute.xlu0 %1657 }
 0x137   : > { %v1719_v19 = vsel %vm1176_vm1, %v1702_v8, %v1704_v1  ;;  %v1675_v63 = vsel %vm1131_vm7, %v1658_v37, %v6894_v41  ;;  %v886_v1 = vsel %vm11348_vm14, %v6960_v32, 0  ;;  %vm11360_vm14 = vcmask 1042432  }
 0x138   : > { %1119 = vrot.lane.b32.xlu1 %v1107_v52, %s6217_s14  ;;  %1089 = vrot.lane.b32.xlu0 %v1074_v44, %s6220_s19  ;;  %v1889_v21 = vsel %vm1360_vm10, %v1675_v63, %v1719_v19  ;;  %v7130_v52 = vsel %vm908_vm5, %v6579_v53, %v6787_v39  ;;  %v1152_v8 = vrot.slane %v886_v1, 3  ;;  %v1110_v44 = vrot.slane %v6998_v0, 4 }
 0x139   : > { %2103 = vmatpush1.bf16.msra.mxu0 %v1889_v21  ;;  %11573 = vst [vmem:[#allocation46_spill] sm:$0xff] %v7130_v52  ;;  %v888_v19 = vsel %vm11327_vm13, %v6981_v51, 0  ;;  %v887_v63 = vsel %vm11336_vm15, %v6976_v45, 0  ;;  %vm11347_vm4 = vcmp.ne.s16.totalorder %v7130_v52, 0  ;;  %v7153_v1 = vsel %vm908_vm5, %v6787_v39, %v6789_v43 }
 0x13a   : > { %v7116_v54 = vpop.permute.xlu1 %1115  ;;  %v7118_v35 = vpop.permute.xlu0 %1077  ;;  %11574 = vst [vmem:[#allocation47_spill] sm:$0xff] %v7153_v1  ;;  %v928_v34 = vsel %vm11347_vm4, %v6960_v32, 0  ;;  %vm11343_vm13 = vcmp.ne.s16.totalorder %v7153_v1, 0 }
 0x13b   : > { %v1197_v39 = vrot.slane %v928_v34, 2  ;;  %v929_v12 = vsel %vm11343_vm13, %v6976_v45, 0  ;;  %v1526_v34 = vsel %vm11347_vm4, %v6814_v31, 0  ;;  %v1527_v43 = vsel %vm11343_vm13, %v6832_v17, 0 }
 0x13c   : > { %1123 = vrot.lane.b32.xlu1 %v1109_v5, %s6217_s14  ;;  %1121 = vrot.lane.b32.xlu0 %v1108_v11, %s6217_s14  ;;  %v1154_v5 = vrot.slane %v888_v19, 3  ;;  %v1153_v11 = vrot.slane %v887_v63, 3  ;;  %vm11364_vm13 = vcmask 1040384   ;;  %vm11361_vm4 = vcmask 1041408  }
 0x13e   : > { %v7132_v37 = vpop.permute.xlu1 %1113  ;;  %v7134_v41 = vpop.permute.xlu0 %1117 }
 0x140   : > { %1164 = vrot.lane.b32.xlu1 %v1152_v8, %s6221_s20  ;;  %1125 = vrot.lane.b32.xlu0 %v1110_v44, %s6217_s14  ;;  %v889_v8 = vsel %vm11334_vm3, %v6998_v0, 0  ;;  %vm11355_vm3 = vcmp.ne.s16.totalorder %v7180_v38, 0 }
 0x141   : > { %v1155_v63 = vrot.slane %v889_v8, 3 }
 0x142   : > { %v7146_v53 = vpop.permute.xlu1 %1162  ;;  %v7148_v21 = vpop.permute.xlu0 %1160 }
 0x144   : > { %1168 = vrot.lane.b32.xlu1 %v1154_v5, %s6221_s20  ;;  %1166 = vrot.lane.b32.xlu0 %v1153_v11, %s6221_s20  ;;  %v1198_v11 = vrot.slane %v929_v12, 2  ;;  %v7193_v12 = vsel %vm908_vm5, %v6805_v26, %v6807_v10  ;;  %v11578_v10 = vrot.slane %v6832_v17, 4 }
 0x145   : > { %11576 = vst [vmem:[#allocation49_spill] sm:$0xff] %v7193_v12  ;;  %vm11357_vm15 = vcmp.ne.s16.totalorder %v7193_v12, 0 }
 0x146   : > { %v7164_v44 = vpop.permute.xlu1 %1205  ;;  %v7166_v19 = vpop.permute.xlu0 %1158 }
 0x148   : > { %1209 = vrot.lane.b32.xlu1 %v1197_v39, %s6215_s12  ;;  %1170 = vrot.lane.b32.xlu0 %v1155_v63, %s6221_s20  ;;  %v930_v63 = vsel %vm11355_vm3, %v6981_v51, 0 }
 0x149   : > { %v1199_v52 = vrot.slane %v930_v63, 2  ;;  %v1007_v63 = vsel %vm1005_vm2, %v7036_v20, %v7016_v7  ;;  %v1232_v20 = vrot.slane %v6960_v32, 1 }
 0x14a   : > { %v7173_v57 = vpop.permute.xlu1 %1738  ;;  %v7175_v5 = vpop.permute.xlu0 %1207 }
 0x14c   : > { %1742 = vrot.lane.b32.xlu1 %v1526_v34, %s6215_s12  ;;  %1211 = vrot.lane.b32.xlu0 %v1198_v11, %s6215_s12  ;;  %v11577_v11 = vrot.slane %v6814_v31, 4 }
 0x14e   : > { %v1765_v8 = vpop.permute.xlu1 %1764  ;;  %v7188_v39 = vpop.permute.xlu0 %1740 }
 0x14f   : > { %v1755_v1 = vsel %vm908_vm5, %v7173_v57, %v7188_v39 }
 0x150   : > { %1768 = vrot.lane.b32.xlu1 %v11577_v11, %s6222_s21  ;;  %1744 = vrot.lane.b32.xlu0 %v1527_v43, %s6215_s12  ;;  %v931_v11 = vsel %vm11357_vm15, %v6998_v0, 0  ;;  %v703_v43 = vsel %vm11353_vm0, %v6594_v58, 0  ;;  %v1052_v58 = vsel %vm11354_vm12, %v7072_v47, %v7074_v4  ;;  %vm11365_vm0 = vcmask 1044480  }
 0x151   : > { %v1200_v50 = vrot.slane %v931_v11, 2 }
 0x152   : > { %v1204_v34 = vpop.permute.xlu1 %1203  ;;  %v7206_v26 = vpop.permute.xlu0 %1766 }
 0x153   : > { %v1781_v60 = vsel %vm1256_vm9, %v1765_v8, %v7206_v26 }
 0x154   : > { %1213 = vrot.lane.b32.xlu1 %v1199_v52, %s6215_s12  ;;  %1770 = vrot.lane.b32.xlu0 %v11578_v10, %s6222_s21  ;;  %v1925_v6 = vsel %vm1360_vm10, %v1755_v1, %v1781_v60  ;;  %v1051_v52 = vsel %vm11354_vm12, %v7034_v18, %v7072_v47  ;;  %v1097_v10 = vsel %vm1095_vm8, %v7102_v28, %v7100_v36  ;;  %vm11359_vm12 = vcmask 1045504  }
 0x155   : > { %2104 = vmatprep.subr.bf16.mxu0 %v1925_v6  ;;  %v1307_v6 = vsel %vm11364_vm13, %v703_v43, %v1007_v63  ;;  %v1096_v18 = vsel %vm1095_vm8, %v7118_v35, %v7102_v28  ;;  %v1133_v47 = vsel %vm1131_vm7, %v7116_v54, %v7134_v41  ;;  %v1304_v36 = vsel %vm11364_vm13, %v702_v30, %v1006_v40 }
 0x156   : > { %v7239_v60 = vpop.permute.xlu1 %1242  ;;  %v1241_v1 = vpop.permute.xlu0 %1240  ;;  %v1330_v48 = vsel %vm11361_vm4, %v1307_v6, %v1052_v58  ;;  %v1328_v42 = vsel %vm11361_vm4, %v1304_v36, %v1051_v52  ;;  %v1528_v28 = vsel %vm11355_vm3, %v6837_v27, 0  ;;  %v1233_v35 = vrot.slane %v6976_v45, 1 }
 0x157   : > { %v1347_v11 = vsel %vm11360_vm14, %v1330_v48, %v1097_v10  ;;  %v1345_v30 = vsel %vm11360_vm14, %v1328_v42, %v1096_v18  ;;  %v1132_v40 = vsel %vm1131_vm7, %v7132_v37, %v7116_v54  ;;  %v1178_v36 = vsel %vm1176_vm1, %v7148_v21, %v7146_v53 }
 0x158   : > { %1244 = vrot.lane.b32.xlu1 %v1232_v20, %s6222_s21  ;;  %1215 = vrot.lane.b32.xlu0 %v1200_v50, %s6215_s12  ;;  %v1364_v43 = vsel %vm1360_vm10, %v1347_v11, %v1133_v47  ;;  %v1177_v58 = vsel %vm1176_vm1, %v7166_v19, %v7148_v21  ;;  %v1222_v52 = vsel %vm908_vm5, %v7164_v44, %v7175_v5  ;;  %vm11358_vm3 = vcmask 1046528  }
 0x159   : > { %v1221_v37 = vsel %vm908_vm5, %v1204_v34, %v7164_v44  ;;  %v1258_v20 = vsel %vm1256_vm9, %v1241_v1, %v7239_v60  ;;  %v1362_v19 = vsel %vm1360_vm10, %v1345_v30, %v1132_v40  ;;  %v1529_v42 = vsel %vm11357_vm15, %v6861_v55, 0 }
 0x15a   : > { %v1763_v63 = vpop.permute.xlu1 %1762  ;;  %v1737_v48 = vpop.permute.xlu0 %1736  ;;  %vm11396_vm4 = vcmp.ne.s16.totalorder %v6367_v29, 0  ;;  %vm11397_vm13 = vcmp.ne.s16.totalorder %v6454_v3, 0 }
 0x15b   : > { %v1780_v10 = vsel %vm1256_vm9, %v1763_v63, %v1765_v8  ;;  %v1754_v54 = vsel %vm908_vm5, %v1737_v48, %v7173_v57  ;;  %v1381_v8 = vsel %vm11365_vm0, %v1364_v43, %v1178_v36  ;;  %v1379_v57 = vsel %vm11365_vm0, %v1362_v19, %v1177_v58  ;;  %v6200_v48 = vld [vmem:[%s6307_s22 + $0x18] sm:$0xff] }
 0x15c   : > { %1746 = vrot.lane.b32.xlu1 %v1528_v28, %s6215_s12  ;;  %1246 = vrot.lane.b32.xlu0 %v1233_v35, %s6222_s21  ;;  %v1921_v21 = vsel %vm1360_vm10, %v1754_v54, %v1780_v10  ;;  %v1398_v50 = vsel %vm11359_vm12, %v1381_v8, %v1222_v52  ;;  %v1396_v6 = vsel %vm11359_vm12, %v1379_v57, %v1221_v37  ;;  %v11579_v28 = vrot.slane %v6837_v27, 4 }
 0x15d   : > { %2105 = vmatpush1.bf16.msra.mxu0 %v1921_v21  ;;  %v1415_v18 = vsel %vm11358_vm3, %v1398_v50, %v1258_v20  ;;  %v6010_v58 = vcombine.high %v6200_v48, %v6200_v48  ;;  %v11582_v52 = vrot.slane %v6861_v55, 4  ;;  %v7323_v37 = vsel %vm11363_vm6, %v6621_v9, %v6824_v33 }
 0x15e   : > { %v1800_v44 = vpop.permute.xlu1 %1799  ;;  %v1239_v34 = vpop.permute.xlu0 %1238  ;;  %v7303_v30 = vrot.slane %v1415_v18, 4  ;;  %11583 = vst [vmem:[#allocation52_spill] sm:$0xff] %v7323_v37  ;;  %v1235_v19 = vrot.slane %v6998_v0, 1  ;;  %vm11390_vm15 = vcmp.ne.s16.totalorder %v7323_v37, 0  ;;  %v7333_v57 = vsel %vm11363_vm6, %v6824_v33, %v6826_v61 }
 0x15f   : > { %v1257_v47 = vsel %vm1256_vm9, %v1239_v34, %v1241_v1  ;;  %v1234_v1 = vrot.slane %v6981_v51, 1  ;;  %11584 = vst [vmem:[#allocation53_spill] sm:$0xff] %v7333_v57  ;;  %v7338_v9 = vsel %vm11363_vm6, %v6826_v61, %v6865_v23  ;;  %v1535_v18 = vsel %vm11390_vm15, %v6814_v31, 0 }
 0x160   : > { %v1413_v11 = vsel %vm11358_vm3, %v1396_v6, %v1257_v47  ;;  %1772 = vrot.lane.b32.xlu1 %v11579_v28, %s6222_s21  ;;  %1748 = vrot.lane.b32.xlu0 %v1529_v42, %s6215_s12  ;;  %11581 = vst [vmem:[#allocation51_spill] sm:$0xff] %v7303_v30  ;;  %11585 = vst [vmem:[#allocation54_spill] sm:$0xff] %v7338_v9  ;;  %vm11393_vm3 = vcmp.ne.s16.totalorder %v6444_v62, 0  ;;  %vm11367_vm12 = vcmp.ne.s16.totalorder %v7333_v57, 0  ;;  %vm11388_vm14 = vcmp.ne.s16.totalorder %v7338_v9, 0 }
 0x161   : > { %v7301_v35 = vrot.slane %v1413_v11, 4  ;;  %v7357_v61 = vsel %vm11363_vm6, %v6865_v23, %v6867_v59  ;;  %v1537_v23 = vsel %vm11388_vm14, %v6837_v27, 0 }
 0x162   : > { %v1798_v40 = vpop.permute.xlu1 %1797  ;;  %v7305_v43 = vpop.permute.xlu0 %1801  ;;  %11586 = vst [vmem:[#allocation55_spill] sm:$0xff] %v7357_v61  ;;  %vm11389_vm6 = vcmp.ne.s16.totalorder %v7357_v61, 0 }
 0x163   : > { %11580 = vst [vmem:[#allocation50_spill] sm:$0xff] %v7301_v35  ;;  %v1815_v36 = vsel %vm11362_vm11, %v1798_v40, %v1800_v44  ;;  %v1816_v63 = vsel %vm11362_vm11, %v1800_v44, %v7305_v43 }
 0x164   : > { %1248 = vrot.lane.b32.xlu1 %v1234_v1, %s6222_s21  ;;  %1774 = vrot.lane.b32.xlu0 %v11582_v52, %s6222_s21  ;;  %v1990_v10 = vsel %vm1360_vm10, %v1816_v63, %v7303_v30  ;;  %v1986_v54 = vsel %vm1360_vm10, %v1815_v36, %v7301_v35  ;;  %v1536_v1 = vsel %vm11367_vm12, %v6832_v17, 0  ;;  %v1491_v36 = vsel %vm11393_vm3, %v6814_v31, 0  ;;  %v7396_v52 = vld [vmem:[%s11235_s3] sm:$0xff]  }
 0x165   : > { %2106 = vmatprep.subr.bf16.mxu0 %v1990_v10 }
 0x166   : > { %v1277_v20 = vpop.permute.xlu1 %1276  ;;  %2107 = vmatpush1.bf16.msra.mxu0 %v1986_v54  ;;  %v1275_v21 = vpop.permute.xlu0 %1274 }
 0x167   : > { %v1293_v8 = vsel %vm11362_vm11, %v1275_v21, %v1277_v20  ;;  %v1538_v21 = vsel %vm11389_vm6, %v6861_v55, 0 }
 0x168   : > { %1466 = vrot.lane.b32.xlu1 %v6010_v58, %s6210_s23  ;;  %1250 = vrot.lane.b32.xlu0 %v1235_v19, %s6222_s21  ;;  %v1968_v50 = vrot.slane %v1293_v8, 4  ;;  %v1490_v58 = vsel %vm11396_vm4, %v6512_v22, 0 }
 0x16a   : > { %v1559_v44 = vpop.permute.xlu1 %1558  ;;  %v7340_v34 = vpop.permute.xlu0 %1278  ;;  %v1969_v47 = vsel %vm1360_vm10, %v7301_v35, %v1968_v50  ;;  %v1492_v50 = vsel %vm11397_vm13, %v6832_v17, 0  ;;  %v7431_v17 = vld [vmem:[%s11235_s3 + $0x8] sm:$0xff]  }
 0x16b   : > { %v1294_v6 = vsel %vm11362_vm11, %v1277_v20, %v7340_v34  ;;  %vm11366_vm11 = vcmp.ne.s16.totalorder %v6451_v2, 0  ;;  %v1572_v40 = vsel %vm1005_vm2, %v6923_v14, %v1559_v44  ;;  %v7384_v14 = vsel %vm11365_vm0, %v1969_v47, 0 }
 0x16c   : > { %v1970_v33 = vrot.slane %v1294_v6, 4  ;;  %1803 = vrot.lane.b32.xlu1 %v1535_v18, %s6223_s24  ;;  %822 = vrot.lane.b32.xlu0 %v6407_v46, %s6212_s25  ;;  %11588 = vst [vmem:[#allocation57_spill] sm:$0xff] %v7384_v14  ;;  %v1833_v31 = vsel %vm1360_vm10, %v1490_v58, %v1572_v40  ;;  %v1493_v19 = vsel %vm11366_vm11, %v6837_v27, 0  ;;  %v11589_v18 = vmov 0  }
 0x16d   : > { %v970_v47 = vsel %vm11390_vm15, %v6960_v32, 0  ;;  %vm11590_vm11 = vcmask 1031168   ;;  %vm11601_vm15 = vcmask 1041408  }
 0x16e   : > { %v1563_v42 = vpop.permute.xlu1 %1562  ;;  %v1561_v11 = vpop.permute.xlu0 %1560  ;;  %v7364_v28 = vsel %vm1360_vm10, %v7303_v30, %v1970_v33  ;;  %v971_v33 = vsel %vm11367_vm12, %v6976_v45, 0  ;;  %vm11591_vm12 = vmmov %vm11590_vm11 }
 0x16f   : > { %11587 = vst [vmem:[#allocation56_spill] sm:$0xff] %v7364_v28  ;;  %6014 = vmatprep.subr.msk.bf16.mxu0 %vm11365_vm0, %v7364_v28  ;;  %v1573_v63 = vsel %vm1005_vm2, %v1559_v44, %v1561_v11  ;;  %v1574_v10 = vsel %vm1005_vm2, %v1561_v11, %v1563_v42  ;;  %vm2064_vm0 = vcmask 736256  }
 0x170   : > { %1807 = vrot.lane.b32.xlu1 %v1537_v23, %s6223_s24  ;;  %1805 = vrot.lane.b32.xlu0 %v1536_v1, %s6223_s24  ;;  %v1837_v48 = vsel %vm1360_vm10, %v1491_v36, %v1573_v63  ;;  %v1841_v44 = vsel %vm1360_vm10, %v1492_v50, %v1574_v10  ;;  %v973_v36 = vsel %vm11389_vm6, %v6998_v0, 0  ;;  %v972_v63 = vsel %vm11388_vm14, %v6981_v51, 0  ;;  %vm11596_vm14 = vmmov %vm11590_vm11 }
 0x171   : > { %2109 = vmatpush1.bf16.msra.mxu0 %v7384_v14  ;;  %2159 = vmatprep.subr.bf16.mxu1 %v1837_v48  ;;  %v598_v48 = vcombine.high %v6485_v15, %v6485_v15  ;;  %v7462_v15 = vld [vmem:[%s11235_s3 + $0x10] ss:$0 sps:$4 sm:$0xff]  }
 0x172   : > { %v1594_v54 = vpop.permute.xlu1 %1593  ;;  %2160 = vmatpush1.bf16.msra.mxu1 %v1833_v31  ;;  %v7399_v20 = vpop.permute.xlu0 %1564 }
 0x173   : > { %v1575_v22 = vsel %vm1005_vm2, %v1563_v42, %v7399_v20 }
 0x174   : > { %780 = vrot.lane.b32.xlu1 %v6415_v49, %s6213_s29  ;;  %1809 = vrot.lane.b32.xlu0 %v1538_v21, %s6223_s24  ;;  %v1845_v8 = vsel %vm1360_vm10, %v1493_v19, %v1575_v22  ;;  %s9354_s29 = scalar_lea.vmem %s11234_s2, %s6082_s26 }
 0x175   : > { %2220 = vmatprep.subr.bf16.mxu0 %v1845_v8  ;;  %6015 = vmatmul.mubr.msk.bf16.vlgmr.msra.gmra.mrb[0].mxu0 %vm2064_vm0, %v7396_v52 }
 0x176   : > { %v1638_v6 = vpop.permute.xlu1 %1637  ;;  %2221 = vmatpush1.bf16.msra.mxu0 %v1841_v44  ;;  %v1596_v27 = vpop.permute.xlu0 %1595  ;;  %2140 = vmatprep.mubr.bf16.mxu0 %v11589_v18 }
 0x177   : > { %v1651_v42 = vsel %vm1095_vm8, %v7051_v16, %v1638_v6  ;;  %v1608_v23 = vsel %vm11590_vm11, %v1594_v54, %v1596_v27  ;;  %v1607_v16 = vsel %vm11591_vm12, %v7000_v56, %v1594_v54  ;;  %vm11592_vm12 = vmmov %vm11590_vm11 }
 0x178   : > { %1282 = vrot.lane.b32.xlu1 %v971_v33, %s6223_s24  ;;  %1280 = vrot.lane.b32.xlu0 %v970_v47, %s6223_s24  ;;  %v1865_v31 = vsel %vm1360_vm10, %v1607_v16, %v1651_v42 }
 0x17a   : > { %v1598_v11 = vpop.permute.xlu1 %1597  ;;  %v1640_v40 = vpop.permute.xlu0 %1639 }
 0x17b   : > { %v1652_v1 = vsel %vm1095_vm8, %v1638_v6, %v1640_v40  ;;  %v1609_v50 = vsel %vm11592_vm12, %v1596_v27, %v1598_v11  ;;  %vm11595_vm12 = vmmov %vm11590_vm11 }
 0x17c   : > { %1286 = vrot.lane.b32.xlu1 %v973_v36, %s6223_s24  ;;  %1284 = vrot.lane.b32.xlu0 %v972_v63, %s6223_s24  ;;  %v1869_v58 = vsel %vm1360_vm10, %v1608_v23, %v1652_v1 }
 0x17d   : > { %2161 = vmatprep.subr.bf16.mxu1 %v1869_v58  ;;  %6016 = vmatmul.mubr.msk.bf16.gmra.mrb[4].mxu0 %vm2064_vm0, %v7431_v17 }
 0x17e   : > { %v1642_v10 = vpop.permute.xlu1 %1641  ;;  %2162 = vmatpush1.bf16.msra.mxu1 %v1865_v31  ;;  %v7453_v22 = vpop.permute.xlu0 %1599  ;;  %2150 = vmatprep.mubr.bf16.mxu0 %v11589_v18 }
 0x17f   : > { %v1653_v56 = vsel %vm1095_vm8, %v1640_v40, %v1642_v10  ;;  %v1610_v19 = vsel %vm11590_vm11, %v1598_v11, %v7453_v22 }
 0x180   : > { %613 = vrot.lane.b32.xlu1 %v598_v48, %s6210_s23  ;;  %864 = vrot.lane.b32.xlu0 %v6415_v49, %s6214_s30  ;;  %v1873_v6 = vsel %vm1360_vm10, %v1609_v50, %v1653_v56 }
 0x182   : > { %v7465_v54 = vpop.permute.xlu1 %993  ;;  %v7467_v21 = vpop.permute.xlu0 %1643 }
 0x183   : > { %v1654_v8 = vsel %vm1095_vm8, %v1642_v10, %v7467_v21 }
 0x184   : > { %948 = vrot.lane.b32.xlu1 %v6415_v49, %s6216_s13  ;;  %906 = vrot.lane.b32.xlu0 %v6407_v46, %s6215_s12  ;;  %v1877_v44 = vsel %vm1360_vm10, %v1610_v19, %v1654_v8 }
 0x185   : > { %2222 = vmatprep.subr.bf16.mxu0 %v1877_v44  ;;  %6017 = vmatmul.mubr.msk.bf16.gmra.mrb[8].mxu0 %vm2064_vm0, %v7462_v15 }
 0x186   : > { %v7482_v33 = vpop.permute.xlu1 %997  ;;  %2223 = vmatpush1.bf16.msra.mxu0 %v1873_v6  ;;  %v7484_v47 = vpop.permute.xlu0 %995  ;;  %2252 = vmatprep.mubr.bf16.mxu0 %v11589_v18 }
 0x18a   : > { %v7487_v27 = vpop.permute.xlu1 %1038  ;;  %v7489_v49 = vpop.permute.xlu0 %999 }
 0x18e   : > { %v1664_v42 = vpop.permute.xlu1 %1663  ;;  %v7491_v11 = vpop.permute.xlu0 %1040 }
 0x18f   : > { %v1677_v58 = vsel %vm1131_vm7, %v6900_v13, %v1664_v42 }
 0x192   : > { %v1708_v40 = vpop.permute.xlu1 %1707  ;;  %v1666_v23 = vpop.permute.xlu0 %1665 }
 0x193   : > { %v1721_v1 = vsel %vm1176_vm1, %v7083_v24, %v1708_v40  ;;  %v1678_v48 = vsel %vm1131_vm7, %v1664_v42, %v1666_v23 }
 0x194   : > { %v1897_v10 = vsel %vm1360_vm10, %v1677_v58, %v1721_v1 }
 0x196   : > { %v7495_v36 = vpop.permute.xlu1 %1042  ;;  %v1710_v63 = vpop.permute.xlu0 %1709 }
 0x197   : > { %v1722_v16 = vsel %vm1176_vm1, %v1708_v40, %v1710_v63 }
 0x198   : > { %v1901_v31 = vsel %vm1360_vm10, %v1678_v48, %v1722_v16 }
 0x199   : > { %2163 = vmatprep.subr.bf16.mxu1 %v1901_v31 }
 0x19a   : > { %v7503_v56 = vpop.permute.xlu1 %1083  ;;  %2164 = vmatpush1.bf16.msra.mxu1 %v1897_v10  ;;  %v7505_v19 = vpop.permute.xlu0 %1044 }
 0x19e   : > { %v1668_v24 = vpop.permute.xlu1 %1667  ;;  %v7507_v8 = vpop.permute.xlu0 %1085 }
 0x19f   : > { %v1679_v48 = vsel %vm1131_vm7, %v1666_v23, %v1668_v24 }
 0x1a2   : > { %v1712_v50 = vpop.permute.xlu1 %1711  ;;  %v7509_v44 = vpop.permute.xlu0 %1669 }
 0x1a3   : > { %v1723_v6 = vsel %vm1176_vm1, %v1710_v63, %v1712_v50  ;;  %v1680_v42 = vsel %vm1131_vm7, %v1668_v24, %v7509_v44 }
 0x1a4   : > { %v1905_v58 = vsel %vm1360_vm10, %v1679_v48, %v1723_v6 }
 0x1a6   : > { %v7512_v40 = vpop.permute.xlu1 %1087  ;;  %v7514_v13 = vpop.permute.xlu0 %1713 }
 0x1a7   : > { %11593 = vst [vmem:[#allocation58_spill] sm:$0xff] %v7514_v13  ;;  %v1724_v1 = vsel %vm1176_vm1, %v1712_v50, %v7514_v13 }
 0x1a8   : > { %v1909_v16 = vsel %vm1360_vm10, %v1680_v42, %v1724_v1 }
 0x1a9   : > { %2224 = vmatprep.subr.bf16.mxu0 %v1909_v16 }
 0x1aa   : > { %v7523_v31 = vpop.permute.xlu1 %1119  ;;  %2225 = vmatpush1.bf16.msra.mxu0 %v1905_v58  ;;  %v7525_v63 = vpop.permute.xlu0 %1089 }
 0x1ae   : > { %v7527_v10 = vpop.permute.xlu1 %1123  ;;  %v7529_v14 = vpop.permute.xlu0 %1121 }
 0x1b2   : > { %v7531_v28 = vpop.permute.xlu1 %1164  ;;  %v7533_v35 = vpop.permute.xlu0 %1125 }
 0x1b6   : > { %v7535_v50 = vpop.permute.xlu1 %1168  ;;  %v7537_v23 = vpop.permute.xlu0 %1166 }
 0x1ba   : > { %v7539_v24 = vpop.permute.xlu1 %1209  ;;  %v7541_v6 = vpop.permute.xlu0 %1170 }
 0x1be   : > { %v1743_v42 = vpop.permute.xlu1 %1742  ;;  %v7543_v1 = vpop.permute.xlu0 %1211 }
 0x1bf   : > { %v1756_v38 = vsel %vm908_vm5, %v7188_v39, %v1743_v42  ;;  %v1009_v39 = vsel %vm1005_vm2, %v7465_v54, %v7484_v47 }
 0x1c2   : > { %v1769_v48 = vpop.permute.xlu1 %1768  ;;  %v1745_v16 = vpop.permute.xlu0 %1744 }
 0x1c3   : > { %v1782_v58 = vsel %vm1256_vm9, %v7206_v26, %v1769_v48  ;;  %v1757_v61 = vsel %vm908_vm5, %v1743_v42, %v1745_v16 }
 0x1c4   : > { %v1929_v37 = vsel %vm1360_vm10, %v1756_v38, %v1782_v58  ;;  %v1010_v38 = vsel %vm1005_vm2, %v7484_v47, %v7482_v33  ;;  %v705_v58 = vsel %vm11393_vm3, %v6960_v32, 0  ;;  %vm11604_vm3 = vmmov %vm11601_vm15 }
 0x1c6   : > { %v7547_v30 = vpop.permute.xlu1 %1213  ;;  %v1771_v9 = vpop.permute.xlu0 %1770 }
 0x1c7   : > { %v1783_v12 = vsel %vm1256_vm9, %v1769_v48, %v1771_v9  ;;  %v1008_v48 = vsel %vm1005_vm2, %v7016_v7, %v7465_v54  ;;  %v1011_v7 = vsel %vm1005_vm2, %v7482_v33, %v7489_v49  ;;  %v1055_v54 = vsel %vm11596_vm14, %v7491_v11, %v7495_v36 }
 0x1c8   : > { %v1933_v57 = vsel %vm1360_vm10, %v1757_v61, %v1783_v12  ;;  %v1053_v12 = vsel %vm11590_vm11, %v7074_v4, %v7487_v27  ;;  %v1054_v61 = vsel %vm11595_vm12, %v7487_v27, %v7491_v11  ;;  %vm11597_vm11 = vcmask 1040384  }
 0x1c9   : > { %2165 = vmatprep.subr.bf16.mxu1 %v1933_v57  ;;  %v706_v33 = vsel %vm11397_vm13, %v6976_v45, 0  ;;  %vm11598_vm12 = vcmp.ne.s16.totalorder %v6451_v2, 0  ;;  %vm11599_vm6 = vmmov %vm11597_vm11  ;;  %vm11606_vm13 = vcmask 1031168  }
 0x1ca   : > { %v7555_v25 = vpop.permute.xlu1 %1244  ;;  %2166 = vmatpush1.bf16.msra.mxu1 %v1929_v37  ;;  %v7557_v0 = vpop.permute.xlu0 %1215  ;;  %v11594_v37 = vld [vmem:[#allocation16_spill] sm:$0xff]  ;;  %v707_v27 = vsel %vm11598_vm12, %v6981_v51, 0  ;;  %vm11600_vm14 = vmmov %vm11599_vm6  ;;  %v1056_v51 = vsel %vm11606_vm13, %v7495_v36, %v7505_v19  ;;  %v1101_v36 = vsel %vm1095_vm8, %v7512_v40, %v7525_v63  ;;  %vm11613_vm12 = vcmask 269312  }
 0x1cb   : > { %v704_v57 = vsel %vm11396_vm4, %v11594_v37, 0  ;;  %v1313_v37 = vsel %vm11599_vm6, %v705_v58, %v1009_v39  ;;  %v1316_v11 = vsel %vm11600_vm14, %v706_v33, %v1010_v38  ;;  %vm11605_vm4 = vmmov %vm11604_vm3  ;;  %v1099_v39 = vsel %vm1095_vm8, %v7503_v56, %v7507_v8 }
 0x1cc   : > { %v1310_v4 = vsel %vm11597_vm11, %v704_v57, %v1008_v48  ;;  %v11602_v48 = vld [vmem:[#allocation45_spill] sm:$0xff]  ;;  %vm11603_vm11 = vmmov %vm11599_vm6  ;;  %v1334_v62 = vsel %vm11604_vm3, %v1313_v37, %v1054_v61  ;;  %v1336_v45 = vsel %vm11605_vm4, %v1316_v11, %v1055_v54  ;;  %v1100_v38 = vsel %vm1095_vm8, %v7507_v8, %v7512_v40 }
 0x1cd   : > { %v1332_v29 = vsel %vm11601_vm15, %v1310_v4, %v1053_v12  ;;  %v1098_v57 = vsel %vm1095_vm8, %v11602_v48, %v7503_v56  ;;  %v1319_v32 = vsel %vm11603_vm11, %v707_v27, %v1011_v7  ;;  %v1134_v12 = vsel %vm1131_vm7, %v7134_v41, %v7523_v31  ;;  %vm11608_vm13 = vmmov %vm11604_vm3 }
 0x1ce   : > { %v1747_v26 = vpop.permute.xlu1 %1746  ;;  %v7559_v13 = vpop.permute.xlu0 %1246  ;;  %vm11607_vm15 = vcmask 1042432   ;;  %v1338_v58 = vsel %vm11608_vm13, %v1319_v32, %v1056_v51  ;;  %v1135_v41 = vsel %vm1131_vm7, %v7523_v31, %v7529_v14  ;;  %v1136_v11 = vsel %vm1131_vm7, %v7529_v14, %v7527_v10  ;;  %v11612_v32 = vld [vmem:[#allocation22_spill] sm:$0xff]  ;;  %vm11614_vm14 = vmmov %vm11613_vm12 }
 0x1cf   : > { %v1349_v4 = vsel %vm11607_vm15, %v1332_v29, %v1098_v57  ;;  %vm11609_vm3 = vmmov %vm11607_vm15  ;;  %v1179_v31 = vsel %vm1176_vm1, %v7146_v53, %v7531_v28  ;;  %v1224_v57 = vsel %vm908_vm5, %v7539_v24, %v7543_v1  ;;  %vm11615_vm11 = vcmask 1044480  }
 0x1d0   : > { %v1351_v33 = vsel %vm11609_vm3, %v1334_v62, %v1099_v39  ;;  %vm11610_vm4 = vmmov %vm11609_vm3  ;;  %v1366_v27 = vsel %vm1360_vm10, %v1349_v4, %v1134_v12  ;;  %v1180_v62 = vsel %vm1176_vm1, %v7531_v28, %v7537_v23  ;;  %v1223_v28 = vsel %vm908_vm5, %v7175_v5, %v7539_v24 }
 0x1d1   : > { %v1353_v40 = vsel %vm11610_vm4, %v1336_v45, %v1100_v38  ;;  %vm11611_vm6 = vmmov %vm11609_vm3  ;;  %v1368_v48 = vsel %vm1360_vm10, %v1351_v33, %v1135_v41  ;;  %v1260_v45 = vsel %vm1256_vm9, %v7555_v25, %v7559_v13  ;;  %v1383_v38 = vsel %vm11615_vm11, %v1366_v27, %v1179_v31 }
 0x1d2   : > { %v1773_v47 = vpop.permute.xlu1 %1772  ;;  %v7585_v42 = vpop.permute.xlu0 %1748  ;;  %v1137_v12 = vsel %vm1131_vm7, %v7527_v10, %v7533_v35  ;;  %vm11616_vm15 = vmmov %vm11615_vm11  ;;  %v1259_v5 = vsel %vm1256_vm9, %v7239_v60, %v7555_v25  ;;  %v1181_v24 = vsel %vm1176_vm1, %v7537_v23, %v7535_v50  ;;  %v1182_v4 = vsel %vm1176_vm1, %v7535_v50, %v7541_v6 }
 0x1d3   : > { %v1784_v7 = vsel %vm1256_vm9, %v1771_v9, %v1773_v47  ;;  %v1759_v56 = vsel %vm908_vm5, %v1747_v26, %v7585_v42  ;;  %v1758_v9 = vsel %vm908_vm5, %v1745_v16, %v1747_v26  ;;  %vm11617_vm13 = vcmask 1045504  }
 0x1d4   : > { %v1937_v37 = vsel %vm1360_vm10, %v1758_v9, %v1784_v7  ;;  %v1385_v7 = vsel %vm11616_vm15, %v1368_v48, %v1180_v62  ;;  %vm11619_vm3 = vmmov %vm11617_vm13  ;;  %v1225_v10 = vsel %vm908_vm5, %v7543_v1, %v7547_v30  ;;  %v1226_v50 = vsel %vm908_vm5, %v7547_v30, %v7557_v0 }
 0x1d5   : > { %v1400_v60 = vsel %vm11619_vm3, %v1383_v38, %v1223_v28  ;;  %vm11620_vm4 = vcmask 1046528   ;;  %vm11625_vm15 = vmmov %vm11619_vm3 }
 0x1d6   : > { %v1249_v61 = vpop.permute.xlu1 %1248  ;;  %v7619_v54 = vpop.permute.xlu0 %1774 }
 0x1d7   : > { %v1785_v8 = vsel %vm1256_vm9, %v1773_v47, %v7619_v54  ;;  %v1355_v47 = vsel %vm11611_vm6, %v1338_v58, %v1101_v36  ;;  %v1402_v36 = vsel %vm11617_vm13, %v1385_v7, %v1224_v57  ;;  %vm11621_vm6 = vmmov %vm11620_vm4  ;;  %v1261_v1 = vsel %vm1256_vm9, %v7559_v13, %v1249_v61  ;;  %v11639_v7 = vld [vmem:[#allocation25_spill] sm:$0xff] }
 0x1d8   : > { %v1941_v29 = vsel %vm1360_vm10, %v1759_v56, %v1785_v8  ;;  %v1419_v23 = vsel %vm11620_vm4, %v1402_v36, %v1260_v45  ;;  %v1370_v8 = vsel %vm1360_vm10, %v1353_v40, %v1136_v11  ;;  %v1372_v58 = vsel %vm1360_vm10, %v1355_v47, %v1137_v12 }
 0x1d9   : > { %2226 = vmatprep.subr.bf16.mxu0 %v1941_v29  ;;  %v1417_v41 = vsel %vm11621_vm6, %v1400_v60, %v1259_v5  ;;  %vm11627_vm13 = vcmask 506880  }
 0x1da   : > { %v1467_v16 = vpop.permute.xlu1 %1466  ;;  %2227 = vmatpush1.bf16.msra.mxu0 %v1937_v37  ;;  %v7649_v26 = vpop.permute.xlu0 %1250  ;;  %v7712_v37 = vrot.slane %v1419_v23, 4  ;;  %v7716_v31 = vrot.slane %v1417_v41, 4  ;;  %vm11633_vm6 = vmmov %vm11627_vm13 }
 0x1db   : > { %v7657_v14 = vsel %vm11613_vm12, %v11612_v32, %v1467_v16  ;;  %v7660_v53 = vsel %vm11614_vm14, %v1467_v16, 0  ;;  %v1262_v9 = vsel %vm1256_vm9, %v1249_v61, %v7649_v26  ;;  %vm11622_vm12 = vmmov %vm11615_vm11  ;;  %v11630_v16 = vld [vmem:[#allocation23_spill] sm:$0xff] }
 0x1dc   : > { %v1551_v51 = vrot.slane %v7660_v53, 4  ;;  %v1550_v39 = vrot.slane %v7657_v14, 4  ;;  %v1387_v29 = vsel %vm11622_vm12, %v1370_v8, %v1181_v24  ;;  %vm11623_vm14 = vmmov %vm11615_vm11  ;;  %11626 = vst [vmem:[#allocation45_spill] sm:$0xff] %v7712_v37 }
 0x1dd   : > { %v1389_v33 = vsel %vm11623_vm14, %v1372_v58, %v1182_v4  ;;  %vm11624_vm11 = vmmov %vm11619_vm3  ;;  %11628 = vst [vmem:[#allocation22_spill] sm:$0xff] %v7716_v31 }
 0x1de   : > { %v1804_v56 = vpop.permute.xlu1 %1803  ;;  %1568 = vrot.lane.b32.xlu1 %v1551_v51, %s6218_s15  ;;  %1566 = vrot.lane.b32.xlu0 %v1550_v39, %s6218_s15  ;;  %v7691_v25 = vpop.permute.xlu0 %822  ;;  %v1404_v30 = vsel %vm11624_vm11, %v1387_v29, %v1225_v10  ;;  %v1406_v27 = vsel %vm11625_vm15, %v1389_v33, %v1226_v50  ;;  %vm11629_vm3 = vmmov %vm11620_vm4  ;;  %vm11631_vm4 = vcmask 261120  }
 0x1df   : > { %11618 = vst [vmem:[#allocation16_spill] sm:$0xff] %v7691_v25  ;;  %v1817_v40 = vsel %vm11627_vm13, %v7305_v43, %v1804_v56  ;;  %v1423_v62 = vsel %vm11629_vm3, %v1406_v27, %v1262_v9  ;;  %v7722_v48 = vsel %vm11631_vm4, %v11630_v16, %v7691_v25  ;;  %vm11634_vm12 = vmmov %vm11629_vm3  ;;  %vm11412_vm14 = vcmp.ne.s16.totalorder %v7691_v25, 0 }
 0x1e0   : > { %11632 = vst [vmem:[#allocation23_spill] sm:$0xff] %v7722_v48  ;;  %v1421_v61 = vsel %vm11634_vm12, %v1404_v30, %v1261_v1  ;;  %v1994_v43 = vsel %vm1360_vm10, %v1817_v40, %v7716_v31  ;;  %v7731_v32 = vrot.slane %v1423_v62, 4  ;;  %vm11411_vm11 = vcmp.ne.s16.totalorder %v7722_v48, 0  ;;  %vm11636_vm15 = vmmov %vm11633_vm6 }
 0x1e1   : > { %v7739_v12 = vrot.slane %v1421_v61, 4  ;;  %vm11640_vm13 = vcmask 15360   ;;  %vm11642_vm4 = vmmov %vm11633_vm6  ;;  %v1512_v50 = vsel %vm11411_vm11, %v7657_v14, 0 }
 0x1e2   : > { %v1808_v47 = vpop.permute.xlu1 %1807  ;;  %v1806_v11 = vpop.permute.xlu0 %1805  ;;  %11635 = vst [vmem:[#allocation59_spill] sm:$0xff] %v7731_v32  ;;  %vm11643_vm12 = vmmov %vm11642_vm4  ;;  %v1629_v1 = vrot.slane %v1512_v50, 4 }
 0x1e3   : > { %v1818_v13 = vsel %vm11633_vm6, %v1804_v56, %v1806_v11  ;;  %v1819_v28 = vsel %vm11636_vm15, %v1806_v11, %v1808_v47  ;;  %11638 = vst [vmem:[#allocation61_spill] sm:$0xff] %v7739_v12  ;;  %v1513_v56 = vsel %vm11412_vm14, %v7660_v53, 0  ;;  %vm11644_vm15 = vmmov %vm11642_vm4 }
 0x1e4   : > { %v1998_v57 = vsel %vm1360_vm10, %v1818_v13, %v7712_v37  ;;  %v2002_v10 = vsel %vm1360_vm10, %v1819_v28, %v7739_v12  ;;  %v1630_v9 = vrot.slane %v1513_v56, 4  ;;  %v11651_v28 = vld [vmem:[#allocation28_spill] sm:$0xff] }
 0x1e5   : > { %2167 = vmatprep.subr.bf16.mxu1 %v1998_v57 }
 0x1e6   : > { %v7735_v45 = vpop.permute.xlu1 %780  ;;  %2168 = vmatpush1.bf16.msra.mxu1 %v1994_v43  ;;  %v7737_v38 = vpop.permute.xlu0 %1809 }
 0x1e7   : > { %11637 = vst [vmem:[#allocation60_spill] sm:$0xff] %v7735_v45  ;;  %v7744_v5 = vsel %vm11640_vm13, %v11639_v7, %v7735_v45  ;;  %vm798_vm3 = vcmp.ne.s16.totalorder %v7735_v45, 0  ;;  %v1820_v24 = vsel %vm11642_vm4, %v1808_v47, %v7737_v38  ;;  %vm11646_vm13 = vmmov %vm11642_vm4 }
 0x1e8   : > { %11641 = vst [vmem:[#allocation25_spill] sm:$0xff] %v7744_v5  ;;  %vm11414_vm6 = vcmp.ne.s16.totalorder %v7744_v5, 0  ;;  %v1504_v4 = vsel %vm798_vm3, %v7660_v53, 0  ;;  %v2006_v36 = vsel %vm1360_vm10, %v1820_v24, %v7731_v32 }
 0x1e9   : > { %1603 = vrot.lane.b32.xlu1 %v1504_v4, %s6219_s16  ;;  %2228 = vmatprep.subr.bf16.mxu0 %v2006_v36  ;;  %v1503_v60 = vsel %vm11414_vm6, %v7657_v14, 0 }
 0x1ea   : > { %v1283_v23 = vpop.permute.xlu1 %1282  ;;  %1601 = vrot.lane.b32.xlu0 %v1503_v60, %s6219_s16  ;;  %2229 = vmatpush1.bf16.msra.mxu0 %v2002_v10  ;;  %v1281_v8 = vpop.permute.xlu0 %1280 }
 0x1eb   : > { %v1295_v58 = vsel %vm11643_vm12, %v7340_v34, %v1281_v8  ;;  %v1296_v41 = vsel %vm11644_vm15, %v1281_v8, %v1283_v23  ;;  %vm11647_vm12 = vcmask 1044480  }
 0x1ec   : > { %v1972_v29 = vrot.slane %v1295_v58, 4  ;;  %v1974_v33 = vrot.slane %v1296_v41, 4  ;;  %vm11648_vm15 = vmmov %vm11647_vm12 }
 0x1ed   : > { %1647 = vrot.lane.b32.xlu1 %v1630_v9, %s6220_s19 }
 0x1ee   : > { %v7772_v30 = vpop.permute.xlu1 %1286  ;;  %1645 = vrot.lane.b32.xlu0 %v1629_v1, %s6220_s19  ;;  %v1285_v27 = vpop.permute.xlu0 %1284  ;;  %v7777_v40 = vsel %vm1360_vm10, %v7712_v37, %v1974_v33  ;;  %v1973_v34 = vsel %vm1360_vm10, %v7716_v31, %v1972_v29 }
 0x1ef   : > { %11645 = vst [vmem:[#allocation62_spill] sm:$0xff] %v7777_v40  ;;  %v1297_v47 = vsel %vm11646_vm13, %v1283_v23, %v1285_v27  ;;  %v1298_v11 = vsel %vm11642_vm4, %v1285_v27, %v7772_v30  ;;  %6018 = vmatprep.subr.msk.bf16.mxu1 %vm11647_vm12, %v7777_v40  ;;  %v7787_v62 = vsel %vm11648_vm15, %v1973_v34, 0  ;;  %vm11652_vm13 = vcmask 269312   ;;  %vm11655_vm15 = vmmov %vm11647_vm12  ;;  %v11657_v23 = vld [vmem:[#allocation27_spill] sm:$0xff] }
 0x1f0   : > { %11649 = vst [vmem:[#allocation63_spill] sm:$0xff] %v7787_v62  ;;  %v1976_v16 = vrot.slane %v1297_v47, 4  ;;  %v1978_v13 = vrot.slane %v1298_v11, 4  ;;  %2170 = vmatpush1.bf16.msra.mxu1 %v7787_v62  ;;  %vm11653_vm4 = vmmov %vm11652_vm13 }
 0x1f2   : > { %v614_v61 = vpop.permute.xlu1 %613  ;;  %v7792_v57 = vsel %vm1360_vm10, %v7731_v32, %v1978_v13  ;;  %v1977_v43 = vsel %vm1360_vm10, %v7739_v12, %v1976_v16  ;;  %v7807_v4 = vpop.permute.xlu0 %864  ;;  %v11661_v13 = vld [vmem:[#allocation31_spill] sm:$0xff] }
 0x1f3   : > { %11650 = vst [vmem:[#allocation64_spill] sm:$0xff] %v7792_v57  ;;  %v7798_v7 = vsel %vm11652_vm13, %v11651_v28, %v614_v61  ;;  %v7801_v24 = vsel %vm11653_vm4, %v614_v61, 0  ;;  %6019 = vmatmul.mubr.msk.bf16.vlgmr.msra.gmra.mrb[0].mxu1 %vm2064_vm0, %v7396_v52  ;;  %6022 = vmatprep.subr.msk.bf16.mxu0 %vm11647_vm12, %v7792_v57  ;;  %11654 = vst [vmem:[#allocation28_spill] sm:$0xff] %v7807_v4  ;;  %v7810_v36 = vsel %vm11655_vm15, %v1977_v43, 0  ;;  %vm11658_vm13 = vcmask 277504  }
 0x1f4   : > { %11656 = vst [vmem:[#allocation65_spill] sm:$0xff] %v7810_v36  ;;  %v986_v56 = vrot.slane %v7801_v24, 7  ;;  %v985_v60 = vrot.slane %v7798_v7, 7  ;;  %2201 = vmatprep.mubr.bf16.mxu1 %v11589_v18  ;;  %2231 = vmatpush1.bf16.msra.mxu0 %v7810_v36  ;;  %v807_v10 = vsel %vm798_vm3, %v7801_v24, 0  ;;  %v806_v50 = vsel %vm11414_vm6, %v7798_v7, 0 }
 0x1f5   : > { %v7827_v8 = vsel %vm11658_vm13, %v11657_v23, %v7807_v4  ;;  %v1031_v58 = vrot.slane %v807_v10, 6  ;;  %v1030_v41 = vrot.slane %v806_v50, 6  ;;  %vm11400_vm12 = vcmp.ne.s16.totalorder %v7807_v4, 0 }
 0x1f6   : > { %1003 = vrot.lane.b32.xlu1 %v986_v56, %s6218_s15  ;;  %1001 = vrot.lane.b32.xlu0 %v985_v60, %s6218_s15  ;;  %11659 = vst [vmem:[#allocation27_spill] sm:$0xff] %v7827_v8  ;;  %vm11403_vm4 = vcmp.ne.s16.totalorder %v7827_v8, 0  ;;  %v1522_v9 = vsel %vm11400_vm12, %v7660_v53, 0  ;;  %v849_v27 = vsel %vm11412_vm14, %v7801_v24, 0  ;;  %v848_v34 = vsel %vm11411_vm11, %v7798_v7, 0  ;;  %v7862_v47 = vpop.permute.xlu0 %906 }
 0x1f7   : > { %6023 = vmatmul.mubr.msk.bf16.vlgmr.msra.gmra.mrb[12].mxu0 %vm2064_vm0, %v7396_v52  ;;  %v1521_v29 = vsel %vm11403_vm4, %v7657_v14, 0  ;;  %v1700_v33 = vrot.slane %v1522_v9, 4  ;;  %11660 = vst [vmem:[#allocation66_spill] sm:$0xff] %v7862_v47  ;;  %v1076_v11 = vrot.slane %v849_v27, 5  ;;  %v1075_v16 = vrot.slane %v848_v34, 5 }
 0x1f8   : > { %2262 = vmatprep.mubr.bf16.mxu0 %v11589_v18  ;;  %v1699_v1 = vrot.slane %v1521_v29, 4  ;;  %v7870_v61 = vsel %vm908_vm5, %v11661_v13, %v7862_v47  ;;  %v1112_v43 = vrot.slane %v7801_v24, 4  ;;  %v1111_v28 = vrot.slane %v7798_v7, 4  ;;  %v2022_v13 = vld [vmem:[%s11236_s4 + $0x8] sm:$0xff] }
 0x1f9   : > { %11662 = vst [vmem:[#allocation31_spill] sm:$0xff] %v7870_v61  ;;  %v891_v56 = vsel %vm11400_vm12, %v7801_v24, 0  ;;  %v890_v60 = vsel %vm11403_vm4, %v7798_v7, 0  ;;  %vm11399_vm15 = vcmp.ne.s16.totalorder %v7870_v61, 0  ;;  %vm11398_vm13 = vcmp.ne.s16.totalorder %v7862_v47, 0 }
 0x1fa   : > { %1048 = vrot.lane.b32.xlu1 %v1031_v58, %s6219_s16  ;;  %1046 = vrot.lane.b32.xlu0 %v1030_v41, %s6219_s16  ;;  %v1157_v10 = vrot.slane %v891_v56, 3  ;;  %v1156_v50 = vrot.slane %v890_v60, 3  ;;  %v933_v23 = vsel %vm11398_vm13, %v7801_v24, 0  ;;  %v932_v58 = vsel %vm11399_vm15, %v7798_v7, 0 }
 0x1fb   : > { %6020 = vmatmul.mubr.msk.bf16.gmra.mrb[4].mxu1 %vm2064_vm0, %v7431_v17  ;;  %v1202_v41 = vrot.slane %v933_v23, 2  ;;  %v1201_v9 = vrot.slane %v932_v58, 2  ;;  %v1531_v29 = vsel %vm11398_vm13, %v7660_v53, 0  ;;  %vm11664_vm13 = vcmask 539648  }
 0x1fc   : > { %2211 = vmatprep.mubr.bf16.mxu1 %v11589_v18  ;;  %v1237_v34 = vrot.slane %v7801_v24, 1  ;;  %vm11674_vm11 = vcmask 1040384  }
 0x1fe   : > { %1673 = vrot.lane.b32.xlu1 %v7660_v53, %s6217_s14  ;;  %1671 = vrot.lane.b32.xlu0 %v7657_v14, %s6217_s14 }
 0x1ff   : > { %6024 = vmatmul.mubr.msk.bf16.gmra.mrb[16].mxu0 %vm2064_vm0, %v7431_v17 }
 0x200   : > { %2272 = vmatprep.mubr.bf16.mxu0 %v11589_v18 }
 0x202   : > { %1717 = vrot.lane.b32.xlu1 %v1700_v33, %s6221_s20  ;;  %1715 = vrot.lane.b32.xlu0 %v1699_v1, %s6221_s20  ;;  %v1530_v33 = vsel %vm11399_vm15, %v7657_v14, 0  ;;  %v7904_v1 = vpop.permute.xlu1 %948 }
 0x203   : > { %6021 = vmatmul.mubr.msk.bf16.gmra.mrb[8].mxu1 %vm2064_vm0, %v7462_v15  ;;  %11663 = vst [vmem:[#allocation67_spill] sm:$0xff] %v7904_v1  ;;  %v7915_v27 = vsel %vm11664_vm13, %v6867_v59, %v7904_v1  ;;  %vm11402_vm12 = vcmp.ne.s16.totalorder %v7904_v1, 0 }
 0x204   : > { %2313 = vmatprep.mubr.bf16.mxu1 %v11589_v18  ;;  %11665 = vst [vmem:[#allocation68_spill] sm:$0xff] %v7915_v27  ;;  %vm11401_vm15 = vcmp.ne.s16.totalorder %v7915_v27, 0 }
 0x205   : > { %v1539_v59 = vsel %vm11401_vm15, %v7657_v14, 0 }
 0x206   : > { %1093 = vrot.lane.b32.xlu1 %v1076_v11, %s6220_s19  ;;  %1091 = vrot.lane.b32.xlu0 %v1075_v16, %s6220_s19  ;;  %v1236_v11 = vrot.slane %v7798_v7, 1  ;;  %v974_v16 = vsel %vm11401_vm15, %v7798_v7, 0  ;;  %vm701_vm15 = vcmp.ne.s16.totalorder %v6407_v46, 0 }
 0x207   : > { %6025 = vmatmul.mubr.msk.bf16.gmra.mrb[20].mxu0 %vm2064_vm0, %v7462_v15 }
 0x20a   : > { %1129 = vrot.lane.b32.xlu1 %v1112_v43, %s6217_s14  ;;  %1127 = vrot.lane.b32.xlu0 %v1111_v28, %s6217_s14  ;;  %v2025_v43 = vld [vmem:[%s11236_s4 + $0x20] sm:$0xff] }
 0x20e   : > { %1174 = vrot.lane.b32.xlu1 %v1157_v10, %s6221_s20  ;;  %1172 = vrot.lane.b32.xlu0 %v1156_v50, %s6221_s20  ;;  %v11668_v50 = vld [vmem:[#allocation9_spill] sm:$0xff] }
 0x20f   : > { %vm11413_vm13 = vcmp.ne.s16.totalorder %v11668_v50, 0 }
 0x212   : > { %1219 = vrot.lane.b32.xlu1 %v1202_v41, %s6215_s12  ;;  %1217 = vrot.lane.b32.xlu0 %v1201_v9, %s6215_s12 }
 0x216   : > { %1752 = vrot.lane.b32.xlu1 %v1531_v29, %s6215_s12  ;;  %1750 = vrot.lane.b32.xlu0 %v1530_v33, %s6215_s12  ;;  %v1495_v29 = vsel %vm701_vm15, %v7657_v14, 0  ;;  %v1494_v33 = vsel %vm11413_vm13, %v6861_v55, 0 }
 0x21a   : > { %1778 = vrot.lane.b32.xlu1 %v1551_v51, %s6222_s21  ;;  %1776 = vrot.lane.b32.xlu0 %v1550_v39, %s6222_s21  ;;  %v1540_v51 = vsel %vm11402_vm12, %v7660_v53, 0  ;;  %v975_v39 = vsel %vm11402_vm12, %v7801_v24, 0  ;;  %v2023_v53 = vld [vmem:[%s11236_s4 + $0x10] sm:$0xff]  ;;  %v2024_v24 = vld [vmem:[%s11236_s4 + $0x18] sm:$0xff]  ;;  %vm11669_vm12 = vcmask 1031168  }
 0x21b   : > { %vm11670_vm4 = vmmov %vm11669_vm12 }
 0x21e   : > { %1254 = vrot.lane.b32.xlu1 %v1237_v34, %s6222_s21  ;;  %1252 = vrot.lane.b32.xlu0 %v1236_v11, %s6222_s21 }
 0x222   : > { %1813 = vrot.lane.b32.xlu1 %v1540_v51, %s6223_s24  ;;  %1811 = vrot.lane.b32.xlu0 %v1539_v59, %s6223_s24 }
 0x226   : > { %1290 = vrot.lane.b32.xlu1 %v975_v39, %s6223_s24  ;;  %1288 = vrot.lane.b32.xlu0 %v974_v16, %s6223_s24 }
 0x22a   : > { %2038 = vperm.xlu1 %6172, %v2023_v53   ;;  %2033 = vperm.xlu0 %6171, %v2022_v13  }
 0x22e   : > { %2043 = vperm.xlu1 %6172, %v2024_v24   ;;  %2048 = vperm.xlu0 %6171, %v2025_v43  }
 0x248   : > { %v7951_v28 = vpop.f32.mrb[0].mxu0 }
 0x249   : > { %11666 = vst [vmem:[#allocation69_spill] sm:$0xff] %v7951_v28  ;;  %v7953_v56 = vpop.f32.mrb[1].mxu0 }
 0x24a   : > { %11667 = vst [vmem:[#allocation70_spill] sm:$0xff] %v7953_v56  ;;  %v7955_v60 = vpop.f32.mrb[2].mxu0 }
 0x24b   : > { %v7957_v10 = vpop.f32.mrb[3].mxu0 }
 0x250   : > { %v1569_v23 = vpop.permute.xlu1 %1568  ;;  %v1567_v58 = vpop.permute.xlu0 %1566 }
 0x251   : > { %v1576_v41 = vsel %vm1005_vm2, %v7399_v20, %v1567_v58  ;;  %v1577_v9 = vsel %vm1005_vm2, %v1567_v58, %v1569_v23  ;;  %v7970_v34 = vpop.f32.mrb[4].mxu0 }
 0x252   : > { %v1853_v11 = vsel %vm1360_vm10, %v1495_v29, %v1577_v9  ;;  %v1849_v51 = vsel %vm1360_vm10, %v1494_v33, %v1576_v41  ;;  %v7974_v59 = vpop.f32.mrb[5].mxu0 }
 0x253   : > { %2281 = vmatprep.subr.bf16.mxu1 %v1853_v11  ;;  %v7976_v20 = vpop.f32.mrb[6].mxu0 }
 0x254   : > { %2282 = vmatpush1.bf16.msra.mxu1 %v1849_v51  ;;  %v7978_v39 = vpop.f32.mrb[7].mxu0 }
 0x258   : > { %v7980_v16 = vpop.f32.mrb[8].mxu0 }
 0x259   : > { %v7982_v14 = vpop.f32.mrb[9].mxu0 }
 0x25a   : > { %v2156_v53 = vpop.f32.mrb[10].mxu0 }
 0x25b   : > { %v1604_v55 = vpop.permute.xlu1 %1603  ;;  %v2157_v13 = vpop.f32.mrb[11].mxu0 }
 0x25c   : > { %v1602_v24 = vpop.permute.xlu0 %1601 }
 0x25d   : > { %v1611_v58 = vsel %vm11669_vm12, %v7453_v22, %v1602_v24  ;;  %v1612_v41 = vsel %vm11670_vm4, %v1602_v24, %v1604_v55  ;;  %v11671_v24 = vld [vmem:[#allocation58_spill] sm:$0xff]  ;;  %vm11672_vm12 = vmmov %vm11670_vm4 }
 0x25f   : > { %v1648_v43 = vpop.permute.xlu1 %1647 }
 0x260   : > { %v1646_v23 = vpop.permute.xlu0 %1645 }
 0x261   : > { %v1655_v9 = vsel %vm1095_vm8, %v7467_v21, %v1646_v23  ;;  %v1656_v29 = vsel %vm1095_vm8, %v1646_v23, %v1648_v43 }
 0x262   : > { %v1885_v33 = vsel %vm1360_vm10, %v1612_v41, %v1656_v29  ;;  %v1881_v11 = vsel %vm1360_vm10, %v1611_v58, %v1655_v9 }
 0x263   : > { %2283 = vmatprep.subr.bf16.mxu1 %v1885_v33 }
 0x264   : > { %2284 = vmatpush1.bf16.msra.mxu1 %v1881_v11 }
 0x268   : > { %v1004_v51 = vpop.permute.xlu1 %1003  ;;  %v1002_v53 = vpop.permute.xlu0 %1001 }
 0x26c   : > { %v1049_v13 = vpop.permute.xlu1 %1048  ;;  %v1047_v36 = vpop.permute.xlu0 %1046 }
 0x270   : > { %v1674_v57 = vpop.permute.xlu1 %1673  ;;  %v1672_v62 = vpop.permute.xlu0 %1671 }
 0x271   : > { %v1681_v55 = vsel %vm1131_vm7, %v7509_v44, %v1672_v62  ;;  %v1682_v21 = vsel %vm1131_vm7, %v1672_v62, %v1674_v57  ;;  %v1012_v62 = vsel %vm1005_vm2, %v7489_v49, %v1002_v53  ;;  %v1013_v57 = vsel %vm1005_vm2, %v1002_v53, %v1004_v51 }
 0x274   : > { %v1718_v22 = vpop.permute.xlu1 %1717  ;;  %v1716_v12 = vpop.permute.xlu0 %1715 }
 0x275   : > { %v1725_v43 = vsel %vm1176_vm1, %v11671_v24, %v1716_v12  ;;  %v1726_v23 = vsel %vm1176_vm1, %v1716_v12, %v1718_v22  ;;  %v1057_v12 = vsel %vm11670_vm4, %v7505_v19, %v1047_v36  ;;  %v1058_v22 = vsel %vm11672_vm12, %v1047_v36, %v1049_v13  ;;  %vm11675_vm4 = vmmov %vm11674_vm11 }
 0x276   : > { %v1917_v58 = vsel %vm1360_vm10, %v1682_v21, %v1726_v23  ;;  %v1913_v41 = vsel %vm1360_vm10, %v1681_v55, %v1725_v43  ;;  %v11673_v55 = vld [vmem:[#allocation41_spill] sm:$0xff]  ;;  %v709_v24 = vsel %vm701_vm15, %v7798_v7, 0  ;;  %vm11676_vm12 = vcmask 1041408  }
 0x277   : > { %2285 = vmatprep.subr.bf16.mxu1 %v1917_v58  ;;  %v708_v21 = vsel %vm11413_vm13, %v11673_v55, 0  ;;  %v1325_v19 = vsel %vm11675_vm4, %v709_v24, %v1013_v57  ;;  %vm11677_vm14 = vmmov %vm11676_vm12  ;;  %vm11678_vm13 = vcmask 1042432   ;;  %vm11684_vm4 = vcmask 1046528  }
 0x278   : > { %v1094_v9 = vpop.permute.xlu1 %1093  ;;  %2286 = vmatpush1.bf16.msra.mxu1 %v1913_v41  ;;  %v1092_v29 = vpop.permute.xlu0 %1091  ;;  %v1322_v53 = vsel %vm11674_vm11, %v708_v21, %v1012_v62  ;;  %v1342_v13 = vsel %vm11677_vm14, %v1325_v19, %v1058_v22  ;;  %vm11679_vm6 = vmmov %vm11678_vm13  ;;  %vm11680_vm14 = vcmask 1044480  }
 0x279   : > { %v1102_v43 = vsel %vm1095_vm8, %v7525_v63, %v1092_v29  ;;  %v1103_v49 = vsel %vm1095_vm8, %v1092_v29, %v1094_v9  ;;  %v1340_v36 = vsel %vm11676_vm12, %v1322_v53, %v1057_v12  ;;  %vm11681_vm11 = vmmov %vm11680_vm14 }
 0x27a   : > { %v1357_v58 = vsel %vm11678_vm13, %v1340_v36, %v1102_v43  ;;  %v1359_v41 = vsel %vm11679_vm6, %v1342_v13, %v1103_v49  ;;  %vm11682_vm6 = vcmask 1045504   ;;  %vm11685_vm12 = vmmov %vm11684_vm4 }
 0x27b   : > { %vm11683_vm13 = vmmov %vm11682_vm6 }
 0x27c   : > { %v1130_v33 = vpop.permute.xlu1 %1129  ;;  %v1128_v11 = vpop.permute.xlu0 %1127 }
 0x27d   : > { %v1138_v7 = vsel %vm1131_vm7, %v7533_v35, %v1128_v11  ;;  %v1139_v63 = vsel %vm1131_vm7, %v1128_v11, %v1130_v33 }
 0x280   : > { %v1175_v32 = vpop.permute.xlu1 %1174  ;;  %v1173_v40 = vpop.permute.xlu0 %1172 }
 0x281   : > { %v1183_v9 = vsel %vm1176_vm1, %v7541_v6, %v1173_v40  ;;  %v1184_v29 = vsel %vm1176_vm1, %v1173_v40, %v1175_v32  ;;  %v1374_v40 = vsel %vm1360_vm10, %v1357_v58, %v1138_v7 }
 0x282   : > { %v1391_v11 = vsel %vm11680_vm14, %v1374_v40, %v1183_v9  ;;  %vm11688_vm14 = vcmask 506880  }
 0x284   : > { %v1220_v44 = vpop.permute.xlu1 %1219  ;;  %v1218_v31 = vpop.permute.xlu0 %1217 }
 0x285   : > { %v1227_v35 = vsel %vm908_vm5, %v7557_v0, %v1218_v31  ;;  %v1228_v33 = vsel %vm908_vm5, %v1218_v31, %v1220_v44 }
 0x286   : > { %v1408_v0 = vsel %vm11682_vm6, %v1391_v11, %v1227_v35 }
 0x288   : > { %v1753_v23 = vpop.permute.xlu1 %1752  ;;  %v1751_v51 = vpop.permute.xlu0 %1750 }
 0x289   : > { %v1760_v12 = vsel %vm908_vm5, %v7585_v42, %v1751_v51  ;;  %v1761_v22 = vsel %vm908_vm5, %v1751_v51, %v1753_v23  ;;  %v1376_v42 = vsel %vm1360_vm10, %v1359_v41, %v1139_v63 }
 0x28c   : > { %v1779_v62 = vpop.permute.xlu1 %1778  ;;  %v1777_v57 = vpop.permute.xlu0 %1776 }
 0x28d   : > { %v1786_v55 = vsel %vm1256_vm9, %v7619_v54, %v1777_v57  ;;  %v1787_v21 = vsel %vm1256_vm9, %v1777_v57, %v1779_v62  ;;  %v1393_v54 = vsel %vm11681_vm11, %v1376_v42, %v1184_v29  ;;  %vm11689_vm11 = vmmov %vm11688_vm14 }
 0x28e   : > { %v1949_v6 = vsel %vm1360_vm10, %v1761_v22, %v1787_v21  ;;  %v1945_v32 = vsel %vm1360_vm10, %v1760_v12, %v1786_v55  ;;  %v1410_v31 = vsel %vm11683_vm13, %v1393_v54, %v1228_v33  ;;  %vm11690_vm6 = vmmov %vm11689_vm11 }
 0x28f   : > { %2287 = vmatprep.subr.bf16.mxu1 %v1949_v6  ;;  %vm11691_vm13 = vmmov %vm11690_vm6 }
 0x290   : > { %v1255_v24 = vpop.permute.xlu1 %1254  ;;  %2288 = vmatpush1.bf16.msra.mxu1 %v1945_v32  ;;  %v1253_v43 = vpop.permute.xlu0 %1252 }
 0x291   : > { %v1263_v44 = vsel %vm1256_vm9, %v7649_v26, %v1253_v43  ;;  %v1264_v49 = vsel %vm1256_vm9, %v1253_v43, %v1255_v24 }
 0x292   : > { %v1425_v23 = vsel %vm11684_vm4, %v1408_v0, %v1263_v44  ;;  %v1427_v51 = vsel %vm11685_vm12, %v1410_v31, %v1264_v49  ;;  %vm11693_vm4 = vcmask 1044480  }
 0x293   : > { %v8049_v53 = vrot.slane %v1425_v23, 4  ;;  %v8051_v19 = vrot.slane %v1427_v51, 4  ;;  %vm11694_vm12 = vmmov %vm11693_vm4 }
 0x294   : > { %v1814_v36 = vpop.permute.xlu1 %1813  ;;  %v1812_v13 = vpop.permute.xlu0 %1811 }
 0x295   : > { %11686 = vst [vmem:[#allocation58_spill] sm:$0xff] %v8049_v53  ;;  %11687 = vst [vmem:[#allocation41_spill] sm:$0xff] %v8051_v19  ;;  %v1821_v58 = vsel %vm11688_vm14, %v7737_v38, %v1812_v13  ;;  %v1822_v41 = vsel %vm11689_vm11, %v1812_v13, %v1814_v36  ;;  %vm11700_vm14 = vcmask 269312  }
 0x296   : > { %v2014_v26 = vsel %vm1360_vm10, %v1822_v41, %v8051_v19  ;;  %v2010_v7 = vsel %vm1360_vm10, %v1821_v58, %v8049_v53  ;;  %vm11701_vm11 = vmmov %vm11700_vm14 }
 0x297   : > { %2289 = vmatprep.subr.bf16.mxu1 %v2014_v26 }
 0x298   : > { %v1291_v63 = vpop.permute.xlu1 %1290  ;;  %2290 = vmatpush1.bf16.msra.mxu1 %v2010_v7  ;;  %v1289_v9 = vpop.permute.xlu0 %1288 }
 0x299   : > { %v1299_v29 = vsel %vm11690_vm6, %v7772_v30, %v1289_v9  ;;  %v1300_v62 = vsel %vm11691_vm13, %v1289_v9, %v1291_v63 }
 0x29a   : > { %v1980_v57 = vrot.slane %v1299_v29, 4  ;;  %v1982_v12 = vrot.slane %v1300_v62, 4 }
 0x29c   : > { %v8065_v38 = vsel %vm1360_vm10, %v8051_v19, %v1982_v12  ;;  %v1981_v22 = vsel %vm1360_vm10, %v8049_v53, %v1980_v57 }
 0x29d   : > { %11692 = vst [vmem:[#allocation71_spill] sm:$0xff] %v8065_v38  ;;  %6026 = vmatprep.subr.msk.bf16.mxu1 %vm11693_vm4, %v8065_v38  ;;  %v8072_v55 = vsel %vm11694_vm12, %v1981_v22, 0  ;;  %vm11706_vm4 = vmmov %vm11701_vm11 }
 0x29e   : > { %11695 = vst [vmem:[#allocation72_spill] sm:$0xff] %v8072_v55  ;;  %2292 = vmatpush1.bf16.msra.mxu1 %v8072_v55  ;;  %vm11707_vm12 = vmmov %vm11706_vm4 }
 0x2a1   : > { %6027 = vmatmul.mubr.msk.bf16.vlgmr.msra.gmra.mrb[12].mxu1 %vm2064_vm0, %v7396_v52 }
 0x2a2   : > { %2323 = vmatprep.mubr.bf16.mxu1 %v11589_v18 }
 0x2a9   : > { %v8078_v30 = vpop.permute.xlu1 %2038  ;;  %6028 = vmatmul.mubr.msk.bf16.gmra.mrb[16].mxu1 %vm2064_vm0, %v7431_v17  ;;  %v8082_v21 = vpop.permute.xlu0 %2033 }
 0x2aa   : > { %2333 = vmatprep.mubr.bf16.mxu1 %v11589_v18  ;;  %v2139_v35 = vadd.f32 %v7957_v10, %v8082_v21  ;;  %v2145_v33 = vadd.f32 %v7974_v59, %v8078_v30  ;;  %v2137_v52 = vadd.f32 %v7955_v60, %v8082_v21  ;;  %v2143_v6 = vadd.f32 %v7970_v34, %v8078_v30 }
 0x2ac   : > { %v2343_v32 = vmax.f32 %v2139_v35, 0.0  ;;  %v2351_v40 = vmax.f32 %v2145_v33, 0.0  ;;  %v2342_v42 = vmax.f32 %v2137_v52, 0.0  ;;  %v2350_v17 = vmax.f32 %v2143_v6, 0.0 }
 0x2ad   : > { %v8093_v11 = vpop.permute.xlu1 %2043  ;;  %v8095_v54 = vpop.permute.xlu0 %2048 }
 0x2ae   : > { %v2375_v24 = vpack.c.bf16 %v2351_v40, %v2343_v32  ;;  %v2374_v43 = vpack.c.bf16 %v2350_v17, %v2342_v42  ;;  %v2149_v10 = vadd.f32 %v7978_v39, %v8093_v11  ;;  %v2155_v59 = vadd.f32 %v7982_v14, %v8095_v54 }
 0x2af   : > { %v2147_v60 = vadd.f32 %v7976_v20, %v8093_v11  ;;  %v2153_v34 = vadd.f32 %v7980_v16, %v8095_v54 }
 0x2b0   : > { %2412 = vrot.lane.b32.xlu0 %v2375_v24, %s6210_s23  ;;  %2410 = vrot.lane.b32.xlu1 %v2374_v43, %s6210_s23  ;;  %v2359_v0 = vmax.f32 %v2149_v10, 0.0  ;;  %v2367_v31 = vmax.f32 %v2155_v59, 0.0 }
 0x2b1   : > { %6029 = vmatmul.mubr.msk.bf16.gmra.mrb[20].mxu1 %vm2064_vm0, %v7462_v15  ;;  %v2358_v44 = vmax.f32 %v2147_v60, 0.0  ;;  %v2366_v39 = vmax.f32 %v2153_v34, 0.0 }
 0x2b2   : > { %v2383_v49 = vpack.c.bf16 %v2367_v31, %v2359_v0 }
 0x2b3   : > { %v2382_v23 = vpack.c.bf16 %v2366_v39, %v2358_v44 }
 0x2c6   : > { %v8109_v14 = vpop.f32.mrb[0].mxu1 }
 0x2c7   : > { %11696 = vst [vmem:[#allocation73_spill] sm:$0xff] %v8109_v14  ;;  %v8111_v51 = vpop.f32.mrb[1].mxu1 }
 0x2c8   : > { %11697 = vst [vmem:[#allocation74_spill] sm:$0xff] %v8111_v51  ;;  %v2197_v20 = vpop.f32.mrb[2].mxu1 }
 0x2c9   : > { %v2199_v36 = vpop.f32.mrb[3].mxu1  ;;  %v2198_v16 = vadd.f32 %v2197_v20, %v8082_v21 }
 0x2ca   : > { %v8114_v13 = vpop.f32.mrb[12].mxu0  ;;  %v2200_v58 = vadd.f32 %v2199_v36, %v8082_v21 }
 0x2cb   : > { %11698 = vst [vmem:[#allocation75_spill] sm:$0xff] %v8114_v13  ;;  %v8117_v41 = vpop.f32.mrb[13].mxu0  ;;  %v2344_v63 = vmax.f32 %v2198_v16, 0.0  ;;  %v11807_v13 = vld [vmem:[#allocation38_spill] sm:$0xff] }
 0x2cc   : > { %11699 = vst [vmem:[#allocation76_spill] sm:$0xff] %v8117_v41  ;;  %v2258_v26 = vpop.f32.mrb[14].mxu0  ;;  %v2345_v62 = vmax.f32 %v2200_v58, 0.0 }
 0x2cd   : > { %v2260_v7 = vpop.f32.mrb[15].mxu0  ;;  %v2259_v22 = vadd.f32 %v2258_v26, %v8082_v21 }
 0x2ce   : > { %v2203_v15 = vpop.f32.mrb[4].mxu1  ;;  %v2261_v52 = vadd.f32 %v2260_v7, %v8082_v21 }
 0x2cf   : > { %v2204_v9 = vadd.f32 %v2203_v15, %v8078_v30  ;;  %v2205_v29 = vpop.f32.mrb[5].mxu1  ;;  %v2346_v43 = vmax.f32 %v2259_v22, 0.0 }
 0x2d0   : > { %v2206_v57 = vadd.f32 %v2205_v29, %v8078_v30  ;;  %v2207_v12 = vpop.f32.mrb[6].mxu1  ;;  %v2347_v60 = vmax.f32 %v2261_v52, 0.0 }
 0x2d1   : > { %v2352_v35 = vmax.f32 %v2204_v9, 0.0  ;;  %v2209_v33 = vpop.f32.mrb[7].mxu1  ;;  %v2208_v40 = vadd.f32 %v2207_v12, %v8093_v11 }
 0x2d2   : > { %v2353_v6 = vmax.f32 %v2206_v57, 0.0  ;;  %v2264_v42 = vpop.f32.mrb[16].mxu0  ;;  %v2210_v24 = vadd.f32 %v2209_v33, %v8093_v11 }
 0x2d3   : > { %v2376_v32 = vpack.c.bf16 %v2352_v35, %v2344_v63  ;;  %v2265_v10 = vadd.f32 %v2264_v42, %v8078_v30  ;;  %v2266_v59 = vpop.f32.mrb[17].mxu0  ;;  %v2360_v20 = vmax.f32 %v2208_v40, 0.0 }
 0x2d4   : > { %v2377_v17 = vpack.c.bf16 %v2353_v6, %v2345_v62  ;;  %v2267_v34 = vadd.f32 %v2266_v59, %v8078_v30  ;;  %v2268_v0 = vpop.f32.mrb[18].mxu0  ;;  %v2361_v26 = vmax.f32 %v2210_v24, 0.0 }
 0x2d5   : > { %2414 = vrot.lane.b32.xlu1 %v2376_v32, %s6210_s23  ;;  %v2354_v44 = vmax.f32 %v2265_v10, 0.0  ;;  %v2270_v39 = vpop.f32.mrb[19].mxu0  ;;  %v2269_v63 = vadd.f32 %v2268_v0, %v8093_v11 }
 0x2d6   : > { %v2213_v31 = vpop.f32.mrb[8].mxu1  ;;  %2416 = vrot.lane.b32.xlu0 %v2377_v17, %s6210_s23  ;;  %v2355_v58 = vmax.f32 %v2267_v34, 0.0  ;;  %v2271_v57 = vadd.f32 %v2270_v39, %v8093_v11  ;;  %v11704_v39 = vld [vmem:[#allocation2_spill] sm:$0xff] }
 0x2d7   : > { %v2214_v36 = vadd.f32 %v2213_v31, %v8095_v54  ;;  %v2215_v16 = vpop.f32.mrb[9].mxu1  ;;  %v2378_v7 = vpack.c.bf16 %v2354_v44, %v2346_v43  ;;  %v2362_v6 = vmax.f32 %v2269_v63, 0.0  ;;  %v11702_v44 = vld [vmem:[#allocation4_spill] sm:$0xff]  ;;  %vm11705_vm13 = vcmp.ne.s16.totalorder %v11704_v39, 0  ;;  %v11710_v63 = vld [vmem:[#allocation6_spill] sm:$0xff] }
 0x2d8   : > { %v2216_v15 = vadd.f32 %v2215_v16, %v8095_v54  ;;  %v2217_v9 = vpop.f32.mrb[10].mxu1  ;;  %v2379_v62 = vpack.c.bf16 %v2355_v58, %v2347_v60  ;;  %v2363_v42 = vmax.f32 %v2271_v57, 0.0  ;;  %vm11703_vm6 = vcmp.ne.s16.totalorder %v11702_v44, 0 }
 0x2d9   : > { %v2368_v29 = vmax.f32 %v2214_v36, 0.0  ;;  %2428 = vrot.lane.b32.xlu1 %v2383_v49, %s6210_s23  ;;  %v2218_v12 = vpop.f32.mrb[11].mxu1 }
 0x2da   : > { %v2369_v22 = vmax.f32 %v2216_v15, 0.0  ;;  %2426 = vrot.lane.b32.xlu0 %v2382_v23, %s6210_s23  ;;  %v2274_v33 = vpop.f32.mrb[20].mxu0  ;;  %v11708_v15 = vld [vmem:[#allocation3_spill] sm:$0xff] }
 0x2db   : > { %v2384_v35 = vpack.c.bf16 %v2368_v29, %v2360_v20  ;;  %v2275_v32 = vadd.f32 %v2274_v33, %v8095_v54  ;;  %v2276_v40 = vpop.f32.mrb[21].mxu0 }
 0x2dc   : > { %v2385_v52 = vpack.c.bf16 %v2369_v22, %v2361_v26  ;;  %v2277_v17 = vadd.f32 %v2276_v40, %v8095_v54  ;;  %v2278_v24 = vpop.f32.mrb[22].mxu0 }
 0x2dd   : > { %v2370_v49 = vmax.f32 %v2275_v32, 0.0  ;;  %v2279_v43 = vpop.f32.mrb[23].mxu0 }
 0x2de   : > { %2432 = vrot.lane.b32.xlu1 %v2385_v52, %s6210_s23  ;;  %2430 = vrot.lane.b32.xlu0 %v2384_v35, %s6210_s23  ;;  %v2371_v10 = vmax.f32 %v2277_v17, 0.0 }
 0x2df   : > { %v2386_v59 = vpack.c.bf16 %v2370_v49, %v2362_v6 }
 0x2e0   : > { %v8139_v23 = vpack.c.bf16 %v2371_v10, %v2363_v42 }
 0x2e2   : > { %2418 = vrot.lane.b32.xlu1 %v2378_v7, %s6210_s23 }
 0x2e6   : > { %2420 = vrot.lane.b32.xlu1 %v2379_v62, %s6210_s23 }
 0x322   : > { %v2411_v60 = vpop.permute.xlu1 %2410  ;;  %v2413_v34 = vpop.permute.xlu0 %2412 }
 0x323   : > { %v8144_v0 = vsel %vm11700_vm14, 0, %v2411_v60  ;;  %v8147_v31 = vsel %vm11701_vm11, %v2411_v60, %v2413_v34  ;;  %vm11709_vm14 = vcmp.ne.s16.totalorder %v11708_v15, 0  ;;  %vm11711_vm11 = vcmp.ne.s16.totalorder %v11710_v63, 0 }
 0x324   : > { %6033 = vmatprep.subr.msk.bf16.mxu0 %vm11703_vm6, %v8147_v31  ;;  %v2482_v20 = vsel %vm11705_vm13, %v8144_v0, 0  ;;  %vm11712_vm6 = vmmov %vm11706_vm4 }
 0x325   : > { %3258 = vmatpush1.bf16.msra.mxu0 %v2482_v20  ;;  %vm11713_vm13 = vmmov %vm11706_vm4 }
 0x347   : > { %v2415_v36 = vpop.permute.xlu1 %2414 }
 0x348   : > { %v8156_v16 = vsel %vm11706_vm4, %v2413_v34, %v2415_v36  ;;  %v8158_v58 = vpop.permute.xlu0 %2416  ;;  %vm11714_vm4 = vcmp.ne.s16.totalorder %v11702_v44, 0 }
 0x349   : > { %v8162_v26 = vsel %vm11707_vm12, %v2415_v36, %v8158_v58  ;;  %v2484_v7 = vsel %vm11709_vm14, %v8156_v16, 0  ;;  %vm11715_vm12 = vcmp.ne.s16.totalorder %v11704_v39, 0  ;;  %vm11716_vm14 = vmmov %vm11712_vm6 }
 0x34a   : > { %6036 = vmatprep.subr.msk.bf16.mxu1 %vm11711_vm11, %v8162_v26  ;;  %vm11717_vm11 = vmmov %vm11712_vm6 }
 0x34b   : > { %v2429_v9 = vpop.permute.xlu1 %2428  ;;  %3344 = vmatpush1.bf16.msra.mxu1 %v2484_v7 }
 0x34c   : > { %v2427_v29 = vpop.permute.xlu0 %2426 }
 0x34d   : > { %v8171_v62 = vsel %vm11712_vm6, %v2427_v29, %v2429_v9  ;;  %v8174_v57 = vsel %vm11713_vm13, 0, %v2427_v29  ;;  %vm11718_vm6 = vcmp.ne.s16.totalorder %v11710_v63, 0  ;;  %vm11719_vm13 = vcmp.ne.s16.totalorder %v11708_v15, 0 }
 0x34e   : > { %6034 = vmatprep.subr.msk.bf16.mxu0 %vm11714_vm4, %v8171_v62  ;;  %v2490_v12 = vsel %vm11715_vm12, %v8174_v57, 0 }
 0x34f   : > { %3260 = vmatpush1.bf16.msra.mxu0 %v2490_v12 }
 0x350   : > { %v8182_v22 = vpop.permute.xlu1 %2432  ;;  %v2431_v35 = vpop.permute.xlu0 %2430 }
 0x351   : > { %v8185_v33 = vsel %vm11716_vm14, %v2429_v9, %v2431_v35  ;;  %v8189_v52 = vsel %vm11717_vm11, %v2431_v35, %v8182_v22 }
 0x352   : > { %6037 = vmatprep.subr.msk.bf16.mxu1 %vm11718_vm6, %v8189_v52  ;;  %v2492_v6 = vsel %vm11719_vm13, %v8185_v33, 0 }
 0x353   : > { %3346 = vmatpush1.bf16.msra.mxu1 %v2492_v6 }
 0x374   : > { %v8197_v32 = vpop.f32.mrb[12].mxu1 }
 0x375   : > { %11720 = vst [vmem:[#allocation77_spill] sm:$0xff] %v8197_v32  ;;  %v8199_v40 = vpop.f32.mrb[13].mxu1 }
 0x376   : > { %11721 = vst [vmem:[#allocation78_spill] sm:$0xff] %v8199_v40  ;;  %v2319_v42 = vpop.f32.mrb[14].mxu1 }
 0x377   : > { %v2321_v17 = vpop.f32.mrb[15].mxu1  ;;  %v2320_v24 = vadd.f32 %v2319_v42, %v8082_v21 }
 0x378   : > { %v2322_v49 = vadd.f32 %v2321_v17, %v8082_v21 }
 0x379   : > { %v2348_v36 = vmax.f32 %v2320_v24, 0.0 }
 0x37a   : > { %v2349_v29 = vmax.f32 %v2322_v49, 0.0 }
 0x37c   : > { %v2325_v43 = vpop.f32.mrb[16].mxu1 }
 0x37d   : > { %v2326_v10 = vadd.f32 %v2325_v43, %v8078_v30  ;;  %v2327_v60 = vpop.f32.mrb[17].mxu1 }
 0x37e   : > { %v2328_v34 = vadd.f32 %v2327_v60, %v8078_v30  ;;  %v2329_v20 = vpop.f32.mrb[18].mxu1 }
 0x37f   : > { %v2356_v7 = vmax.f32 %v2326_v10, 0.0  ;;  %v2331_v9 = vpop.f32.mrb[19].mxu1  ;;  %v2330_v55 = vadd.f32 %v2329_v20, %v8093_v11 }
 0x380   : > { %v2357_v12 = vmax.f32 %v2328_v34, 0.0  ;;  %v2332_v21 = vadd.f32 %v2331_v9, %v8093_v11 }
 0x381   : > { %v2380_v35 = vpack.c.bf16 %v2356_v7, %v2348_v36  ;;  %v2364_v10 = vmax.f32 %v2330_v55, 0.0  ;;  %v11722_v55 = vld [vmem:[#allocation10_spill] sm:$0xff]  ;;  %v11726_v7 = vld [vmem:[#allocation12_spill] sm:$0xff] }
 0x382   : > { %v2381_v6 = vpack.c.bf16 %v2357_v12, %v2349_v29  ;;  %v2365_v34 = vmax.f32 %v2332_v21, 0.0  ;;  %vm11723_vm4 = vcmp.ne.s16.totalorder %v11722_v55, 0  ;;  %vm11727_vm14 = vcmp.ne.s16.totalorder %v11726_v7, 0  ;;  %v11728_v29 = vld [vmem:[#allocation13_spill] sm:$0xff] }
 0x383   : > { %2422 = vrot.lane.b32.xlu0 %v2380_v35, %s6210_s23  ;;  %v2534_v9 = vsel %vm11727_vm14, %v8144_v0, 0  ;;  %vm11729_vm11 = vcmp.ne.s16.totalorder %v11728_v29, 0  ;;  %v11730_v35 = vld [vmem:[#allocation14_spill] sm:$0xff]  ;;  %v11732_v21 = vld [vmem:[#allocation33_spill] sm:$0xff] }
 0x384   : > { %v2335_v42 = vpop.f32.mrb[20].mxu1  ;;  %2424 = vrot.lane.b32.xlu1 %v2381_v6, %s6210_s23  ;;  %v2500_v12 = vsel %vm11729_vm11, %v8156_v16, 0  ;;  %vm11731_vm6 = vcmp.ne.s16.totalorder %v11730_v35, 0  ;;  %vm11733_vm13 = vcmp.ne.s16.totalorder %v11732_v21, 0 }
 0x385   : > { %v2336_v17 = vadd.f32 %v2335_v42, %v8095_v54  ;;  %v2337_v30 = vpop.f32.mrb[21].mxu1  ;;  %v2552_v6 = vsel %vm11731_vm6, %v8144_v0, 0  ;;  %v2501_v42 = vsel %vm11733_vm13, %v8162_v26, 0 }
 0x386   : > { %v2338_v24 = vadd.f32 %v2337_v30, %v8095_v54  ;;  %v2339_v43 = vpop.f32.mrb[22].mxu1  ;;  %v2516_v54 = vsel %vm11723_vm4, %v8144_v0, 0 }
 0x387   : > { %v2372_v49 = vmax.f32 %v2336_v17, 0.0  ;;  %v2340_v60 = vpop.f32.mrb[23].mxu1  ;;  %2434 = vrot.lane.b32.xlu0 %v2386_v59, %s6210_s23  ;;  %v11724_v59 = vld [vmem:[#allocation11_spill] sm:$0xff]  ;;  %v11734_v17 = vld [vmem:[#allocation18_spill] sm:$0xff] }
 0x388   : > { %v2373_v20 = vmax.f32 %v2338_v24, 0.0  ;;  %2436 = vrot.lane.b32.xlu1 %v8139_v23, %s6210_s23  ;;  %vm11725_vm12 = vcmp.ne.s16.totalorder %v11724_v59, 0  ;;  %vm11735_vm4 = vcmp.ne.s16.totalorder %v11734_v17, 0  ;;  %v11736_v24 = vld [vmem:[#allocation19_spill] sm:$0xff] }
 0x389   : > { %v2388_v11 = vpack.c.bf16 %v2372_v49, %v2364_v10  ;;  %v2498_v23 = vsel %vm11725_vm12, %v8144_v0, 0  ;;  %v2518_v30 = vsel %vm11735_vm4, %v8156_v16, 0  ;;  %vm11737_vm12 = vcmp.ne.s16.totalorder %v11736_v24, 0  ;;  %v11738_v10 = vld [vmem:[#allocation21_spill] sm:$0xff]  ;;  %v11740_v60 = vld [vmem:[#allocation15_spill] sm:$0xff] }
 0x38a   : > { %v2389_v36 = vpack.c.bf16 %v2373_v20, %v2365_v34  ;;  %v2570_v43 = vsel %vm11737_vm12, %v8144_v0, 0  ;;  %vm11739_vm14 = vcmp.ne.s16.totalorder %v11738_v10, 0  ;;  %vm11741_vm11 = vcmp.ne.s16.totalorder %v11740_v60, 0  ;;  %v11742_v20 = vld [vmem:[#allocation40_spill] sm:$0xff] }
 0x38b   : > { %2438 = vrot.lane.b32.xlu0 %v2388_v11, %s6210_s23  ;;  %v2536_v49 = vsel %vm11739_vm14, %v8156_v16, 0  ;;  %v2499_v34 = vsel %vm11741_vm11, %v8147_v31, 0  ;;  %vm11743_vm6 = vcmp.ne.s16.totalorder %v11742_v20, 0 }
 0x38c   : > { %2440 = vrot.lane.b32.xlu1 %v2389_v36, %s6210_s23  ;;  %v2537_v11 = vsel %vm11743_vm6, %v8162_v26, 0 }
 0x38f   : > { %2596 = vrot.lane.b32.xlu0 %v8156_v16, %s6218_s15 }
 0x390   : > { %2592 = vrot.lane.b32.xlu1 %v8144_v0, %s6218_s15 }
 0x393   : > { %2598 = vrot.lane.b32.xlu0 %v8162_v26, %s6218_s15 }
 0x394   : > { %2832 = vrot.lane.b32.xlu1 %v8144_v0, %s6217_s14 }
 0x397   : > { %2764 = vrot.lane.b32.xlu0 %v2516_v54, %s6220_s19  ;;  %v11746_v54 = vld [vmem:[#allocation26_spill] sm:$0xff] }
 0x398   : > { %3072 = vrot.lane.b32.xlu1 %v8144_v0, %s6222_s21  ;;  %v11744_v0 = vld [vmem:[#allocation17_spill] sm:$0xff]  ;;  %vm11747_vm4 = vcmp.ne.s16.totalorder %v11746_v54, 0 }
 0x399   : > { %vm11745_vm13 = vcmp.ne.s16.totalorder %v11744_v0, 0 }
 0x39a   : > { %v2517_v36 = vsel %vm11745_vm13, %v8147_v31, 0 }
 0x39b   : > { %2836 = vrot.lane.b32.xlu0 %v8156_v16, %s6217_s14 }
 0x39c   : > { %2594 = vrot.lane.b32.xlu1 %v8147_v31, %s6218_s15 }
 0x39f   : > { %2838 = vrot.lane.b32.xlu0 %v8162_v26, %s6217_s14 }
 0x3a0   : > { %2678 = vrot.lane.b32.xlu1 %v2498_v23, %s6219_s16  ;;  %v2554_v23 = vsel %vm11747_vm4, %v8156_v16, 0 }
 0x3a3   : > { %3076 = vrot.lane.b32.xlu0 %v8156_v16, %s6222_s21 }
 0x3a4   : > { %2834 = vrot.lane.b32.xlu1 %v8147_v31, %s6217_s14 }
 0x3a7   : > { %3078 = vrot.lane.b32.xlu0 %v8162_v26, %s6222_s21 }
 0x3a8   : > { %2918 = vrot.lane.b32.xlu1 %v2534_v9, %s6221_s20  ;;  %v11748_v9 = vld [vmem:[#allocation32_spill] sm:$0xff] }
 0x3a9   : > { %vm11749_vm12 = vcmp.ne.s16.totalorder %v11748_v9, 0 }
 0x3ab   : > { %2682 = vrot.lane.b32.xlu0 %v2500_v12, %s6219_s16  ;;  %v2519_v12 = vsel %vm11749_vm12, %v8162_v26, 0 }
 0x3ac   : > { %3004 = vrot.lane.b32.xlu1 %v2552_v6, %s6215_s12  ;;  %v11750_v6 = vld [vmem:[#allocation46_spill] sm:$0xff] }
 0x3ad   : > { %vm11751_vm14 = vcmp.ne.s16.totalorder %v11750_v6, 0 }
 0x3af   : > { %2684 = vrot.lane.b32.xlu0 %v2501_v42, %s6219_s16  ;;  %v2555_v42 = vsel %vm11751_vm14, %v8162_v26, 0  ;;  %vm11762_vm14 = vcmp.ne.s16.totalorder %v11724_v59, 0 }
 0x3b0   : > { %3074 = vrot.lane.b32.xlu1 %v8147_v31, %s6222_s21 }
 0x3b3   : > { %2768 = vrot.lane.b32.xlu0 %v2518_v30, %s6220_s19  ;;  %v11752_v30 = vld [vmem:[#allocation20_spill] sm:$0xff] }
 0x3b4   : > { %3158 = vrot.lane.b32.xlu1 %v2570_v43, %s6223_s24  ;;  %vm11753_vm11 = vcmp.ne.s16.totalorder %v11752_v30, 0 }
 0x3b5   : > { %v2535_v43 = vsel %vm11753_vm11, %v8147_v31, 0  ;;  %vm11763_vm11 = vcmp.ne.s16.totalorder %v11722_v55, 0 }
 0x3b7   : > { %2922 = vrot.lane.b32.xlu0 %v2536_v49, %s6221_s20  ;;  %v11754_v49 = vld [vmem:[#allocation30_spill] sm:$0xff] }
 0x3b8   : > { %2680 = vrot.lane.b32.xlu1 %v2499_v34, %s6219_s16  ;;  %vm11755_vm6 = vcmp.ne.s16.totalorder %v11754_v49, 0 }
 0x3b9   : > { %v2572_v34 = vsel %vm11755_vm6, %v8156_v16, 0  ;;  %v2525_v16 = vsel %vm11763_vm11, %v8174_v57, 0  ;;  %vm11764_vm6 = vcmp.ne.s16.totalorder %v11728_v29, 0  ;;  %vm11769_vm11 = vcmp.ne.s16.totalorder %v11748_v9, 0 }
 0x3bb   : > { %2924 = vrot.lane.b32.xlu0 %v2537_v11, %s6221_s20  ;;  %v11756_v11 = vld [vmem:[#allocation24_spill] sm:$0xff] }
 0x3bc   : > { %2766 = vrot.lane.b32.xlu1 %v2517_v36, %s6220_s19  ;;  %vm11757_vm13 = vcmp.ne.s16.totalorder %v11756_v11, 0 }
 0x3bd   : > { %v2553_v36 = vsel %vm11757_vm13, %v8147_v31, 0  ;;  %vm11765_vm13 = vcmp.ne.s16.totalorder %v11726_v7, 0 }
 0x3bf   : > { %3008 = vrot.lane.b32.xlu0 %v2554_v23, %s6215_s12  ;;  %v11758_v23 = vld [vmem:[#allocation52_spill] sm:$0xff] }
 0x3c0   : > { %2770 = vrot.lane.b32.xlu1 %v2519_v12, %s6220_s19  ;;  %vm11759_vm4 = vcmp.ne.s16.totalorder %v11758_v23, 0 }
 0x3c1   : > { %v2573_v12 = vsel %vm11759_vm4, %v8162_v26, 0  ;;  %v2509_v26 = vsel %vm11764_vm6, %v8185_v33, 0  ;;  %vm11766_vm4 = vcmp.ne.s16.totalorder %v11732_v21, 0  ;;  %vm11770_vm6 = vcmp.ne.s16.totalorder %v11736_v24, 0  ;;  %v8501_v21 = vld [vmem:[%s11237_s5 + $0x4] ss:$12 sps:$4 sm:$0xff]  }
 0x3c2   : > { %11792 = vst [vmem:[#allocation82_spill] sm:$0xff] %v8501_v21  ;;  %3289 = vmatprep.mubr.bf16.mxu0 %v8501_v21  ;;  %3375 = vmatprep.mubr.bf16.mxu1 %v8501_v21 }
 0x3c3   : > { %3010 = vrot.lane.b32.xlu0 %v2555_v42, %s6215_s12  ;;  %v11760_v42 = vld [vmem:[#allocation29_spill] sm:$0xff] }
 0x3c4   : > { %2920 = vrot.lane.b32.xlu1 %v2535_v43, %s6221_s20  ;;  %vm11761_vm12 = vcmp.ne.s16.totalorder %v11760_v42, 0 }
 0x3c5   : > { %v2571_v43 = vsel %vm11761_vm12, %v8147_v31, 0  ;;  %v2507_v31 = vsel %vm11762_vm14, %v8174_v57, 0  ;;  %vm11767_vm12 = vcmp.ne.s16.totalorder %v11730_v35, 0  ;;  %vm11768_vm14 = vcmp.ne.s16.totalorder %v11744_v0, 0 }
 0x3c7   : > { %3162 = vrot.lane.b32.xlu0 %v2572_v34, %s6223_s24  ;;  %v2543_v34 = vsel %vm11765_vm13, %v8174_v57, 0  ;;  %vm11771_vm13 = vcmp.ne.s16.totalorder %v11738_v10, 0  ;;  %v11784_v10 = vld [vmem:[#allocation34_spill] sm:$0xff] }
 0x3c8   : > { %3006 = vrot.lane.b32.xlu1 %v2553_v36, %s6215_s12  ;;  %v2510_v36 = vsel %vm11766_vm4, %v8189_v52, 0  ;;  %vm11772_vm4 = vcmp.ne.s16.totalorder %v11740_v60, 0 }
 0x3cb   : > { %3164 = vrot.lane.b32.xlu0 %v2573_v12, %s6223_s24  ;;  %v8361_v12 = vpop.permute.xlu1 %2418 }
 0x3cc   : > { %3160 = vrot.lane.b32.xlu1 %v2571_v43, %s6223_s24  ;;  %v2561_v43 = vsel %vm11767_vm12, %v8174_v57, 0  ;;  %vm11773_vm12 = vcmp.ne.s16.totalorder %v11742_v20, 0 }
 0x3cf   : > { %2610 = vrot.lane.b32.xlu0 %v8174_v57, %s6218_s15 }
 0x3d0   : > { %2614 = vrot.lane.b32.xlu1 %v8185_v33, %s6218_s15 }
 0x3d3   : > { %2850 = vrot.lane.b32.xlu0 %v8174_v57, %s6217_s14 }
 0x3d4   : > { %2616 = vrot.lane.b32.xlu1 %v8189_v52, %s6218_s15 }
 0x3d7   : > { %3090 = vrot.lane.b32.xlu0 %v8174_v57, %s6222_s21 }
 0x3d8   : > { %2854 = vrot.lane.b32.xlu1 %v8185_v33, %s6217_s14 }
 0x3db   : > { %2612 = vrot.lane.b32.xlu0 %v8171_v62, %s6218_s15 }
 0x3dc   : > { %2856 = vrot.lane.b32.xlu1 %v8189_v52, %s6217_s14 }
 0x3df   : > { %2696 = vrot.lane.b32.xlu0 %v2507_v31, %s6219_s16  ;;  %v2526_v31 = vsel %vm11768_vm14, %v8171_v62, 0  ;;  %vm11774_vm14 = vcmp.ne.s16.totalorder %v11734_v17, 0  ;;  %v11790_v17 = vld [vmem:[#allocation39_spill] sm:$0xff] }
 0x3e0   : > { %3094 = vrot.lane.b32.xlu1 %v8185_v33, %s6222_s21 }
 0x3e3   : > { %2782 = vrot.lane.b32.xlu0 %v2525_v16, %s6220_s19  ;;  %v8372_v16 = vpop.permute.xlu1 %2420 }
 0x3e4   : > { %3096 = vrot.lane.b32.xlu1 %v8189_v52, %s6222_s21 }
 0x3e7   : > { %2852 = vrot.lane.b32.xlu0 %v8171_v62, %s6217_s14 }
 0x3e8   : > { %2700 = vrot.lane.b32.xlu1 %v2509_v26, %s6219_s16  ;;  %v2528_v26 = vsel %vm11769_vm11, %v8189_v52, 0  ;;  %vm11775_vm11 = vcmp.ne.s16.totalorder %v11746_v54, 0 }
 0x3eb   : > { %2936 = vrot.lane.b32.xlu0 %v2543_v34, %s6221_s20 }
 0x3ec   : > { %2702 = vrot.lane.b32.xlu1 %v2510_v36, %s6219_s16 }
 0x3ef   : > { %3022 = vrot.lane.b32.xlu0 %v2561_v43, %s6215_s12  ;;  %v2579_v43 = vsel %vm11770_vm6, %v8174_v57, 0  ;;  %v2546_v57 = vsel %vm11773_vm12, %v8189_v52, 0  ;;  %vm11776_vm6 = vcmp.ne.s16.totalorder %v11752_v30, 0  ;;  %vm11779_vm12 = vcmp.ne.s16.totalorder %v11754_v49, 0  ;;  %v11793_v30 = vld [vmem:[#allocation35_spill] sm:$0xff] }
 0x3f0   : > { %2784 = vrot.lane.b32.xlu1 %v2526_v31, %s6220_s19  ;;  %v2545_v31 = vsel %vm11771_vm13, %v8185_v33, 0  ;;  %vm11777_vm13 = vcmp.ne.s16.totalorder %v11750_v6, 0 }
 0x3f1   : > { %v2564_v63 = vsel %vm11777_vm13, %v8189_v52, 0  ;;  %vm11785_vm13 = vcmp.ne.s16.totalorder %v11784_v10, 0 }
 0x3f3   : > { %3092 = vrot.lane.b32.xlu0 %v8171_v62, %s6222_s21 }
 0x3f4   : > { %2788 = vrot.lane.b32.xlu1 %v2528_v26, %s6220_s19  ;;  %v2508_v26 = vsel %vm11772_vm4, %v8171_v62, 0  ;;  %vm11778_vm4 = vcmp.ne.s16.totalorder %v11756_v11, 0 }
 0x3f5   : > { %v8380_v34 = vpop.permute.xlu0 %2422 }
 0x3f6   : > { %v8382_v36 = vpop.permute.xlu1 %2424 }
 0x3f7   : > { %3176 = vrot.lane.b32.xlu0 %v2579_v43, %s6223_s24 }
 0x3f8   : > { %2940 = vrot.lane.b32.xlu1 %v2545_v31, %s6221_s20  ;;  %v2527_v31 = vsel %vm11774_vm14, %v8185_v33, 0  ;;  %vm11780_vm14 = vcmp.ne.s16.totalorder %v11760_v42, 0 }
 0x3f9   : > { %v8392_v38 = vpop.permute.xlu0 %2434 }
 0x3fa   : > { %v8394_v53 = vpop.permute.xlu1 %2436 }
 0x3fb   : > { %2698 = vrot.lane.b32.xlu0 %v2508_v26, %s6219_s16  ;;  %v2563_v26 = vsel %vm11775_vm11, %v8185_v33, 0  ;;  %vm11781_vm11 = vcmask 269312  }
 0x3fc   : > { %2942 = vrot.lane.b32.xlu1 %v2546_v57, %s6221_s20  ;;  %v2544_v57 = vsel %vm11776_vm6, %v8171_v62, 0  ;;  %v8448_v9 = vsel %vm11781_vm11, %v8158_v58, %v8361_v12  ;;  %vm11783_vm6 = vcmp.ne.s16.totalorder %v11758_v23, 0 }
 0x3fd   : > { %v8404_v43 = vpop.permute.xlu0 %2438  ;;  %11782 = vst [vmem:[#allocation79_spill] sm:$0xff] %v8448_v9 }
 0x3fe   : > { %v8406_v19 = vpop.permute.xlu1 %2440 }
 0x3ff   : > { %2786 = vrot.lane.b32.xlu0 %v2527_v31, %s6220_s19 }
 0x400   : > { %3026 = vrot.lane.b32.xlu1 %v2563_v26, %s6215_s12  ;;  %v2562_v26 = vsel %vm11778_vm4, %v8171_v62, 0  ;;  %vm11787_vm4 = vmmov %vm11781_vm11  ;;  %vm11794_vm11 = vcmp.ne.s16.totalorder %v11793_v30, 0  ;;  %v11809_v30 = vld [vmem:[#allocation37_spill] sm:$0xff] }
 0x401   : > { %v8416_v37 = vpop.permute.xlu0 %2596  ;;  %v2502_v49 = vsel %vm11794_vm11, %v8448_v9, 0 }
 0x402   : > { %v2593_v15 = vpop.permute.xlu1 %2592 }
 0x403   : > { %2938 = vrot.lane.b32.xlu0 %v2544_v57, %s6221_s20  ;;  %v2581_v57 = vsel %vm11779_vm12, %v8185_v33, 0  ;;  %v2582_v33 = vsel %vm11783_vm6, %v8189_v52, 0  ;;  %vm11788_vm12 = vmmov %vm11787_vm4 }
 0x404   : > { %3028 = vrot.lane.b32.xlu1 %v2564_v63, %s6215_s12  ;;  %v2580_v63 = vsel %vm11780_vm14, %v8171_v62, 0  ;;  %v2520_v62 = vsel %vm11785_vm13, %v8448_v9, 0  ;;  %vm11791_vm14 = vcmp.ne.s16.totalorder %v11790_v17, 0  ;;  %vm11797_vm13 = vmmov %vm11787_vm4 }
 0x405   : > { %v8426_v31 = vpop.permute.xlu0 %2598  ;;  %v8527_v11 = vsel %vm11797_vm13, %v8182_v22, %v8392_v38  ;;  %v11802_v22 = vld [vmem:[#allocation53_spill] sm:$0xff] }
 0x406   : > { %v8428_v39 = vpop.permute.xlu1 %2832  ;;  %11798 = vst [vmem:[#allocation83_spill] sm:$0xff] %v8527_v11 }
 0x407   : > { %3024 = vrot.lane.b32.xlu0 %v2562_v26, %s6215_s12 }
 0x408   : > { %3180 = vrot.lane.b32.xlu1 %v2581_v57, %s6223_s24 }
 0x409   : > { %v8438_v44 = vpop.permute.xlu0 %2764 }
 0x40a   : > { %v8440_v20 = vpop.permute.xlu1 %3072 }
 0x40b   : > { %3178 = vrot.lane.b32.xlu0 %v2580_v63, %s6223_s24 }
 0x40c   : > { %3182 = vrot.lane.b32.xlu1 %v2582_v33, %s6223_s24  ;;  %v8471_v33 = vsel %vm11787_vm4, %v8372_v16, %v8380_v34 }
 0x40d   : > { %v8455_v26 = vpop.permute.xlu0 %2836  ;;  %v2504_v6 = vsel %vm11791_vm14, %v8471_v33, 0  ;;  %vm11804_vm14 = vmmov %vm11797_vm13 }
 0x40e   : > { %v2595_v57 = vpop.permute.xlu1 %2594 }
 0x40f   : > { %2772 = vrot.lane.b32.xlu0 %v2520_v62, %s6220_s19  ;;  %v2629_v58 = vsel %vm1005_vm2, %v2595_v57, %v8416_v37  ;;  %v2628_v63 = vsel %vm1005_vm2, %v2593_v15, %v2595_v57  ;;  %v8483_v57 = vsel %vm11788_vm12, %v8382_v36, 0  ;;  %vm11803_vm12 = vcmp.ne.s16.totalorder %v11802_v22, 0 }
 0x410   : > { %2600 = vrot.lane.b32.xlu1 %v8448_v9, %s6218_s15  ;;  %3261 = vmatprep.subr.bf16.mxu0 %v2629_v58  ;;  %v2506_v42 = vsel %vm798_vm3, %v8483_v57, 0  ;;  %v2574_v35 = vsel %vm11803_vm12, %v8448_v9, 0  ;;  %vm11812_vm12 = vcmp.ne.s16.totalorder %v11784_v10, 0  ;;  %v11815_v10 = vld [vmem:[#allocation36_spill] sm:$0xff] }
 0x411   : > { %3262 = vmatpush1.bf16.msra.mxu0 %v2628_v63  ;;  %v8466_v52 = vpop.permute.xlu0 %2838  ;;  %v2529_v14 = vsel %vm11812_vm12, %v8527_v11, 0 }
 0x412   : > { %11786 = vst [vmem:[#allocation80_spill] sm:$0xff] %v8466_v52  ;;  %v8473_v23 = vpop.permute.xlu1 %2678 }
 0x413   : > { %2604 = vrot.lane.b32.xlu0 %v8471_v33, %s6218_s15 }
 0x414   : > { %2840 = vrot.lane.b32.xlu1 %v8448_v9, %s6217_s14 }
 0x415   : > { %v8479_v15 = vpop.permute.xlu0 %3076 }
 0x416   : > { %v8485_v62 = vpop.permute.xlu1 %2834 }
 0x417   : > { %2608 = vrot.lane.b32.xlu0 %v8483_v57, %s6218_s15 }
 0x418   : > { %3080 = vrot.lane.b32.xlu1 %v8448_v9, %s6222_s21 }
 0x419   : > { %v8491_v58 = vpop.permute.xlu0 %3078 }
 0x41a   : > { %11789 = vst [vmem:[#allocation81_spill] sm:$0xff] %v8491_v58  ;;  %v8493_v63 = vpop.permute.xlu1 %2918 }
 0x41b   : > { %2690 = vrot.lane.b32.xlu0 %v2504_v6, %s6219_s16  ;;  %v11795_v6 = vld [vmem:[#allocation42_spill] sm:$0xff] }
 0x41c   : > { %2686 = vrot.lane.b32.xlu1 %v2502_v49, %s6219_s16  ;;  %vm11796_vm6 = vcmp.ne.s16.totalorder %v11795_v6, 0 }
 0x41d   : > { %v8509_v0 = vpop.permute.xlu0 %2682  ;;  %v2538_v29 = vsel %vm11796_vm6, %v8448_v9, 0  ;;  %vm11806_vm6 = vmmov %vm11797_vm13  ;;  %vm11808_vm13 = vcmp.ne.s16.totalorder %v11807_v13, 0 }
 0x41e   : > { %v8512_v54 = vpop.permute.xlu1 %3004  ;;  %v8570_v41 = vsel %vm11806_vm6, %v8380_v34, %v8382_v36  ;;  %v2522_v51 = vsel %vm11808_vm13, %v8471_v33, 0  ;;  %vm11816_vm6 = vcmp.ne.s16.totalorder %v11815_v10, 0  ;;  %vm11818_vm13 = vcmp.ne.s16.totalorder %v11795_v6, 0 }
 0x41f   : > { %2694 = vrot.lane.b32.xlu0 %v2506_v42, %s6219_s16  ;;  %v11799_v42 = vld [vmem:[#allocation47_spill] sm:$0xff] }
 0x420   : > { %2926 = vrot.lane.b32.xlu1 %v2538_v29, %s6221_s20  ;;  %vm11800_vm4 = vcmp.ne.s16.totalorder %v11799_v42, 0  ;;  %vm11820_vm12 = vcmp.ne.s16.totalorder %v11799_v42, 0 }
 0x421   : > { %v8522_v49 = vpop.permute.xlu0 %2684  ;;  %v2556_v24 = vsel %vm11800_vm4, %v8448_v9, 0  ;;  %vm11810_vm4 = vcmp.ne.s16.totalorder %v11809_v30, 0 }
 0x422   : > { %v8529_v60 = vpop.permute.xlu1 %3074 }
 0x423   : > { %2618 = vrot.lane.b32.xlu0 %v8527_v11, %s6218_s15 }
 0x424   : > { %3012 = vrot.lane.b32.xlu1 %v2556_v24, %s6215_s12  ;;  %v8554_v24 = vsel %vm11804_vm14, %v8361_v12, %v8372_v16  ;;  %vm11813_vm14 = vcmp.ne.s16.totalorder %v7744_v5, 0 }
 0x425   : > { %v8537_v7 = vpop.permute.xlu0 %2768  ;;  %v2503_v34 = vsel %vm11810_vm4, %v8554_v24, 0  ;;  %vm11819_vm4 = vcmp.ne.s16.totalorder %v7722_v48, 0 }
 0x426   : > { %11801 = vst [vmem:[#allocation84_spill] sm:$0xff] %v8537_v7  ;;  %v8539_v29 = vpop.permute.xlu1 %3158 }
 0x427   : > { %2858 = vrot.lane.b32.xlu0 %v8527_v11, %s6217_s14 }
 0x428   : > { %3166 = vrot.lane.b32.xlu1 %v2574_v35, %s6223_s24  ;;  %v2511_v35 = vsel %vm11794_vm11, %v8527_v11, 0  ;;  %vm11814_vm11 = vcmp.ne.s16.totalorder %v7691_v25, 0 }
 0x429   : > { %v8547_v55 = vpop.permute.xlu0 %2922 }
 0x42a   : > { %v8549_v59 = vpop.permute.xlu1 %2680 }
 0x42b   : > { %3098 = vrot.lane.b32.xlu0 %v8527_v11, %s6222_s21 }
 0x42c   : > { %2602 = vrot.lane.b32.xlu1 %v8554_v24, %s6218_s15 }
 0x42d   : > { %v8560_v40 = vpop.permute.xlu0 %2924 }
 0x42e   : > { %11805 = vst [vmem:[#allocation85_spill] sm:$0xff] %v8560_v40  ;;  %v8562_v32 = vpop.permute.xlu1 %2766 }
 0x42f   : > { %2704 = vrot.lane.b32.xlu0 %v2511_v35, %s6219_s16 }
 0x430   : > { %2606 = vrot.lane.b32.xlu1 %v8570_v41, %s6218_s15 }
 0x431   : > { %v8575_v12 = vpop.permute.xlu0 %3008 }
 0x432   : > { %v8577_v16 = vpop.permute.xlu1 %2770 }
 0x433   : > { %2776 = vrot.lane.b32.xlu0 %v2522_v51, %s6220_s19  ;;  %v2505_v51 = vsel %vm11813_vm14, %v8570_v41, 0  ;;  %vm11821_vm14 = vcmask 269312  }
 0x434   : > { %2688 = vrot.lane.b32.xlu1 %v2503_v34, %s6219_s16  ;;  %v2524_v34 = vsel %vm11814_vm11, %v8483_v57, 0  ;;  %v8631_v6 = vsel %vm11821_vm14, %v8392_v38, %v8394_v53  ;;  %vm11822_vm11 = vcmp.ne.s16.totalorder %v11802_v22, 0 }
 0x435   : > { %v8587_v36 = vpop.permute.xlu0 %3010 }
 0x436   : > { %11811 = vst [vmem:[#allocation86_spill] sm:$0xff] %v8587_v36  ;;  %v8589_v35 = vpop.permute.xlu1 %2920 }
 0x437   : > { %2790 = vrot.lane.b32.xlu0 %v2529_v14, %s6220_s19  ;;  %v2521_v14 = vsel %vm11816_vm6, %v8554_v24, 0  ;;  %vm11823_vm6 = vmmov %vm11821_vm14  ;;  %vm11828_vm14 = vcmp.ne.s16.totalorder %v7744_v5, 0 }
 0x438   : > { %2692 = vrot.lane.b32.xlu1 %v2505_v51, %s6219_s16  ;;  %v2547_v51 = vsel %vm11818_vm13, %v8527_v11, 0  ;;  %v8646_v42 = vsel %vm11823_vm6, %v8404_v43, %v8406_v19  ;;  %vm11824_vm13 = vmmov %vm11823_vm6 }
 0x439   : > { %v8599_v56 = vpop.permute.xlu0 %3162 }
 0x43a   : > { %v8601_v28 = vpop.permute.xlu1 %3006 }
 0x43b   : > { %2780 = vrot.lane.b32.xlu0 %v2524_v34, %s6220_s19  ;;  %v2523_v34 = vsel %vm11819_vm4, %v8570_v41, 0  ;;  %vm11825_vm4 = vcmp.ne.s16.totalorder %v11809_v30, 0 }
 0x43c   : > { %2774 = vrot.lane.b32.xlu1 %v2521_v14, %s6220_s19  ;;  %v2565_v14 = vsel %vm11820_vm12, %v8527_v11, 0  ;;  %v2512_v22 = vsel %vm11825_vm4, %v8631_v6, 0  ;;  %vm11826_vm12 = vmmov %vm11823_vm6  ;;  %vm11830_vm6 = vcmp.ne.s16.totalorder %v11790_v17, 0 }
 0x43d   : > { %v8611_v50 = vpop.permute.xlu0 %3164  ;;  %v8668_v52 = vsel %vm11826_vm12, %v8406_v19, 0  ;;  %vm11834_vm12 = vcmp.ne.s16.totalorder %v7722_v48, 0 }
 0x43e   : > { %11817 = vst [vmem:[#allocation87_spill] sm:$0xff] %v8611_v50  ;;  %v8613_v46 = vpop.permute.xlu1 %3160  ;;  %v2583_v50 = vsel %vm11822_vm11, %v8527_v11, 0  ;;  %vm11829_vm11 = vcmask 1031168  }
 0x43f   : > { %2944 = vrot.lane.b32.xlu0 %v2547_v51, %s6221_s20  ;;  %v2715_v19 = vsel %vm11829_vm11, %v8549_v59, %v8509_v0  ;;  %vm11832_vm4 = vmmov %vm11829_vm11  ;;  %vm11836_vm11 = vcmp.ne.s16.totalorder %v7691_v25, 0 }
 0x440   : > { %2778 = vrot.lane.b32.xlu1 %v2523_v34, %s6220_s19 }
 0x441   : > { %v2611_v58 = vpop.permute.xlu0 %2610 }
 0x442   : > { %v8623_v36 = vpop.permute.xlu1 %2614 }
 0x443   : > { %3030 = vrot.lane.b32.xlu0 %v2565_v14, %s6215_s12  ;;  %v8656_v14 = vsel %vm11824_vm13, %v8394_v53, %v8404_v43  ;;  %vm11831_vm13 = vcmp.ne.s16.totalorder %v11815_v10, 0  ;;  %v11838_v10 = vld [vmem:[#allocation43_spill] sm:$0xff] }
 0x444   : > { %2620 = vrot.lane.b32.xlu1 %v8631_v6, %s6218_s15 }
 0x445   : > { %v8636_v51 = vpop.permute.xlu0 %2850 }
 0x446   : > { %v8638_v34 = vpop.permute.xlu1 %2616 }
 0x447   : > { %3184 = vrot.lane.b32.xlu0 %v2583_v50, %s6223_s24 }
 0x448   : > { %2624 = vrot.lane.b32.xlu1 %v8646_v42, %s6218_s15 }
 0x449   : > { %v8651_v38 = vpop.permute.xlu0 %3090 }
 0x44a   : > { %v8658_v40 = vpop.permute.xlu1 %2854 }
 0x44b   : > { %2622 = vrot.lane.b32.xlu0 %v8656_v14, %s6218_s15 }
 0x44c   : > { %2706 = vrot.lane.b32.xlu1 %v2512_v22, %s6219_s16  ;;  %v2514_v22 = vsel %vm11828_vm14, %v8646_v42, 0  ;;  %vm11835_vm14 = vcmp.ne.s16.totalorder %v11807_v13, 0 }
 0x44d   : > { %v2613_v50 = vpop.permute.xlu0 %2612 }
 0x44e   : > { %v8670_v11 = vpop.permute.xlu1 %2856  ;;  %v2637_v53 = vsel %vm1005_vm2, %v2613_v50, %v8623_v36  ;;  %v2636_v43 = vsel %vm1005_vm2, %v2611_v58, %v2613_v50  ;;  %v2513_v58 = vsel %vm11830_vm6, %v8656_v14, 0  ;;  %v2530_v50 = vsel %vm11831_vm13, %v8631_v6, 0  ;;  %vm11841_vm13 = vmmov %vm11832_vm4 }
 0x44f   : > { %11827 = vst [vmem:[#allocation88_spill] sm:$0xff] %v8670_v11  ;;  %2626 = vrot.lane.b32.xlu0 %v8668_v52, %s6218_s15  ;;  %3263 = vmatprep.subr.bf16.mxu0 %v2637_v53  ;;  %v2714_v53 = vsel %vm11832_vm4, %v8473_v23, %v8549_v59  ;;  %v2531_v23 = vsel %vm11835_vm14, %v8656_v14, 0  ;;  %vm11839_vm6 = vcmp.ne.s16.totalorder %v11838_v10, 0 }
 0x450   : > { %2710 = vrot.lane.b32.xlu1 %v2514_v22, %s6219_s16  ;;  %3264 = vmatpush1.bf16.msra.mxu0 %v2636_v43  ;;  %v2539_v13 = vsel %vm11839_vm6, %v8554_v24, 0 }
 0x451   : > { %3265 = vmatprep.subr.bf16.mxu0 %v2715_v19  ;;  %v2697_v30 = vpop.permute.xlu0 %2696  ;;  %v2515_v19 = vsel %vm798_vm3, %v8668_v52, 0 }
 0x452   : > { %v8684_v11 = vpop.permute.xlu1 %3094 }
 0x453   : > { %2708 = vrot.lane.b32.xlu0 %v2513_v58, %s6219_s16  ;;  %v2532_v58 = vsel %vm11834_vm12, %v8646_v42, 0  ;;  %vm11842_vm12 = vcmp.ne.s16.totalorder %v7827_v8, 0  ;;  %v11849_v8 = vld [vmem:[#allocation48_spill] sm:$0xff] }
 0x454   : > { %2792 = vrot.lane.b32.xlu1 %v2530_v50, %s6220_s19  ;;  %3266 = vmatpush1.bf16.msra.mxu0 %v2714_v53  ;;  %v2541_v3 = vsel %vm11842_vm12, %v8570_v41, 0 }
 0x455   : > { %v2783_v43 = vpop.permute.xlu0 %2782 }
 0x456   : > { %v8697_v22 = vpop.permute.xlu1 %3096 }
 0x457   : > { %11833 = vst [vmem:[#allocation89_spill] sm:$0xff] %v8697_v22  ;;  %2712 = vrot.lane.b32.xlu0 %v2515_v19, %s6219_s16  ;;  %v2533_v19 = vsel %vm11836_vm11, %v8668_v52, 0  ;;  %vm11845_vm11 = vmmov %vm11839_vm6  ;;  %vm11846_vm6 = vcmp.ne.s16.totalorder %v7807_v4, 0 }
 0x458   : > { %2796 = vrot.lane.b32.xlu1 %v2532_v58, %s6220_s19 }
 0x459   : > { %v8707_v5 = vpop.permute.xlu0 %2852 }
 0x45a   : > { %v8709_v59 = vpop.permute.xlu1 %2700 }
 0x45b   : > { %2794 = vrot.lane.b32.xlu0 %v2531_v23, %s6220_s19 }
 0x45c   : > { %2842 = vrot.lane.b32.xlu1 %v8554_v24, %s6217_s14 }
 0x45d   : > { %v8717_v50 = vpop.permute.xlu0 %2936 }
 0x45e   : > { %v8719_v53 = vpop.permute.xlu1 %2702 }
 0x45f   : > { %2798 = vrot.lane.b32.xlu0 %v2533_v19, %s6220_s19 }
 0x460   : > { %2846 = vrot.lane.b32.xlu1 %v8570_v41, %s6217_s14 }
 0x461   : > { %v8727_v58 = vpop.permute.xlu0 %3022 }
 0x462   : > { %v2785_v48 = vpop.permute.xlu1 %2784 }
 0x463   : > { %2844 = vrot.lane.b32.xlu0 %v8471_v33, %s6217_s14 }
 0x464   : > { %2860 = vrot.lane.b32.xlu1 %v8631_v6, %s6217_s14 }
 0x465   : > { %v8733_v23 = vpop.permute.xlu0 %3092 }
 0x466   : > { %v8735_v45 = vpop.permute.xlu1 %2788 }
 0x467   : > { %11837 = vst [vmem:[#allocation90_spill] sm:$0xff] %v8735_v45  ;;  %2848 = vrot.lane.b32.xlu0 %v8483_v57, %s6217_s14 }
 0x468   : > { %2864 = vrot.lane.b32.xlu1 %v8646_v42, %s6217_s14 }
 0x469   : > { %v8741_v19 = vpop.permute.xlu0 %3176 }
 0x46a   : > { %v8743_v25 = vpop.permute.xlu1 %2940 }
 0x46b   : > { %2862 = vrot.lane.b32.xlu0 %v8656_v14, %s6217_s14 }
 0x46c   : > { %2928 = vrot.lane.b32.xlu1 %v2539_v13, %s6221_s20  ;;  %v2801_v13 = vsel %vm1095_vm8, %v8562_v32, %v8537_v7 }
 0x46d   : > { %v2699_v17 = vpop.permute.xlu0 %2698 }
 0x46e   : > { %v8751_v22 = vpop.permute.xlu1 %2942  ;;  %v2723_v21 = vsel %vm11841_vm13, %v2699_v17, %v8709_v59  ;;  %v2722_v45 = vsel %vm11832_vm4, %v2697_v30, %v2699_v17  ;;  %v11843_v17 = vld [vmem:[#allocation44_spill] sm:$0xff]  ;;  %vm11847_vm13 = vmmov %vm11842_vm12  ;;  %vm11850_vm12 = vcmp.ne.s16.totalorder %v11849_v8, 0 }
 0x46f   : > { %11840 = vst [vmem:[#allocation91_spill] sm:$0xff] %v8751_v22  ;;  %2866 = vrot.lane.b32.xlu0 %v8668_v52, %s6217_s14  ;;  %3267 = vmatprep.subr.bf16.mxu0 %v2723_v21  ;;  %vm11844_vm14 = vcmp.ne.s16.totalorder %v11843_v17, 0 }
 0x470   : > { %2932 = vrot.lane.b32.xlu1 %v2541_v3, %s6221_s20  ;;  %3268 = vmatpush1.bf16.msra.mxu0 %v2722_v45  ;;  %v2540_v21 = vsel %vm11844_vm14, %v8471_v33, 0  ;;  %v2548_v3 = vsel %vm11845_vm11, %v8631_v6, 0  ;;  %v2800_v45 = vsel %vm1095_vm8, %v8438_v44, %v8562_v32  ;;  %v2550_v44 = vsel %vm11847_vm13, %v8646_v42, 0  ;;  %vm11848_vm4 = vmmov %vm11844_vm14 }
 0x471   : > { %3269 = vmatprep.subr.bf16.mxu0 %v2801_v13  ;;  %v8765_v22 = vpop.permute.xlu0 %2786  ;;  %v2808_v32 = vsel %vm1095_vm8, %v2783_v43, %v2785_v48  ;;  %v2868_v43 = vsel %vm1131_vm7, %v8428_v39, %v8485_v62  ;;  %vm11851_vm14 = vmmov %vm11846_vm6  ;;  %vm11852_vm11 = vcmp.ne.s16.totalorder %v7870_v61, 0 }
 0x472   : > { %v8767_v9 = vpop.permute.xlu1 %3026  ;;  %v2809_v30 = vsel %vm1095_vm8, %v2785_v48, %v8765_v22  ;;  %v2557_v48 = vsel %vm11850_vm12, %v8554_v24, 0  ;;  %v2559_v39 = vsel %vm11852_vm11, %v8570_v41, 0  ;;  %vm11855_vm13 = vmmov %vm11850_vm12 }
 0x473   : > { %2930 = vrot.lane.b32.xlu0 %v2540_v21, %s6221_s20  ;;  %v2542_v21 = vsel %vm11846_vm6, %v8483_v57, 0  ;;  %vm11857_vm12 = vmmov %vm11852_vm11 }
 0x474   : > { %2946 = vrot.lane.b32.xlu1 %v2548_v3, %s6221_s20  ;;  %3270 = vmatpush1.bf16.msra.mxu0 %v2800_v45  ;;  %v2869_v3 = vsel %vm1131_vm7, %v8485_v62, %v8455_v26  ;;  %v2876_v62 = vsel %vm1131_vm7, %v8636_v51, %v8707_v5  ;;  %v2954_v51 = vsel %vm1176_vm1, %v8493_v63, %v8589_v35 }
 0x475   : > { %3271 = vmatprep.subr.bf16.mxu0 %v2809_v30  ;;  %v2939_v13 = vpop.permute.xlu0 %2938 }
 0x476   : > { %v8782_v7 = vpop.permute.xlu1 %3028 }
 0x477   : > { %2934 = vrot.lane.b32.xlu0 %v2542_v21, %s6221_s20  ;;  %v2549_v21 = vsel %vm11848_vm4, %v8656_v14, 0  ;;  %vm11856_vm4 = vcmp.ne.s16.totalorder %v7862_v47, 0 }
 0x478   : > { %2950 = vrot.lane.b32.xlu1 %v2550_v44, %s6221_s20  ;;  %3272 = vmatpush1.bf16.msra.mxu0 %v2808_v32  ;;  %v2877_v44 = vsel %vm1131_vm7, %v8707_v5, %v8658_v40  ;;  %v2566_v5 = vsel %vm11855_vm13, %v8631_v6, 0  ;;  %vm11859_vm11 = vmmov %vm11856_vm4  ;;  %vm11861_vm13 = vcmask 1031168  }
 0x479   : > { %3273 = vmatprep.subr.bf16.mxu0 %v2869_v3  ;;  %v3025_v45 = vpop.permute.xlu0 %3024 }
 0x47a   : > { %v8796_v30 = vpop.permute.xlu1 %3180 }
 0x47b   : > { %2948 = vrot.lane.b32.xlu0 %v2549_v21, %s6221_s20  ;;  %v2551_v21 = vsel %vm11851_vm14, %v8668_v52, 0 }
 0x47c   : > { %3014 = vrot.lane.b32.xlu1 %v2557_v48, %s6215_s12  ;;  %3274 = vmatpush1.bf16.msra.mxu0 %v2868_v43  ;;  %v2955_v48 = vsel %vm1176_vm1, %v8589_v35, %v8547_v55  ;;  %v2560_v35 = vsel %vm11856_vm4, %v8483_v57, 0 }
 0x47d   : > { %3275 = vmatprep.subr.bf16.mxu0 %v2877_v44  ;;  %v8812_v32 = vpop.permute.xlu0 %3178 }
 0x47e   : > { %v8814_v3 = vpop.permute.xlu1 %3182 }
 0x47f   : > { %2952 = vrot.lane.b32.xlu0 %v2551_v21, %s6221_s20  ;;  %v11853_v21 = vld [vmem:[#allocation49_spill] sm:$0xff] }
 0x480   : > { %3018 = vrot.lane.b32.xlu1 %v2559_v39, %s6215_s12  ;;  %3276 = vmatpush1.bf16.msra.mxu0 %v2876_v62  ;;  %vm11854_vm6 = vcmp.ne.s16.totalorder %v11853_v21, 0  ;;  %v2963_v62 = vsel %vm1176_vm1, %v2939_v13, %v8743_v25 }
 0x481   : > { %3277 = vmatprep.subr.bf16.mxu0 %v2955_v48  ;;  %v8830_v43 = vpop.permute.xlu0 %2772  ;;  %v2558_v4 = vsel %vm11854_vm6, %v8471_v33, 0  ;;  %vm11858_vm14 = vmmov %vm11854_vm6  ;;  %vm11860_vm6 = vcmask 506880  }
 0x482   : > { %v8832_v44 = vpop.permute.xlu1 %2600  ;;  %vm11862_vm4 = vmmov %vm11860_vm6 }
 0x483   : > { %3016 = vrot.lane.b32.xlu0 %v2558_v4, %s6215_s12  ;;  %v2631_v39 = vsel %vm1005_vm2, %v8426_v31, %v8832_v44  ;;  %v2630_v4 = vsel %vm1005_vm2, %v8416_v37, %v8426_v31  ;;  %v3041_v37 = vsel %vm908_vm5, %v8601_v28, %v8575_v12 }
 0x484   : > { %3032 = vrot.lane.b32.xlu1 %v2566_v5, %s6215_s12  ;;  %3278 = vmatpush1.bf16.msra.mxu0 %v2954_v51  ;;  %v2568_v5 = vsel %vm11857_vm12, %v8646_v42, 0  ;;  %v2962_v51 = vsel %vm1176_vm1, %v8717_v50, %v2939_v13  ;;  %v3040_v50 = vsel %vm908_vm5, %v8512_v54, %v8601_v28  ;;  %v3049_v13 = vsel %vm908_vm5, %v3025_v45, %v8767_v9  ;;  %vm11863_vm12 = vmmov %vm11861_vm13 }
 0x485   : > { %3347 = vmatprep.subr.bf16.mxu1 %v2631_v39  ;;  %3279 = vmatprep.subr.bf16.mxu0 %v2963_v62  ;;  %v8853_v48 = vpop.permute.xlu0 %2604  ;;  %v2567_v62 = vsel %vm11858_vm14, %v8656_v14, 0  ;;  %v3048_v28 = vsel %vm908_vm5, %v8727_v58, %v3025_v45  ;;  %v3109_v54 = vsel %vm1256_vm9, %v8529_v60, %v8479_v15  ;;  %v3108_v58 = vsel %vm1256_vm9, %v8440_v20, %v8529_v60  ;;  %v8929_v20 = vld [vmem:[%s11237_s5] ss:$12 sps:$4 sm:$0xff]   ;;  %vm11864_vm14 = vmmov %vm11862_vm4 }
 0x486   : > { %3348 = vmatpush1.bf16.msra.mxu1 %v2630_v4  ;;  %v8855_v63 = vpop.permute.xlu1 %2840  ;;  %v3117_v45 = vsel %vm1256_vm9, %v8733_v23, %v8684_v11  ;;  %v3116_v60 = vsel %vm1256_vm9, %v8651_v38, %v8733_v23 }
 0x487   : > { %3020 = vrot.lane.b32.xlu0 %v2560_v35, %s6215_s12 }
 0x488   : > { %3036 = vrot.lane.b32.xlu1 %v2568_v5, %s6215_s12  ;;  %3280 = vmatpush1.bf16.msra.mxu0 %v2962_v51  ;;  %v2569_v5 = vsel %vm11859_vm11, %v8668_v52, 0 }
 0x489   : > { %3281 = vmatprep.subr.bf16.mxu0 %v3041_v37  ;;  %v8870_v31 = vpop.permute.xlu0 %2608 }
 0x48a   : > { %v8872_v39 = vpop.permute.xlu1 %3080 }
 0x48b   : > { %3034 = vrot.lane.b32.xlu0 %v2567_v62, %s6215_s12 }
 0x48c   : > { %3082 = vrot.lane.b32.xlu1 %v8554_v24, %s6222_s21  ;;  %3282 = vmatpush1.bf16.msra.mxu0 %v3040_v50 }
 0x48d   : > { %3283 = vmatprep.subr.bf16.mxu0 %v3049_v13  ;;  %v8885_v4 = vpop.permute.xlu0 %2690 }
 0x48e   : > { %v8887_v35 = vpop.permute.xlu1 %2686 }
 0x48f   : > { %3038 = vrot.lane.b32.xlu0 %v2569_v5, %s6215_s12  ;;  %v2638_v5 = vsel %vm1005_vm2, %v8623_v36, %v8638_v34  ;;  %v2717_v38 = vsel %vm11861_vm13, %v8522_v49, %v8887_v35  ;;  %v3194_v36 = vsel %vm11862_vm4, %v8539_v29, %v8613_v46  ;;  %vm11868_vm13 = vcmp.ne.s16.totalorder %v6451_v2, 0 }
 0x490   : > { %3086 = vrot.lane.b32.xlu1 %v8570_v41, %s6222_s21  ;;  %3284 = vmatpush1.bf16.msra.mxu0 %v3048_v28  ;;  %v3195_v28 = vsel %vm11860_vm6, %v8613_v46, %v8599_v56  ;;  %v11865_v46 = vld [vmem:[#allocation55_spill] sm:$0xff]  ;;  %vm11867_vm6 = vmmov %vm11862_vm4 }
 0x491   : > { %3285 = vmatprep.subr.bf16.mxu0 %v3109_v54  ;;  %v8900_v51 = vpop.permute.xlu0 %2694  ;;  %v2021_v54 = vld [vmem:[%s11236_s4] sm:$0xff]  ;;  %vm11866_vm11 = vcmp.ne.s16.totalorder %v11865_v46, 0 }
 0x492   : > { %v8902_v37 = vpop.permute.xlu1 %2926  ;;  %v2576_v29 = vsel %vm11866_vm11, %v8471_v33, 0  ;;  %vm11872_vm11 = vmmov %vm11863_vm12 }
 0x493   : > { %3084 = vrot.lane.b32.xlu0 %v8471_v33, %s6222_s21 }
 0x494   : > { %3100 = vrot.lane.b32.xlu1 %v8631_v6, %s6222_s21  ;;  %3286 = vmatpush1.bf16.msra.mxu0 %v3108_v58 }
 0x495   : > { %3287 = vmatprep.subr.bf16.mxu0 %v3117_v45  ;;  %v8914_v62 = vpop.permute.xlu0 %2618  ;;  %v3203_v45 = vsel %vm11864_vm14, %v8812_v32, %v8796_v30  ;;  %vm11871_vm14 = vcmp.ne.s16.totalorder %v7904_v1, 0 }
 0x496   : > { %v8916_v50 = vpop.permute.xlu1 %3012  ;;  %v2639_v13 = vsel %vm1005_vm2, %v8638_v34, %v8914_v62  ;;  %v2716_v34 = vsel %vm11863_vm12, %v8509_v0, %v8522_v49  ;;  %v3202_v0 = vsel %vm11867_vm6, %v8741_v19, %v8812_v32  ;;  %v2578_v19 = vsel %vm11871_vm14, %v8483_v57, 0 }
 0x497   : > { %3088 = vrot.lane.b32.xlu0 %v8483_v57, %s6222_s21  ;;  %3349 = vmatprep.subr.bf16.mxu1 %v2639_v13  ;;  %v2724_v32 = vsel %vm11872_vm11, %v8709_v59, %v8719_v53  ;;  %vm11873_vm6 = vcmp.ne.s16.totalorder %v7915_v27, 0  ;;  %vm11880_vm14 = vcmp.ne.s16.totalorder %v6451_v2, 0 }
 0x498   : > { %3104 = vrot.lane.b32.xlu1 %v8646_v42, %s6222_s21  ;;  %3288 = vmatpush1.bf16.msra.mxu0 %v3116_v60  ;;  %v2577_v59 = vsel %vm11873_vm6, %v8570_v41, 0 }
 0x499   : > { %3350 = vmatpush1.bf16.msra.mxu1 %v2638_v5  ;;  %3300 = vmatprep.subr.bf16.mxu0 %v3195_v28  ;;  %v8942_v23 = vpop.permute.xlu0 %2858  ;;  %v11869_v28 = vld [vmem:[#allocation54_spill] sm:$0xff] }
 0x49a   : > { %3351 = vmatprep.subr.bf16.mxu1 %v2717_v38  ;;  %v8947_v58 = vpop.permute.xlu1 %3166  ;;  %vm11870_vm4 = vcmp.ne.s16.totalorder %v11869_v28, 0  ;;  %vm11881_vm11 = vcmp.ne.s16.totalorder %v11869_v28, 0 }
 0x49b   : > { %3102 = vrot.lane.b32.xlu0 %v8656_v14, %s6222_s21  ;;  %3290 = vmatmul.mubr.bf16.vlgmr.msra.gmra.mrb[24].mxu0 %v8929_v20  ;;  %v2575_v38 = vsel %vm11870_vm4, %v8554_v24, 0 }
 0x49c   : > { %2028 = vperm.xlu1 %6172, %v2021_v54   ;;  %3301 = vmatpush1.bf16.msra.mxu0 %v3194_v36  ;;  %v8996_v36 = vld [vmem:[%s11237_s5 + $0x8] ss:$12 sps:$4 sm:$0xff]  }
 0x49d   : > { %3352 = vmatpush1.bf16.msra.mxu1 %v2716_v34  ;;  %3302 = vmatprep.subr.bf16.mxu0 %v3203_v45  ;;  %v8961_v13 = vpop.permute.xlu0 %3098  ;;  %v11876_v45 = vld [vmem:[#allocation8_spill] sm:$0xff] }
 0x49e   : > { %v2603_v60 = vpop.permute.xlu1 %2602  ;;  %3332 = vmatprep.mubr.bf16.mxu0 %v11589_v18  ;;  %vm11877_vm4 = vcmp.ne.s16.totalorder %v11876_v45, 0 }
 0x49f   : > { %3106 = vrot.lane.b32.xlu0 %v8668_v52, %s6222_s21  ;;  %vm11885_vm6 = vmmov %vm11877_vm4 }
 0x4a0   : > { %3170 = vrot.lane.b32.xlu1 %v2576_v29, %s6223_s24  ;;  %3303 = vmatpush1.bf16.msra.mxu0 %v3202_v0 }
 0x4a1   : > { %6039 = vmatprep.subr.msk.bf16.mxu0 %vm11868_vm13, %v8554_v24  ;;  %v8976_v49 = vpop.permute.xlu0 %2704  ;;  %v2803_v24 = vsel %vm1095_vm8, %v8577_v16, %v8830_v43  ;;  %vm11874_vm13 = vcmask 261120  }
 0x4a2   : > { %v8978_v5 = vpop.permute.xlu1 %2606  ;;  %v2725_v54 = vsel %vm11863_vm12, %v8719_v53, %v8976_v49  ;;  %v11875_v53 = vld [vmem:[#allocation79_spill] sm:$0xff]  ;;  %vm11878_vm12 = vcmp.ne.s16.totalorder %v11865_v46, 0 }
 0x4a3   : > { %3168 = vrot.lane.b32.xlu0 %v2575_v38, %s6223_s24  ;;  %3353 = vmatprep.subr.bf16.mxu1 %v2725_v54  ;;  %v2486_v29 = vsel %vm11877_vm4, %v11875_v53, 0  ;;  %v2585_v0 = vsel %vm11878_vm12, %v8656_v14, 0  ;;  %v11879_v38 = vld [vmem:[#allocation84_spill] sm:$0xff]  ;;  %vm11888_vm4 = vcmp.ne.s16.totalorder %v7915_v27, 0  ;;  %vm11893_vm12 = vcmask 1031168  }
 0x4a4   : > { %3174 = vrot.lane.b32.xlu1 %v2578_v19, %s6223_s24  ;;  %3354 = vmatpush1.bf16.msra.mxu1 %v2724_v32  ;;  %v2802_v54 = vsel %vm1095_vm8, %v11879_v38, %v8577_v16  ;;  %v11884_v16 = vld [vmem:[#allocation83_spill] sm:$0xff] }
 0x4a5   : > { %3355 = vmatprep.subr.bf16.mxu1 %v2803_v24  ;;  %v9002_v34 = vpop.permute.xlu0 %2776  ;;  %v2584_v24 = vsel %vm11881_vm11, %v8631_v6, 0  ;;  %vm11896_vm11 = vmmov %vm11893_vm12 }
 0x4a6   : > { %v9004_v57 = vpop.permute.xlu1 %2688 }
 0x4a7   : > { %3172 = vrot.lane.b32.xlu0 %v2577_v59, %s6223_s24  ;;  %6035 = vmatmul.mubr.msk.bf16.vlgmr.msra.gmra.mrb[24].mxu0 %vm11874_vm13, %v8996_v36  ;;  %v11882_v59 = vld [vmem:[#allocation90_spill] sm:$0xff]  ;;  %vm11886_vm13 = vcmp.ne.s16.totalorder %v7904_v1, 0 }
 0x4a8   : > { %3430 = vmatpush1.bf16.msra.mxu0 %v2486_v29  ;;  %3188 = vrot.lane.b32.xlu1 %v2585_v0, %s6223_s24  ;;  %v11883_v29 = vld [vmem:[#allocation82_spill] sm:$0xff]  ;;  %v2494_v0 = vsel %vm11885_vm6, %v11884_v16, 0  ;;  %v2587_v38 = vsel %vm11886_vm13, %v8668_v52, 0  ;;  %vm11897_vm6 = vmmov %vm11896_vm11  ;;  %vm11900_vm13 = vcmask 506880  }
 0x4a9   : > { %3356 = vmatpush1.bf16.msra.mxu1 %v2802_v54  ;;  %6040 = vmatprep.subr.msk.bf16.mxu0 %vm11880_vm14, %v8631_v6  ;;  %v9025_v19 = vpop.permute.xlu0 %2790  ;;  %v2810_v6 = vsel %vm1095_vm8, %v8765_v22, %v11882_v59  ;;  %v2633_v54 = vsel %vm1005_vm2, %v2603_v60, %v8853_v48  ;;  %v2632_v22 = vsel %vm1005_vm2, %v8832_v44, %v2603_v60  ;;  %v11890_v44 = vld [vmem:[#allocation85_spill] sm:$0xff]  ;;  %vm11894_vm14 = vmmov %vm11893_vm12 }
 0x4aa   : > { %v9027_v32 = vpop.permute.xlu1 %2692  ;;  %v2811_v53 = vsel %vm1095_vm8, %v11882_v59, %v9025_v19  ;;  %3461 = vmatprep.mubr.bf16.mxu0 %v11883_v29  ;;  %v2957_v60 = vsel %vm1176_vm1, %v11890_v44, %v8902_v37 }
 0x4ab   : > { %3186 = vrot.lane.b32.xlu0 %v2584_v24, %s6223_s24  ;;  %3357 = vmatprep.subr.bf16.mxu1 %v2811_v53  ;;  %v11887_v24 = vld [vmem:[#allocation80_spill] sm:$0xff] }
 0x4ac   : > { %3432 = vmatpush1.bf16.msra.mxu0 %v2494_v0  ;;  %3192 = vrot.lane.b32.xlu1 %v2587_v38, %s6223_s24  ;;  %v2871_v53 = vsel %vm1131_vm7, %v11887_v24, %v8855_v63  ;;  %v2586_v0 = vsel %vm11888_vm4, %v8646_v42, 0  ;;  %v2870_v59 = vsel %vm1131_vm7, %v8455_v26, %v11887_v24  ;;  %v11889_v38 = vld [vmem:[#allocation88_spill] sm:$0xff]  ;;  %vm11901_vm4 = vmmov %vm11900_vm13 }
 0x4ad   : > { %3358 = vmatpush1.bf16.msra.mxu1 %v2810_v6  ;;  %3433 = vmatprep.subr.bf16.mxu0 %v2633_v54  ;;  %v9052_v16 = vpop.permute.xlu0 %2780  ;;  %v2879_v6 = vsel %vm1131_vm7, %v11889_v38, %v8942_v23 }
 0x4ae   : > { %3359 = vmatprep.subr.bf16.mxu1 %v2871_v53  ;;  %v2775_v52 = vpop.permute.xlu1 %2774 }
 0x4af   : > { %3190 = vrot.lane.b32.xlu0 %v2586_v0, %s6223_s24  ;;  %v2878_v0 = vsel %vm1131_vm7, %v8658_v40, %v11889_v38 }
 0x4b0   : > { %3434 = vmatpush1.bf16.msra.mxu0 %v2632_v22  ;;  %v2956_v22 = vsel %vm1176_vm1, %v8547_v55, %v11890_v44 }
 0x4b1   : > { %3360 = vmatpush1.bf16.msra.mxu1 %v2870_v59  ;;  %v9066_v54 = vpop.permute.xlu0 %2944  ;;  %v11891_v59 = vld [vmem:[#allocation91_spill] sm:$0xff] }
 0x4b2   : > { %3361 = vmatprep.subr.bf16.mxu1 %v2879_v6  ;;  %v9068_v53 = vpop.permute.xlu1 %2778  ;;  %v2965_v6 = vsel %vm1176_vm1, %v11891_v59, %v9066_v54  ;;  %v2964_v38 = vsel %vm1176_vm1, %v8743_v25, %v11891_v59  ;;  %v2719_v59 = vsel %vm11893_vm12, %v9004_v57, %v8885_v4  ;;  %vm11902_vm12 = vmmov %vm11901_vm4 }
 0x4b5   : > { %3362 = vmatpush1.bf16.msra.mxu1 %v2878_v0  ;;  %v9076_v26 = vpop.permute.xlu0 %3030  ;;  %v11892_v0 = vld [vmem:[#allocation86_spill] sm:$0xff] }
 0x4b6   : > { %3363 = vmatprep.subr.bf16.mxu1 %v2957_v60  ;;  %v2621_v24 = vpop.permute.xlu1 %2620  ;;  %v3043_v60 = vsel %vm908_vm5, %v11892_v0, %v8916_v50  ;;  %v3042_v25 = vsel %vm908_vm5, %v8575_v12, %v11892_v0  ;;  %v2718_v12 = vsel %vm11894_vm14, %v8887_v35, %v9004_v57  ;;  %v11898_v57 = vld [vmem:[#allocation89_spill] sm:$0xff]  ;;  %vm11903_vm14 = vmmov %vm11901_vm4 }
 0x4b9   : > { %3364 = vmatpush1.bf16.msra.mxu1 %v2956_v22  ;;  %v9084_v45 = vpop.permute.xlu0 %3184 }
 0x4ba   : > { %3365 = vmatprep.subr.bf16.mxu1 %v2965_v6  ;;  %v9086_v40 = vpop.permute.xlu1 %2624  ;;  %v2640_v6 = vsel %vm1005_vm2, %v8914_v62, %v2621_v24  ;;  %v3050_v62 = vsel %vm908_vm5, %v8767_v9, %v8782_v7  ;;  %v2805_v9 = vsel %vm1095_vm8, %v2775_v52, %v9002_v34 }
 0x4bd   : > { %3366 = vmatpush1.bf16.msra.mxu1 %v2964_v38  ;;  %v9094_v55 = vpop.permute.xlu0 %2622  ;;  %v3051_v38 = vsel %vm908_vm5, %v8782_v7, %v9076_v26 }
 0x4be   : > { %3367 = vmatprep.subr.bf16.mxu1 %v3043_v60  ;;  %v2707_v44 = vpop.permute.xlu1 %2706  ;;  %v2641_v22 = vsel %vm1005_vm2, %v2621_v24, %v9094_v55  ;;  %v11895_v24 = vld [vmem:[#allocation81_spill] sm:$0xff] }
 0x4bf   : > { %3435 = vmatprep.subr.bf16.mxu0 %v2641_v22  ;;  %v3111_v0 = vsel %vm1256_vm9, %v11895_v24, %v8872_v39  ;;  %v2726_v35 = vsel %vm11897_vm6, %v8976_v49, %v2707_v44  ;;  %v3110_v7 = vsel %vm1256_vm9, %v8479_v15, %v11895_v24  ;;  %v2804_v49 = vsel %vm1095_vm8, %v8830_v43, %v2775_v52 }
 0x4c0   : > { %3436 = vmatpush1.bf16.msra.mxu0 %v2640_v6  ;;  %v3118_v15 = vsel %vm1256_vm9, %v8684_v11, %v11898_v57  ;;  %v3205_v52 = vsel %vm11902_vm12, %v8814_v3, %v9084_v45 }
 0x4c1   : > { %3368 = vmatpush1.bf16.msra.mxu1 %v3042_v25  ;;  %3437 = vmatprep.subr.bf16.mxu0 %v2719_v59  ;;  %v9109_v60 = vpop.permute.xlu0 %2626 }
 0x4c2   : > { %3369 = vmatprep.subr.bf16.mxu1 %v3051_v38  ;;  %v9111_v22 = vpop.permute.xlu1 %2710  ;;  %v3119_v38 = vsel %vm1256_vm9, %v11898_v57, %v8961_v13 }
 0x4c4   : > { %3438 = vmatpush1.bf16.msra.mxu0 %v2718_v12 }
 0x4c5   : > { %3370 = vmatpush1.bf16.msra.mxu1 %v3050_v62  ;;  %v9122_v6 = vpop.permute.xlu0 %2708 }
 0x4c6   : > { %3371 = vmatprep.subr.bf16.mxu1 %v3111_v0  ;;  %v2793_v25 = vpop.permute.xlu1 %2792  ;;  %v2727_v59 = vsel %vm11896_vm11, %v2707_v44, %v9122_v6  ;;  %v11899_v44 = vld [vmem:[#allocation87_spill] sm:$0xff]  ;;  %vm11905_vm11 = vcmask 261120  }
 0x4c7   : > { %3439 = vmatprep.subr.bf16.mxu0 %v2727_v59  ;;  %v3197_v24 = vsel %vm11900_vm13, %v11899_v44, %v8947_v58  ;;  %v2812_v43 = vsel %vm1095_vm8, %v9025_v19, %v2793_v25  ;;  %v3196_v11 = vsel %vm11901_vm4, %v8599_v56, %v11899_v44  ;;  %v3204_v19 = vsel %vm11903_vm14, %v8796_v30, %v8814_v3  ;;  %v11906_v30 = vld [vmem:[#allocation9_spill] sm:$0xff]  ;;  %v12170_v56 = vld [vmem:[#allocation16_spill] sm:$0xff] }
 0x4c8   : > { %3440 = vmatpush1.bf16.msra.mxu0 %v2726_v35  ;;  %vm11907_vm6 = vcmp.ne.s16.totalorder %v11906_v30, 0  ;;  %vm11909_vm4 = vcmask 1031168  }
 0x4c9   : > { %3372 = vmatpush1.bf16.msra.mxu1 %v3110_v7  ;;  %3441 = vmatprep.subr.bf16.mxu0 %v2805_v9  ;;  %v9136_v12 = vpop.permute.xlu0 %2712  ;;  %vm11908_vm13 = vmmov %vm11907_vm6 }
 0x4ca   : > { %3373 = vmatprep.subr.bf16.mxu1 %v3119_v38  ;;  %v9138_v62 = vpop.permute.xlu1 %2796  ;;  %vm11910_vm12 = vmmov %vm11909_vm4 }
 0x4cb   : > { %vm11911_vm14 = vmmov %vm11909_vm4 }
 0x4cc   : > { %3442 = vmatpush1.bf16.msra.mxu0 %v2804_v49 }
 0x4cd   : > { %3374 = vmatpush1.bf16.msra.mxu1 %v3118_v15  ;;  %v9148_v0 = vpop.permute.xlu0 %2794 }
 0x4ce   : > { %3386 = vmatprep.subr.bf16.mxu1 %v3197_v24  ;;  %v2843_v59 = vpop.permute.xlu1 %2842  ;;  %v2813_v35 = vsel %vm1095_vm8, %v2793_v25, %v9148_v0 }
 0x4cf   : > { %3443 = vmatprep.subr.bf16.mxu0 %v2813_v35  ;;  %v2872_v49 = vsel %vm1131_vm7, %v8855_v63, %v2843_v59 }
 0x4d0   : > { %3376 = vmatmul.mubr.bf16.vlgmr.msra.gmra.mrb[24].mxu1 %v8929_v20  ;;  %3444 = vmatpush1.bf16.msra.mxu0 %v2812_v43  ;;  %v2634_v43 = vsel %vm1005_vm2, %v8853_v48, %v8978_v5  ;;  %v2721_v48 = vsel %vm11909_vm4, %v9027_v32, %v8900_v51 }
 0x4d1   : > { %3387 = vmatpush1.bf16.msra.mxu1 %v3196_v11  ;;  %v9161_v7 = vpop.permute.xlu0 %2798  ;;  %3418 = vmatprep.mubr.bf16.mxu1 %v11589_v18 }
 0x4d2   : > { %3388 = vmatprep.subr.bf16.mxu1 %v3205_v52  ;;  %v9164_v9 = vpop.permute.xlu1 %2846 }
 0x4d5   : > { %3389 = vmatpush1.bf16.msra.mxu1 %v3204_v19  ;;  %v9169_v25 = vpop.permute.xlu0 %2844  ;;  %v2642_v19 = vsel %vm1005_vm2, %v9094_v55, %v9086_v40 }
 0x4d6   : > { %6042 = vmatprep.subr.msk.bf16.mxu1 %vm701_vm15, %v8570_v41  ;;  %v2861_v57 = vpop.permute.xlu1 %2860  ;;  %v2873_v38 = vsel %vm1131_vm7, %v2843_v59, %v9169_v25  ;;  %v2488_v41 = vsel %vm11907_vm6, %v8471_v33, 0  ;;  %v2496_v33 = vsel %vm11908_vm13, %v8656_v14, 0  ;;  %vm11916_vm6 = vcmask 506880  }
 0x4d7   : > { %3445 = vmatprep.subr.bf16.mxu0 %v2873_v38  ;;  %v2880_v59 = vsel %vm1131_vm7, %v8942_v23, %v2861_v57  ;;  %v2643_v23 = vsel %vm1005_vm2, %v9086_v40, %v9109_v60  ;;  %vm11918_vm13 = vmmov %vm11916_vm6 }
 0x4d8   : > { %3446 = vmatpush1.bf16.msra.mxu0 %v2872_v49 }
 0x4d9   : > { %v9178_v15 = vpop.permute.xlu0 %2848 }
 0x4da   : > { %v9180_v44 = vpop.permute.xlu1 %2864 }
 0x4dc   : > { %6038 = vmatmul.mubr.msk.bf16.vlgmr.msra.gmra.mrb[24].mxu1 %vm11905_vm11, %v8996_v36  ;;  %vm11912_vm11 = vmmov %vm11909_vm4 }
 0x4dd   : > { %3516 = vmatpush1.bf16.msra.mxu1 %v2488_v41  ;;  %v9187_v3 = vpop.permute.xlu0 %2862  ;;  %3547 = vmatprep.mubr.bf16.mxu1 %v11883_v29  ;;  %v2635_v29 = vsel %vm1005_vm2, %v8978_v5, %v8870_v31  ;;  %v2728_v49 = vsel %vm11912_vm11, %v9122_v6, %v9111_v22  ;;  %v2806_v41 = vsel %vm1095_vm8, %v9002_v34, %v9068_v53  ;;  %vm11920_vm4 = vmmov %vm11916_vm6 }
 0x4de   : > { %6043 = vmatprep.subr.msk.bf16.mxu1 %vm701_vm15, %v8646_v42  ;;  %v2929_v63 = vpop.permute.xlu1 %2928  ;;  %v2881_v24 = vsel %vm1131_vm7, %v2861_v57, %v9187_v3  ;;  %v2720_v57 = vsel %vm11910_vm12, %v8885_v4, %v9027_v32  ;;  %v2807_v4 = vsel %vm1095_vm8, %v9068_v53, %v9052_v16  ;;  %v2875_v34 = vsel %vm1131_vm7, %v9164_v9, %v9178_v15  ;;  %vm11922_vm12 = vmmov %vm11920_vm4 }
 0x4df   : > { %3447 = vmatprep.subr.bf16.mxu0 %v2881_v24  ;;  %v2958_v31 = vsel %vm1176_vm1, %v8902_v37, %v2929_v63  ;;  %v2729_v37 = vsel %vm11911_vm14, %v9111_v22, %v9136_v12  ;;  %v2814_v24 = vsel %vm1095_vm8, %v9148_v0, %v9138_v62  ;;  %vm11924_vm14 = vmmov %vm11920_vm4 }
 0x4e0   : > { %3448 = vmatpush1.bf16.msra.mxu0 %v2880_v59  ;;  %v2874_v59 = vsel %vm1131_vm7, %v9169_v25, %v9164_v9  ;;  %vm11926_vm11 = vmmov %vm11920_vm4 }
 0x4e1   : > { %3518 = vmatpush1.bf16.msra.mxu1 %v2496_v33  ;;  %v2867_v35 = vpop.permute.xlu0 %2866 }
 0x4e2   : > { %3519 = vmatprep.subr.bf16.mxu1 %v2635_v29  ;;  %v9203_v42 = vpop.permute.xlu1 %2932  ;;  %v2882_v29 = vsel %vm1131_vm7, %v9187_v3, %v9180_v44 }
 0x4e5   : > { %3520 = vmatpush1.bf16.msra.mxu1 %v2634_v43  ;;  %v2931_v14 = vpop.permute.xlu0 %2930 }
 0x4e6   : > { %3521 = vmatprep.subr.bf16.mxu1 %v2643_v23  ;;  %v2947_v11 = vpop.permute.xlu1 %2946  ;;  %v2959_v52 = vsel %vm1176_vm1, %v2929_v63, %v2931_v14 }
 0x4e7   : > { %3449 = vmatprep.subr.bf16.mxu0 %v2959_v52  ;;  %v2966_v51 = vsel %vm1176_vm1, %v9066_v54, %v2947_v11  ;;  %v2815_v54 = vsel %vm1095_vm8, %v9138_v62, %v9161_v7 }
 0x4e8   : > { %3450 = vmatpush1.bf16.msra.mxu0 %v2958_v31 }
 0x4e9   : > { %3522 = vmatpush1.bf16.msra.mxu1 %v2642_v19  ;;  %v2935_v5 = vpop.permute.xlu0 %2934 }
 0x4ea   : > { %3523 = vmatprep.subr.bf16.mxu1 %v2721_v48  ;;  %v2951_v60 = vpop.permute.xlu1 %2950  ;;  %v2961_v9 = vsel %vm1176_vm1, %v9203_v42, %v2935_v5 }
 0x4ed   : > { %3524 = vmatpush1.bf16.msra.mxu1 %v2720_v57  ;;  %v2949_v38 = vpop.permute.xlu0 %2948 }
 0x4ee   : > { %3525 = vmatprep.subr.bf16.mxu1 %v2729_v37  ;;  %v3015_v40 = vpop.permute.xlu1 %3014  ;;  %v2967_v55 = vsel %vm1176_vm1, %v2947_v11, %v2949_v38  ;;  %v2968_v3 = vsel %vm1176_vm1, %v2949_v38, %v2951_v60 }
 0x4ef   : > { %3451 = vmatprep.subr.bf16.mxu0 %v2967_v55  ;;  %v3044_v16 = vsel %vm908_vm5, %v8916_v50, %v3015_v40  ;;  %v2883_v50 = vsel %vm1131_vm7, %v9180_v44, %v2867_v35  ;;  %v2960_v35 = vsel %vm1176_vm1, %v2931_v14, %v9203_v42 }
 0x4f0   : > { %3452 = vmatpush1.bf16.msra.mxu0 %v2966_v51 }
 0x4f1   : > { %3526 = vmatpush1.bf16.msra.mxu1 %v2728_v49  ;;  %v2953_v32 = vpop.permute.xlu0 %2952 }
 0x4f2   : > { %3527 = vmatprep.subr.bf16.mxu1 %v2807_v4  ;;  %v3019_v12 = vpop.permute.xlu1 %3018  ;;  %v2969_v43 = vsel %vm1176_vm1, %v2951_v60, %v2953_v32  ;;  %v11913_v4 = vld [vmem:[#allocation69_spill] sm:$0xff] }
 0x4f5   : > { %3528 = vmatpush1.bf16.msra.mxu1 %v2806_v41  ;;  %v3017_v63 = vpop.permute.xlu0 %3016 }
 0x4f6   : > { %3529 = vmatprep.subr.bf16.mxu1 %v2815_v54  ;;  %v3033_v22 = vpop.permute.xlu1 %3032  ;;  %v3045_v6 = vsel %vm908_vm5, %v3015_v40, %v3017_v63  ;;  %v3046_v14 = vsel %vm908_vm5, %v3017_v63, %v3019_v12  ;;  %v11915_v54 = vld [vmem:[#allocation73_spill] sm:$0xff] }
 0x4f7   : > { %3453 = vmatprep.subr.bf16.mxu0 %v3045_v6  ;;  %v3052_v0 = vsel %vm908_vm5, %v9076_v26, %v3033_v22 }
 0x4f8   : > { %3454 = vmatpush1.bf16.msra.mxu0 %v3044_v16 }
 0x4f9   : > { %3530 = vmatpush1.bf16.msra.mxu1 %v2814_v24  ;;  %v3021_v53 = vpop.permute.xlu0 %3020 }
 0x4fa   : > { %3531 = vmatprep.subr.bf16.mxu1 %v2875_v34  ;;  %v3037_v7 = vpop.permute.xlu1 %3036  ;;  %v3047_v52 = vsel %vm908_vm5, %v3019_v12, %v3021_v53  ;;  %v11914_v12 = vld [vmem:[#allocation70_spill] sm:$0xff] }
 0x4fb   : > { %v11917_v34 = vld [vmem:[#allocation74_spill] sm:$0xff] }
 0x4fd   : > { %3532 = vmatpush1.bf16.msra.mxu1 %v2874_v59  ;;  %v3035_v33 = vpop.permute.xlu0 %3034  ;;  %v11919_v59 = vld [vmem:[#allocation75_spill] sm:$0xff] }
 0x4fe   : > { %3533 = vmatprep.subr.bf16.mxu1 %v2883_v50  ;;  %v3053_v62 = vsel %vm908_vm5, %v3033_v22, %v3035_v33  ;;  %v3083_v15 = vpop.permute.xlu1 %3082  ;;  %v3054_v60 = vsel %vm908_vm5, %v3035_v33, %v3037_v7 }
 0x4ff   : > { %3455 = vmatprep.subr.bf16.mxu0 %v3053_v62  ;;  %v3112_v44 = vsel %vm1256_vm9, %v8872_v39, %v3083_v15 }
 0x500   : > { %3456 = vmatpush1.bf16.msra.mxu0 %v3052_v0 }
 0x501   : > { %3534 = vmatpush1.bf16.msra.mxu1 %v2882_v29  ;;  %v3039_v25 = vpop.permute.xlu0 %3038 }
 0x502   : > { %3535 = vmatprep.subr.bf16.mxu1 %v2961_v9  ;;  %v3087_v26 = vpop.permute.xlu1 %3086  ;;  %v3055_v19 = vsel %vm908_vm5, %v3037_v7, %v3039_v25 }
 0x505   : > { %3536 = vmatpush1.bf16.msra.mxu1 %v2960_v35  ;;  %v3085_v23 = vpop.permute.xlu0 %3084 }
 0x506   : > { %3537 = vmatprep.subr.bf16.mxu1 %v2969_v43  ;;  %v3113_v11 = vsel %vm1256_vm9, %v3083_v15, %v3085_v23  ;;  %v3101_v42 = vpop.permute.xlu1 %3100  ;;  %v3114_v55 = vsel %vm1256_vm9, %v3085_v23, %v3087_v26  ;;  %v11921_v15 = vld [vmem:[#allocation76_spill] sm:$0xff]  ;;  %v11923_v43 = vld [vmem:[#allocation77_spill] sm:$0xff] }
 0x507   : > { %3457 = vmatprep.subr.bf16.mxu0 %v3113_v11  ;;  %v3120_v39 = vsel %vm1256_vm9, %v8961_v13, %v3101_v42 }
 0x508   : > { %3458 = vmatpush1.bf16.msra.mxu0 %v3112_v44  ;;  %v11925_v44 = vld [vmem:[#allocation78_spill] sm:$0xff] }
 0x509   : > { %3538 = vmatpush1.bf16.msra.mxu1 %v2968_v3  ;;  %v3089_v31 = vpop.permute.xlu0 %3088 }
 0x50a   : > { %3539 = vmatprep.subr.bf16.mxu1 %v3047_v52  ;;  %v3115_v57 = vsel %vm1256_vm9, %v3087_v26, %v3089_v31  ;;  %v3105_v38 = vpop.permute.xlu1 %3104 }
 0x50d   : > { %3540 = vmatpush1.bf16.msra.mxu1 %v3046_v14  ;;  %v3103_v48 = vpop.permute.xlu0 %3102 }
 0x50e   : > { %3541 = vmatprep.subr.bf16.mxu1 %v3055_v19  ;;  %v3121_v5 = vsel %vm1256_vm9, %v3101_v42, %v3103_v48  ;;  %v3122_v13 = vsel %vm1256_vm9, %v3103_v48, %v3105_v38 }
 0x50f   : > { %3459 = vmatprep.subr.bf16.mxu0 %v3121_v5 }
 0x510   : > { %3460 = vmatpush1.bf16.msra.mxu0 %v3120_v39 }
 0x511   : > { %3542 = vmatpush1.bf16.msra.mxu1 %v3054_v60  ;;  %v3107_v37 = vpop.permute.xlu0 %3106 }
 0x512   : > { %3543 = vmatprep.subr.bf16.mxu1 %v3115_v57  ;;  %v3123_v40 = vsel %vm1256_vm9, %v3105_v38, %v3107_v37 }
 0x513   : > { %3462 = vmatmul.mubr.bf16.vlgmr.msra.gmra.mrb[28].mxu0 %v8929_v20 }
 0x514   : > { %3504 = vmatprep.mubr.bf16.mxu0 %v11589_v18 }
 0x515   : > { %3544 = vmatpush1.bf16.msra.mxu1 %v3114_v55  ;;  %v3169_v51 = vpop.permute.xlu0 %3168 }
 0x516   : > { %3545 = vmatprep.subr.bf16.mxu1 %v3123_v40 }
 0x519   : > { %3546 = vmatpush1.bf16.msra.mxu1 %v3122_v13  ;;  %v3173_v6 = vpop.permute.xlu0 %3172 }
 0x51b   : > { %v2029_v49 = vpop.permute.xlu1 %2028 }
 0x51c   : > { %3548 = vmatmul.mubr.bf16.vlgmr.msra.gmra.mrb[28].mxu1 %v8929_v20  ;;  %v2133_v32 = vadd.f32 %v11913_v4, %v2029_v49  ;;  %v2135_v41 = vadd.f32 %v11914_v12, %v2029_v49  ;;  %v2194_v63 = vadd.f32 %v11915_v54, %v2029_v49  ;;  %v2196_v53 = vadd.f32 %v11917_v34, %v2029_v49 }
 0x51d   : > { %3590 = vmatprep.mubr.bf16.mxu1 %v11589_v18  ;;  %v3198_v20 = vsel %vm11918_vm13, %v8947_v58, %v3169_v51  ;;  %v2255_v50 = vadd.f32 %v11919_v59, %v2029_v49  ;;  %v2257_v29 = vadd.f32 %v11921_v15, %v2029_v49  ;;  %v3187_v25 = vpop.permute.xlu0 %3186  ;;  %v2316_v23 = vadd.f32 %v11923_v43, %v2029_v49 }
 0x51e   : > { %v3601_v22 = vadd.f32 %v2135_v41, %v2133_v32  ;;  %v2318_v3 = vadd.f32 %v11925_v44, %v2029_v49  ;;  %v3206_v31 = vsel %vm11926_vm11, %v9084_v45, %v3187_v25  ;;  %vm11928_vm13 = vcmask 261120   ;;  %v3226_v45 = vld [vmem:[%s11238_s6] sm:$0xff] }
 0x51f   : > { %v3171_v16 = vpop.permute.xlu1 %3170 }
 0x520   : > { %v3199_v24 = vsel %vm11916_vm6, %v3169_v51, %v3171_v16  ;;  %v3602_v7 = vadd.f32 %v3601_v22, %v2194_v63  ;;  %v3200_v35 = vsel %vm11922_vm12, %v3171_v16, %v3173_v6  ;;  %vm11927_vm6 = vmmov %vm11920_vm4 }
 0x521   : > { %3472 = vmatprep.subr.bf16.mxu0 %v3199_v24  ;;  %v3191_v14 = vpop.permute.xlu0 %3190  ;;  %vm11929_vm12 = vmmov %vm11928_vm13 }
 0x522   : > { %3473 = vmatpush1.bf16.msra.mxu0 %v3198_v20  ;;  %v3603_v33 = vadd.f32 %v3602_v7, %v2196_v53 }
 0x523   : > { %v3175_v62 = vpop.permute.xlu1 %3174 }
 0x524   : > { %v3201_v0 = vsel %vm11920_vm4, %v3173_v6, %v3175_v62  ;;  %v3604_v9 = vadd.f32 %v3603_v33, %v2255_v50 }
 0x525   : > { %3558 = vmatprep.subr.bf16.mxu1 %v3201_v0 }
 0x526   : > { %3559 = vmatpush1.bf16.msra.mxu1 %v3200_v35  ;;  %v3605_v26 = vadd.f32 %v3604_v9, %v2257_v29 }
 0x527   : > { %v3189_v11 = vpop.permute.xlu1 %3188 }
 0x528   : > { %v3207_v58 = vsel %vm11924_vm14, %v3187_v25, %v3189_v11  ;;  %v3606_v52 = vadd.f32 %v3605_v26, %v2316_v23  ;;  %v3208_v5 = vsel %vm11920_vm4, %v3189_v11, %v3191_v14 }
 0x529   : > { %3474 = vmatprep.subr.bf16.mxu0 %v3207_v58 }
 0x52a   : > { %3475 = vmatpush1.bf16.msra.mxu0 %v3206_v31  ;;  %v3607_v42 = vadd.f32 %v3606_v52, %v2318_v3 }
 0x52b   : > { %v3193_v19 = vpop.permute.xlu1 %3192 }
 0x52c   : > { %3608 = vadd.xlane.f32.xlu0 %v3607_v42  ;;  %v3209_v48 = vsel %vm11927_vm6, %v3191_v14, %v3193_v19 }
 0x52d   : > { %6041 = vmatmul.mubr.msk.bf16.vlgmr.msra.gmra.mrb[28].mxu0 %vm11928_vm13, %v8996_v36  ;;  %3560 = vmatprep.subr.bf16.mxu1 %v3209_v48 }
 0x52e   : > { %3561 = vmatpush1.bf16.msra.mxu1 %v3208_v5  ;;  %4340 = vmatprep.mubr.bf16.mxu0 %v11589_v18 }
 0x531   : > { %6044 = vmatmul.mubr.msk.bf16.vlgmr.msra.gmra.mrb[28].mxu1 %vm11929_vm12, %v8996_v36 }
 0x532   : > { %4401 = vmatprep.mubr.bf16.mxu1 %v11589_v18 }
 0x542   : > { %3230 = vperm.xlu0 %6171, %v3226_v45  }
 0x57a   : > { %v3334_v39 = vpop.f32.mrb[24].mxu0 }
 0x57b   : > { %v3336_v60 = vpop.f32.mrb[25].mxu0 }
 0x57c   : > { %v9312_v57 = vpop.f32.mrb[26].mxu0 }
 0x57d   : > { %v9314_v37 = vpop.f32.mrb[27].mxu0 }
 0x5af   : > { %v3420_v38 = vpop.f32.mrb[24].mxu1 }
 0x5b0   : > { %v3422_v40 = vpop.f32.mrb[25].mxu1 }
 0x5b1   : > { %v9316_v55 = vpop.f32.mrb[26].mxu1 }
 0x5b2   : > { %v3426_v13 = vpop.f32.mrb[27].mxu1 }
 0x5b9   : > { %v3609_v51 = vpop.xlane.xlu0 %3608 }
 0x5ba   : > { %v3611_v36 = vmul.f32 0.0009765625, %v3609_v51 }
 0x5bc   : > { %v9318_v49 = vsub.f32 %v2133_v32, %v3611_v36  ;;  %v9320_v4 = vsub.f32 %v2135_v41, %v3611_v36  ;;  %v9322_v12 = vsub.f32 %v2194_v63, %v3611_v36  ;;  %v9324_v54 = vsub.f32 %v2196_v53, %v3611_v36 }
 0x5bd   : > { %v9330_v16 = vsub.f32 %v2255_v50, %v3611_v36  ;;  %v3617_v32 = vsub.f32 %v2257_v29, %v3611_v36  ;;  %v3618_v7 = vsub.f32 %v2316_v23, %v3611_v36  ;;  %v3619_v59 = vsub.f32 %v2318_v3, %v3611_v36  ;;  %v3227_v29 = vld [vmem:[%s11238_s6 + $0x8] sm:$0xff] }
 0x5be   : > { %v3620_v22 = vmul.f32 %v9318_v49, %v9318_v49  ;;  %v3621_v6 = vmul.f32 %v9320_v4, %v9320_v4  ;;  %v3622_v24 = vmul.f32 %v9322_v12, %v9322_v12  ;;  %v3623_v41 = vmul.f32 %v9324_v54, %v9324_v54 }
 0x5bf   : > { %v3624_v53 = vmul.f32 %v9330_v16, %v9330_v16  ;;  %v3625_v33 = vmul.f32 %v3617_v32, %v3617_v32  ;;  %v3626_v0 = vmul.f32 %v3618_v7, %v3618_v7  ;;  %v3627_v15 = vmul.f32 %v3619_v59, %v3619_v59 }
 0x5c0   : > { %v3628_v34 = vadd.f32 %v3621_v6, %v3620_v22 }
 0x5c1   : > { %v3231_v14 = vpop.permute.xlu0 %3230 }
 0x5c2   : > { %v3629_v63 = vadd.f32 %v3628_v34, %v3622_v24  ;;  %v6085_v19 = vadd.f32 %v3336_v60, %v3231_v14  ;;  %v6084_v48 = vadd.f32 %v3334_v39, %v3231_v14  ;;  %v6089_v5 = vadd.f32 %v3422_v40, %v3231_v14 }
 0x5c3   : > { %v6088_v45 = vadd.f32 %v3420_v38, %v3231_v14 }
 0x5c4   : > { %v3630_v20 = vadd.f32 %v3629_v63, %v3623_v41  ;;  %v3649_v34 = vadd.f32 1.0, %v6085_v19  ;;  %v3648_v41 = vadd.f32 1.0, %v6084_v48  ;;  %v3651_v63 = vadd.f32 1.0, %v6089_v5  ;;  %v3696_v19 = vld [vmem:[%s9354_s29] sm:$0xff]  ;;  %v3698_v48 = vld [vmem:[%s9354_s29 + $0x10] sm:$0xff] }
 0x5c6   : > { %v3631_v62 = vadd.f32 %v3630_v20, %v3624_v53  ;;  %v3650_v53 = vadd.f32 1.0, %v6088_v45 }
 0x5c8   : > { %v3632_v50 = vadd.f32 %v3631_v62, %v3625_v33 }
 0x5ca   : > { %v3633_v9 = vadd.f32 %v3632_v50, %v3626_v0 }
 0x5cc   : > { %v3634_v25 = vadd.f32 %v3633_v9, %v3627_v15 }
 0x5ce   : > { %3635 = vadd.xlane.f32.xlu1 %v3634_v25 }
 0x5df   : > { %3235 = vperm.xlu1 %6172, %v3227_v29  }
 0x600   : > { %v3506_v35 = vpop.f32.mrb[28].mxu0 }
 0x601   : > { %v3508_v43 = vpop.f32.mrb[29].mxu0  ;;  %v6092_v51 = vadd.f32 %v3506_v35, %v3231_v14 }
 0x602   : > { %v3510_v23 = vpop.f32.mrb[30].mxu0  ;;  %v6093_v36 = vadd.f32 %v3508_v43, %v3231_v14 }
 0x603   : > { %v3512_v26 = vpop.f32.mrb[31].mxu0  ;;  %v3652_v20 = vadd.f32 1.0, %v6092_v51 }
 0x604   : > { %v3592_v11 = vpop.f32.mrb[28].mxu1  ;;  %v3653_v33 = vadd.f32 1.0, %v6093_v36 }
 0x605   : > { %v3594_v58 = vpop.f32.mrb[29].mxu1  ;;  %v6096_v22 = vadd.f32 %v3592_v11, %v3231_v14 }
 0x606   : > { %v3596_v44 = vpop.f32.mrb[30].mxu1  ;;  %v6097_v6 = vadd.f32 %v3594_v58, %v3231_v14 }
 0x607   : > { %v3598_v3 = vpop.f32.mrb[31].mxu1  ;;  %v3654_v62 = vadd.f32 1.0, %v6096_v22 }
 0x608   : > { %v3655_v0 = vadd.f32 1.0, %v6097_v6 }
 0x65b   : > { %v3636_v52 = vpop.xlane.xlu1 %3635 }
 0x65c   : > { %v3637_v31 = vmul.f32 0.0009765625, %v3636_v52 }
 0x65e   : > { %v3638_v42 = vadd.f32 1e-05, %v3637_v31  ;;  %v3697_v31 = vld [vmem:[%s9354_s29 + $0x8] sm:$0xff] }
 0x65f   : > { %v3236_v24 = vpop.permute.xlu1 %3235 }
 0x660   : > { %6196 = vrsqrt.f32 %v3638_v42  ;;  %v6087_v39 = vadd.f32 %v9314_v37, %v3236_v24  ;;  %v6086_v60 = vadd.f32 %v9312_v57, %v3236_v24  ;;  %v6091_v38 = vadd.f32 %v3426_v13, %v3236_v24 }
 0x661   : > { %v6090_v40 = vadd.f32 %v9316_v55, %v3236_v24  ;;  %v6095_v15 = vadd.f32 %v3512_v26, %v3236_v24  ;;  %v6094_v9 = vadd.f32 %v3510_v23, %v3236_v24  ;;  %v6099_v25 = vadd.f32 %v3598_v3, %v3236_v24 }
 0x662   : > { %v6098_v29 = vadd.f32 %v3596_v44, %v3236_v24 }
 0x66a   : > { %v6197_v50 = vpop.eup %6196 }
 0x66b   : > { %v3641_v35 = vmul.f32 %v6197_v50, %v9320_v4  ;;  %v3640_v43 = vmul.f32 %v6197_v50, %v9318_v49  ;;  %v3643_v11 = vmul.f32 %v6197_v50, %v9324_v54  ;;  %v3642_v58 = vmul.f32 %v6197_v50, %v9322_v12 }
 0x66c   : > { %v3645_v57 = vmul.f32 %v6197_v50, %v3617_v32  ;;  %v3644_v37 = vmul.f32 %v6197_v50, %v9330_v16  ;;  %v3647_v55 = vmul.f32 %v6197_v50, %v3619_v59  ;;  %v3646_v13 = vmul.f32 %v6197_v50, %v3618_v7  ;;  %v3699_v16 = vld [vmem:[%s9354_s29 + $0x18] sm:$0xff] }
 0x66d   : > { %v3657_v49 = vmul.f32 %v3649_v34, %v3641_v35  ;;  %v3656_v4 = vmul.f32 %v3648_v41, %v3640_v43  ;;  %v3659_v54 = vmul.f32 %v3651_v63, %v3643_v11  ;;  %v3658_v23 = vmul.f32 %v3650_v53, %v3642_v58  ;;  %v3701_v63 = vld [vmem:[%s9354_s29 + $0x28] sm:$0xff]  ;;  %v3702_v11 = vld [vmem:[%s9354_s29 + $0x30] sm:$0xff] }
 0x66e   : > { %v3661_v12 = vmul.f32 %v3653_v33, %v3645_v57  ;;  %v3660_v26 = vmul.f32 %v3652_v20, %v3644_v37  ;;  %v3663_v44 = vmul.f32 %v3655_v0, %v3647_v55  ;;  %v3662_v3 = vmul.f32 %v3654_v62, %v3646_v13 }
 0x66f   : > { %v3665_v52 = vadd.f32 %v6087_v39, %v3657_v49  ;;  %v3664_v42 = vadd.f32 %v6086_v60, %v3656_v4  ;;  %v3667_v14 = vadd.f32 %v6091_v38, %v3659_v54  ;;  %v3666_v32 = vadd.f32 %v6090_v40, %v3658_v23 }
 0x670   : > { %v3669_v59 = vadd.f32 %v6095_v15, %v3661_v12  ;;  %v3668_v7 = vadd.f32 %v6094_v9, %v3660_v26  ;;  %v3671_v5 = vadd.f32 %v6099_v25, %v3663_v44  ;;  %v3670_v45 = vadd.f32 %v6098_v29, %v3662_v3  ;;  %v3700_v9 = vld [vmem:[%s9354_s29 + $0x20] sm:$0xff]  ;;  %v3703_v29 = vld [vmem:[%s9354_s29 + $0x38] sm:$0xff] }
 0x671   : > { %vm3673_vm14 = vcmp.gt.f32.partialorder %v3665_v52, 0.0  ;;  %v3681_v51 = vmul.f32 0.01, %v3665_v52  ;;  %vm3672_vm11 = vcmp.gt.f32.partialorder %v3664_v42, 0.0  ;;  %v3680_v36 = vmul.f32 0.01, %v3664_v42 }
 0x672   : > { %vm3675_vm6 = vcmp.gt.f32.partialorder %v3667_v14, 0.0  ;;  %v3683_v22 = vmul.f32 0.01, %v3667_v14  ;;  %vm3674_vm13 = vcmp.gt.f32.partialorder %v3666_v32, 0.0  ;;  %v3682_v6 = vmul.f32 0.01, %v3666_v32 }
 0x673   : > { %v3689_v24 = vsel %vm3673_vm14, %v3665_v52, %v3681_v51  ;;  %v3688_v34 = vsel %vm3672_vm11, %v3664_v42, %v3680_v36  ;;  %vm3677_vm4 = vcmp.gt.f32.partialorder %v3669_v59, 0.0  ;;  %v3685_v41 = vmul.f32 0.01, %v3669_v59  ;;  %v11931_v42 = vld [vmem:[#allocation11_spill] sm:$0xff] }
 0x674   : > { %v3705_v53 = vadd.f32 %v3697_v31, %v3689_v24  ;;  %v3704_v20 = vadd.f32 %v3696_v19, %v3688_v34  ;;  %v3691_v33 = vsel %vm3675_vm6, %v3667_v14, %v3683_v22  ;;  %v3690_v62 = vsel %vm3674_vm13, %v3666_v32, %v3682_v6  ;;  %v11940_v36 = vld [vmem:[#allocation19_spill] sm:$0xff] }
 0x675   : > { %v3707_v0 = vadd.f32 %v3699_v16, %v3691_v33  ;;  %v3706_v39 = vadd.f32 %v3698_v48, %v3690_v62  ;;  %v3693_v60 = vsel %vm3677_vm4, %v3669_v59, %v3685_v41  ;;  %vm3676_vm12 = vcmp.gt.f32.partialorder %v3668_v7, 0.0  ;;  %v11934_v16 = vld [vmem:[#allocation10_spill] sm:$0xff]  ;;  %v11942_v34 = vld [vmem:[#allocation15_spill] sm:$0xff]  ;;  %v11946_v33 = vld [vmem:[#allocation13_spill] sm:$0xff] }
 0x676   : > { %v3713_v38 = vpack.c.bf16 %v3705_v53, %v3705_v53  ;;  %v3712_v40 = vpack.c.bf16 %v3704_v20, %v3704_v20  ;;  %v3709_v50 = vadd.f32 %v3701_v63, %v3693_v60  ;;  %v3684_v15 = vmul.f32 0.01, %v3668_v7  ;;  %v11936_v59 = vld [vmem:[#allocation14_spill] sm:$0xff]  ;;  %v11944_v53 = vld [vmem:[#allocation24_spill] sm:$0xff] }
 0x677   : > { %vm3679_vm14 = vcmp.gt.f32.partialorder %v3671_v5, 0.0  ;;  %v3687_v25 = vmul.f32 0.01, %v3671_v5  ;;  %vm3678_vm11 = vcmp.gt.f32.partialorder %v3670_v45, 0.0  ;;  %v3686_v43 = vmul.f32 0.01, %v3670_v45 }
 0x678   : > { %3730 = vrot.lane.b32.xlu1 %v3713_v38, %s6210_s23  ;;  %3728 = vrot.lane.b32.xlu0 %v3712_v40, %s6210_s23  ;;  %v3692_v35 = vsel %vm3676_vm12, %v3668_v7, %v3684_v15  ;;  %v3715_v37 = vpack.c.bf16 %v3707_v0, %v3707_v0  ;;  %v3714_v55 = vpack.c.bf16 %v3706_v39, %v3706_v39  ;;  %vm11930_vm6 = vcmask 269312   ;;  %v11948_v0 = vld [vmem:[#allocation29_spill] sm:$0xff]  ;;  %v11950_v60 = vld [vmem:[#allocation26_spill] sm:$0xff] }
 0x679   : > { %v3708_v58 = vadd.f32 %v3700_v9, %v3692_v35  ;;  %v3695_v57 = vsel %vm3679_vm14, %v3671_v5, %v3687_v25  ;;  %v3694_v49 = vsel %vm3678_vm11, %v3670_v45, %v3686_v43  ;;  %v3717_v54 = vpack.c.bf16 %v3709_v50, %v3709_v50  ;;  %vm11933_vm4 = vmmov %vm11930_vm6  ;;  %v11938_v45 = vld [vmem:[#allocation12_spill] sm:$0xff]  ;;  %v11952_v40 = vld [vmem:[#allocation17_spill] sm:$0xff] }
 0x67a   : > { %v3711_v13 = vadd.f32 %v3703_v29, %v3695_v57  ;;  %v3710_v4 = vadd.f32 %v3702_v11, %v3694_v49  ;;  %vm11932_vm13 = vcmp.ne.s16.totalorder %v11931_v42, 0  ;;  %vm11935_vm12 = vcmp.ne.s16.totalorder %v11934_v16, 0  ;;  %v11954_v15 = vld [vmem:[#allocation30_spill] sm:$0xff]  ;;  %v11956_v35 = vld [vmem:[#allocation20_spill] sm:$0xff] }
 0x67b   : > { %v3716_v23 = vpack.c.bf16 %v3708_v58, %v3708_v58  ;;  %vm11937_vm14 = vcmp.ne.s16.totalorder %v11936_v59, 0  ;;  %vm11939_vm11 = vcmp.ne.s16.totalorder %v11938_v45, 0 }
 0x67c   : > { %3734 = vrot.lane.b32.xlu1 %v3715_v37, %s6210_s23  ;;  %3732 = vrot.lane.b32.xlu0 %v3714_v55, %s6210_s23  ;;  %v3719_v12 = vpack.c.bf16 %v3711_v13, %v3711_v13  ;;  %v3718_v26 = vpack.c.bf16 %v3710_v4, %v3710_v4  ;;  %v11959_v55 = vld [vmem:[#allocation33_spill] sm:$0xff]  ;;  %v11962_v4 = vld [vmem:[#allocation46_spill] sm:$0xff] }
 0x680   : > { %3738 = vrot.lane.b32.xlu1 %v3717_v54, %s6210_s23  ;;  %3736 = vrot.lane.b32.xlu0 %v3716_v23, %s6210_s23  ;;  %v11964_v23 = vld [vmem:[#allocation18_spill] sm:$0xff] }
 0x684   : > { %3742 = vrot.lane.b32.xlu1 %v3719_v12, %s6210_s23  ;;  %3740 = vrot.lane.b32.xlu0 %v3718_v26, %s6210_s23  ;;  %v11966_v26 = vld [vmem:[#allocation35_spill] sm:$0xff] }
 0x6ea   : > { %v3729_v44 = vpop.permute.xlu0 %3728  ;;  %v3731_v31 = vpop.permute.xlu1 %3730 }
 0x6eb   : > { %v9374_v3 = vsel %vm11930_vm6, 0, %v3729_v44  ;;  %v9385_v32 = vsel %vm11933_vm4, %v3729_v44, %v3731_v31  ;;  %vm11941_vm6 = vcmp.ne.s16.totalorder %v11940_v36, 0 }
 0x6ec   : > { %3933 = vrot.lane.b32.xlu0 %v9374_v3, %s6217_s14  ;;  %v3819_v52 = vrot.slane %v9374_v3, 4  ;;  %v3772_v14 = vsel %vm11932_vm13, %v9374_v3, 0  ;;  %v3820_v19 = vrot.slane %v9385_v32, 4  ;;  %v3781_v48 = vsel %vm11935_vm12, %v9374_v3, 0 }
 0x6ed   : > { %v3799_v7 = vsel %vm11937_vm14, %v9374_v3, 0  ;;  %v3898_v5 = vrot.slane %v3781_v48, 4  ;;  %v3790_v51 = vsel %vm11939_vm11, %v9374_v3, 0  ;;  %v3808_v22 = vsel %vm11941_vm6, %v9374_v3, 0 }
 0x6ee   : > { %3828 = vrot.lane.b32.xlu1 %v3819_v52, %s6218_s15  ;;  %v3968_v6 = vrot.slane %v3790_v51, 4  ;;  %v3733_v24 = vpop.permute.xlu0 %3732  ;;  %vm11943_vm13 = vcmp.ne.s16.totalorder %v11942_v34, 0  ;;  %vm11945_vm12 = vcmp.ne.s16.totalorder %v11944_v53, 0  ;;  %vm11947_vm14 = vcmp.ne.s16.totalorder %v11946_v33, 0  ;;  %v3735_v25 = vpop.permute.xlu1 %3734 }
 0x6ef   : > { %v3773_v41 = vsel %vm11943_vm13, %v9385_v32, 0  ;;  %v9413_v63 = vsel %vm11933_vm4, %v3731_v31, %v3733_v24  ;;  %v3800_v20 = vsel %vm11945_vm12, %v9385_v32, 0  ;;  %vm11949_vm11 = vcmp.ne.s16.totalorder %v11948_v0, 0  ;;  %v11968_v31 = vld [vmem:[#allocation21_spill] sm:$0xff] }
 0x6f0   : > { %3863 = vrot.lane.b32.xlu0 %v3772_v14, %s6219_s16  ;;  %v3774_v62 = vsel %vm11947_vm14, %v9413_v63, 0  ;;  %v3809_v39 = vsel %vm11949_vm11, %v9385_v32, 0  ;;  %vm11951_vm6 = vcmp.ne.s16.totalorder %v11950_v60, 0  ;;  %vm11953_vm13 = vcmp.ne.s16.totalorder %v11952_v40, 0 }
 0x6f1   : > { %v3801_v38 = vsel %vm11951_vm6, %v9413_v63, 0  ;;  %v3782_v50 = vsel %vm11953_vm13, %v9385_v32, 0  ;;  %vm11955_vm4 = vcmp.ne.s16.totalorder %v11954_v15, 0  ;;  %vm11957_vm12 = vcmp.ne.s16.totalorder %v11956_v35, 0 }
 0x6f2   : > { %4038 = vrot.lane.b32.xlu1 %v3819_v52, %s6222_s21  ;;  %v3810_v9 = vsel %vm11955_vm4, %v9413_v63, 0  ;;  %v3899_v29 = vrot.slane %v3782_v50, 4  ;;  %v3791_v43 = vsel %vm11957_vm12, %v9385_v32, 0  ;;  %vm11958_vm14 = vcmask 269312   ;;  %v3737_v37 = vpop.permute.xlu0 %3736  ;;  %v11978_v50 = vld [vmem:[#allocation40_spill] sm:$0xff] }
 0x6f3   : > { %v9446_v11 = vsel %vm11958_vm14, %v3733_v24, %v3735_v25  ;;  %v3969_v58 = vrot.slane %v3791_v43, 4  ;;  %v3821_v57 = vrot.slane %v9413_v63, 4  ;;  %vm11960_vm11 = vcmp.ne.s16.totalorder %v11959_v55, 0  ;;  %vm11961_vm6 = vmmov %vm11958_vm14  ;;  %v11974_v24 = vld [vmem:[#allocation32_spill] sm:$0xff] }
 0x6f4   : > { %3935 = vrot.lane.b32.xlu0 %v9385_v32, %s6217_s14  ;;  %v3775_v13 = vsel %vm11960_vm11, %v9446_v11, 0  ;;  %v9459_v49 = vsel %vm11961_vm6, %v3735_v25, %v3737_v37  ;;  %vm11963_vm13 = vcmp.ne.s16.totalorder %v11962_v4, 0  ;;  %vm11965_vm4 = vcmp.ne.s16.totalorder %v11964_v23, 0 }
 0x6f5   : > { %v3802_v54 = vsel %vm11963_vm13, %v9446_v11, 0  ;;  %v3783_v12 = vsel %vm11965_vm4, %v9413_v63, 0  ;;  %vm11967_vm12 = vcmp.ne.s16.totalorder %v11966_v26, 0  ;;  %vm11969_vm14 = vcmp.ne.s16.totalorder %v11968_v31, 0 }
 0x6f6   : > { %3830 = vrot.lane.b32.xlu1 %v3820_v19, %s6218_s15  ;;  %v3776_v44 = vsel %vm11967_vm12, %v9459_v49, 0  ;;  %v3900_v52 = vrot.slane %v3783_v12, 4  ;;  %v3792_v14 = vsel %vm11969_vm14, %v9413_v63, 0  ;;  %v3822_v51 = vrot.slane %v9446_v11, 4 }
 0x6f7   : > { %vm11975_vm13 = vcmp.ne.s16.totalorder %v11974_v24, 0  ;;  %vm11979_vm12 = vcmp.ne.s16.totalorder %v11978_v50, 0  ;;  %vm11980_vm14 = vcmask 269312  }
 0x6f8   : > { %4012 = vrot.lane.b32.xlu0 %v3799_v7, %s6215_s12  ;;  %v3970_v7 = vrot.slane %v3792_v14, 4 }
 0x6fa   : > { %3907 = vrot.lane.b32.xlu1 %v3898_v5, %s6220_s19  ;;  %v3823_v5 = vrot.slane %v9459_v49, 4 }
 0x6fc   : > { %4073 = vrot.lane.b32.xlu0 %v3808_v22, %s6223_s24  ;;  %v11972_v22 = vld [vmem:[#allocation34_spill] sm:$0xff] }
 0x6fd   : > { %vm11973_vm6 = vcmp.ne.s16.totalorder %v11972_v22, 0 }
 0x6fe   : > { %3977 = vrot.lane.b32.xlu1 %v3968_v6, %s6221_s20  ;;  %v3785_v6 = vsel %vm11973_vm6, %v9459_v49, 0 }
 0x700   : > { %3865 = vrot.lane.b32.xlu0 %v3773_v41, %s6219_s16  ;;  %v3784_v41 = vsel %vm11975_vm13, %v9446_v11, 0 }
 0x702   : > { %3937 = vrot.lane.b32.xlu1 %v9413_v63, %s6217_s14 }
 0x704   : > { %4014 = vrot.lane.b32.xlu0 %v3800_v20, %s6215_s12  ;;  %v3902_v20 = vrot.slane %v3785_v6, 4  ;;  %v11990_v6 = vld [vmem:[#allocation36_spill] sm:$0xff] }
 0x706   : > { %3867 = vrot.lane.b32.xlu1 %v3774_v62, %s6219_s16  ;;  %v11976_v62 = vld [vmem:[#allocation42_spill] sm:$0xff] }
 0x707   : > { %vm11977_vm4 = vcmp.ne.s16.totalorder %v11976_v62, 0  ;;  %v12017_v62 = vld [vmem:[#allocation4_spill] sm:$0xff] }
 0x708   : > { %4075 = vrot.lane.b32.xlu0 %v3809_v39, %s6223_s24  ;;  %v3794_v39 = vsel %vm11977_vm4, %v9459_v49, 0  ;;  %vm11986_vm4 = vcmp.ne.s16.totalorder %v11853_v21, 0  ;;  %v12011_v21 = vld [vmem:[#allocation27_spill] sm:$0xff] }
 0x709   : > { %v3972_v25 = vrot.slane %v3794_v39, 4 }
 0x70a   : > { %4016 = vrot.lane.b32.xlu1 %v3801_v38, %s6215_s12  ;;  %v3901_v38 = vrot.slane %v3784_v41, 4 }
 0x70c   : > { %4040 = vrot.lane.b32.xlu0 %v3820_v19, %s6222_s21  ;;  %v11970_v19 = vld [vmem:[#allocation47_spill] sm:$0xff] }
 0x70d   : > { %vm11971_vm11 = vcmp.ne.s16.totalorder %v11970_v19, 0 }
 0x70e   : > { %4077 = vrot.lane.b32.xlu1 %v3810_v9, %s6223_s24  ;;  %v3803_v48 = vsel %vm11971_vm11, %v9459_v49, 0  ;;  %v3793_v9 = vsel %vm11979_vm12, %v9446_v11, 0  ;;  %vm11981_vm11 = vmmov %vm11980_vm14  ;;  %vm11987_vm12 = vcmp.ne.s16.totalorder %v11849_v8, 0 }
 0x70f   : > { %v3971_v43 = vrot.slane %v3793_v9, 4 }
 0x710   : > { %3909 = vrot.lane.b32.xlu0 %v3899_v29, %s6220_s19  ;;  %v3741_v29 = vpop.permute.xlu0 %3740 }
 0x712   : > { %3939 = vrot.lane.b32.xlu1 %v9446_v11, %s6217_s14 }
 0x714   : > { %3979 = vrot.lane.b32.xlu0 %v3969_v58, %s6221_s20  ;;  %v3739_v58 = vpop.permute.xlu1 %3738 }
 0x716   : > { %4042 = vrot.lane.b32.xlu1 %v3821_v57, %s6222_s21 }
 0x718   : > { %3832 = vrot.lane.b32.xlu0 %v3821_v57, %s6218_s15  ;;  %v9506_v57 = vsel %vm11980_vm14, %v3739_v58, %v3741_v29 }
 0x71a   : > { %3869 = vrot.lane.b32.xlu1 %v3775_v13, %s6219_s16  ;;  %v9511_v13 = vsel %vm11981_vm11, %v3737_v37, %v3739_v58  ;;  %v3805_v37 = vsel %vm11986_vm4, %v9506_v57, 0  ;;  %vm11991_vm11 = vcmp.ne.s16.totalorder %v11990_v6, 0  ;;  %v11994_v58 = vld [vmem:[#allocation52_spill] sm:$0xff] }
 0x71b   : > { %v3804_v14 = vsel %vm11987_vm12, %v9511_v13, 0  ;;  %v3786_v41 = vsel %vm11991_vm11, %v9511_v13, 0  ;;  %vm11995_vm4 = vcmp.ne.s16.totalorder %v11994_v58, 0  ;;  %vm11999_vm11 = vcmask 269312  }
 0x71c   : > { %3941 = vrot.lane.b32.xlu0 %v9459_v49, %s6217_s14 }
 0x71e   : > { %4018 = vrot.lane.b32.xlu1 %v3802_v54, %s6215_s12  ;;  %v11982_v54 = vld [vmem:[#allocation39_spill] sm:$0xff] }
 0x71f   : > { %vm11983_vm6 = vcmp.ne.s16.totalorder %v11982_v54, 0 }
 0x720   : > { %3871 = vrot.lane.b32.xlu0 %v3776_v44, %s6219_s16  ;;  %v3778_v12 = vsel %vm11983_vm6, %v9506_v57, 0  ;;  %v11984_v44 = vld [vmem:[#allocation37_spill] sm:$0xff]  ;;  %vm11992_vm6 = vcmp.ne.s16.totalorder %v11843_v17, 0 }
 0x721   : > { %vm11985_vm13 = vcmp.ne.s16.totalorder %v11984_v44, 0  ;;  %v3796_v39 = vsel %vm11992_vm6, %v9506_v57, 0  ;;  %vm12000_vm6 = vcmp.ne.s16.totalorder %v11865_v46, 0 }
 0x722   : > { %3911 = vrot.lane.b32.xlu1 %v3900_v52, %s6220_s19  ;;  %v3777_v52 = vsel %vm11985_vm13, %v9511_v13, 0  ;;  %vm11993_vm13 = vcmp.ne.s16.totalorder %v11838_v10, 0  ;;  %v12013_v10 = vld [vmem:[#allocation28_spill] sm:$0xff] }
 0x723   : > { %v3795_v9 = vsel %vm11993_vm13, %v9511_v13, 0  ;;  %vm12001_vm13 = vmmov %vm11999_vm11 }
 0x724   : > { %4020 = vrot.lane.b32.xlu0 %v3803_v48, %s6215_s12  ;;  %v3825_v48 = vrot.slane %v9506_v57, 4 }
 0x726   : > { %3981 = vrot.lane.b32.xlu1 %v3970_v7, %s6221_s20  ;;  %v3824_v7 = vrot.slane %v9511_v13, 4 }
 0x728   : > { %3836 = vrot.lane.b32.xlu0 %v3823_v5, %s6218_s15 }
 0x72a   : > { %3834 = vrot.lane.b32.xlu1 %v3822_v51, %s6218_s15 }
 0x72c   : > { %4046 = vrot.lane.b32.xlu0 %v3823_v5, %s6222_s21  ;;  %v11988_v5 = vld [vmem:[#allocation38_spill] sm:$0xff] }
 0x72d   : > { %vm11989_vm14 = vcmp.ne.s16.totalorder %v11988_v5, 0 }
 0x72e   : > { %4044 = vrot.lane.b32.xlu1 %v3822_v51, %s6222_s21  ;;  %v3787_v51 = vsel %vm11989_vm14, %v9506_v57, 0  ;;  %vm11998_vm14 = vcmp.ne.s16.totalorder %v11869_v28, 0 }
 0x730   : > { %3915 = vrot.lane.b32.xlu0 %v3902_v20, %s6220_s19  ;;  %v3904_v20 = vrot.slane %v3787_v51, 4  ;;  %v3814_v51 = vsel %vm12000_vm6, %v9506_v57, 0 }
 0x732   : > { %3913 = vrot.lane.b32.xlu1 %v3901_v38, %s6220_s19  ;;  %v3903_v38 = vrot.slane %v3786_v41, 4 }
 0x734   : > { %3985 = vrot.lane.b32.xlu0 %v3972_v25, %s6221_s20  ;;  %v3974_v25 = vrot.slane %v3796_v39, 4 }
 0x736   : > { %3983 = vrot.lane.b32.xlu1 %v3971_v43, %s6221_s20  ;;  %v3973_v43 = vrot.slane %v3795_v9, 4 }
 0x738   : > { %3945 = vrot.lane.b32.xlu0 %v9506_v57, %s6217_s14 }
 0x73a   : > { %3943 = vrot.lane.b32.xlu1 %v9511_v13, %s6217_s14 }
 0x73c   : > { %3875 = vrot.lane.b32.xlu0 %v3778_v12, %s6219_s16  ;;  %v3811_v12 = vsel %vm11995_vm4, %v9446_v11, 0 }
 0x73e   : > { %3873 = vrot.lane.b32.xlu1 %v3777_v52, %s6219_s16  ;;  %v3743_v52 = vpop.permute.xlu1 %3742 }
 0x73f   : > { %v3762_v41 = vsel %vm12001_vm13, %v3743_v52, 0  ;;  %vm12012_vm13 = vcmp.ne.s16.totalorder %v12011_v21, 0 }
 0x740   : > { %4024 = vrot.lane.b32.xlu0 %v3805_v37, %s6215_s12  ;;  %v11996_v37 = vld [vmem:[#allocation53_spill] sm:$0xff]  ;;  %v3827_v28 = vrot.slane %v3762_v41, 4 }
 0x741   : > { %vm11997_vm12 = vcmp.ne.s16.totalorder %v11996_v37, 0 }
 0x742   : > { %4022 = vrot.lane.b32.xlu1 %v3804_v14, %s6215_s12  ;;  %v3812_v14 = vsel %vm11997_vm12, %v9459_v49, 0  ;;  %vm12005_vm12 = vcmp.ne.s16.totalorder %v7870_v61, 0  ;;  %v12009_v61 = vld [vmem:[#allocation16_spill] sm:$0xff] }
 0x743   : > { %vm12010_vm6 = vcmp.ne.s16.totalorder %v12009_v61, 0 }
 0x744   : > { %3840 = vrot.lane.b32.xlu0 %v3825_v48, %s6218_s15 }
 0x746   : > { %3838 = vrot.lane.b32.xlu1 %v3824_v7, %s6218_s15 }
 0x748   : > { %4050 = vrot.lane.b32.xlu0 %v3825_v48, %s6222_s21  ;;  %v3813_v48 = vsel %vm11998_vm14, %v9511_v13, 0  ;;  %vm12006_vm14 = vcmp.ne.s16.totalorder %v7862_v47, 0 }
 0x74a   : > { %4048 = vrot.lane.b32.xlu1 %v3824_v7, %s6222_s21  ;;  %v9565_v7 = vsel %vm11999_vm11, %v3741_v29, %v3743_v52  ;;  %v3780_v29 = vsel %vm798_vm3, %v3762_v41, 0 }
 0x74b   : > { %v3797_v17 = vsel %vm12012_vm13, %v9565_v7, 0  ;;  %vm12021_vm13 = vcmask 1031168  }
 0x74c   : > { %3919 = vrot.lane.b32.xlu0 %v3904_v20, %s6220_s19  ;;  %v12002_v20 = vld [vmem:[#allocation25_spill] sm:$0xff]  ;;  %v3975_v54 = vrot.slane %v3797_v17, 4 }
 0x74d   : > { %vm12003_vm4 = vcmp.ne.s16.totalorder %v12002_v20, 0 }
 0x74e   : > { %3917 = vrot.lane.b32.xlu1 %v3903_v38, %s6220_s19  ;;  %v3779_v39 = vsel %vm12003_vm4, %v9565_v7, 0  ;;  %vm12014_vm4 = vcmp.ne.s16.totalorder %v12013_v10, 0 }
 0x74f   : > { %v3798_v38 = vsel %vm12014_vm4, %v3762_v41, 0  ;;  %vm12022_vm4 = vmmov %vm12021_vm13 }
 0x750   : > { %3989 = vrot.lane.b32.xlu0 %v3974_v25, %s6221_s20 }
 0x752   : > { %3987 = vrot.lane.b32.xlu1 %v3973_v43, %s6221_s20 }
 0x754   : > { %4079 = vrot.lane.b32.xlu0 %v3811_v12, %s6223_s24  ;;  %v3806_v12 = vsel %vm12005_vm12, %v9565_v7, 0  ;;  %vm12015_vm12 = vcmp.ne.s16.totalorder %v7915_v27, 0 }
 0x756   : > { %4081 = vrot.lane.b32.xlu1 %v3812_v14, %s6223_s24  ;;  %v3807_v14 = vsel %vm12006_vm14, %v3762_v41, 0  ;;  %vm12016_vm14 = vcmp.ne.s16.totalorder %v7904_v1, 0 }
 0x758   : > { %4083 = vrot.lane.b32.xlu0 %v3813_v48, %s6223_s24 }
 0x75a   : > { %4085 = vrot.lane.b32.xlu1 %v3814_v51, %s6223_s24  ;;  %v3826_v51 = vrot.slane %v9565_v7, 4 }
 0x75c   : > { %3877 = vrot.lane.b32.xlu0 %v3779_v39, %s6219_s16  ;;  %v12007_v39 = vld [vmem:[#allocation23_spill] sm:$0xff] }
 0x75d   : > { %vm12008_vm11 = vcmp.ne.s16.totalorder %v12007_v39, 0 }
 0x75e   : > { %3879 = vrot.lane.b32.xlu1 %v3780_v29, %s6219_s16  ;;  %v9580_v9 = vpop.permute.xlu0 %3933  ;;  %v3788_v29 = vsel %vm12008_vm11, %v9565_v7, 0  ;;  %vm12018_vm11 = vcmp.ne.s16.totalorder %v12017_v62, 0 }
 0x75f   : > { %v3765_v26 = vsel %vm12018_vm11, %v9385_v32, 0 }
 0x760   : > { %v3829_v25 = vpop.permute.xlu1 %3828  ;;  %3947 = vrot.lane.b32.xlu0 %v9565_v7, %s6217_s14 }
 0x762   : > { %3949 = vrot.lane.b32.xlu1 %v3762_v41, %s6217_s14  ;;  %v9585_v43 = vpop.permute.xlu0 %3863 }
 0x764   : > { %v9590_v52 = vpop.permute.xlu1 %4038  ;;  %4026 = vrot.lane.b32.xlu0 %v3806_v12, %s6215_s12  ;;  %v3789_v12 = vsel %vm12010_vm6, %v3762_v41, 0 }
 0x765   : > { %v3906_v5 = vrot.slane %v3789_v12, 4 }
 0x766   : > { %4028 = vrot.lane.b32.xlu1 %v3807_v14, %s6215_s12  ;;  %v9596_v48 = vpop.permute.xlu0 %3935  ;;  %v3905_v14 = vrot.slane %v3788_v29, 4  ;;  %v3976_v29 = vrot.slane %v3798_v38, 4  ;;  %v4257_v38 = vld [vmem:[%s11240_s8 + $0x8] sm:$0xff] }
 0x768   : > { %v3831_v46 = vpop.permute.xlu1 %3830  ;;  %3842 = vrot.lane.b32.xlu0 %v3826_v51, %s6218_s15 }
 0x76a   : > { %3844 = vrot.lane.b32.xlu1 %v3827_v28, %s6218_s15  ;;  %v9606_v47 = vpop.permute.xlu0 %4012 }
 0x76c   : > { %v3908_v8 = vpop.permute.xlu1 %3907  ;;  %3921 = vrot.lane.b32.xlu0 %v3905_v14, %s6220_s19 }
 0x76e   : > { %3923 = vrot.lane.b32.xlu1 %v3906_v5, %s6220_s19  ;;  %v9615_v61 = vpop.permute.xlu0 %4073  ;;  %v3815_v5 = vsel %vm12015_vm12, %v9565_v7, 0 }
 0x770   : > { %v3978_v39 = vpop.permute.xlu1 %3977  ;;  %3991 = vrot.lane.b32.xlu0 %v3975_v54, %s6221_s20  ;;  %v3816_v54 = vsel %vm12016_vm14, %v3762_v41, 0  ;;  %vm12025_vm14 = vcmask 506880  }
 0x772   : > { %3993 = vrot.lane.b32.xlu1 %v3976_v29, %s6221_s20  ;;  %v3866_v21 = vpop.permute.xlu0 %3865  ;;  %v4259_v29 = vld [vmem:[%s11240_s8 + $0x18] sm:$0xff] }
 0x774   : > { %v9619_v37 = vpop.permute.xlu1 %3937  ;;  %4052 = vrot.lane.b32.xlu0 %v3826_v51, %s6222_s21  ;;  %v4258_v51 = vld [vmem:[%s11240_s8 + $0x10] sm:$0xff] }
 0x776   : > { %4054 = vrot.lane.b32.xlu1 %v3827_v28, %s6222_s21  ;;  %v9623_v12 = vpop.permute.xlu0 %4014 }
 0x778   : > { %v9628_v17 = vpop.permute.xlu1 %3867  ;;  %4087 = vrot.lane.b32.xlu0 %v3815_v5, %s6223_s24  ;;  %v4260_v5 = vld [vmem:[%s11240_s8 + $0x20] sm:$0xff] }
 0x77a   : > { %4089 = vrot.lane.b32.xlu1 %v3816_v54, %s6223_s24  ;;  %v9637_v28 = vpop.permute.xlu0 %4075 }
 0x77c   : > { %v9642_v14 = vpop.permute.xlu1 %4016  ;;  %4268 = vperm.xlu0 %6171, %v4257_v38   ;;  %v3846_v38 = vsel %vm1005_vm2, %v3829_v25, %v3831_v46 }
 0x77e   : > { %4273 = vperm.xlu1 %6172, %v4258_v51   ;;  %v4041_v41 = vpop.permute.xlu0 %4040 }
 0x780   : > { %v9650_v54 = vpop.permute.xlu1 %4077  ;;  %4278 = vperm.xlu0 %6171, %v4259_v29   ;;  %v12019_v29 = vld [vmem:[#allocation2_spill] sm:$0xff] }
 0x781   : > { %vm12020_vm6 = vcmp.ne.s16.totalorder %v12019_v29, 0 }
 0x782   : > { %4283 = vperm.xlu1 %6172, %v4260_v5   ;;  %v3910_v1 = vpop.permute.xlu0 %3909  ;;  %v3764_v5 = vsel %vm12020_vm6, %v9374_v3, 0  ;;  %v3881_v3 = vsel %vm12022_vm4, %v9585_v43, %v3866_v21  ;;  %v3951_v43 = vsel %vm1131_vm7, %v9580_v9, %v9596_v48  ;;  %v12023_v9 = vld [vmem:[#allocation6_spill] sm:$0xff]  ;;  %vm12028_vm6 = vmmov %vm12025_vm14 }
 0x783   : > { %v4101_v22 = vsel %vm1360_vm10, %v3764_v5, %v3846_v38  ;;  %v3925_v15 = vsel %vm1095_vm8, %v3908_v8, %v3910_v1  ;;  %v3952_v8 = vsel %vm1131_vm7, %v9596_v48, %v9619_v37  ;;  %vm12024_vm12 = vcmp.ne.s16.totalorder %v12023_v9, 0 }
 0x784   : > { %v9652_v27 = vpop.permute.xlu1 %3939  ;;  %v4133_v38 = vsel %vm1360_vm10, %v3881_v3, %v3925_v15  ;;  %v4056_v3 = vsel %vm1256_vm9, %v9590_v52, %v4041_v41  ;;  %v3767_v48 = vsel %vm12024_vm12, %v9446_v11, 0  ;;  %v12026_v52 = vld [vmem:[#allocation3_spill] sm:$0xff]  ;;  %vm12033_vm12 = vcmask 1044480  }
 0x785   : > { %vm12027_vm11 = vcmp.ne.s16.totalorder %v12026_v52, 0 }
 0x786   : > { %v3980_v10 = vpop.permute.xlu0 %3979 }
 0x787   : > { %v3995_v5 = vsel %vm1176_vm1, %v3978_v39, %v3980_v10  ;;  %v4031_v39 = vsel %vm908_vm5, %v9623_v12, %v9642_v14 }
 0x788   : > { %v9654_v19 = vpop.permute.xlu1 %4042 }
 0x78a   : > { %v3833_v6 = vpop.permute.xlu0 %3832 }
 0x78b   : > { %v3847_v51 = vsel %vm1005_vm2, %v3831_v46, %v3833_v6 }
 0x78c   : > { %v3870_v20 = vpop.permute.xlu1 %3869  ;;  %v4105_v44 = vsel %vm1360_vm10, %v3765_v26, %v3847_v51  ;;  %v3882_v26 = vsel %vm12021_vm13, %v3866_v21, %v9628_v17  ;;  %vm12031_vm13 = vmmov %vm12022_vm4 }
 0x78d   : > { %4308 = vmatprep.subr.bf16.mxu0 %v4105_v44 }
 0x78e   : > { %4309 = vmatpush1.bf16.msra.mxu0 %v4101_v22  ;;  %v9666_v24 = vpop.permute.xlu0 %3941 }
 0x790   : > { %v9668_v25 = vpop.permute.xlu1 %4018 }
 0x792   : > { %v9670_v46 = vpop.permute.xlu0 %3871 }
 0x794   : > { %v3912_v32 = vpop.permute.xlu1 %3911 }
 0x795   : > { %v3926_v51 = vsel %vm1095_vm8, %v3910_v1, %v3912_v32  ;;  %v4057_v1 = vsel %vm1256_vm9, %v4041_v41, %v9654_v19  ;;  %v3766_v41 = vsel %vm12027_vm11, %v9413_v63, 0  ;;  %v12029_v63 = vld [vmem:[#allocation51_spill] sm:$0xff] }
 0x796   : > { %v9678_v44 = vpop.permute.xlu0 %4020  ;;  %v4137_v22 = vsel %vm1360_vm10, %v3882_v26, %v3926_v51  ;;  %v4165_v51 = vsel %vm1360_vm10, %v3951_v43, %v3995_v5 }
 0x797   : > { %4310 = vmatprep.subr.bf16.mxu0 %v4137_v22 }
 0x798   : > { %v3982_v60 = vpop.permute.xlu1 %3981  ;;  %4311 = vmatpush1.bf16.msra.mxu0 %v4133_v38  ;;  %v4092_v38 = vsel %vm12025_vm14, %v9637_v28, %v9650_v54  ;;  %vm12035_vm14 = vcmp.ne.s16.totalorder %v6451_v2, 0 }
 0x799   : > { %v3996_v21 = vsel %vm1176_vm1, %v3980_v10, %v3982_v60  ;;  %v4201_v10 = vsel %vm1360_vm10, %v4031_v39, %v4057_v1  ;;  %v4030_v1 = vsel %vm908_vm5, %v9606_v47, %v9623_v12  ;;  %v12030_v12 = vld [vmem:[#allocation50_spill] sm:$0xff] }
 0x79a   : > { %v9692_v26 = vpop.permute.xlu0 %3836  ;;  %v4169_v15 = vsel %vm1360_vm10, %v3952_v8, %v3996_v21 }
 0x79b   : > { %4312 = vmatprep.subr.bf16.mxu0 %v4169_v15  ;;  %v4091_v15 = vsel %vm12028_vm6, %v9615_v61, %v9637_v28  ;;  %v3884_v61 = vsel %vm12022_vm4, %v3870_v20, %v9670_v46  ;;  %vm12038_vm6 = vmmov %vm12022_vm4 }
 0x79c   : > { %v3835_v22 = vpop.permute.xlu1 %3834  ;;  %4313 = vmatpush1.bf16.msra.mxu0 %v4165_v51  ;;  %v4231_v51 = vsel %vm1360_vm10, %v4092_v38, %v12029_v63  ;;  %v12032_v38 = vld [vmem:[#allocation56_spill] sm:$0xff] }
 0x79d   : > { %v3848_v8 = vsel %vm1005_vm2, %v3833_v6, %v3835_v22  ;;  %v3849_v5 = vsel %vm1005_vm2, %v3835_v22, %v9692_v26  ;;  %4314 = vmatprep.subr.bf16.mxu0 %v4201_v10  ;;  %v4197_v6 = vsel %vm1360_vm10, %v4030_v1, %v4056_v3  ;;  %v4228_v22 = vsel %vm1360_vm10, %v4091_v15, %v12030_v12  ;;  %v12034_v1 = vld [vmem:[#allocation57_spill] sm:$0xff] }
 0x79e   : > { %v9717_v21 = vpop.permute.xlu0 %4046  ;;  %v4113_v11 = vsel %vm1360_vm10, %v3767_v48, %v3849_v5  ;;  %v4109_v43 = vsel %vm1360_vm10, %v3766_v41, %v3848_v8  ;;  %v3883_v3 = vsel %vm12031_vm13, %v9628_v17, %v3870_v20  ;;  %v9747_v17 = vld [vmem:[%s11239_s7] sm:$0xff]   ;;  %v3953_v20 = vsel %vm1131_vm7, %v9619_v37, %v9652_v27  ;;  %vm12039_vm13 = vmmov %vm12022_vm4 }
 0x79f   : > { %4369 = vmatprep.subr.bf16.mxu1 %v4113_v11  ;;  %v3954_v11 = vsel %vm1131_vm7, %v9652_v27, %v9666_v24  ;;  %v4033_v12 = vsel %vm908_vm5, %v9668_v25, %v9678_v44  ;;  %vm12040_vm4 = vcmask 506880  }
 0x7a0   : > { %v4045_v39 = vpop.permute.xlu1 %4044  ;;  %4315 = vmatpush1.bf16.msra.mxu0 %v4197_v6  ;;  %4370 = vmatpush1.bf16.msra.mxu1 %v4109_v43 }
 0x7a1   : > { %4316 = vmatprep.subr.bf16.mxu0 %v4231_v51  ;;  %v4059_v43 = vsel %vm1256_vm9, %v4045_v39, %v9717_v21  ;;  %v4058_v27 = vsel %vm1256_vm9, %v9654_v19, %v4045_v39 }
 0x7a2   : > { %v9727_v47 = vpop.permute.xlu0 %3915 }
 0x7a4   : > { %v3914_v10 = vpop.permute.xlu1 %3913  ;;  %4317 = vmatpush1.bf16.msra.mxu0 %v4228_v22  ;;  %v4209_v22 = vsel %vm1360_vm10, %v4033_v12, %v4059_v43 }
 0x7a5   : > { %v3927_v28 = vsel %vm1095_vm8, %v3912_v32, %v3914_v10  ;;  %v3928_v48 = vsel %vm1095_vm8, %v3914_v10, %v9727_v47  ;;  %6048 = vmatprep.subr.msk.bf16.mxu0 %vm12033_vm12, %v12032_v38  ;;  %v4032_v10 = vsel %vm908_vm5, %v9642_v14, %v9668_v25  ;;  %v9795_v25 = vld [vmem:[%s11239_s7 + $0x10] ss:$0 sps:$4 sm:$0xff]   ;;  %vm12041_vm12 = vmmov %vm12040_vm4 }
 0x7a6   : > { %v9740_v8 = vpop.permute.xlu0 %3985  ;;  %v4145_v5 = vsel %vm1360_vm10, %v3884_v61, %v3928_v48  ;;  %v4141_v41 = vsel %vm1360_vm10, %v3883_v3, %v3927_v28  ;;  %v4205_v61 = vsel %vm1360_vm10, %v4032_v10, %v4058_v27  ;;  %v9783_v28 = vld [vmem:[%s11239_s7 + $0x8] sm:$0xff]  }
 0x7a7   : > { %4371 = vmatprep.subr.bf16.mxu1 %v4145_v5 }
 0x7a8   : > { %v3984_v32 = vpop.permute.xlu1 %3983  ;;  %4319 = vmatpush1.bf16.msra.mxu0 %v12034_v1  ;;  %4372 = vmatpush1.bf16.msra.mxu1 %v4141_v41 }
 0x7a9   : > { %v3997_v6 = vsel %vm1176_vm1, %v3982_v60, %v3984_v32  ;;  %v3998_v15 = vsel %vm1176_vm1, %v3984_v32, %v9740_v8  ;;  %v12036_v32 = vld [vmem:[#allocation8_spill] sm:$0xff] }
 0x7aa   : > { %v9761_v63 = vpop.permute.xlu0 %3945  ;;  %v4177_v37 = vsel %vm1360_vm10, %v3954_v11, %v3998_v15  ;;  %v4173_v51 = vsel %vm1360_vm10, %v3953_v20, %v3997_v6  ;;  %v3769_v20 = vsel %vm12035_vm14, %v9511_v13, 0  ;;  %vm12037_vm11 = vcmp.ne.s16.totalorder %v12036_v32, 0  ;;  %vm12044_vm14 = vmmov %vm12040_vm4 }
 0x7ab   : > { %6049 = vmatmul.mubr.msk.bf16.vlgmr.msra.gmra.mrb[32].mxu0 %vm2064_vm0, %v9747_v17  ;;  %4373 = vmatprep.subr.bf16.mxu1 %v4177_v37  ;;  %v3768_v1 = vsel %vm12037_vm11, %v9459_v49, 0  ;;  %vm12045_vm11 = vmmov %vm12040_vm4 }
 0x7ac   : > { %v3944_v60 = vpop.permute.xlu1 %3943  ;;  %4374 = vmatpush1.bf16.msra.mxu1 %v4173_v51  ;;  %4350 = vmatprep.mubr.bf16.mxu0 %v11589_v18 }
 0x7ad   : > { %4375 = vmatprep.subr.bf16.mxu1 %v4209_v22 }
 0x7ae   : > { %v9777_v3 = vpop.permute.xlu0 %3875 }
 0x7b0   : > { %v3874_v19 = vpop.permute.xlu1 %3873  ;;  %4376 = vmatpush1.bf16.msra.mxu1 %v4205_v61  ;;  %v3955_v61 = vsel %vm1131_vm7, %v9666_v24, %v3944_v60 }
 0x7b1   : > { %v3885_v49 = vsel %vm12038_vm6, %v9670_v46, %v3874_v19  ;;  %v3886_v37 = vsel %vm12039_vm13, %v3874_v19, %v9777_v3  ;;  %v3956_v19 = vsel %vm1131_vm7, %v3944_v60, %v9761_v63  ;;  %vm12047_vm6 = vcmask 1044480  }
 0x7b2   : > { %v9785_v39 = vpop.permute.xlu0 %4024  ;;  %vm12052_vm13 = vmmov %vm12047_vm6 }
 0x7b3   : > { %6050 = vmatmul.mubr.msk.bf16.gmra.mrb[36].mxu0 %vm2064_vm0, %v9783_v28 }
 0x7b4   : > { %v4023_v48 = vpop.permute.xlu1 %4022  ;;  %4360 = vmatprep.mubr.bf16.mxu0 %v11589_v18 }
 0x7b5   : > { %v4035_v24 = vsel %vm908_vm5, %v4023_v48, %v9785_v39 }
 0x7b6   : > { %v9790_v14 = vpop.permute.xlu0 %3840 }
 0x7b8   : > { %v3839_v38 = vpop.permute.xlu1 %3838 }
 0x7b9   : > { %v3850_v5 = vsel %vm1005_vm2, %v9692_v26, %v3839_v38  ;;  %v3851_v41 = vsel %vm1005_vm2, %v3839_v38, %v9790_v14 }
 0x7ba   : > { %v9807_v11 = vpop.permute.xlu0 %4050  ;;  %v4121_v43 = vsel %vm1360_vm10, %v3769_v20, %v3851_v41  ;;  %v4117_v6 = vsel %vm1360_vm10, %v3768_v1, %v3850_v5 }
 0x7bb   : > { %6051 = vmatmul.mubr.msk.bf16.gmra.mrb[40].mxu0 %vm2064_vm0, %v9795_v25  ;;  %4430 = vmatprep.subr.bf16.mxu0 %v4121_v43 }
 0x7bc   : > { %v4049_v26 = vpop.permute.xlu1 %4048  ;;  %4431 = vmatpush1.bf16.msra.mxu0 %v4117_v6  ;;  %4462 = vmatprep.mubr.bf16.mxu0 %v11589_v18 }
 0x7bd   : > { %v4060_v60 = vsel %vm1256_vm9, %v9717_v21, %v4049_v26 }
 0x7be   : > { %v9814_v15 = vpop.permute.xlu0 %3919 }
 0x7c0   : > { %v3918_v13 = vpop.permute.xlu1 %3917 }
 0x7c1   : > { %v3929_v51 = vsel %vm1095_vm8, %v9727_v47, %v3918_v13  ;;  %v3930_v12 = vsel %vm1095_vm8, %v3918_v13, %v9814_v15  ;;  %v4061_v47 = vsel %vm1256_vm9, %v4049_v26, %v9807_v11 }
 0x7c2   : > { %v9824_v27 = vpop.permute.xlu0 %3989  ;;  %v4153_v22 = vsel %vm1360_vm10, %v3886_v37, %v3930_v12  ;;  %v4149_v10 = vsel %vm1360_vm10, %v3885_v49, %v3929_v51  ;;  %v4034_v49 = vsel %vm908_vm5, %v9678_v44, %v4023_v48  ;;  %v12042_v51 = vld [vmem:[#allocation45_spill] sm:$0xff]  ;;  %v12046_v44 = vld [vmem:[#allocation62_spill] sm:$0xff] }
 0x7c3   : > { %4432 = vmatprep.subr.bf16.mxu0 %v4153_v22  ;;  %v12043_v22 = vld [vmem:[#allocation22_spill] sm:$0xff] }
 0x7c4   : > { %v3988_v46 = vpop.permute.xlu1 %3987  ;;  %4433 = vmatpush1.bf16.msra.mxu0 %v4149_v10 }
 0x7c5   : > { %v3999_v38 = vsel %vm1176_vm1, %v9740_v8, %v3988_v46  ;;  %v4000_v5 = vsel %vm1176_vm1, %v3988_v46, %v9824_v27  ;;  %v4217_v8 = vsel %vm1360_vm10, %v4035_v24, %v4061_v47  ;;  %v12048_v46 = vld [vmem:[#allocation59_spill] sm:$0xff]  ;;  %v12049_v47 = vld [vmem:[#allocation61_spill] sm:$0xff] }
 0x7c6   : > { %v4080_v41 = vpop.permute.xlu0 %4079  ;;  %v4185_v20 = vsel %vm1360_vm10, %v3956_v19, %v4000_v5  ;;  %v4181_v1 = vsel %vm1360_vm10, %v3955_v61, %v3999_v38 }
 0x7c7   : > { %4434 = vmatprep.subr.bf16.mxu0 %v4185_v20  ;;  %v4093_v43 = vsel %vm12040_vm4, %v9650_v54, %v4080_v41  ;;  %v4213_v54 = vsel %vm1360_vm10, %v4034_v49, %v4060_v60  ;;  %v12051_v20 = vld [vmem:[#allocation64_spill] sm:$0xff]  ;;  %v12053_v60 = vld [vmem:[#allocation65_spill] sm:$0xff]  ;;  %vm12054_vm4 = vcmp.ne.s16.totalorder %v11906_v30, 0 }
 0x7c8   : > { %v4082_v6 = vpop.permute.xlu1 %4081  ;;  %4435 = vmatpush1.bf16.msra.mxu0 %v4181_v1  ;;  %v4234_v21 = vsel %vm1360_vm10, %v4093_v43, %v12043_v22 }
 0x7c9   : > { %v4094_v13 = vsel %vm12041_vm12, %v4080_v41, %v4082_v6  ;;  %4436 = vmatprep.subr.bf16.mxu0 %v4217_v8  ;;  %v12050_v41 = vld [vmem:[#allocation63_spill] sm:$0xff]  ;;  %vm12055_vm12 = vcmask 1031168  }
 0x7ca   : > { %v4084_v37 = vpop.permute.xlu0 %4083  ;;  %v4237_v12 = vsel %vm1360_vm10, %v4094_v13, %v12042_v51  ;;  %v3771_v51 = vsel %vm701_vm15, %v9565_v7, 0 }
 0x7cb   : > { %4377 = vmatprep.subr.bf16.mxu1 %v4237_v12  ;;  %v4095_v26 = vsel %vm12044_vm14, %v4082_v6, %v4084_v37  ;;  %vm12056_vm14 = vmmov %vm12055_vm12 }
 0x7cc   : > { %v9856_v10 = vpop.permute.xlu1 %4085  ;;  %4378 = vmatpush1.bf16.msra.mxu1 %v4234_v21  ;;  %4437 = vmatpush1.bf16.msra.mxu0 %v4213_v54  ;;  %v4240_v38 = vsel %vm1360_vm10, %v4095_v26, %v12049_v47  ;;  %v3770_v21 = vsel %vm12054_vm4, %v9506_v57, 0  ;;  %vm12072_vm4 = vcmp.ne.s16.totalorder %v11934_v16, 0 }
 0x7cd   : > { %v4096_v61 = vsel %vm12045_vm11, %v4084_v37, %v9856_v10  ;;  %6052 = vmatprep.subr.msk.bf16.mxu1 %vm12047_vm6, %v12046_v44  ;;  %vm12057_vm6 = vmmov %vm12045_vm11 }
 0x7ce   : > { %v3878_v48 = vpop.permute.xlu0 %3877  ;;  %v4243_v19 = vsel %vm1360_vm10, %v4096_v61, %v12048_v46 }
 0x7cf   : > { %4438 = vmatprep.subr.bf16.mxu0 %v4243_v19  ;;  %v3887_v57 = vsel %vm12056_vm14, %v9777_v3, %v3878_v48  ;;  %vm12074_vm14 = vcmp.ne.s16.totalorder %v12017_v62, 0 }
 0x7d0   : > { %v3880_v5 = vpop.permute.xlu1 %3879  ;;  %4380 = vmatpush1.bf16.msra.mxu1 %v12050_v41  ;;  %4439 = vmatpush1.bf16.msra.mxu0 %v4240_v38 }
 0x7d1   : > { %6056 = vmatprep.subr.msk.bf16.mxu0 %vm12052_vm13, %v12051_v20  ;;  %v3888_v7 = vsel %vm12055_vm12, %v3878_v48, %v3880_v5  ;;  %vm12073_vm12 = vcmp.ne.s16.totalorder %v12019_v29, 0 }
 0x7d2   : > { %v3948_v1 = vpop.permute.xlu0 %3947 }
 0x7d3   : > { %6053 = vmatmul.mubr.msk.bf16.vlgmr.msra.gmra.mrb[32].mxu1 %vm2064_vm0, %v9747_v17  ;;  %v3957_v48 = vsel %vm1131_vm7, %v9761_v63, %v3948_v1 }
 0x7d4   : > { %v3950_v24 = vpop.permute.xlu1 %3949  ;;  %4441 = vmatpush1.bf16.msra.mxu0 %v12053_v60  ;;  %4411 = vmatprep.mubr.bf16.mxu1 %v11589_v18 }
 0x7d5   : > { %v3958_v38 = vsel %vm1131_vm7, %v3948_v1, %v3950_v24 }
 0x7d6   : > { %v4027_v43 = vpop.permute.xlu0 %4026 }
 0x7d7   : > { %6057 = vmatmul.mubr.msk.bf16.vlgmr.msra.gmra.mrb[44].mxu0 %vm2064_vm0, %v9747_v17  ;;  %v4036_v63 = vsel %vm908_vm5, %v9785_v39, %v4027_v43 }
 0x7d8   : > { %v4029_v6 = vpop.permute.xlu1 %4028  ;;  %4472 = vmatprep.mubr.bf16.mxu0 %v11589_v18 }
 0x7d9   : > { %v4037_v24 = vsel %vm908_vm5, %v4027_v43, %v4029_v6  ;;  %v12060_v43 = vld [vmem:[#allocation71_spill] sm:$0xff] }
 0x7da   : > { %v3843_v8 = vpop.permute.xlu0 %3842 }
 0x7db   : > { %6054 = vmatmul.mubr.msk.bf16.gmra.mrb[36].mxu1 %vm2064_vm0, %v9783_v28  ;;  %v3852_v13 = vsel %vm1005_vm2, %v9790_v14, %v3843_v8 }
 0x7dc   : > { %v3845_v49 = vpop.permute.xlu1 %3844  ;;  %4421 = vmatprep.mubr.bf16.mxu1 %v11589_v18  ;;  %v4125_v14 = vsel %vm1360_vm10, %v3770_v21, %v3852_v13  ;;  %v12061_v21 = vld [vmem:[#allocation72_spill] sm:$0xff] }
 0x7dd   : > { %v3853_v37 = vsel %vm1005_vm2, %v3843_v8, %v3845_v49 }
 0x7de   : > { %v3922_v12 = vpop.permute.xlu0 %3921  ;;  %v4129_v22 = vsel %vm1360_vm10, %v3771_v51, %v3853_v37 }
 0x7df   : > { %6058 = vmatmul.mubr.msk.bf16.gmra.mrb[48].mxu0 %vm2064_vm0, %v9783_v28  ;;  %4491 = vmatprep.subr.bf16.mxu1 %v4129_v22  ;;  %v3931_v54 = vsel %vm1095_vm8, %v9814_v15, %v3922_v12  ;;  %v12059_v22 = vld [vmem:[#allocation58_spill] sm:$0xff] }
 0x7e0   : > { %v3924_v26 = vpop.permute.xlu1 %3923  ;;  %4492 = vmatpush1.bf16.msra.mxu1 %v4125_v14  ;;  %4482 = vmatprep.mubr.bf16.mxu0 %v11589_v18  ;;  %v4157_v15 = vsel %vm1360_vm10, %v3887_v57, %v3931_v54 }
 0x7e1   : > { %v3932_v61 = vsel %vm1095_vm8, %v3922_v12, %v3924_v26  ;;  %v12058_v12 = vld [vmem:[#allocation41_spill] sm:$0xff] }
 0x7e2   : > { %v3992_v44 = vpop.permute.xlu0 %3991  ;;  %v4161_v46 = vsel %vm1360_vm10, %v3888_v7, %v3932_v61 }
 0x7e3   : > { %6055 = vmatmul.mubr.msk.bf16.gmra.mrb[40].mxu1 %vm2064_vm0, %v9795_v25  ;;  %4493 = vmatprep.subr.bf16.mxu1 %v4161_v46  ;;  %v4001_v19 = vsel %vm1176_vm1, %v9824_v27, %v3992_v44 }
 0x7e4   : > { %v3994_v47 = vpop.permute.xlu1 %3993  ;;  %4494 = vmatpush1.bf16.msra.mxu1 %v4157_v15  ;;  %4523 = vmatprep.mubr.bf16.mxu1 %v11589_v18  ;;  %v4189_v27 = vsel %vm1360_vm10, %v3957_v48, %v4001_v19 }
 0x7e5   : > { %v4002_v3 = vsel %vm1176_vm1, %v3992_v44, %v3994_v47 }
 0x7e6   : > { %v4053_v5 = vpop.permute.xlu0 %4052  ;;  %v4193_v41 = vsel %vm1360_vm10, %v3958_v38, %v4002_v3 }
 0x7e7   : > { %6059 = vmatmul.mubr.msk.bf16.gmra.mrb[52].mxu0 %vm2064_vm0, %v9795_v25  ;;  %4495 = vmatprep.subr.bf16.mxu1 %v4193_v41  ;;  %v4062_v20 = vsel %vm1256_vm9, %v9807_v11, %v4053_v5 }
 0x7e8   : > { %v4055_v60 = vpop.permute.xlu1 %4054  ;;  %4496 = vmatpush1.bf16.msra.mxu1 %v4189_v27  ;;  %v4221_v49 = vsel %vm1360_vm10, %v4036_v63, %v4062_v20 }
 0x7e9   : > { %v4063_v8 = vsel %vm1256_vm9, %v4053_v5, %v4055_v60 }
 0x7ea   : > { %v4088_v1 = vpop.permute.xlu0 %4087  ;;  %v4225_v13 = vsel %vm1360_vm10, %v4037_v24, %v4063_v8 }
 0x7eb   : > { %4497 = vmatprep.subr.bf16.mxu1 %v4225_v13  ;;  %v4097_v37 = vsel %vm12045_vm11, %v9856_v10, %v4088_v1  ;;  %vm12075_vm11 = vcmp.ne.s16.totalorder %v11952_v40, 0 }
 0x7ec   : > { %v4090_v51 = vpop.permute.xlu1 %4089  ;;  %4498 = vmatpush1.bf16.msra.mxu1 %v4221_v49  ;;  %v4246_v39 = vsel %vm1360_vm10, %v4097_v37, %v12059_v22 }
 0x7ed   : > { %v4098_v11 = vsel %vm12057_vm6, %v4088_v1, %v4090_v51 }
 0x7ee   : > { %v4249_v6 = vsel %vm1360_vm10, %v4098_v11, %v12058_v12  ;;  %vm12070_vm10 = vcmask 269312  }
 0x7ef   : > { %4499 = vmatprep.subr.bf16.mxu1 %v4249_v6 }
 0x7f0   : > { %4500 = vmatpush1.bf16.msra.mxu1 %v4246_v39 }
 0x7f1   : > { %6060 = vmatprep.subr.msk.bf16.mxu1 %vm12052_vm13, %v12060_v43 }
 0x7f4   : > { %4502 = vmatpush1.bf16.msra.mxu1 %v12061_v21 }
 0x7f7   : > { %6061 = vmatmul.mubr.msk.bf16.vlgmr.msra.gmra.mrb[44].mxu1 %vm2064_vm0, %v9747_v17 }
 0x7f8   : > { %4533 = vmatprep.mubr.bf16.mxu1 %v11589_v18 }
 0x7fb   : > { %v9944_v7 = vpop.permute.xlu0 %4268 }
 0x7fd   : > { %v9947_v61 = vpop.permute.xlu1 %4273 }
 0x7ff   : > { %6062 = vmatmul.mubr.msk.bf16.gmra.mrb[48].mxu1 %vm2064_vm0, %v9783_v28  ;;  %v9952_v41 = vpop.permute.xlu0 %4278 }
 0x800   : > { %4543 = vmatprep.mubr.bf16.mxu1 %v11589_v18 }
 0x801   : > { %v9956_v60 = vpop.permute.xlu1 %4283 }
 0x807   : > { %6063 = vmatmul.mubr.msk.bf16.gmra.mrb[52].mxu1 %vm2064_vm0, %v9795_v25  ;;  %vm12071_vm0 = vmmov %vm12070_vm10 }
 0x808   : > { %vm12076_vm6 = vmmov %vm12071_vm0 }
 0x809   : > { %vm12077_vm13 = vmmov %vm12071_vm0 }
 0x87e   : > { %v9940_v10 = vpop.f32.mrb[32].mxu0 }
 0x87f   : > { %12062 = vst [vmem:[#allocation79_spill] sm:$0xff] %v9940_v10  ;;  %v9942_v14 = vpop.f32.mrb[33].mxu0 }
 0x880   : > { %12063 = vst [vmem:[#allocation84_spill] sm:$0xff] %v9942_v14  ;;  %v4346_v54 = vpop.f32.mrb[34].mxu0 }
 0x881   : > { %v4348_v26 = vpop.f32.mrb[35].mxu0  ;;  %v4347_v17 = vadd.f32 %v4346_v54, %v9944_v7 }
 0x882   : > { %v4349_v57 = vadd.f32 %v4348_v26, %v9944_v7 }
 0x883   : > { %v4552_v19 = vmax.f32 %v4347_v17, 0.0 }
 0x884   : > { %v4553_v3 = vmax.f32 %v4349_v57, 0.0 }
 0x886   : > { %v4352_v28 = vpop.f32.mrb[36].mxu0 }
 0x887   : > { %v4353_v44 = vadd.f32 %v4352_v28, %v9947_v61  ;;  %v4354_v46 = vpop.f32.mrb[37].mxu0 }
 0x888   : > { %v4355_v25 = vadd.f32 %v4354_v46, %v9947_v61  ;;  %v4356_v15 = vpop.f32.mrb[38].mxu0 }
 0x889   : > { %v4560_v47 = vmax.f32 %v4353_v44, 0.0  ;;  %v4358_v38 = vpop.f32.mrb[39].mxu0  ;;  %v4357_v20 = vadd.f32 %v4356_v15, %v9952_v41 }
 0x88a   : > { %v4561_v48 = vmax.f32 %v4355_v25, 0.0  ;;  %v4359_v24 = vadd.f32 %v4358_v38, %v9952_v41 }
 0x88b   : > { %v4584_v5 = vpack.c.bf16 %v4560_v47, %v4552_v19  ;;  %v4568_v37 = vmax.f32 %v4357_v20, 0.0 }
 0x88c   : > { %v4585_v27 = vpack.c.bf16 %v4561_v48, %v4553_v3  ;;  %v4569_v12 = vmax.f32 %v4359_v24, 0.0 }
 0x88d   : > { %4620 = vrot.lane.b32.xlu0 %v4584_v5, %s6210_s23 }
 0x88e   : > { %v4362_v8 = vpop.f32.mrb[40].mxu0  ;;  %4622 = vrot.lane.b32.xlu1 %v4585_v27, %s6210_s23 }
 0x88f   : > { %v4363_v63 = vadd.f32 %v4362_v8, %v9956_v60  ;;  %v4364_v1 = vpop.f32.mrb[41].mxu0 }
 0x890   : > { %v4365_v13 = vadd.f32 %v4364_v1, %v9956_v60  ;;  %v4366_v49 = vpop.f32.mrb[42].mxu0 }
 0x891   : > { %v4576_v51 = vmax.f32 %v4363_v63, 0.0  ;;  %v4367_v11 = vpop.f32.mrb[43].mxu0 }
 0x892   : > { %v4577_v6 = vmax.f32 %v4365_v13, 0.0 }
 0x893   : > { %v4592_v22 = vpack.c.bf16 %v4576_v51, %v4568_v37 }
 0x894   : > { %v4593_v39 = vpack.c.bf16 %v4577_v6, %v4569_v12 }
 0x895   : > { %4636 = vrot.lane.b32.xlu1 %v4592_v22, %s6210_s23 }
 0x896   : > { %4638 = vrot.lane.b32.xlu0 %v4593_v39, %s6210_s23 }
 0x8a6   : > { %v9964_v43 = vpop.f32.mrb[32].mxu1 }
 0x8a7   : > { %12064 = vst [vmem:[#allocation90_spill] sm:$0xff] %v9964_v43  ;;  %v9966_v21 = vpop.f32.mrb[33].mxu1 }
 0x8a8   : > { %12065 = vst [vmem:[#allocation82_spill] sm:$0xff] %v9966_v21  ;;  %v4407_v54 = vpop.f32.mrb[34].mxu1 }
 0x8a9   : > { %v4409_v26 = vpop.f32.mrb[35].mxu1  ;;  %v4408_v44 = vadd.f32 %v4407_v54, %v9944_v7 }
 0x8aa   : > { %v9968_v17 = vpop.f32.mrb[44].mxu0  ;;  %v4410_v25 = vadd.f32 %v4409_v26, %v9944_v7 }
 0x8ab   : > { %12066 = vst [vmem:[#allocation83_spill] sm:$0xff] %v9968_v17  ;;  %v9970_v57 = vpop.f32.mrb[45].mxu0  ;;  %v4554_v48 = vmax.f32 %v4408_v44, 0.0 }
 0x8ac   : > { %12067 = vst [vmem:[#allocation80_spill] sm:$0xff] %v9970_v57  ;;  %v4468_v28 = vpop.f32.mrb[46].mxu0  ;;  %v4555_v24 = vmax.f32 %v4410_v25, 0.0 }
 0x8ad   : > { %v4470_v46 = vpop.f32.mrb[47].mxu0  ;;  %v4469_v5 = vadd.f32 %v4468_v28, %v9944_v7 }
 0x8ae   : > { %v4413_v15 = vpop.f32.mrb[36].mxu1  ;;  %v4471_v8 = vadd.f32 %v4470_v46, %v9944_v7 }
 0x8af   : > { %v4414_v19 = vadd.f32 %v4413_v15, %v9947_v61  ;;  %v4415_v47 = vpop.f32.mrb[37].mxu1  ;;  %v4556_v6 = vmax.f32 %v4469_v5, 0.0 }
 0x8b0   : > { %v4416_v38 = vadd.f32 %v4415_v47, %v9947_v61  ;;  %v4417_v3 = vpop.f32.mrb[38].mxu1  ;;  %v4557_v26 = vmax.f32 %v4471_v8, 0.0 }
 0x8b1   : > { %v4562_v27 = vmax.f32 %v4414_v19, 0.0  ;;  %v4419_v20 = vpop.f32.mrb[39].mxu1  ;;  %v4418_v22 = vadd.f32 %v4417_v3, %v9952_v41 }
 0x8b2   : > { %v4563_v63 = vmax.f32 %v4416_v38, 0.0  ;;  %v4474_v1 = vpop.f32.mrb[48].mxu0  ;;  %v4420_v28 = vadd.f32 %v4419_v20, %v9952_v41 }
 0x8b3   : > { %v4586_v13 = vpack.c.bf16 %v4562_v27, %v4554_v48  ;;  %v4475_v49 = vadd.f32 %v4474_v1, %v9947_v61  ;;  %v4476_v37 = vpop.f32.mrb[49].mxu0  ;;  %v4570_v3 = vmax.f32 %v4418_v22, 0.0 }
 0x8b4   : > { %v4587_v51 = vpack.c.bf16 %v4563_v63, %v4555_v24  ;;  %v4477_v11 = vadd.f32 %v4476_v37, %v9947_v61  ;;  %v4478_v12 = vpop.f32.mrb[50].mxu0  ;;  %v4571_v8 = vmax.f32 %v4420_v28, 0.0 }
 0x8b5   : > { %v4564_v39 = vmax.f32 %v4475_v49, 0.0  ;;  %v4480_v54 = vpop.f32.mrb[51].mxu0  ;;  %4624 = vrot.lane.b32.xlu0 %v4586_v13, %s6210_s23  ;;  %v4479_v5 = vadd.f32 %v4478_v12, %v9952_v41 }
 0x8b6   : > { %v4565_v44 = vmax.f32 %v4477_v11, 0.0  ;;  %v4423_v46 = vpop.f32.mrb[40].mxu1  ;;  %4626 = vrot.lane.b32.xlu1 %v4587_v51, %s6210_s23  ;;  %v4481_v20 = vadd.f32 %v4480_v54, %v9952_v41 }
 0x8b7   : > { %v4588_v25 = vpack.c.bf16 %v4564_v39, %v4556_v6  ;;  %v4424_v15 = vadd.f32 %v4423_v46, %v9956_v60  ;;  %v4425_v19 = vpop.f32.mrb[41].mxu1  ;;  %v4572_v39 = vmax.f32 %v4479_v5, 0.0 }
 0x8b8   : > { %v4589_v47 = vpack.c.bf16 %v4565_v44, %v4557_v26  ;;  %v4426_v38 = vadd.f32 %v4425_v19, %v9956_v60  ;;  %v4427_v48 = vpop.f32.mrb[42].mxu1  ;;  %v4573_v22 = vmax.f32 %v4481_v20, 0.0 }
 0x8b9   : > { %v4578_v27 = vmax.f32 %v4424_v15, 0.0  ;;  %v4428_v24 = vpop.f32.mrb[43].mxu1 }
 0x8ba   : > { %v4579_v63 = vmax.f32 %v4426_v38, 0.0  ;;  %v4484_v1 = vpop.f32.mrb[52].mxu0 }
 0x8bb   : > { %v4594_v13 = vpack.c.bf16 %v4578_v27, %v4570_v3  ;;  %v4485_v49 = vadd.f32 %v4484_v1, %v9956_v60  ;;  %v4486_v37 = vpop.f32.mrb[53].mxu0 }
 0x8bc   : > { %v4595_v51 = vpack.c.bf16 %v4579_v63, %v4571_v8  ;;  %v4487_v11 = vadd.f32 %v4486_v37, %v9956_v60  ;;  %v4488_v6 = vpop.f32.mrb[54].mxu0 }
 0x8bd   : > { %v4580_v26 = vmax.f32 %v4485_v49, 0.0  ;;  %4640 = vrot.lane.b32.xlu1 %v4594_v13, %s6210_s23  ;;  %v4489_v12 = vpop.f32.mrb[55].mxu0 }
 0x8be   : > { %v4581_v44 = vmax.f32 %v4487_v11, 0.0  ;;  %4642 = vrot.lane.b32.xlu0 %v4595_v51, %s6210_s23 }
 0x8bf   : > { %v4596_v54 = vpack.c.bf16 %v4580_v26, %v4572_v39 }
 0x8c0   : > { %v4597_v28 = vpack.c.bf16 %v4581_v44, %v4573_v22 }
 0x8c2   : > { %4628 = vrot.lane.b32.xlu0 %v4588_v25, %s6210_s23 }
 0x8c6   : > { %4630 = vrot.lane.b32.xlu0 %v4589_v47, %s6210_s23 }
 0x8ca   : > { %v9994_v46 = vpop.f32.mrb[44].mxu1 }
 0x8cb   : > { %12068 = vst [vmem:[#allocation88_spill] sm:$0xff] %v9994_v46  ;;  %v9996_v15 = vpop.f32.mrb[45].mxu1 }
 0x8cc   : > { %12069 = vst [vmem:[#allocation85_spill] sm:$0xff] %v9996_v15  ;;  %v4529_v19 = vpop.f32.mrb[46].mxu1 }
 0x8cd   : > { %v4531_v38 = vpop.f32.mrb[47].mxu1  ;;  %v4530_v48 = vadd.f32 %v4529_v19, %v9944_v7 }
 0x8ce   : > { %v4532_v3 = vadd.f32 %v4531_v38, %v9944_v7 }
 0x8cf   : > { %v4558_v25 = vmax.f32 %v4530_v48, 0.0 }
 0x8d0   : > { %v4559_v1 = vmax.f32 %v4532_v3, 0.0 }
 0x8d2   : > { %v4535_v5 = vpop.f32.mrb[48].mxu1 }
 0x8d3   : > { %v4536_v27 = vadd.f32 %v4535_v5, %v9947_v61  ;;  %v4537_v24 = vpop.f32.mrb[49].mxu1 }
 0x8d4   : > { %v4538_v8 = vadd.f32 %v4537_v24, %v9947_v61  ;;  %v4539_v20 = vpop.f32.mrb[50].mxu1 }
 0x8d5   : > { %v4566_v63 = vmax.f32 %v4536_v27, 0.0  ;;  %v4541_v47 = vpop.f32.mrb[51].mxu1  ;;  %v4540_v51 = vadd.f32 %v4539_v20, %v9952_v41 }
 0x8d6   : > { %v4567_v13 = vmax.f32 %v4538_v8, 0.0  ;;  %v4542_v7 = vadd.f32 %v4541_v47, %v9952_v41 }
 0x8d7   : > { %v4590_v49 = vpack.c.bf16 %v4566_v63, %v4558_v25  ;;  %v4574_v12 = vmax.f32 %v4540_v51, 0.0 }
 0x8d8   : > { %v4591_v37 = vpack.c.bf16 %v4567_v13, %v4559_v1  ;;  %v4575_v19 = vmax.f32 %v4542_v7, 0.0 }
 0x8d9   : > { %4632 = vrot.lane.b32.xlu1 %v4590_v49, %s6210_s23 }
 0x8da   : > { %v4545_v11 = vpop.f32.mrb[52].mxu1  ;;  %4634 = vrot.lane.b32.xlu0 %v4591_v37, %s6210_s23 }
 0x8db   : > { %v4546_v6 = vadd.f32 %v4545_v11, %v9956_v60  ;;  %v4547_v61 = vpop.f32.mrb[53].mxu1 }
 0x8dc   : > { %v4548_v39 = vadd.f32 %v4547_v61, %v9956_v60  ;;  %v4549_v26 = vpop.f32.mrb[54].mxu1 }
 0x8dd   : > { %v4582_v22 = vmax.f32 %v4546_v6, 0.0  ;;  %4644 = vrot.lane.b32.xlu1 %v4596_v54, %s6210_s23  ;;  %v4550_v44 = vpop.f32.mrb[55].mxu1 }
 0x8de   : > { %v4583_v38 = vmax.f32 %v4548_v39, 0.0  ;;  %4646 = vrot.lane.b32.xlu0 %v4597_v28, %s6210_s23 }
 0x8df   : > { %v4598_v48 = vpack.c.bf16 %v4582_v22, %v4574_v12 }
 0x8e0   : > { %v4599_v41 = vpack.c.bf16 %v4583_v38, %v4575_v19 }
 0x8e1   : > { %4648 = vrot.lane.b32.xlu1 %v4598_v48, %s6210_s23 }
 0x8e2   : > { %4650 = vrot.lane.b32.xlu0 %v4599_v41, %s6210_s23 }
 0x8ff   : > { %v4621_v3 = vpop.permute.xlu0 %4620 }
 0x900   : > { %v4681_v5 = vsel %vm12070_vm10, 0, %v4621_v3  ;;  %v4623_v60 = vpop.permute.xlu1 %4622  ;;  %vm12078_vm10 = vmmov %vm12073_vm12 }
 0x901   : > { %v10014_v27 = vsel %vm12071_vm0, %v4621_v3, %v4623_v60  ;;  %4802 = vrot.lane.b32.xlu0 %v4681_v5, %s6218_s15  ;;  %v4726_v54 = vsel %vm12072_vm4, %v4681_v5, 0  ;;  %v4692_v28 = vsel %vm12073_vm12, %v4681_v5, 0  ;;  %vm12079_vm0 = vmmov %vm12074_vm14  ;;  %vm12080_vm4 = vcmp.ne.s16.totalorder %v11931_v42, 0 }
 0x902   : > { %4974 = vrot.lane.b32.xlu1 %v4726_v54, %s6220_s19  ;;  %6067 = vmatprep.subr.msk.bf16.mxu0 %vm12074_vm14, %v10014_v27  ;;  %v4727_v24 = vsel %vm12075_vm11, %v10014_v27, 0  ;;  %v4708_v1 = vsel %vm12080_vm4, %v4681_v5, 0  ;;  %vm12081_vm12 = vcmp.ne.s16.totalorder %v11938_v45, 0  ;;  %vm12082_vm14 = vmmov %vm12080_vm4  ;;  %vm12083_vm11 = vcmp.ne.s16.totalorder %v11936_v59, 0  ;;  %v12113_v54 = vld [vmem:[#allocation26_spill] sm:$0xff] }
 0x903   : > { %5467 = vmatpush1.bf16.msra.mxu0 %v4692_v28  ;;  %v4744_v62 = vsel %vm12081_vm12, %v4681_v5, 0  ;;  %v4762_v13 = vsel %vm12083_vm11, %v4681_v5, 0  ;;  %vm12088_vm4 = vcmp.ne.s16.totalorder %v11942_v34, 0 }
 0x904   : > { %v4709_v11 = vsel %vm12088_vm4, %v10014_v27, 0 }
 0x905   : > { %5042 = vrot.lane.b32.xlu0 %v4681_v5, %s6217_s14 }
 0x906   : > { %4976 = vrot.lane.b32.xlu1 %v4727_v24, %s6220_s19 }
 0x907   : > { %v4637_v8 = vpop.permute.xlu1 %4636 }
 0x908   : > { %v4684_v20 = vsel %vm12076_vm6, 0, %v4637_v8  ;;  %v4639_v25 = vpop.permute.xlu0 %4638  ;;  %vm12084_vm6 = vcmp.ne.s16.totalorder %v11934_v16, 0 }
 0x909   : > { %v10032_v63 = vsel %vm12077_vm13, %v4637_v8, %v4639_v25  ;;  %5282 = vrot.lane.b32.xlu0 %v4681_v5, %s6222_s21  ;;  %v4700_v47 = vsel %vm12078_vm10, %v4684_v20, 0  ;;  %v4717_v29 = vsel %vm12082_vm14, %v4684_v20, 0  ;;  %v4735_v49 = vsel %vm12084_vm6, %v4684_v20, 0  ;;  %vm12086_vm10 = vmmov %vm12081_vm12  ;;  %v12115_v8 = vld [vmem:[#allocation30_spill] sm:$0xff] }
 0x90a   : > { %4820 = vrot.lane.b32.xlu1 %v4684_v20, %s6218_s15  ;;  %6068 = vmatprep.subr.msk.bf16.mxu0 %vm12079_vm0, %v10032_v63  ;;  %vm12085_vm13 = vcmp.ne.s16.totalorder %v11940_v36, 0  ;;  %v4753_v37 = vsel %vm12086_vm10, %v4684_v20, 0  ;;  %vm12087_vm0 = vcmask 269312   ;;  %vm12090_vm14 = vmmov %vm12083_vm11  ;;  %vm12091_vm11 = vcmp.ne.s16.totalorder %v12026_v52, 0 }
 0x90b   : > { %5469 = vmatpush1.bf16.msra.mxu0 %v4700_v47  ;;  %v4780_v42 = vsel %vm12085_vm13, %v4681_v5, 0  ;;  %vm12089_vm12 = vmmov %vm12087_vm0  ;;  %v4771_v45 = vsel %vm12090_vm14, %v4684_v20, 0  ;;  %vm12092_vm6 = vcmp.ne.s16.totalorder %v12023_v9, 0  ;;  %vm12093_vm13 = vcmp.ne.s16.totalorder %v11956_v35, 0 }
 0x90c   : > { %v4745_v39 = vsel %vm12093_vm13, %v10014_v27, 0  ;;  %vm12094_vm10 = vmmov %vm12087_vm0  ;;  %vm12101_vm13 = vcmp.ne.s16.totalorder %v11942_v34, 0 }
 0x90d   : > { %4804 = vrot.lane.b32.xlu0 %v10014_v27, %s6218_s15  ;;  %vm12096_vm4 = vmmov %vm12094_vm10 }
 0x90e   : > { %5060 = vrot.lane.b32.xlu1 %v4684_v20, %s6217_s14  ;;  %vm12098_vm14 = vmmov %vm12091_vm11 }
 0x911   : > { %4888 = vrot.lane.b32.xlu0 %v4708_v1, %s6219_s16  ;;  %v12118_v1 = vld [vmem:[#allocation32_spill] sm:$0xff] }
 0x912   : > { %5300 = vrot.lane.b32.xlu1 %v4684_v20, %s6222_s21 }
 0x915   : > { %5044 = vrot.lane.b32.xlu0 %v10014_v27, %s6217_s14 }
 0x916   : > { %4822 = vrot.lane.b32.xlu1 %v10032_v63, %s6218_s15 }
 0x919   : > { %5128 = vrot.lane.b32.xlu0 %v4744_v62, %s6221_s20 }
 0x91a   : > { %4906 = vrot.lane.b32.xlu1 %v4717_v29, %s6219_s16 }
 0x91d   : > { %5214 = vrot.lane.b32.xlu0 %v4762_v13, %s6215_s12 }
 0x91e   : > { %4992 = vrot.lane.b32.xlu1 %v4735_v49, %s6220_s19 }
 0x921   : > { %5284 = vrot.lane.b32.xlu0 %v10014_v27, %s6222_s21 }
 0x922   : > { %5062 = vrot.lane.b32.xlu1 %v10032_v63, %s6217_s14 }
 0x925   : > { %5368 = vrot.lane.b32.xlu0 %v4780_v42, %s6223_s24 }
 0x926   : > { %5146 = vrot.lane.b32.xlu1 %v4753_v37, %s6221_s20 }
 0x927   : > { %v4625_v16 = vpop.permute.xlu0 %4624 }
 0x928   : > { %v10075_v51 = vsel %vm12087_vm0, %v4623_v60, %v4625_v16  ;;  %v10077_v7 = vpop.permute.xlu1 %4626  ;;  %vm12095_vm0 = vcmp.ne.s16.totalorder %v11944_v53, 0 }
 0x929   : > { %v10084_v6 = vsel %vm12089_vm12, %v4625_v16, %v10077_v7  ;;  %4890 = vrot.lane.b32.xlu0 %v4709_v11, %s6219_s16  ;;  %v4694_v61 = vsel %vm12091_vm11, %v10075_v51, 0  ;;  %v4763_v22 = vsel %vm12095_vm0, %v10014_v27, 0  ;;  %vm12097_vm12 = vcmp.ne.s16.totalorder %v11940_v36, 0  ;;  %vm12099_vm11 = vmmov %vm12092_vm6 }
 0x92a   : > { %5232 = vrot.lane.b32.xlu1 %v4771_v45, %s6215_s12  ;;  %6070 = vmatprep.subr.msk.bf16.mxu1 %vm12092_vm6, %v10084_v6  ;;  %v4789_v19 = vsel %vm12097_vm12, %v4684_v20, 0  ;;  %vm12100_vm6 = vcmp.ne.s16.totalorder %v11948_v0, 0  ;;  %v4718_v36 = vsel %vm12101_vm13, %v10032_v63, 0  ;;  %vm12103_vm0 = vcmp.ne.s16.totalorder %v11964_v23, 0 }
 0x92b   : > { %5553 = vmatpush1.bf16.msra.mxu1 %v4694_v61  ;;  %v4781_v48 = vsel %vm12100_vm6, %v10014_v27, 0  ;;  %v4728_v52 = vsel %vm12103_vm0, %v10075_v51, 0  ;;  %vm12105_vm12 = vcmp.ne.s16.totalorder %v11944_v53, 0  ;;  %vm12109_vm13 = vcmp.ne.s16.totalorder %v11962_v4, 0 }
 0x92c   : > { %v4765_v0 = vsel %vm12109_vm13, %v10084_v6, 0  ;;  %vm12111_vm0 = vcmp.ne.s16.totalorder %v11946_v33, 0  ;;  %vm12120_vm13 = vcmp.ne.s16.totalorder %v11964_v23, 0 }
 0x92d   : > { %5130 = vrot.lane.b32.xlu0 %v4745_v39, %s6221_s20  ;;  %v4710_v5 = vsel %vm12111_vm0, %v10075_v51, 0  ;;  %v12127_v39 = vld [vmem:[#allocation34_spill] sm:$0xff] }
 0x92e   : > { %5302 = vrot.lane.b32.xlu1 %v10032_v63, %s6222_s21 }
 0x92f   : > { %v4641_v59 = vpop.permute.xlu1 %4640 }
 0x930   : > { %v10103_v26 = vsel %vm12094_vm10, %v4639_v25, %v4641_v59  ;;  %v10105_v12 = vpop.permute.xlu0 %4642  ;;  %vm12102_vm10 = vcmp.ne.s16.totalorder %v11952_v40, 0  ;;  %v4772_v40 = vsel %vm12105_vm12, %v10032_v63, 0  ;;  %vm12114_vm12 = vcmp.ne.s16.totalorder %v12113_v54, 0 }
 0x931   : > { %v10112_v44 = vsel %vm12096_vm4, %v4641_v59, %v10105_v12  ;;  %5216 = vrot.lane.b32.xlu0 %v4763_v22, %s6215_s12  ;;  %v4702_v38 = vsel %vm12098_vm14, %v10103_v26, 0  ;;  %v4736_v9 = vsel %vm12102_vm10, %v10032_v63, 0  ;;  %vm12104_vm4 = vcmp.ne.s16.totalorder %v11956_v35, 0  ;;  %vm12106_vm14 = vmmov %vm12100_vm6 }
 0x932   : > { %5386 = vrot.lane.b32.xlu1 %v4789_v19, %s6223_s24  ;;  %6071 = vmatprep.subr.msk.bf16.mxu1 %vm12099_vm11, %v10112_v44  ;;  %v4754_v34 = vsel %vm12104_vm4, %v10032_v63, 0  ;;  %v4790_v41 = vsel %vm12106_vm14, %v10032_v63, 0  ;;  %vm12107_vm11 = vcmp.ne.s16.totalorder %v11959_v55, 0  ;;  %vm12108_vm6 = vcmp.ne.s16.totalorder %v11978_v50, 0 }
 0x933   : > { %5555 = vmatpush1.bf16.msra.mxu1 %v4702_v38  ;;  %v4711_v35 = vsel %vm12107_vm11, %v10084_v6, 0  ;;  %v4747_v53 = vsel %vm12108_vm6, %v10084_v6, 0  ;;  %vm12110_vm10 = vcmp.ne.s16.totalorder %v11994_v58, 0  ;;  %vm12112_vm4 = vcmp.ne.s16.totalorder %v11968_v31, 0  ;;  %vm12117_vm11 = vmmov %vm12111_vm0 }
 0x934   : > { %v4783_v3 = vsel %vm12110_vm10, %v10084_v6, 0  ;;  %v4629_v60 = vpop.permute.xlu0 %4628  ;;  %v4746_v27 = vsel %vm12112_vm4, %v10075_v51, 0  ;;  %v4764_v28 = vsel %vm12114_vm12, %v10075_v51, 0  ;;  %vm12116_vm14 = vcmp.ne.s16.totalorder %v12115_v8, 0  ;;  %vm12121_vm10 = vmmov %vm12112_vm4 }
 0x935   : > { %5370 = vrot.lane.b32.xlu0 %v4781_v48, %s6223_s24  ;;  %v4782_v20 = vsel %vm12116_vm14, %v10075_v51, 0  ;;  %v4719_v47 = vsel %vm12117_vm11, %v10103_v26, 0  ;;  %vm12119_vm6 = vcmp.ne.s16.totalorder %v12118_v1, 0  ;;  %v4737_v29 = vsel %vm12120_vm13, %v10103_v26, 0  ;;  %vm12122_vm0 = vmmov %vm12114_vm12 }
 0x936   : > { %4908 = vrot.lane.b32.xlu1 %v4718_v36, %s6219_s16  ;;  %v4729_v62 = vsel %vm12119_vm6, %v10084_v6, 0  ;;  %v4755_v33 = vsel %vm12121_vm10, %v10103_v26, 0  ;;  %v4773_v37 = vsel %vm12122_vm0, %v10103_v26, 0  ;;  %vm12123_vm4 = vmmov %vm12116_vm14  ;;  %vm12124_vm12 = vcmask 269312  }
 0x937   : > { %v10251_v11 = vsel %vm12124_vm12, %v10077_v7, %v4629_v60  ;;  %vm12126_vm14 = vcmp.ne.s16.totalorder %v11959_v55, 0  ;;  %vm12128_vm11 = vcmp.ne.s16.totalorder %v12127_v39, 0  ;;  %v4738_v7 = vsel %vm12119_vm6, %v10112_v44, 0  ;;  %vm12129_vm13 = vmmov %vm12124_vm12 }
 0x938   : > { %v10196_v24 = vpop.permute.xlu0 %4630  ;;  %12125 = vst [vmem:[#allocation91_spill] sm:$0xff] %v10251_v11  ;;  %v4730_v59 = vsel %vm12128_vm11, %v10251_v11, 0  ;;  %vm12130_vm10 = vcmp.ne.s16.totalorder %v11978_v50, 0  ;;  %vm12131_vm0 = vmmov %vm12124_vm12 }
 0x939   : > { %4808 = vrot.lane.b32.xlu0 %v10084_v6, %s6218_s15  ;;  %v4756_v19 = vsel %vm12130_vm10, %v10112_v44, 0  ;;  %vm12139_vm6 = vmmov %vm12131_vm0 }
 0x93a   : > { %4994 = vrot.lane.b32.xlu1 %v4736_v9, %s6220_s19 }
 0x93d   : > { %4978 = vrot.lane.b32.xlu0 %v4728_v52, %s6220_s19 }
 0x93e   : > { %5148 = vrot.lane.b32.xlu1 %v4754_v34, %s6221_s20  ;;  %v12133_v34 = vld [vmem:[#allocation37_spill] sm:$0xff] }
 0x93f   : > { %vm12134_vm12 = vcmp.ne.s16.totalorder %v12133_v34, 0 }
 0x941   : > { %5048 = vrot.lane.b32.xlu0 %v10084_v6, %s6217_s14 }
 0x942   : > { %5234 = vrot.lane.b32.xlu1 %v4772_v40, %s6215_s12 }
 0x945   : > { %5288 = vrot.lane.b32.xlu0 %v10084_v6, %s6222_s21  ;;  %v4720_v6 = vsel %vm12126_vm14, %v10112_v44, 0  ;;  %vm12136_vm14 = vcmp.ne.s16.totalorder %v11994_v58, 0 }
 0x946   : > { %5388 = vrot.lane.b32.xlu1 %v4790_v41, %s6223_s24  ;;  %v10309_v41 = vld [vmem:[%s11241_s9 + $0x4] ss:$12 sps:$4 sm:$0xff]  }
 0x947   : > { %12135 = vst [vmem:[#allocation86_spill] sm:$0xff] %v10309_v41  ;;  %5498 = vmatprep.mubr.bf16.mxu0 %v10309_v41  ;;  %5584 = vmatprep.mubr.bf16.mxu1 %v10309_v41 }
 0x949   : > { %4894 = vrot.lane.b32.xlu0 %v4711_v35, %s6219_s16 }
 0x94a   : > { %4806 = vrot.lane.b32.xlu1 %v10075_v51, %s6218_s15 }
 0x94b   : > { %v10206_v63 = vpop.permute.xlu1 %4632 }
 0x94c   : > { %v10204_v25 = vpop.permute.xlu0 %4634 }
 0x94d   : > { %5134 = vrot.lane.b32.xlu0 %v4747_v53, %s6221_s20  ;;  %v10289_v48 = vsel %vm12131_vm0, %v10206_v63, %v10204_v25 }
 0x94e   : > { %5046 = vrot.lane.b32.xlu1 %v10075_v51, %s6217_s14 }
 0x94f   : > { %v10222_v49 = vpop.permute.xlu1 %4644 }
 0x950   : > { %v10219_v13 = vpop.permute.xlu0 %4646 }
 0x951   : > { %5220 = vrot.lane.b32.xlu0 %v4765_v0, %s6215_s12  ;;  %v12137_v0 = vld [vmem:[#allocation25_spill] sm:$0xff] }
 0x952   : > { %5286 = vrot.lane.b32.xlu1 %v10075_v51, %s6222_s21  ;;  %v4791_v51 = vsel %vm12123_vm4, %v10103_v26, 0  ;;  %vm12132_vm4 = vcmp.ne.s16.totalorder %v11962_v4, 0  ;;  %v4792_v4 = vsel %vm12136_vm14, %v10112_v44, 0  ;;  %vm12138_vm11 = vcmp.ne.s16.totalorder %v12137_v0, 0 }
 0x953   : > { %v10234_v42 = vpop.permute.xlu1 %4648  ;;  %v4774_v9 = vsel %vm12132_vm4, %v10112_v44, 0  ;;  %vm12150_vm14 = vcmp.ne.s16.totalorder %v12127_v39, 0 }
 0x954   : > { %v10232_v23 = vpop.permute.xlu0 %4650 }
 0x955   : > { %5374 = vrot.lane.b32.xlu0 %v4783_v3, %s6223_s24  ;;  %v4715_v3 = vsel %vm12138_vm11, %v10289_v48, 0 }
 0x956   : > { %4892 = vrot.lane.b32.xlu1 %v4710_v5, %s6219_s16 }
 0x959   : > { %4824 = vrot.lane.b32.xlu0 %v10103_v26, %s6218_s15 }
 0x95a   : > { %5132 = vrot.lane.b32.xlu1 %v4746_v27, %s6221_s20 }
 0x95d   : > { %5064 = vrot.lane.b32.xlu0 %v10103_v26, %s6217_s14 }
 0x95e   : > { %5218 = vrot.lane.b32.xlu1 %v4764_v28, %s6215_s12  ;;  %v12141_v28 = vld [vmem:[#allocation35_spill] sm:$0xff] }
 0x961   : > { %5304 = vrot.lane.b32.xlu0 %v10103_v26, %s6222_s21  ;;  %v10274_v26 = vsel %vm12129_vm13, %v4629_v60, %v10196_v24  ;;  %vm12142_vm13 = vcmp.ne.s16.totalorder %v12141_v28, 0 }
 0x962   : > { %5372 = vrot.lane.b32.xlu1 %v4782_v20, %s6223_s24  ;;  %v4713_v40 = vsel %vm12134_vm12, %v10274_v26, 0  ;;  %v4712_v8 = vsel %vm12142_vm13, %v10251_v11, 0  ;;  %vm12143_vm10 = vmmov %vm12142_vm13  ;;  %vm12156_vm13 = vcmask 269312  }
 0x963   : > { %v10405_v39 = vsel %vm12156_vm13, %v10196_v24, %v10206_v63 }
 0x965   : > { %4910 = vrot.lane.b32.xlu0 %v4719_v47, %s6219_s16 }
 0x966   : > { %4980 = vrot.lane.b32.xlu1 %v4729_v62, %s6220_s19  ;;  %v12144_v62 = vld [vmem:[#allocation42_spill] sm:$0xff] }
 0x967   : > { %vm12145_vm0 = vcmp.ne.s16.totalorder %v12144_v62, 0 }
 0x969   : > { %4996 = vrot.lane.b32.xlu0 %v4737_v29, %s6220_s19  ;;  %v4748_v29 = vsel %vm12145_vm0, %v10251_v11, 0 }
 0x96a   : > { %4826 = vrot.lane.b32.xlu1 %v10112_v44, %s6218_s15 }
 0x96d   : > { %5150 = vrot.lane.b32.xlu0 %v4755_v33, %s6221_s20 }
 0x96e   : > { %5066 = vrot.lane.b32.xlu1 %v10112_v44, %s6217_s14 }
 0x971   : > { %5236 = vrot.lane.b32.xlu0 %v4773_v37, %s6215_s12 }
 0x972   : > { %5306 = vrot.lane.b32.xlu1 %v10112_v44, %s6222_s21  ;;  %v10333_v44 = vsel %vm12139_vm6, %v10105_v12, %v10222_v49 }
 0x973   : > { %v10242_v31 = vpop.permute.xlu0 %4802  ;;  %12140 = vst [vmem:[#allocation81_spill] sm:$0xff] %v10333_v44  ;;  %v4721_v1 = vsel %vm12143_vm10, %v10333_v44, 0  ;;  %vm12157_vm10 = vmmov %vm12156_vm13 }
 0x974   : > { %v10244_v16 = vpop.permute.xlu1 %4974 }
 0x975   : > { %5390 = vrot.lane.b32.xlu0 %v4791_v51, %s6223_s24  ;;  %v12146_v51 = vld [vmem:[#allocation36_spill] sm:$0xff] }
 0x976   : > { %4912 = vrot.lane.b32.xlu1 %v4720_v6, %s6219_s16  ;;  %vm12147_vm4 = vcmp.ne.s16.totalorder %v12146_v51, 0 }
 0x977   : > { %v10258_v45 = vpop.permute.xlu0 %5042  ;;  %v4731_v6 = vsel %vm12147_vm4, %v10274_v26, 0  ;;  %vm12160_vm4 = vcmp.ne.s16.totalorder %v12144_v62, 0  ;;  %v12165_v62 = vld [vmem:[#allocation38_spill] sm:$0xff] }
 0x978   : > { %v10260_v61 = vpop.permute.xlu1 %4976  ;;  %v4757_v46 = vsel %vm12160_vm4, %v10333_v44, 0 }
 0x979   : > { %4982 = vrot.lane.b32.xlu0 %v4730_v59, %s6220_s19  ;;  %v12148_v59 = vld [vmem:[#allocation47_spill] sm:$0xff] }
 0x97a   : > { %4998 = vrot.lane.b32.xlu1 %v4738_v7, %s6220_s19  ;;  %vm12149_vm12 = vcmp.ne.s16.totalorder %v12148_v59, 0 }
 0x97b   : > { %v10270_v55 = vpop.permute.xlu0 %5282  ;;  %v4766_v7 = vsel %vm12149_vm12, %v10251_v11, 0 }
 0x97c   : > { %v10276_v22 = vpop.permute.xlu1 %4820 }
 0x97d   : > { %4812 = vrot.lane.b32.xlu0 %v10274_v26, %s6218_s15 }
 0x97e   : > { %5152 = vrot.lane.b32.xlu1 %v4756_v19, %s6221_s20 }
 0x97f   : > { %v10284_v38 = vpop.permute.xlu0 %4804 }
 0x980   : > { %v10291_v36 = vpop.permute.xlu1 %5060 }
 0x981   : > { %4816 = vrot.lane.b32.xlu0 %v10289_v48, %s6218_s15 }
 0x982   : > { %5238 = vrot.lane.b32.xlu1 %v4774_v9, %s6215_s12 }
 0x983   : > { %v10299_v50 = vpop.permute.xlu0 %4888 }
 0x984   : > { %v10301_v52 = vpop.permute.xlu1 %5300 }
 0x985   : > { %4898 = vrot.lane.b32.xlu0 %v4713_v40, %s6219_s16  ;;  %v4739_v40 = vsel %vm12150_vm14, %v10333_v44, 0  ;;  %vm12166_vm14 = vcmp.ne.s16.totalorder %v12165_v62, 0 }
 0x986   : > { %5392 = vrot.lane.b32.xlu1 %v4792_v4, %s6223_s24  ;;  %v12151_v4 = vld [vmem:[#allocation53_spill] sm:$0xff] }
 0x987   : > { %v10317_v35 = vpop.permute.xlu0 %5044  ;;  %vm12152_vm11 = vcmp.ne.s16.totalorder %v12151_v4, 0 }
 0x988   : > { %v10320_v53 = vpop.permute.xlu1 %4822 }
 0x989   : > { %4902 = vrot.lane.b32.xlu0 %v4715_v3, %s6219_s16  ;;  %v4784_v3 = vsel %vm12152_vm11, %v10251_v11, 0  ;;  %vm12169_vm11 = vcmp.ne.s16.totalorder %v12148_v59, 0 }
 0x98a   : > { %4810 = vrot.lane.b32.xlu1 %v10251_v11, %s6218_s15 }
 0x98b   : > { %v10328_v58 = vpop.permute.xlu0 %5128 }
 0x98c   : > { %v10335_v5 = vpop.permute.xlu1 %4906 }
 0x98d   : > { %4828 = vrot.lane.b32.xlu0 %v10333_v44, %s6218_s15 }
 0x98e   : > { %5050 = vrot.lane.b32.xlu1 %v10251_v11, %s6217_s14 }
 0x98f   : > { %v10341_v60 = vpop.permute.xlu0 %5214 }
 0x990   : > { %v10343_v27 = vpop.permute.xlu1 %4992 }
 0x991   : > { %5068 = vrot.lane.b32.xlu0 %v10333_v44, %s6217_s14 }
 0x992   : > { %5290 = vrot.lane.b32.xlu1 %v10251_v11, %s6222_s21  ;;  %v12176_v11 = vld [vmem:[#allocation48_spill] sm:$0xff] }
 0x993   : > { %v10349_v12 = vpop.permute.xlu0 %5284 }
 0x994   : > { %v10351_v54 = vpop.permute.xlu1 %5062 }
 0x995   : > { %5308 = vrot.lane.b32.xlu0 %v10333_v44, %s6222_s21 }
 0x996   : > { %4896 = vrot.lane.b32.xlu1 %v4712_v8, %s6219_s16 }
 0x997   : > { %v10359_v20 = vpop.permute.xlu0 %5368 }
 0x998   : > { %v10361_v47 = vpop.permute.xlu1 %5146 }
 0x999   : > { %4914 = vrot.lane.b32.xlu0 %v4721_v1, %s6219_s16  ;;  %v12154_v1 = vld [vmem:[#allocation23_spill] sm:$0xff] }
 0x99a   : > { %5136 = vrot.lane.b32.xlu1 %v4748_v29, %s6221_s20  ;;  %vm12155_vm6 = vcmp.ne.s16.totalorder %v12154_v1, 0 }
 0x99b   : > { %v10371_v33 = vpop.permute.xlu0 %4890  ;;  %v4733_v29 = vsel %vm12155_vm6, %v10289_v48, 0  ;;  %vm12171_vm6 = vcmp.ne.s16.totalorder %v12170_v56, 0 }
 0x99c   : > { %v10373_v37 = vpop.permute.xlu1 %5232 }
 0x99d   : > { %4984 = vrot.lane.b32.xlu0 %v4731_v6, %s6220_s19 }
 0x99e   : > { %5222 = vrot.lane.b32.xlu1 %v4766_v7, %s6215_s12 }
 0x99f   : > { %v10383_v19 = vpop.permute.xlu0 %5130 }
 0x9a0   : > { %v10385_v9 = vpop.permute.xlu1 %5302 }
 0x9a1   : > { %5000 = vrot.lane.b32.xlu0 %v4739_v40, %s6220_s19  ;;  %v10416_v40 = vsel %vm12157_vm10, %v10204_v25, 0  ;;  %vm12177_vm10 = vcmp.ne.s16.totalorder %v12176_v11, 0 }
 0x9a2   : > { %5376 = vrot.lane.b32.xlu1 %v4784_v3, %s6223_s24  ;;  %v12158_v3 = vld [vmem:[#allocation39_spill] sm:$0xff]  ;;  %v4716_v17 = vsel %vm798_vm3, %v10416_v40, 0 }
 0x9a3   : > { %v10395_v28 = vpop.permute.xlu0 %5216  ;;  %vm12159_vm0 = vcmp.ne.s16.totalorder %v12158_v3, 0 }
 0x9a4   : > { %v10397_v8 = vpop.permute.xlu1 %5386 }
 0x9a5   : > { %12153 = vst [vmem:[#allocation89_spill] sm:$0xff] %v10397_v8  ;;  %4988 = vrot.lane.b32.xlu0 %v4733_v29, %s6220_s19  ;;  %v4714_v29 = vsel %vm12159_vm0, %v10405_v39, 0  ;;  %vm12179_vm0 = vcmp.ne.s16.totalorder %v12151_v4, 0  ;;  %v12184_v4 = vld [vmem:[#allocation28_spill] sm:$0xff] }
 0x9a6   : > { %4814 = vrot.lane.b32.xlu1 %v10405_v39, %s6218_s15 }
 0x9a7   : > { %v10410_v6 = vpop.permute.xlu0 %5370 }
 0x9a8   : > { %v10412_v7 = vpop.permute.xlu1 %4908 }
 0x9a9   : > { %5052 = vrot.lane.b32.xlu0 %v10274_v26, %s6217_s14 }
 0x9aa   : > { %4818 = vrot.lane.b32.xlu1 %v10416_v40, %s6218_s15 }
 0x9ab   : > { %v10422_v24 = vpop.permute.xlu0 %4808 }
 0x9ac   : > { %v10424_v63 = vpop.permute.xlu1 %4994 }
 0x9ad   : > { %5056 = vrot.lane.b32.xlu0 %v10289_v48, %s6217_s14 }
 0x9ae   : > { %4900 = vrot.lane.b32.xlu1 %v4714_v29, %s6219_s16  ;;  %v12163_v29 = vld [vmem:[#allocation43_spill] sm:$0xff] }
 0x9af   : > { %v10432_v25 = vpop.permute.xlu0 %4978  ;;  %vm12164_vm12 = vcmp.ne.s16.totalorder %v12163_v29, 0 }
 0x9b0   : > { %v10434_v15 = vpop.permute.xlu1 %5148  ;;  %v4749_v14 = vsel %vm12164_vm12, %v10274_v26, 0  ;;  %vm12183_vm12 = vcmask 269312  }
 0x9b1   : > { %5154 = vrot.lane.b32.xlu0 %v4757_v46, %s6221_s20  ;;  %v4732_v46 = vsel %vm12166_vm14, %v10405_v39, 0  ;;  %vm12185_vm14 = vcmp.ne.s16.totalorder %v12184_v4, 0 }
 0x9b2   : > { %4904 = vrot.lane.b32.xlu1 %v4716_v17, %s6219_s16  ;;  %v4775_v17 = vsel %vm12169_vm11, %v10333_v44, 0 }
 0x9b3   : > { %v10444_v21 = vpop.permute.xlu0 %5048 }
 0x9b4   : > { %12162 = vst [vmem:[#allocation87_spill] sm:$0xff] %v10444_v21  ;;  %v10446_v43 = vpop.permute.xlu1 %5234 }
 0x9b5   : > { %5138 = vrot.lane.b32.xlu0 %v4749_v14, %s6221_s20  ;;  %v4734_v14 = vsel %vm12171_vm6, %v10416_v40, 0  ;;  %vm12188_vm6 = vcmask 1031168  }
 0x9b6   : > { %4986 = vrot.lane.b32.xlu1 %v4732_v46, %s6220_s19  ;;  %v12173_v46 = vld [vmem:[#allocation27_spill] sm:$0xff] }
 0x9b7   : > { %v10456_v10 = vpop.permute.xlu0 %5288  ;;  %vm12174_vm13 = vcmp.ne.s16.totalorder %v12173_v46, 0 }
 0x9b8   : > { %12167 = vst [vmem:[#allocation69_spill] sm:$0xff] %v10456_v10  ;;  %v10458_v30 = vpop.permute.xlu1 %5388  ;;  %v4751_v10 = vsel %vm12174_vm13, %v10289_v48, 0  ;;  %vm12189_vm13 = vmmov %vm12183_vm12 }
 0x9b9   : > { %12168 = vst [vmem:[#allocation70_spill] sm:$0xff] %v10458_v30  ;;  %5240 = vrot.lane.b32.xlu0 %v4775_v17, %s6215_s12  ;;  %v4838_v17 = vsel %vm1005_vm2, %v10242_v31, %v10284_v38  ;;  %v4793_v31 = vsel %vm12179_vm0, %v10333_v44, 0  ;;  %vm12191_vm0 = vmmov %vm12188_vm6 }
 0x9ba   : > { %4990 = vrot.lane.b32.xlu1 %v4734_v14, %s6220_s19 }
 0x9bb   : > { %v10468_v21 = vpop.permute.xlu0 %4894 }
 0x9bc   : > { %12172 = vst [vmem:[#allocation73_spill] sm:$0xff] %v10468_v21  ;;  %v10470_v41 = vpop.permute.xlu1 %4806 }
 0x9bd   : > { %5142 = vrot.lane.b32.xlu0 %v4751_v10, %s6221_s20  ;;  %v4839_v59 = vsel %vm1005_vm2, %v10284_v38, %v10470_v41  ;;  %v4767_v10 = vsel %vm12177_vm10, %v10274_v26, 0  ;;  %v12180_v38 = vld [vmem:[#allocation44_spill] sm:$0xff]  ;;  %vm12190_vm10 = vmmov %vm12183_vm12 }
 0x9be   : > { %5054 = vrot.lane.b32.xlu1 %v10405_v39, %s6217_s14  ;;  %5470 = vmatprep.subr.bf16.mxu0 %v4839_v59  ;;  %vm12181_vm4 = vcmp.ne.s16.totalorder %v12180_v38, 0 }
 0x9bf   : > { %5471 = vmatpush1.bf16.msra.mxu0 %v4838_v17  ;;  %v10484_v14 = vpop.permute.xlu0 %5134  ;;  %v4750_v17 = vsel %vm12181_vm4, %v10405_v39, 0  ;;  %vm12192_vm4 = vcmp.ne.s16.totalorder %v12133_v34, 0 }
 0x9c0   : > { %12175 = vst [vmem:[#allocation74_spill] sm:$0xff] %v10484_v14  ;;  %v10486_v32 = vpop.permute.xlu1 %5046 }
 0x9c1   : > { %5224 = vrot.lane.b32.xlu0 %v4767_v10, %s6215_s12 }
 0x9c2   : > { %5058 = vrot.lane.b32.xlu1 %v10416_v40, %s6217_s14 }
 0x9c3   : > { %v10494_v2 = vpop.permute.xlu0 %5220 }
 0x9c4   : > { %12178 = vst [vmem:[#allocation75_spill] sm:$0xff] %v10494_v2  ;;  %v10496_v59 = vpop.permute.xlu1 %5286  ;;  %v10511_v2 = vsel %vm12183_vm12, %v10222_v49, %v10219_v13  ;;  %vm12193_vm12 = vcmp.ne.s16.totalorder %v12146_v51, 0  ;;  %v5011_v51 = vsel %vm1095_vm8, %v10260_v61, %v10432_v25 }
 0x9c5   : > { %5394 = vrot.lane.b32.xlu0 %v4793_v31, %s6223_s24  ;;  %v4752_v31 = vsel %vm12185_vm14, %v10416_v40, 0  ;;  %vm12194_vm14 = vmmov %vm12191_vm0 }
 0x9c6   : > { %5140 = vrot.lane.b32.xlu1 %v4750_v17, %s6221_s20 }
 0x9c7   : > { %v10506_v10 = vpop.permute.xlu0 %5374 }
 0x9c8   : > { %12182 = vst [vmem:[#allocation76_spill] sm:$0xff] %v10506_v10  ;;  %v10513_v14 = vpop.permute.xlu1 %4892  ;;  %v12186_v10 = vld [vmem:[#allocation49_spill] sm:$0xff] }
 0x9c9   : > { %4830 = vrot.lane.b32.xlu0 %v10511_v2, %s6218_s15  ;;  %vm12187_vm11 = vcmp.ne.s16.totalorder %v12186_v10, 0  ;;  %v4925_v8 = vsel %vm12188_vm6, %v10371_v33, %v10513_v14  ;;  %vm12196_vm6 = vmmov %vm12191_vm0 }
 0x9ca   : > { %5144 = vrot.lane.b32.xlu1 %v4752_v31, %s6221_s20  ;;  %v4768_v21 = vsel %vm12187_vm11, %v10405_v39, 0  ;;  %v4846_v31 = vsel %vm1005_vm2, %v10276_v22, %v10320_v53  ;;  %v10552_v22 = vsel %vm12190_vm10, %v10219_v13, %v10234_v42  ;;  %v4722_v13 = vsel %vm12192_vm4, %v10511_v2, 0  ;;  %vm12195_vm11 = vmmov %vm12190_vm10 }
 0x9cb   : > { %v10521_v44 = vpop.permute.xlu0 %4824  ;;  %v10583_v34 = vsel %vm12195_vm11, %v10232_v23, 0  ;;  %vm12198_vm10 = vcmp.ne.s16.totalorder %v12163_v29, 0  ;;  %vm12200_vm4 = vcmp.ne.s16.totalorder %v12137_v0, 0  ;;  %v12201_v0 = vld [vmem:[#allocation31_spill] sm:$0xff]  ;;  %vm12204_vm11 = vcmp.ne.s16.totalorder %v12154_v1, 0 }
 0x9cc   : > { %v10523_v17 = vpop.permute.xlu1 %5132  ;;  %v4847_v49 = vsel %vm1005_vm2, %v10320_v53, %v10521_v44 }
 0x9cd   : > { %5070 = vrot.lane.b32.xlu0 %v10511_v2, %s6217_s14  ;;  %5472 = vmatprep.subr.bf16.mxu0 %v4847_v49  ;;  %v10545_v49 = vsel %vm12189_vm13, %v10234_v42, %v10232_v23  ;;  %vm12197_vm13 = vcmp.ne.s16.totalorder %v12158_v3, 0  ;;  %v4758_v3 = vsel %vm12198_vm10, %v10511_v2, 0  ;;  %vm12209_vm10 = vcmask 506880  }
 0x9ce   : > { %5226 = vrot.lane.b32.xlu1 %v4768_v21, %s6215_s12  ;;  %5473 = vmatpush1.bf16.msra.mxu0 %v4846_v31  ;;  %v4924_v21 = vsel %vm12191_vm0, %v10299_v50, %v10371_v33  ;;  %v4740_v33 = vsel %vm12193_vm12, %v10511_v2, 0  ;;  %vm12199_vm0 = vcmp.ne.s16.totalorder %v12165_v62, 0  ;;  %v4724_v62 = vsel %vm12200_vm4, %v10545_v49, 0 }
 0x9cf   : > { %5474 = vmatprep.subr.bf16.mxu0 %v4925_v8  ;;  %v10540_v18 = vpop.permute.xlu0 %5064  ;;  %vm12202_vm12 = vcmp.ne.s16.totalorder %v12201_v0, 0  ;;  %vm12211_vm4 = vcmp.ne.s16.totalorder %v12173_v46, 0  ;;  %v4840_v46 = vsel %vm1005_vm2, %v10470_v41, %v10422_v24  ;;  %v10772_v41 = vld [vmem:[%s11241_s9] ss:$12 sps:$4 sm:$0xff]  }
 0x9d0   : > { %v10547_v30 = vpop.permute.xlu1 %5218 }
 0x9d1   : > { %4834 = vrot.lane.b32.xlu0 %v10545_v49, %s6218_s15 }
 0x9d2   : > { %4832 = vrot.lane.b32.xlu1 %v10552_v22, %s6218_s15  ;;  %5475 = vmatpush1.bf16.msra.mxu0 %v4924_v21  ;;  %v4932_v21 = vsel %vm12196_vm6, %v10335_v5, %v10412_v7  ;;  %v4723_v5 = vsel %vm12197_vm13, %v10552_v22, 0  ;;  %vm12205_vm6 = vcmp.ne.s16.totalorder %v12176_v11, 0  ;;  %vm12208_vm13 = vcmp.ne.s16.totalorder %v12170_v56, 0 }
 0x9d3   : > { %v10561_v53 = vpop.permute.xlu0 %5304  ;;  %v4776_v57 = vsel %vm12205_vm6, %v10511_v2, 0  ;;  %vm12215_vm6 = vmmov %vm12209_vm10 }
 0x9d4   : > { %v10563_v8 = vpop.permute.xlu1 %5372 }
 0x9d5   : > { %4916 = vrot.lane.b32.xlu0 %v4722_v13, %s6219_s16 }
 0x9d6   : > { %5072 = vrot.lane.b32.xlu1 %v10552_v22, %s6217_s14 }
 0x9d7   : > { %v10571_v42 = vpop.permute.xlu0 %4910 }
 0x9d8   : > { %v10573_v50 = vpop.permute.xlu1 %4980  ;;  %v4933_v31 = vsel %vm12194_vm14, %v10412_v7, %v10571_v42  ;;  %v5010_v7 = vsel %vm1095_vm8, %v10244_v16, %v10260_v61  ;;  %v4741_v16 = vsel %vm12199_vm0, %v10552_v22, 0  ;;  %v5018_v61 = vsel %vm1095_vm8, %v10343_v27, %v10424_v63 }
 0x9d9   : > { %5002 = vrot.lane.b32.xlu0 %v4740_v33, %s6220_s19  ;;  %5476 = vmatprep.subr.bf16.mxu0 %v4933_v31  ;;  %v5078_v27 = vsel %vm1131_vm7, %v10258_v45, %v10317_v35  ;;  %vm12203_vm14 = vcmp.ne.s16.totalorder %v12180_v38, 0  ;;  %v4742_v38 = vsel %vm12204_vm11, %v10545_v49, 0  ;;  %vm12210_vm0 = vcmp.ne.s16.totalorder %v12186_v10, 0 }
 0x9da   : > { %4836 = vrot.lane.b32.xlu1 %v10583_v34, %s6218_s15  ;;  %5477 = vmatpush1.bf16.msra.mxu0 %v4932_v21  ;;  %v4759_v45 = vsel %vm12203_vm14, %v10552_v22, 0  ;;  %v4760_v10 = vsel %vm12211_vm4, %v10545_v49, 0  ;;  %vm12213_vm14 = vcmp.ne.s16.totalorder %v12201_v0, 0  ;;  %vm12214_vm11 = vcmp.ne.s16.totalorder %v12184_v4, 0 }
 0x9db   : > { %5478 = vmatprep.subr.bf16.mxu0 %v5011_v51  ;;  %v10594_v13 = vpop.permute.xlu0 %4996  ;;  %v5079_v51 = vsel %vm1131_vm7, %v10317_v35, %v10486_v32  ;;  %v5086_v35 = vsel %vm1131_vm7, %v10291_v36, %v10351_v54  ;;  %v4725_v36 = vsel %vm798_vm3, %v10583_v34, 0 }
 0x9dc   : > { %v10596_v23 = vpop.permute.xlu1 %4826  ;;  %v5019_v33 = vsel %vm1095_vm8, %v10424_v63, %v10594_v13  ;;  %v5087_v63 = vsel %vm1131_vm7, %v10351_v54, %v10540_v18  ;;  %v5164_v54 = vsel %vm1176_vm1, %v10328_v58, %v10383_v19  ;;  %v12206_v58 = vld [vmem:[#allocation66_spill] sm:$0xff] }
 0x9dd   : > { %5074 = vrot.lane.b32.xlu0 %v10545_v49, %s6217_s14  ;;  %vm12207_vm3 = vcmp.ne.s16.totalorder %v12206_v58, 0 }
 0x9de   : > { %4918 = vrot.lane.b32.xlu1 %v4723_v5, %s6219_s16  ;;  %5479 = vmatpush1.bf16.msra.mxu0 %v5010_v7 }
 0x9df   : > { %5480 = vmatprep.subr.bf16.mxu0 %v5019_v33  ;;  %v10610_v31 = vpop.permute.xlu0 %5150 }
 0x9e0   : > { %v10612_v21 = vpop.permute.xlu1 %5066 }
 0x9e1   : > { %5156 = vrot.lane.b32.xlu0 %v4758_v3, %s6221_s20  ;;  %v4769_v3 = vsel %vm12202_vm12, %v10289_v48, 0  ;;  %vm12212_vm12 = vmmov %vm12209_vm10 }
 0x9e2   : > { %5004 = vrot.lane.b32.xlu1 %v4741_v16, %s6220_s19  ;;  %5481 = vmatpush1.bf16.msra.mxu0 %v5018_v61  ;;  %v5165_v16 = vsel %vm1176_vm1, %v10383_v19, %v10523_v17  ;;  %v4770_v19 = vsel %vm12207_vm3, %v10416_v40, 0  ;;  %vm12217_vm3 = vmmov %vm12215_vm6 }
 0x9e3   : > { %5482 = vmatprep.subr.bf16.mxu0 %v5079_v51  ;;  %v10628_v29 = vpop.permute.xlu0 %5236 }
 0x9e4   : > { %v10630_v5 = vpop.permute.xlu1 %5306 }
 0x9e5   : > { %4920 = vrot.lane.b32.xlu0 %v4724_v62, %s6219_s16  ;;  %v5173_v62 = vsel %vm1176_vm1, %v10434_v15, %v10610_v31 }
 0x9e6   : > { %5076 = vrot.lane.b32.xlu1 %v10583_v34, %s6217_s14  ;;  %5483 = vmatpush1.bf16.msra.mxu0 %v5078_v27 }
 0x9e7   : > { %5484 = vmatprep.subr.bf16.mxu0 %v5087_v63  ;;  %v10644_v7 = vpop.permute.xlu0 %5390  ;;  %v5172_v63 = vsel %vm1176_vm1, %v10361_v47, %v10434_v15  ;;  %v5250_v15 = vsel %vm908_vm5, %v10341_v60, %v10395_v28  ;;  %v5259_v47 = vsel %vm908_vm5, %v10446_v43, %v10628_v29  ;;  %v4777_v60 = vsel %vm12210_vm0, %v10552_v22, 0 }
 0x9e8   : > { %v10646_v33 = vpop.permute.xlu1 %4912 }
 0x9e9   : > { %5228 = vrot.lane.b32.xlu0 %v4769_v3, %s6215_s12  ;;  %v5251_v3 = vsel %vm908_vm5, %v10395_v28, %v10547_v30  ;;  %v5258_v28 = vsel %vm908_vm5, %v10373_v37, %v10446_v43  ;;  %v5318_v43 = vsel %vm1256_vm9, %v10270_v55, %v10349_v12 }
 0x9ea   : > { %5158 = vrot.lane.b32.xlu1 %v4759_v45, %s6221_s20  ;;  %5485 = vmatpush1.bf16.msra.mxu0 %v5086_v35  ;;  %v4743_v35 = vsel %vm12208_vm13, %v10583_v34, 0  ;;  %vm12219_vm13 = vcmask 1031168  }
 0x9eb   : > { %5486 = vmatprep.subr.bf16.mxu0 %v5165_v16  ;;  %v10662_v61 = vpop.permute.xlu0 %4982  ;;  %vm12223_vm0 = vmmov %vm12219_vm13 }
 0x9ec   : > { %v10664_v51 = vpop.permute.xlu1 %4998  ;;  %vm12224_vm4 = vmmov %vm12223_vm0 }
 0x9ed   : > { %5006 = vrot.lane.b32.xlu0 %v4742_v38, %s6220_s19 }
 0x9ee   : > { %4922 = vrot.lane.b32.xlu1 %v4725_v36, %s6219_s16  ;;  %5487 = vmatpush1.bf16.msra.mxu0 %v5164_v54  ;;  %v5319_v36 = vsel %vm1256_vm9, %v10349_v12, %v10496_v59 }
 0x9ef   : > { %5488 = vmatprep.subr.bf16.mxu0 %v5173_v62  ;;  %v10680_v1 = vpop.permute.xlu0 %4812 }
 0x9f0   : > { %v10682_v27 = vpop.permute.xlu1 %5152 }
 0x9f1   : > { %5242 = vrot.lane.b32.xlu0 %v4776_v57, %s6215_s12  ;;  %v5327_v57 = vsel %vm1256_vm9, %v10385_v9, %v10561_v53 }
 0x9f2   : > { %5230 = vrot.lane.b32.xlu1 %v4770_v19, %s6215_s12  ;;  %5489 = vmatpush1.bf16.msra.mxu0 %v5172_v63  ;;  %v5326_v63 = vsel %vm1256_vm9, %v10301_v52, %v10385_v9  ;;  %v4778_v9 = vsel %vm12213_vm14, %v10545_v49, 0 }
 0x9f3   : > { %5490 = vmatprep.subr.bf16.mxu0 %v5251_v3  ;;  %v10698_v11 = vpop.permute.xlu0 %4816  ;;  %v4848_v3 = vsel %vm1005_vm2, %v10521_v44, %v10596_v23  ;;  %v5404_v44 = vsel %vm12215_vm6, %v10359_v20, %v10410_v6  ;;  %v12220_v20 = vld [vmem:[#allocation89_spill] sm:$0xff]  ;;  %vm12230_vm6 = vcmp.ne.s16.totalorder %v12206_v58, 0 }
 0x9f4   : > { %v10700_v45 = vpop.permute.xlu1 %5238 }
 0x9f5   : > { %5292 = vrot.lane.b32.xlu0 %v10274_v26, %s6222_s21 }
 0x9f6   : > { %5008 = vrot.lane.b32.xlu1 %v4743_v35, %s6220_s19  ;;  %5491 = vmatpush1.bf16.msra.mxu0 %v5250_v15  ;;  %v4761_v15 = vsel %vm12214_vm11, %v10583_v34, 0  ;;  %vm12229_vm11 = vmmov %vm12223_vm0 }
 0x9f7   : > { %5492 = vmatprep.subr.bf16.mxu0 %v5259_v47  ;;  %v10714_v16 = vpop.permute.xlu0 %4898 }
 0x9f8   : > { %v10716_v38 = vpop.permute.xlu1 %5392 }
 0x9f9   : > { %v10721_v56 = vsel %vm12209_vm10, %v10644_v7, %v10716_v38  ;;  %5296 = vrot.lane.b32.xlu0 %v10289_v48, %s6222_s21  ;;  %vm12221_vm10 = vmmov %vm12217_vm3 }
 0x9fa   : > { %5244 = vrot.lane.b32.xlu1 %v4777_v60, %s6215_s12  ;;  %5493 = vmatpush1.bf16.msra.mxu0 %v5258_v28  ;;  %v12218_v60 = vmov 0  }
 0x9fb   : > { %5494 = vmatprep.subr.bf16.mxu0 %v5319_v36  ;;  %v10735_v54 = vpop.permute.xlu0 %4902  ;;  %v12222_v36 = vld [vmem:[#allocation73_spill] sm:$0xff] }
 0x9fc   : > { %v10737_v62 = vpop.permute.xlu1 %4810 }
 0x9fd   : > { %5160 = vrot.lane.b32.xlu0 %v4760_v10, %s6221_s20  ;;  %v4841_v37 = vsel %vm1005_vm2, %v10422_v24, %v10737_v62  ;;  %v5405_v24 = vsel %vm12212_vm12, %v10410_v6, %v10563_v8  ;;  %v4926_v10 = vsel %vm12224_vm4, %v10513_v14, %v12222_v36  ;;  %v4779_v14 = vsel %vm12230_vm6, %v10583_v34, 0 }
 0x9fe   : > { %5294 = vrot.lane.b32.xlu1 %v10405_v39, %s6222_s21  ;;  %5495 = vmatpush1.bf16.msra.mxu0 %v5318_v43  ;;  %v12225_v43 = vld [vmem:[#allocation7_spill] sm:$0xff] }
 0x9ff   : > { %5556 = vmatprep.subr.bf16.mxu1 %v4841_v37  ;;  %5496 = vmatprep.subr.bf16.mxu0 %v5327_v57  ;;  %v10757_v19 = vpop.permute.xlu0 %4828  ;;  %vm12226_vm12 = vcmp.ne.s16.totalorder %v12225_v43, 0 }
 0xa00   : > { %5557 = vmatpush1.bf16.msra.mxu1 %v4840_v46  ;;  %v10759_v55 = vpop.permute.xlu1 %5050  ;;  %v4849_v12 = vsel %vm1005_vm2, %v10596_v23, %v10757_v19  ;;  %v12216_v23 = vld [vmem:[#allocation70_spill] sm:$0xff]  ;;  %vm12239_vm4 = vmmov %vm12226_vm12 }
 0xa01   : > { %5310 = vrot.lane.b32.xlu0 %v10511_v2, %s6222_s21  ;;  %5558 = vmatprep.subr.bf16.mxu1 %v4849_v12  ;;  %v5413_v0 = vsel %vm12217_vm3, %v12216_v23, %v10644_v7  ;;  %v5412_v6 = vsel %vm12221_vm10, %v12220_v20, %v12216_v23  ;;  %v12227_v46 = vld [vmem:[#allocation54_spill] sm:$0xff]  ;;  %vm12231_vm3 = vmmov %vm12223_vm0  ;;  %vm12234_vm10 = vcmask 261120  }
 0xa02   : > { %5298 = vrot.lane.b32.xlu1 %v10416_v40, %s6222_s21  ;;  %5497 = vmatpush1.bf16.msra.mxu0 %v5326_v63  ;;  %vm12228_vm14 = vcmp.ne.s16.totalorder %v12227_v46, 0  ;;  %v12238_v20 = vld [vmem:[#allocation86_spill] sm:$0xff] }
 0xa03   : > { %5509 = vmatprep.subr.bf16.mxu0 %v5405_v24  ;;  %v10782_v35 = vpop.permute.xlu0 %5068  ;;  %v4785_v12 = vsel %vm12228_vm14, %v10274_v26, 0  ;;  %v10841_v24 = vld [vmem:[%s11241_s9 + $0x8] ss:$12 sps:$4 sm:$0xff]  }
 0xa04   : > { %5559 = vmatpush1.bf16.msra.mxu1 %v4848_v3  ;;  %v10784_v52 = vpop.permute.xlu1 %5290 }
 0xa05   : > { %5246 = vrot.lane.b32.xlu0 %v4778_v9, %s6215_s12  ;;  %5499 = vmatmul.mubr.bf16.vlgmr.msra.gmra.mrb[56].mxu0 %v10772_v41 }
 0xa06   : > { %5162 = vrot.lane.b32.xlu1 %v4761_v15, %s6221_s20  ;;  %5510 = vmatpush1.bf16.msra.mxu0 %v5404_v44  ;;  %v5013_v15 = vsel %vm1095_vm8, %v10573_v50, %v10662_v61  ;;  %v12232_v44 = vld [vmem:[#allocation68_spill] sm:$0xff] }
 0xa07   : > { %5511 = vmatprep.subr.bf16.mxu0 %v5413_v0  ;;  %v10801_v47 = vpop.permute.xlu0 %5308  ;;  %5541 = vmatprep.mubr.bf16.mxu0 %v12218_v60 }
 0xa08   : > { %v4897_v28 = vpop.permute.xlu1 %4896 }
 0xa09   : > { %v10806_v4 = vsel %vm12219_vm13, %v4897_v28, %v10714_v16  ;;  %5314 = vrot.lane.b32.xlu0 %v10545_v49, %s6222_s21  ;;  %v4927_v7 = vsel %vm12223_vm0, %v12222_v36, %v4897_v28  ;;  %vm12233_vm13 = vcmp.ne.s16.totalorder %v12232_v44, 0  ;;  %v4256_v44 = vld [vmem:[%s11240_s8] sm:$0xff] }
 0xa0a   : > { %5312 = vrot.lane.b32.xlu1 %v10552_v22, %s6222_s21  ;;  %5512 = vmatpush1.bf16.msra.mxu0 %v5412_v6  ;;  %v4787_v23 = vsel %vm12233_vm13, %v10289_v48, 0  ;;  %vm12246_vm6 = vmmov %vm12233_vm13 }
 0xa0b   : > { %5560 = vmatprep.subr.bf16.mxu1 %v4927_v7  ;;  %6073 = vmatprep.subr.msk.bf16.mxu0 %vm12226_vm12, %v10274_v26  ;;  %v10823_v37 = vpop.permute.xlu0 %4914  ;;  %v4934_v26 = vsel %vm12231_vm3, %v10571_v42, %v10646_v33  ;;  %v12235_v42 = vld [vmem:[#allocation91_spill] sm:$0xff]  ;;  %vm12240_vm12 = vmmov %vm12228_vm14 }
 0xa0c   : > { %5561 = vmatpush1.bf16.msra.mxu1 %v4926_v10  ;;  %v10825_v57 = vpop.permute.xlu1 %5136  ;;  %v4935_v63 = vsel %vm12229_vm11, %v10646_v33, %v10823_v37  ;;  %v12236_v33 = vld [vmem:[#allocation8_spill] sm:$0xff]  ;;  %v4794_v36 = vsel %vm12240_vm12, %v10511_v2, 0  ;;  %v12243_v10 = vld [vmem:[#allocation81_spill] sm:$0xff] }
 0xa0d   : > { %5378 = vrot.lane.b32.xlu0 %v4785_v12, %s6223_s24  ;;  %5562 = vmatprep.subr.bf16.mxu1 %v4935_v63  ;;  %vm12237_vm0 = vcmp.ne.s16.totalorder %v12236_v33, 0  ;;  %v12245_v63 = vld [vmem:[#allocation87_spill] sm:$0xff] }
 0xa0e   : > { %5248 = vrot.lane.b32.xlu1 %v4779_v14, %s6215_s12  ;;  %v4696_v0 = vsel %vm12237_vm0, %v12235_v42, 0  ;;  %vm12244_vm11 = vmmov %vm12237_vm0  ;;  %v5081_v14 = vsel %vm1131_vm7, %v12245_v63, %v10759_v55  ;;  %v5080_v42 = vsel %vm1131_vm7, %v10486_v32, %v12245_v63  ;;  %vm12255_vm0 = vcmask 506880  }
 0xa0f   : > { %v10846_v3 = vpop.permute.xlu0 %4984  ;;  %v4704_v43 = vsel %vm12244_vm11, %v12243_v10, 0  ;;  %vm12257_vm12 = vmmov %vm12255_vm0 }
 0xa10   : > { %5563 = vmatpush1.bf16.msra.mxu1 %v4934_v26  ;;  %v10851_v9 = vsel %vm1095_vm8, %v10662_v61, %v10846_v3  ;;  %v10853_v58 = vpop.permute.xlu1 %5222  ;;  %v5012_v61 = vsel %vm1095_vm8, %v10432_v25, %v10573_v50  ;;  %v12241_v25 = vld [vmem:[#allocation55_spill] sm:$0xff]  ;;  %v4796_v26 = vsel %vm12246_vm6, %v10545_v49, 0  ;;  %vm12262_vm6 = vcmask 1031168  }
 0xa11   : > { %5564 = vmatprep.subr.bf16.mxu1 %v5013_v15  ;;  %5382 = vrot.lane.b32.xlu0 %v4787_v23, %s6223_s24  ;;  %vm12242_vm14 = vcmp.ne.s16.totalorder %v12241_v25, 0  ;;  %v12247_v15 = vld [vmem:[#allocation67_spill] sm:$0xff]  ;;  %v4842_v23 = vsel %vm1005_vm2, %v10737_v62, %v10680_v1  ;;  %v5089_v62 = vsel %vm1131_vm7, %v10612_v21, %v10782_v35 }
 0xa12   : > { %6069 = vmatmul.mubr.msk.bf16.vlgmr.msra.gmra.mrb[56].mxu0 %vm12234_vm10, %v10841_v24  ;;  %5316 = vrot.lane.b32.xlu1 %v10583_v34, %s6222_s21  ;;  %v4786_v50 = vsel %vm12242_vm14, %v10405_v39, 0  ;;  %vm12248_vm3 = vcmp.ne.s16.totalorder %v12247_v15, 0  ;;  %vm12249_vm13 = vmmov %vm12242_vm14  ;;  %vm12259_vm14 = vcmask 261120  }
 0xa13   : > { %5639 = vmatpush1.bf16.msra.mxu0 %v4696_v0  ;;  %v10872_v28 = vpop.permute.xlu0 %5000  ;;  %5670 = vmatprep.mubr.bf16.mxu0 %v12238_v20  ;;  %v4795_v32 = vsel %vm12249_vm13, %v10552_v22, 0  ;;  %v5088_v0 = vsel %vm1131_vm7, %v10540_v18, %v10612_v21  ;;  %vm12251_vm10 = vmmov %vm12248_vm3 }
 0xa14   : > { %6074 = vmatprep.subr.msk.bf16.mxu0 %vm12239_vm4, %v10511_v2  ;;  %5565 = vmatpush1.bf16.msra.mxu1 %v5012_v61  ;;  %v10878_v6 = vpop.permute.xlu1 %5376  ;;  %v5021_v7 = vsel %vm1095_vm8, %v10664_v51, %v10872_v28  ;;  %v5020_v2 = vsel %vm1095_vm8, %v10594_v13, %v10664_v51  ;;  %v4788_v13 = vsel %vm12248_vm3, %v10416_v40, 0  ;;  %v4797_v25 = vsel %vm12251_vm10, %v10583_v34, 0  ;;  %vm12256_vm4 = vmmov %vm12255_vm0 }
 0xa15   : > { %5396 = vrot.lane.b32.xlu0 %v4794_v36, %s6223_s24  ;;  %5566 = vmatprep.subr.bf16.mxu1 %v5021_v7  ;;  %v12250_v36 = vld [vmem:[#allocation74_spill] sm:$0xff]  ;;  %v5174_v34 = vsel %vm1176_vm1, %v10610_v31, %v10682_v27  ;;  %vm12265_vm13 = vmmov %vm12262_vm6 }
 0xa16   : > { %5380 = vrot.lane.b32.xlu1 %v4786_v50, %s6223_s24  ;;  %v5167_v7 = vsel %vm1176_vm1, %v12250_v36, %v10825_v57  ;;  %v5166_v18 = vsel %vm1176_vm1, %v10523_v17, %v12250_v36  ;;  %v12252_v17 = vld [vmem:[#allocation75_spill] sm:$0xff]  ;;  %vm12266_vm10 = vmmov %vm12262_vm6 }
 0xa17   : > { %5641 = vmatpush1.bf16.msra.mxu0 %v4704_v43  ;;  %v10897_v46 = vpop.permute.xlu0 %4988  ;;  %v5253_v63 = vsel %vm908_vm5, %v12252_v17, %v10853_v58 }
 0xa18   : > { %5567 = vmatpush1.bf16.msra.mxu1 %v5020_v2  ;;  %v10899_v12 = vpop.permute.xlu1 %4814 }
 0xa19   : > { %5568 = vmatprep.subr.bf16.mxu1 %v5081_v14  ;;  %5400 = vrot.lane.b32.xlu0 %v4796_v26, %s6223_s24  ;;  %v4843_v51 = vsel %vm1005_vm2, %v10680_v1, %v10899_v12  ;;  %v5252_v14 = vsel %vm908_vm5, %v10547_v30, %v12252_v17  ;;  %v12253_v30 = vld [vmem:[#allocation69_spill] sm:$0xff] }
 0xa1a   : > { %5384 = vrot.lane.b32.xlu1 %v4788_v13, %s6223_s24  ;;  %5642 = vmatprep.subr.bf16.mxu0 %v4843_v51 }
 0xa1b   : > { %5643 = vmatpush1.bf16.msra.mxu0 %v4842_v23  ;;  %v10924_v40 = vpop.permute.xlu0 %5052  ;;  %v5321_v23 = vsel %vm1256_vm9, %v12253_v30, %v10784_v52 }
 0xa1c   : > { %5569 = vmatpush1.bf16.msra.mxu1 %v5080_v42  ;;  %v10929_v33 = vsel %vm1131_vm7, %v10759_v55, %v10924_v40  ;;  %v10931_v1 = vpop.permute.xlu1 %4818 }
 0xa1d   : > { %5570 = vmatprep.subr.bf16.mxu1 %v5089_v62  ;;  %4263 = vperm.xlu0 %6171, %v4256_v44   ;;  %v5320_v44 = vsel %vm1256_vm9, %v10496_v59, %v12253_v30  ;;  %v12254_v59 = vld [vmem:[#allocation76_spill] sm:$0xff] }
 0xa1e   : > { %5398 = vrot.lane.b32.xlu1 %v4795_v32, %s6223_s24  ;;  %v5407_v36 = vsel %vm12255_vm0, %v12254_v59, %v10878_v6  ;;  %vm12267_vm0 = vmmov %vm12262_vm6 }
 0xa1f   : > { %v10943_v55 = vpop.permute.xlu0 %5056 }
 0xa20   : > { %5571 = vmatpush1.bf16.msra.mxu1 %v5088_v0  ;;  %v10945_v61 = vpop.permute.xlu1 %4900 }
 0xa21   : > { %5572 = vmatprep.subr.bf16.mxu1 %v5167_v7  ;;  %v5406_v7 = vsel %vm12256_vm4, %v10563_v8, %v12254_v59  ;;  %vm12269_vm4 = vmmov %vm12267_vm0 }
 0xa22   : > { %5402 = vrot.lane.b32.xlu1 %v4797_v25, %s6223_s24 }
 0xa23   : > { %v10957_v21 = vpop.permute.xlu0 %5154 }
 0xa24   : > { %5573 = vmatpush1.bf16.msra.mxu1 %v5166_v18  ;;  %v10959_v50 = vpop.permute.xlu1 %4904  ;;  %v5175_v10 = vsel %vm1176_vm1, %v10682_v27, %v10957_v21  ;;  %v5260_v27 = vsel %vm908_vm5, %v10628_v29, %v10700_v45  ;;  %v5329_v29 = vsel %vm1256_vm9, %v10630_v5, %v10801_v47 }
 0xa25   : > { %5574 = vmatprep.subr.bf16.mxu1 %v5175_v10 }
 0xa27   : > { %v10967_v43 = vpop.permute.xlu0 %5138 }
 0xa28   : > { %5575 = vmatpush1.bf16.msra.mxu1 %v5174_v34  ;;  %v10969_v2 = vpop.permute.xlu1 %4986 }
 0xa29   : > { %5576 = vmatprep.subr.bf16.mxu1 %v5253_v63 }
 0xa2b   : > { %v10977_v26 = vpop.permute.xlu0 %5240 }
 0xa2c   : > { %5577 = vmatpush1.bf16.msra.mxu1 %v5252_v14  ;;  %v10979_v15 = vpop.permute.xlu1 %4990  ;;  %v5261_v31 = vsel %vm908_vm5, %v10700_v45, %v10977_v26  ;;  %v5328_v45 = vsel %vm1256_vm9, %v10561_v53, %v10630_v5  ;;  %v12260_v14 = vld [vmem:[#allocation9_spill] sm:$0xff] }
 0xa2d   : > { %5578 = vmatprep.subr.bf16.mxu1 %v5261_v31  ;;  %vm12261_vm11 = vcmp.ne.s16.totalorder %v12260_v14, 0 }
 0xa2e   : > { %vm12263_vm3 = vmmov %vm12261_vm11 }
 0xa2f   : > { %v10987_v13 = vpop.permute.xlu0 %5142 }
 0xa30   : > { %5579 = vmatpush1.bf16.msra.mxu1 %v5260_v27  ;;  %v10989_v51 = vpop.permute.xlu1 %5054 }
 0xa31   : > { %5580 = vmatprep.subr.bf16.mxu1 %v5321_v23 }
 0xa33   : > { %v10997_v42 = vpop.permute.xlu0 %5224 }
 0xa34   : > { %5581 = vmatpush1.bf16.msra.mxu1 %v5320_v44  ;;  %v10999_v62 = vpop.permute.xlu1 %5058 }
 0xa35   : > { %5582 = vmatprep.subr.bf16.mxu1 %v5329_v29 }
 0xa37   : > { %v11007_v32 = vpop.permute.xlu0 %5394 }
 0xa38   : > { %5583 = vmatpush1.bf16.msra.mxu1 %v5328_v45  ;;  %v11009_v0 = vpop.permute.xlu1 %5140  ;;  %v5415_v53 = vsel %vm12257_vm12, %v10716_v38, %v11007_v32  ;;  %v5015_v45 = vsel %vm1095_vm8, %v10846_v3, %v10969_v2 }
 0xa39   : > { %5595 = vmatprep.subr.bf16.mxu1 %v5407_v36 }
 0xa3b   : > { %5585 = vmatmul.mubr.bf16.vlgmr.msra.gmra.mrb[56].mxu1 %v10772_v41  ;;  %v4831_v25 = vpop.permute.xlu0 %4830 }
 0xa3c   : > { %5596 = vmatpush1.bf16.msra.mxu1 %v5406_v7  ;;  %v11018_v18 = vpop.permute.xlu1 %5144  ;;  %5627 = vmatprep.mubr.bf16.mxu1 %v12218_v60  ;;  %v4850_v38 = vsel %vm1005_vm2, %v10757_v19, %v4831_v25 }
 0xa3d   : > { %5597 = vmatprep.subr.bf16.mxu1 %v5415_v53 }
 0xa3f   : > { %v11024_v5 = vpop.permute.xlu0 %5070 }
 0xa40   : > { %5598 = vmatpush1.bf16.msra.mxu1 %v10721_v56  ;;  %v11027_v10 = vpop.permute.xlu1 %5226  ;;  %v4698_v56 = vsel %vm12261_vm11, %v10405_v39, 0  ;;  %v4706_v39 = vsel %vm12263_vm3, %v10552_v22, 0  ;;  %v5090_v34 = vsel %vm1131_vm7, %v10782_v35, %v11024_v5  ;;  %v5168_v35 = vsel %vm1176_vm1, %v10825_v57, %v10967_v43 }
 0xa41   : > { %6076 = vmatprep.subr.msk.bf16.mxu1 %vm701_vm15, %v10289_v48  ;;  %v4929_v48 = vsel %vm12262_vm6, %v10714_v16, %v10945_v61  ;;  %v4845_v16 = vsel %vm1005_vm2, %v10698_v11, %v10931_v1 }
 0xa43   : > { %v4835_v8 = vpop.permute.xlu0 %4834 }
 0xa44   : > { %v4833_v17 = vpop.permute.xlu1 %4832 }
 0xa45   : > { %v4851_v63 = vsel %vm1005_vm2, %v4831_v25, %v4833_v17  ;;  %v4852_v1 = vsel %vm1005_vm2, %v4833_v17, %v4835_v8  ;;  %v5083_v25 = vsel %vm1131_vm7, %v10924_v40, %v10989_v51  ;;  %v5017_v17 = vsel %vm1095_vm8, %v10897_v46, %v10979_v15 }
 0xa46   : > { %5644 = vmatprep.subr.bf16.mxu0 %v4851_v63 }
 0xa47   : > { %6072 = vmatmul.mubr.msk.bf16.vlgmr.msra.gmra.mrb[56].mxu1 %vm12259_vm14, %v10841_v24  ;;  %5645 = vmatpush1.bf16.msra.mxu0 %v4850_v38  ;;  %v4917_v31 = vpop.permute.xlu0 %4916 }
 0xa48   : > { %5725 = vmatpush1.bf16.msra.mxu1 %v4698_v56  ;;  %v11043_v27 = vpop.permute.xlu1 %5072  ;;  %5646 = vmatprep.subr.bf16.mxu0 %v4929_v48  ;;  %v4936_v44 = vsel %vm12265_vm13, %v10823_v37, %v4917_v31  ;;  %v4930_v37 = vsel %vm12267_vm0, %v10945_v61, %v10735_v54 }
 0xa49   : > { %6077 = vmatprep.subr.msk.bf16.mxu1 %vm701_vm15, %v10545_v49  ;;  %5756 = vmatprep.mubr.bf16.mxu1 %v12238_v20  ;;  %v4844_v49 = vsel %vm1005_vm2, %v10899_v12, %v10698_v11  ;;  %vm12264_vm15 = vmmov %vm12262_vm6  ;;  %v4931_v11 = vsel %vm12266_vm10, %v10735_v54, %v10959_v50  ;;  %vm12278_vm6 = vcmask 261120  }
 0xa4a   : > { %vm12279_vm3 = vmmov %vm12278_vm6 }
 0xa4b   : > { %5647 = vmatpush1.bf16.msra.mxu0 %v10806_v4  ;;  %v5003_v19 = vpop.permute.xlu0 %5002 }
 0xa4c   : > { %5727 = vmatpush1.bf16.msra.mxu1 %v4706_v39  ;;  %v4837_v30 = vpop.permute.xlu1 %4836  ;;  %v5022_v3 = vsel %vm1095_vm8, %v10872_v28, %v5003_v19  ;;  %v5254_v39 = vsel %vm908_vm5, %v10853_v58, %v10997_v42 }
 0xa4d   : > { %5728 = vmatprep.subr.bf16.mxu1 %v4845_v16  ;;  %v4853_v23 = vsel %vm1005_vm2, %v4835_v8, %v4837_v30  ;;  %vm12268_vm2 = vmmov %vm12267_vm0 }
 0xa4f   : > { %v11060_v20 = vpop.permute.xlu0 %5074 }
 0xa50   : > { %5729 = vmatpush1.bf16.msra.mxu1 %v4844_v49  ;;  %v4919_v22 = vpop.permute.xlu1 %4918 }
 0xa51   : > { %5730 = vmatprep.subr.bf16.mxu1 %v4853_v23  ;;  %v4937_v4 = vsel %vm12264_vm15, %v4917_v31, %v4919_v22  ;;  %v5092_v23 = vsel %vm1131_vm7, %v11043_v27, %v11060_v20 }
 0xa52   : > { %5648 = vmatprep.subr.bf16.mxu0 %v4937_v4 }
 0xa53   : > { %5649 = vmatpush1.bf16.msra.mxu0 %v4936_v44  ;;  %v5157_v29 = vpop.permute.xlu0 %5156 }
 0xa54   : > { %5731 = vmatpush1.bf16.msra.mxu1 %v4852_v1  ;;  %v5005_v12 = vpop.permute.xlu1 %5004  ;;  %5650 = vmatprep.subr.bf16.mxu0 %v5015_v45  ;;  %v5176_v31 = vsel %vm1176_vm1, %v10957_v21, %v5157_v29  ;;  %v5084_v21 = vsel %vm1131_vm7, %v10989_v51, %v10943_v55 }
 0xa55   : > { %5732 = vmatprep.subr.bf16.mxu1 %v4931_v11  ;;  %v5023_v36 = vsel %vm1095_vm8, %v5003_v19, %v5005_v12 }
 0xa57   : > { %5651 = vmatpush1.bf16.msra.mxu0 %v10851_v9  ;;  %v4921_v59 = vpop.permute.xlu0 %4920  ;;  %v5091_v9 = vsel %vm1131_vm7, %v11024_v5, %v11043_v27  ;;  %v5016_v5 = vsel %vm1095_vm8, %v10969_v2, %v10897_v46  ;;  %v5255_v46 = vsel %vm908_vm5, %v10997_v42, %v11027_v10  ;;  %v5171_v42 = vsel %vm1176_vm1, %v10987_v13, %v11018_v18 }
 0xa58   : > { %5733 = vmatpush1.bf16.msra.mxu1 %v4930_v37  ;;  %v5077_v7 = vpop.permute.xlu1 %5076  ;;  %5652 = vmatprep.subr.bf16.mxu0 %v5023_v36  ;;  %v4938_v40 = vsel %vm12269_vm4, %v4919_v22, %v4921_v59  ;;  %v5170_v22 = vsel %vm1176_vm1, %v11009_v0, %v10987_v13 }
 0xa59   : > { %v5093_v30 = vsel %vm1131_vm7, %v11060_v20, %v5077_v7 }
 0xa5b   : > { %5653 = vmatpush1.bf16.msra.mxu0 %v5022_v3  ;;  %v11079_v50 = vpop.permute.xlu0 %5228 }
 0xa5c   : > { %v11084_v53 = vpop.permute.xlu1 %5158  ;;  %5654 = vmatprep.subr.bf16.mxu0 %v5083_v25 }
 0xa5d   : > { %v5177_v14 = vsel %vm1176_vm1, %v5157_v29, %v11084_v53 }
 0xa5f   : > { %5655 = vmatpush1.bf16.msra.mxu0 %v10929_v33  ;;  %v5007_v54 = vpop.permute.xlu0 %5006  ;;  %v5169_v33 = vsel %vm1176_vm1, %v10967_v43, %v11009_v0  ;;  %v5085_v43 = vsel %vm1131_vm7, %v10943_v55, %v10999_v62 }
 0xa60   : > { %v4923_v61 = vpop.permute.xlu1 %4922  ;;  %5656 = vmatprep.subr.bf16.mxu0 %v5091_v9  ;;  %v5024_v48 = vsel %vm1095_vm8, %v5005_v12, %v5007_v54 }
 0xa61   : > { %v4939_v28 = vsel %vm12268_vm2, %v4921_v59, %v4923_v61 }
 0xa62   : > { %5734 = vmatprep.subr.bf16.mxu1 %v4939_v28 }
 0xa63   : > { %5657 = vmatpush1.bf16.msra.mxu0 %v5090_v34  ;;  %5735 = vmatpush1.bf16.msra.mxu1 %v4938_v40  ;;  %v5243_v8 = vpop.permute.xlu0 %5242 }
 0xa64   : > { %v5231_v63 = vpop.permute.xlu1 %5230  ;;  %5658 = vmatprep.subr.bf16.mxu0 %v5169_v33  ;;  %5736 = vmatprep.subr.bf16.mxu1 %v5017_v17  ;;  %v5262_v55 = vsel %vm908_vm5, %v10977_v26, %v5243_v8 }
 0xa65   : > { %v5257_v18 = vsel %vm908_vm5, %v11079_v50, %v5231_v63 }
 0xa67   : > { %5659 = vmatpush1.bf16.msra.mxu0 %v5168_v35  ;;  %5737 = vmatpush1.bf16.msra.mxu1 %v5016_v5  ;;  %v5293_v38 = vpop.permute.xlu0 %5292 }
 0xa68   : > { %v5009_v56 = vpop.permute.xlu1 %5008  ;;  %5660 = vmatprep.subr.bf16.mxu0 %v5177_v14  ;;  %v5322_v27 = vsel %vm1256_vm9, %v10784_v52, %v5293_v38  ;;  %v5256_v52 = vsel %vm908_vm5, %v11027_v10, %v11079_v50 }
 0xa69   : > { %v5025_v15 = vsel %vm1095_vm8, %v5007_v54, %v5009_v56  ;;  %vm12270_vm8 = vmmov %vm12257_vm12 }
 0xa6a   : > { %5738 = vmatprep.subr.bf16.mxu1 %v5025_v15  ;;  %v12283_v15 = vld [vmem:[#allocation82_spill] sm:$0xff] }
 0xa6b   : > { %5661 = vmatpush1.bf16.msra.mxu0 %v5176_v31  ;;  %5739 = vmatpush1.bf16.msra.mxu1 %v5024_v48  ;;  %v5297_v57 = vpop.permute.xlu0 %5296 }
 0xa6c   : > { %v5245_v2 = vpop.permute.xlu1 %5244  ;;  %5662 = vmatprep.subr.bf16.mxu0 %v5255_v46  ;;  %5740 = vmatprep.subr.bf16.mxu1 %v5085_v43 }
 0xa6d   : > { %v5263_v16 = vsel %vm908_vm5, %v5243_v8, %v5245_v2 }
 0xa6f   : > { %5663 = vmatpush1.bf16.msra.mxu0 %v5254_v39  ;;  %5741 = vmatpush1.bf16.msra.mxu1 %v5084_v21  ;;  %v5161_v19 = vpop.permute.xlu0 %5160 }
 0xa70   : > { %v5295_v62 = vpop.permute.xlu1 %5294  ;;  %5664 = vmatprep.subr.bf16.mxu0 %v5263_v16  ;;  %5742 = vmatprep.subr.bf16.mxu1 %v5093_v30  ;;  %v5178_v44 = vsel %vm1176_vm1, %v11084_v53, %v5161_v19  ;;  %v12287_v30 = vld [vmem:[#allocation85_spill] sm:$0xff] }
 0xa71   : > { %v5323_v51 = vsel %vm1256_vm9, %v5293_v38, %v5295_v62  ;;  %v12282_v38 = vld [vmem:[#allocation90_spill] sm:$0xff] }
 0xa73   : > { %5665 = vmatpush1.bf16.msra.mxu0 %v5262_v55  ;;  %5743 = vmatpush1.bf16.msra.mxu1 %v5092_v23  ;;  %v5311_v58 = vpop.permute.xlu0 %5310 }
 0xa74   : > { %v5299_v49 = vpop.permute.xlu1 %5298  ;;  %5666 = vmatprep.subr.bf16.mxu0 %v5323_v51  ;;  %5744 = vmatprep.subr.bf16.mxu1 %v5171_v42  ;;  %v5330_v0 = vsel %vm1256_vm9, %v10801_v47, %v5311_v58  ;;  %v5324_v47 = vsel %vm1256_vm9, %v5295_v62, %v5297_v57 }
 0xa75   : > { %v5325_v59 = vsel %vm1256_vm9, %v5297_v57, %v5299_v49  ;;  %v12284_v57 = vld [vmem:[#allocation83_spill] sm:$0xff] }
 0xa77   : > { %5667 = vmatpush1.bf16.msra.mxu0 %v5322_v27  ;;  %5745 = vmatpush1.bf16.msra.mxu1 %v5170_v22  ;;  %v5247_v26 = vpop.permute.xlu0 %5246 }
 0xa78   : > { %v5163_v20 = vpop.permute.xlu1 %5162  ;;  %v5264_v12 = vsel %vm908_vm5, %v5245_v2, %v5247_v26  ;;  %v12285_v2 = vld [vmem:[#allocation80_spill] sm:$0xff] }
 0xa79   : > { %v5179_v4 = vsel %vm1176_vm1, %v5161_v19, %v5163_v20  ;;  %vm12271_vm1 = vmmov %vm12270_vm8  ;;  %v12286_v19 = vld [vmem:[#allocation88_spill] sm:$0xff] }
 0xa7a   : > { %5746 = vmatprep.subr.bf16.mxu1 %v5179_v4  ;;  %vm12273_vm7 = vmmov %vm12271_vm1 }
 0xa7b   : > { %5747 = vmatpush1.bf16.msra.mxu1 %v5178_v44  ;;  %v5315_v1 = vpop.permute.xlu0 %5314  ;;  %vm12275_vm12 = vmmov %vm12271_vm1 }
 0xa7c   : > { %v5313_v29 = vpop.permute.xlu1 %5312  ;;  %5748 = vmatprep.subr.bf16.mxu1 %v5257_v18  ;;  %vm12276_vm14 = vmmov %vm12271_vm1 }
 0xa7d   : > { %v5331_v13 = vsel %vm1256_vm9, %v5311_v58, %v5313_v29  ;;  %v5332_v25 = vsel %vm1256_vm9, %v5313_v29, %v5315_v1  ;;  %vm12277_vm11 = vmmov %vm12271_vm1  ;;  %v5437_v58 = vld [vmem:[%s11242_s10 + $0x8] sm:$0xff] }
 0xa7e   : > { %5668 = vmatprep.subr.bf16.mxu0 %v5331_v13 }
 0xa7f   : > { %5669 = vmatpush1.bf16.msra.mxu0 %v5330_v0  ;;  %5749 = vmatpush1.bf16.msra.mxu1 %v5256_v52  ;;  %v5379_v37 = vpop.permute.xlu0 %5378 }
 0xa80   : > { %v5249_v45 = vpop.permute.xlu1 %5248  ;;  %v5408_v53 = vsel %vm12271_vm1, %v10878_v6, %v5379_v37 }
 0xa81   : > { %v5265_v11 = vsel %vm908_vm5, %v5247_v26, %v5249_v45  ;;  %vm12272_vm5 = vmmov %vm12271_vm1 }
 0xa82   : > { %5750 = vmatprep.subr.bf16.mxu1 %v5265_v11  ;;  %5671 = vmatmul.mubr.bf16.vlgmr.msra.gmra.mrb[60].mxu0 %v10772_v41 }
 0xa83   : > { %5751 = vmatpush1.bf16.msra.mxu1 %v5264_v12  ;;  %5713 = vmatprep.mubr.bf16.mxu0 %v12218_v60  ;;  %v5383_v7 = vpop.permute.xlu0 %5382 }
 0xa84   : > { %v5317_v10 = vpop.permute.xlu1 %5316  ;;  %5752 = vmatprep.subr.bf16.mxu1 %v5325_v59 }
 0xa85   : > { %v5333_v36 = vsel %vm1256_vm9, %v5315_v1, %v5317_v10  ;;  %vm12274_vm9 = vmmov %vm12271_vm1 }
 0xa87   : > { %5753 = vmatpush1.bf16.msra.mxu1 %v5324_v47  ;;  %v5397_v61 = vpop.permute.xlu0 %5396 }
 0xa88   : > { %v5381_v3 = vpop.permute.xlu1 %5380  ;;  %5754 = vmatprep.subr.bf16.mxu1 %v5333_v36  ;;  %v5416_v6 = vsel %vm12275_vm12, %v11007_v32, %v5397_v61  ;;  %v12281_v32 = vld [vmem:[#allocation84_spill] sm:$0xff] }
 0xa89   : > { %v5409_v50 = vsel %vm12270_vm8, %v5379_v37, %v5381_v3  ;;  %v5410_v28 = vsel %vm12273_vm7, %v5381_v3, %v5383_v7 }
 0xa8a   : > { %5681 = vmatprep.subr.bf16.mxu0 %v5409_v50 }
 0xa8b   : > { %5682 = vmatpush1.bf16.msra.mxu0 %v5408_v53  ;;  %5755 = vmatpush1.bf16.msra.mxu1 %v5332_v25  ;;  %v5401_v8 = vpop.permute.xlu0 %5400 }
 0xa8c   : > { %v5385_v54 = vpop.permute.xlu1 %5384 }
 0xa8d   : > { %v5411_v9 = vsel %vm12272_vm5, %v5383_v7, %v5385_v54 }
 0xa8e   : > { %5757 = vmatmul.mubr.bf16.vlgmr.msra.gmra.mrb[60].mxu1 %v10772_v41  ;;  %5767 = vmatprep.subr.bf16.mxu1 %v5411_v9 }
 0xa8f   : > { %5768 = vmatpush1.bf16.msra.mxu1 %v5410_v28  ;;  %5799 = vmatprep.mubr.bf16.mxu1 %v12218_v60  ;;  %v12280_v60 = vld [vmem:[#allocation79_spill] sm:$0xff] }
 0xa90   : > { %v5399_v34 = vpop.permute.xlu1 %5398 }
 0xa91   : > { %v5417_v40 = vsel %vm12274_vm9, %v5397_v61, %v5399_v34  ;;  %v5418_v63 = vsel %vm12277_vm11, %v5399_v34, %v5401_v8 }
 0xa92   : > { %5683 = vmatprep.subr.bf16.mxu0 %v5417_v40  ;;  %v5436_v40 = vld [vmem:[%s11242_s10] sm:$0xff] }
 0xa93   : > { %5684 = vmatpush1.bf16.msra.mxu0 %v5416_v6 }
 0xa94   : > { %v5403_v33 = vpop.permute.xlu1 %5402 }
 0xa95   : > { %v5419_v17 = vsel %vm12276_vm14, %v5401_v8, %v5403_v33 }
 0xa96   : > { %6075 = vmatmul.mubr.msk.bf16.vlgmr.msra.gmra.mrb[60].mxu0 %vm12278_vm6, %v10841_v24  ;;  %5769 = vmatprep.subr.bf16.mxu1 %v5419_v17 }
 0xa97   : > { %5770 = vmatpush1.bf16.msra.mxu1 %v5418_v63 }
 0xa9a   : > { %6078 = vmatmul.mubr.msk.bf16.vlgmr.msra.gmra.mrb[60].mxu1 %vm12279_vm3, %v10841_v24 }
 0xa9c   : > { %v4264_v41 = vpop.permute.xlu0 %4263 }
 0xa9d   : > { %v4343_v35 = vadd.f32 %v12280_v60, %v4264_v41  ;;  %v4345_v5 = vadd.f32 %v12281_v32, %v4264_v41  ;;  %v4404_v14 = vadd.f32 %v12282_v38, %v4264_v41  ;;  %v4406_v31 = vadd.f32 %v12283_v15, %v4264_v41 }
 0xa9e   : > { %v4465_v46 = vadd.f32 %v12284_v57, %v4264_v41  ;;  %v4467_v21 = vadd.f32 %v12285_v2, %v4264_v41  ;;  %v4526_v16 = vadd.f32 %v12286_v19, %v4264_v41  ;;  %v4528_v62 = vadd.f32 %v12287_v30, %v4264_v41 }
 0xa9f   : > { %v5810_v56 = vadd.f32 %v4345_v5, %v4343_v35 }
 0xaa1   : > { %v5811_v48 = vadd.f32 %v5810_v56, %v4404_v14 }
 0xaa3   : > { %v5812_v43 = vadd.f32 %v5811_v48, %v4406_v31 }
 0xaa5   : > { %v5813_v39 = vadd.f32 %v5812_v43, %v4465_v46 }
 0xaa7   : > { %v5814_v24 = vadd.f32 %v5813_v39, %v4467_v21 }
 0xaa9   : > { %v5815_v23 = vadd.f32 %v5814_v24, %v4526_v16 }
 0xaab   : > { %v5816_v55 = vadd.f32 %v5815_v23, %v4528_v62 }
 0xaad   : > { %5817 = vadd.xlane.f32.xlu1 %v5816_v55 }
 0xabe   : > { %5445 = vperm.xlu1 %6172, %v5437_v58  }
 0xae5   : > { %v5543_v51 = vpop.f32.mrb[56].mxu0 }
 0xae6   : > { %v5545_v42 = vpop.f32.mrb[57].mxu0 }
 0xae7   : > { %v5547_v49 = vpop.f32.mrb[58].mxu0 }
 0xae8   : > { %v5549_v22 = vpop.f32.mrb[59].mxu0 }
 0xb1a   : > { %v5629_v27 = vpop.f32.mrb[56].mxu1 }
 0xb1b   : > { %v5631_v26 = vpop.f32.mrb[57].mxu1 }
 0xb1c   : > { %v5633_v20 = vpop.f32.mrb[58].mxu1 }
 0xb1d   : > { %v5635_v4 = vpop.f32.mrb[59].mxu1 }
 0xb3a   : > { %v5818_v44 = vpop.xlane.xlu1 %5817 }
 0xb3b   : > { %v5819_v18 = vmul.f32 0.0009765625, %v5818_v44 }
 0xb3d   : > { %v11188_v1 = vsub.f32 %v4343_v35, %v5819_v18  ;;  %v11190_v29 = vsub.f32 %v4345_v5, %v5819_v18  ;;  %v11192_v13 = vsub.f32 %v4404_v14, %v5819_v18  ;;  %v11194_v52 = vsub.f32 %v4406_v31, %v5819_v18 }
 0xb3e   : > { %v11200_v11 = vsub.f32 %v4465_v46, %v5819_v18  ;;  %v5825_v59 = vsub.f32 %v4467_v21, %v5819_v18  ;;  %v5826_v36 = vsub.f32 %v4526_v16, %v5819_v18  ;;  %v5827_v50 = vsub.f32 %v4528_v62, %v5819_v18  ;;  %v5446_v56 = vpop.permute.xlu1 %5445 }
 0xb3f   : > { %v5828_v0 = vmul.f32 %v11188_v1, %v11188_v1  ;;  %v5829_v45 = vmul.f32 %v11190_v29, %v11190_v29  ;;  %v5830_v12 = vmul.f32 %v11192_v13, %v11192_v13  ;;  %v5831_v10 = vmul.f32 %v11194_v52, %v11194_v52 }
 0xb40   : > { %v5832_v7 = vmul.f32 %v11200_v11, %v11200_v11  ;;  %v5833_v25 = vmul.f32 %v5825_v59, %v5825_v59  ;;  %v5834_v54 = vmul.f32 %v5826_v36, %v5826_v36  ;;  %v5835_v61 = vmul.f32 %v5827_v50, %v5827_v50 }
 0xb41   : > { %v5836_v37 = vadd.f32 %v5829_v45, %v5828_v0  ;;  %v6102_v39 = vadd.f32 %v5547_v49, %v5446_v56  ;;  %v6103_v19 = vadd.f32 %v5549_v22, %v5446_v56  ;;  %v6106_v16 = vadd.f32 %v5633_v20, %v5446_v56 }
 0xb42   : > { %v6107_v24 = vadd.f32 %v5635_v4, %v5446_v56 }
 0xb43   : > { %v5837_v47 = vadd.f32 %v5836_v37, %v5830_v12 }
 0xb45   : > { %v5838_v3 = vadd.f32 %v5837_v47, %v5831_v10 }
 0xb47   : > { %v5839_v53 = vadd.f32 %v5838_v3, %v5832_v7 }
 0xb49   : > { %v5840_v9 = vadd.f32 %v5839_v53, %v5833_v25 }
 0xb4b   : > { %v5841_v28 = vadd.f32 %v5840_v9, %v5834_v54 }
 0xb4d   : > { %v5842_v34 = vadd.f32 %v5841_v28, %v5835_v61 }
 0xb4f   : > { %5843 = vadd.xlane.f32.xlu0 %v5842_v34 }
 0xb65   : > { %5440 = vperm.xlu0 %6171, %v5436_v40  }
 0xb69   : > { %v5715_v6 = vpop.f32.mrb[60].mxu0 }
 0xb6a   : > { %v5717_v8 = vpop.f32.mrb[61].mxu0 }
 0xb6b   : > { %v5719_v33 = vpop.f32.mrb[62].mxu0 }
 0xb6c   : > { %v5721_v17 = vpop.f32.mrb[63].mxu0  ;;  %v6110_v30 = vadd.f32 %v5719_v33, %v5446_v56 }
 0xb6d   : > { %v5801_v63 = vpop.f32.mrb[60].mxu1  ;;  %v6111_v62 = vadd.f32 %v5721_v17, %v5446_v56 }
 0xb6e   : > { %v5803_v41 = vpop.f32.mrb[61].mxu1 }
 0xb6f   : > { %v5805_v60 = vpop.f32.mrb[62].mxu1 }
 0xb70   : > { %v5807_v35 = vpop.f32.mrb[63].mxu1  ;;  %v6114_v23 = vadd.f32 %v5805_v60, %v5446_v56 }
 0xb71   : > { %v6115_v55 = vadd.f32 %v5807_v35, %v5446_v56 }
 0xbdc   : > { %v5844_v32 = vpop.xlane.xlu0 %5843 }
 0xbdd   : > { %v5845_v5 = vmul.f32 0.0009765625, %v5844_v32 }
 0xbdf   : > { %v5846_v38 = vadd.f32 1e-05, %v5845_v5 }
 0xbe1   : > { %6198 = vrsqrt.f32 %v5846_v38 }
 0xbe4   : > { %v5441_v14 = vpop.permute.xlu0 %5440 }
 0xbe5   : > { %v6100_v15 = vadd.f32 %v5543_v51, %v5441_v14  ;;  %v6101_v31 = vadd.f32 %v5545_v42, %v5441_v14  ;;  %v6104_v48 = vadd.f32 %v5629_v27, %v5441_v14  ;;  %v6105_v57 = vadd.f32 %v5631_v26, %v5441_v14 }
 0xbe6   : > { %v6108_v46 = vadd.f32 %v5715_v6, %v5441_v14  ;;  %v6109_v43 = vadd.f32 %v5717_v8, %v5441_v14  ;;  %v6112_v2 = vadd.f32 %v5801_v63, %v5441_v14  ;;  %v6113_v21 = vadd.f32 %v5803_v41, %v5441_v14 }
 0xbe7   : > { %v5856_v58 = vadd.f32 1.0, %v6100_v15  ;;  %v5857_v44 = vadd.f32 1.0, %v6101_v31  ;;  %v5858_v18 = vadd.f32 1.0, %v6104_v48  ;;  %v5859_v0 = vadd.f32 1.0, %v6105_v57 }
 0xbe8   : > { %v5860_v42 = vadd.f32 1.0, %v6108_v46  ;;  %v5861_v27 = vadd.f32 1.0, %v6109_v43  ;;  %v5862_v26 = vadd.f32 1.0, %v6112_v2  ;;  %v5863_v45 = vadd.f32 1.0, %v6113_v21 }
 0xbeb   : > { %v6199_v51 = vpop.eup %6198 }
 0xbec   : > { %v5848_v12 = vmul.f32 %v6199_v51, %v11188_v1  ;;  %v5849_v49 = vmul.f32 %v6199_v51, %v11190_v29  ;;  %v5850_v22 = vmul.f32 %v6199_v51, %v11192_v13  ;;  %v5851_v20 = vmul.f32 %v6199_v51, %v11194_v52 }
 0xbed   : > { %v5852_v4 = vmul.f32 %v6199_v51, %v11200_v11  ;;  %v5853_v37 = vmul.f32 %v6199_v51, %v5825_v59  ;;  %v5854_v10 = vmul.f32 %v6199_v51, %v5826_v36  ;;  %v5855_v47 = vmul.f32 %v6199_v51, %v5827_v50 }
 0xbee   : > { %v5864_v7 = vmul.f32 %v5856_v58, %v5848_v12  ;;  %v5865_v3 = vmul.f32 %v5857_v44, %v5849_v49  ;;  %v5866_v25 = vmul.f32 %v5858_v18, %v5850_v22  ;;  %v5867_v53 = vmul.f32 %v5859_v0, %v5851_v20 }
 0xbef   : > { %v5868_v54 = vmul.f32 %v5860_v42, %v5852_v4  ;;  %v5869_v9 = vmul.f32 %v5861_v27, %v5853_v37  ;;  %v5870_v61 = vmul.f32 %v5862_v26, %v5854_v10  ;;  %v5871_v28 = vmul.f32 %v5863_v45, %v5855_v47 }
 0xbf0   : > { %v5872_v1 = vadd.f32 %v6102_v39, %v5864_v7  ;;  %v5873_v29 = vadd.f32 %v6103_v19, %v5865_v3  ;;  %v5874_v34 = vadd.f32 %v6106_v16, %v5866_v25  ;;  %v5875_v13 = vadd.f32 %v6107_v24, %v5867_v53 }
 0xbf1   : > { %v5876_v40 = vadd.f32 %v6110_v30, %v5868_v54  ;;  %v5877_v52 = vadd.f32 %v6111_v62, %v5869_v9  ;;  %v5878_v6 = vadd.f32 %v6114_v23, %v5870_v61  ;;  %v5879_v11 = vadd.f32 %v6115_v55, %v5871_v28 }
 0xbf2   : > { %vm5880_vm15 = vcmp.gt.f32.partialorder %v5872_v1, 0.0  ;;  %vm5881_vm13 = vcmp.gt.f32.partialorder %v5873_v29, 0.0  ;;  %vm5882_vm10 = vcmp.gt.f32.partialorder %v5874_v34, 0.0  ;;  %vm5883_vm0 = vcmp.gt.f32.partialorder %v5875_v13, 0.0 }
 0xbf3   : > { %vm5884_vm2 = vcmp.gt.f32.partialorder %v5876_v40, 0.0  ;;  %vm5885_vm4 = vcmp.gt.f32.partialorder %v5877_v52, 0.0  ;;  %vm5886_vm8 = vcmp.gt.f32.partialorder %v5878_v6, 0.0  ;;  %vm5887_vm1 = vcmp.gt.f32.partialorder %v5879_v11, 0.0 }
 0xbf4   : > { %v5888_v59 = vmul.f32 0.01, %v5872_v1  ;;  %v5889_v36 = vmul.f32 0.01, %v5873_v29  ;;  %v5890_v50 = vmul.f32 0.01, %v5874_v34 }
 0xbf5   : > { %v5891_v8 = vmul.f32 0.01, %v5875_v13  ;;  %v5892_v33 = vmul.f32 0.01, %v5876_v40  ;;  %v5893_v17 = vmul.f32 0.01, %v5877_v52 }
 0xbf6   : > { %v5894_v63 = vmul.f32 0.01, %v5878_v6  ;;  %v5895_v41 = vmul.f32 0.01, %v5879_v11  ;;  %v5896_v60 = vsel %vm5880_vm15, %v5872_v1, %v5888_v59  ;;  %v5897_v35 = vsel %vm5881_vm13, %v5873_v29, %v5889_v36 }
 0xbf7   : > { %v5898_v32 = vsel %vm5882_vm10, %v5874_v34, %v5890_v50  ;;  %v5899_v5 = vsel %vm5883_vm0, %v5875_v13, %v5891_v8  ;;  %v5900_v38 = vsel %vm5884_vm2, %v5876_v40, %v5892_v33  ;;  %v5901_v14 = vsel %vm5885_vm4, %v5877_v52, %v5893_v17  ;;  %5904 = vst [vmem:[%s423_s28] sm:$0xff] %v5896_v60 }
 0xbf8   : > { %5905 = vst [vmem:[%s423_s28 + $0x8] sm:$0xff] %v5897_v35  ;;  %v5902_v56 = vsel %vm5886_vm8, %v5878_v6, %v5894_v63  ;;  %v5903_v15 = vsel %vm5887_vm1, %v5879_v11, %v5895_v41  ;;  %5906 = vst [vmem:[%s423_s28 + $0x10] sm:$0xff] %v5898_v32 }
 0xbf9   : > { %5907 = vst [vmem:[%s423_s28 + $0x18] sm:$0xff] %v5899_v5  ;;  %5908 = vst [vmem:[%s423_s28 + $0x20] sm:$0xff] %v5900_v38 }
 0xbfa   : > { %5909 = vst [vmem:[%s423_s28 + $0x28] sm:$0xff] %v5901_v14  ;;  %5910 = vst [vmem:[%s423_s28 + $0x30] sm:$0xff] %v5902_v56 }
 0xbfb   : > { %5911 = vst [vmem:[%s423_s28 + $0x38] sm:$0xff] %v5903_v15 }
 0xbfc PF: > { %s21_s17 = sadd.s32 1, %s6207_s17  }
 0xbfd   : > { %p18_p4 = scmp.ge.s32.totalorder %s21_s17, 4  }
 0xbff   :  { %20 = sbr.rel (!%p18_p4) target bundleno = 1 (0x1), region = 100 }

</bundles_post_ra>
